<compile_context>
chip_gen: v7x
topology: tpu7x:2x2x1
jax: 0.10.0
libtpu: 0.0.40
codegen_flags: <defaults>
</compile_context>

<pallas_src>
import functools

import jax
import jax.numpy as jnp
from jax.experimental import pallas as pl
from jax.experimental.pallas import tpu as pltpu

_INV_SQRT2 = 0.7071067811865476
_VMEM_LIMIT_BYTES = 48 * 1024 * 1024   # safe under v7x's 64 MiB; raise on v5e/v6e


def _round_up(x, m):
    return ((x + m - 1) // m) * m


def _decoder_kernel(num_iters, hid, hw_total,
                    idx_ref, off_ref, table_ref,
                    wo_ref, bo_ref,
                    wzrh_ref, wqh_ref,
                    wx_ref, bx_ref,
                    w1h_ref, w1x_ref, b1_ref,
                    w2_ref, b2_ref,
                    out_ref):
    f32 = jnp.float32
    tbl = table_ref[...]                                   # (B*H*W, hid), bf16 or f32
    cdt = tbl.dtype                                        # matmul input dtype

    # --- Fused pseudoimage gather: one-hot row-select on the MXU -----------
    # one-hot values are exactly 0/1, so the f32-accumulated matmul returns
    # the table rows exactly (in the table's dtype).
    idx = idx_ref[...]                                     # (TN, 1) int32
    iota = jax.lax.broadcasted_iota(jnp.int32, (idx.shape[0], hw_total), 1)
    onehot = jnp.where(iota == idx, 1.0, 0.0).astype(cdt)  # (TN, B*H*W)
    h = jnp.dot(onehot, tbl, preferred_element_type=f32)   # (TN, hid) f32

    # --- offset_encoder Linear(3, 64): K=3 -> three VPU broadcast-FMAs -----
    off = off_ref[...]                                     # (TN, 3) f32
    wo = wo_ref[...]                                       # (3, 64) f32
    pf = (off[:, 0:1] * wo[0:1, :]
          + off[:, 1:2] * wo[1:2, :]
          + off[:, 2:3] * wo[2:3, :]
          + bo_ref[...])                                   # (TN, 64) f32

    # --- x-contributions of z|r|q are iteration-invariant -> hoist + fuse --
    x_all = (jnp.dot(pf.astype(cdt), wx_ref[...], preferred_element_type=f32)
             + bx_ref[...])                                # (TN, 3*hid) f32
    xzr = x_all[:, :2 * hid]
    xq = x_all[:, 2 * hid:]

    wzr = wzrh_ref[...]                                    # (hid, 2*hid)
    wq = wqh_ref[...]                                      # (hid, hid)

    for _ in range(num_iters):                             # ConvGRU iterations
        zr = jax.nn.sigmoid(
            jnp.dot(h.astype(cdt), wzr, preferred_element_type=f32) + xzr)
        z = zr[:, :hid]
        r = zr[:, hid:]
        q = jnp.tanh(
            jnp.dot((r * h).astype(cdt), wq, preferred_element_type=f32) + xq)
        h = (1.0 - z) * h + z * q                          # element-wise in f32

    # --- decoder: Linear(3*Cp, 32) -> exact GELU -> Linear(32, 3) ----------
    d = (jnp.dot(h.astype(cdt), w1h_ref[...], preferred_element_type=f32)
         + jnp.dot(pf.astype(cdt), w1x_ref[...], preferred_element_type=f32)
         + b1_ref[...])
    d = 0.5 * d * (1.0 + jax.lax.erf(d * _INV_SQRT2))      # nn.GELU() default (exact)
    res = jnp.dot(d.astype(cdt), w2_ref[...], preferred_element_type=f32)  # (TN, 128)
    out_ref[...] = (res[:, :3] + b2_ref[...]).astype(out_ref.dtype)        # narrow store


def prepare_packed_params(params, compute_dtype=jnp.bfloat16):
    """Fused / lane-shaped kernel weights from the canonical per-gate params."""
    cdt = compute_dtype
    hid = params["wzh"].shape[0]
    wzrh = jnp.concatenate([params["wzh"], params["wrh"]], axis=1).astype(cdt)
    wqh = params["wqh"].astype(cdt)
    wx = jnp.concatenate([params["wzx"], params["wrx"], params["wqx"]], axis=1).astype(cdt)
    bx = jnp.concatenate([params["bz"], params["br"], params["bq"]], axis=1).astype(jnp.float32)
    # Final Linear weight lane-padded to 128 for a clean MXU shape; only the
    # first 3 output columns are stored to HBM.
    w2p = (jnp.zeros((params["w2"].shape[0], 128), jnp.float32)
           .at[:, :3].set(params["w2"]).astype(cdt))
    return dict(
        hid=hid,
        wo=params["wo"].astype(jnp.float32), bo=params["bo"].astype(jnp.float32),
        wzrh=wzrh, wqh=wqh, wx=wx, bx=bx,
        w1h=params["w1h"].astype(cdt), w1x=params["w1x"].astype(cdt),
        b1=params["b1"].astype(jnp.float32),
        w2=w2p, b2=params["b2"].astype(jnp.float32))


def _decode_points(packed, idx, off, table, num_iters, tile_n,
                   core_parallel, vmem_limit_bytes):
    n = idx.shape[0]
    hid = packed["hid"]
    hw_total = table.shape[0]
    assert n % tile_n == 0, "caller pads the point count to a multiple of tile_n"
    grid = (n // tile_n,)

    row = lambda i: (i, 0)
    full = lambda i: (0, 0)

    weight_keys = ("wo", "bo", "wzrh", "wqh", "wx", "bx",
                   "w1h", "w1x", "b1", "w2", "b2")
    weight_arrays = [packed[k] for k in weight_keys]

    in_specs = [pl.BlockSpec((tile_n, 1), row),            # flat voxel index / point
                pl.BlockSpec((tile_n, 3), row),            # point offsets
                pl.BlockSpec(table.shape, full)]           # pseudoimage table (VMEM-resident)
    in_specs += [pl.BlockSpec(w.shape, full) for w in weight_arrays]
    # TODO(synk): pipeline_mode=pl.Buffered(1) on the constant table/weight specs
    # would save ~0.5 MiB of VMEM when sweeping tile_n toward the v7x budget.

    dim_sem = (pltpu.CORE_PARALLEL,) if core_parallel else ("parallel",)

    return pl.pallas_call(
        functools.partial(_decoder_kernel, num_iters, hid, hw_total),
        out_shape=jax.ShapeDtypeStruct((n, 3), jnp.float32),
        grid=grid,
        in_specs=in_specs,
        out_specs=pl.BlockSpec((tile_n, 3), row),
        compiler_params=pltpu.CompilerParams(
            dimension_semantics=dim_sem,
            vmem_limit_bytes=vmem_limit_bytes),
    )(idx, off, table, *weight_arrays)


def conv_gru_decoder_forward(params, before_pseudoimages, after_pseudoimages,
                             voxelizer_infos, num_iters=4, tile_n=1024,
                             compute_dtype=jnp.bfloat16, core_parallel=False,
                             vmem_limit_bytes=_VMEM_LIMIT_BYTES):
    """Mirrors ConvGRUDecoder.forward.

    compute_dtype=float32 reproduces the PyTorch module's math exactly;
    bfloat16 (default) casts matmul inputs to bf16 with f32 accumulation.
    """
    B, Cp, H, W = before_pseudoimages.shape
    hw = H * W
    packed = prepare_packed_params(params, compute_dtype=compute_dtype)

    # Gather table: row (b*H*W + y*W + x) = concat(before[b,:,y,x], after[b,:,y,x]).
    # Fits VMEM for small grids (e.g. 16x16x2 samples = 128 KB in bf16).
    # TODO(synk): for large pseudoimages keep the table in HBM (memory_space=pl.ANY)
    # and gather rows with manual double-buffered DMAs driven by prefetched indices.
    bt = jnp.transpose(before_pseudoimages.reshape(B, Cp, hw), (0, 2, 1))
    at = jnp.transpose(after_pseudoimages.reshape(B, Cp, hw), (0, 2, 1))
    table = jnp.concatenate([bt, at], axis=-1).reshape(B * hw, 2 * Cp).astype(compute_dtype)

    idxs, offs, counts = [], [], []
    for b in range(B):
        vc = voxelizer_infos[b]["voxel_coords"].astype(jnp.int32)
        po = voxelizer_infos[b]["point_offsets"].astype(jnp.float32)
        idxs.append((b * hw + vc[:, 1] * W + vc[:, 2]).reshape(-1, 1))
        offs.append(po)
        counts.append(po.shape[0])

    idx = jnp.concatenate(idxs, axis=0)
    off = jnp.concatenate(offs, axis=0)
    n_total = idx.shape[0]
    n_pad = max(_round_up(n_total, tile_n), tile_n)
    if n_pad != n_total:                                   # padded rows sliced away below
        idx = jnp.pad(idx, ((0, n_pad - n_total), (0, 0)))
        off = jnp.pad(off, ((0, n_pad - n_total), (0, 0)))

    flow_all = _decode_points(packed, idx, off, table, num_iters, tile_n,
                              core_parallel, vmem_limit_bytes)

    flows, start = [], 0
    for c in counts:
        flows.append(flow_all[start:start + c])
        start += c
    return flows


def init_params(key, pseudoimage_channels=64):
    hid = pseudoimage_channels * 2   # GRU hidden_dim
    inp = 64                         # GRU input_dim == offset_encoder output
    ks = jax.random.split(key, 16)
    s = 0.1

    def nrm(k, shape):
        return jax.random.normal(k, shape, jnp.float32) * s

    return dict(
        # offset_encoder Linear(3, 64)
        wo=nrm(ks[0], (3, inp)),          bo=nrm(ks[1], (1, inp)),
        # convz / convr / convq: Conv1d(inp+hid, hid, 1) split into h-part / x-part
        wzh=nrm(ks[2], (hid, hid)), wzx=nrm(ks[3], (inp, hid)), bz=nrm(ks[4], (1, hid)),
        wrh=nrm(ks[5], (hid, hid)), wrx=nrm(ks[6], (inp, hid)), br=nrm(ks[7], (1, hid)),
        wqh=nrm(ks[8], (hid, hid)), wqx=nrm(ks[9], (inp, hid)), bq=nrm(ks[10], (1, hid)),
        # decoder Linear(3*Cp, 32) split into h-part / pf-part, then Linear(32, 3)
        w1h=nrm(ks[11], (hid, 32)), w1x=nrm(ks[12], (inp, 32)), b1=nrm(ks[13], (1, 32)),
        w2=nrm(ks[14], (32, 3)),    b2=nrm(ks[15], (1, 3)),
    )


def _reference_points(params, h0, po, num_iters, compute_dtype=jnp.float32):
    """Pure-JAX per-sample reference.

    compute_dtype=float32 is exactly the PyTorch module's math.  bfloat16
    applies the identical matmul-input casts the fast kernel uses (f32
    accumulation, f32 element-wise), so only accumulation order differs.
    """
    f32 = jnp.float32
    cdt = compute_dtype

    def mm(a, w):
        return jnp.dot(a.astype(cdt), w.astype(cdt), preferred_element_type=f32)

    h = h0.astype(cdt).astype(f32)            # matches the kernel's gather-table dtype
    pf = po @ params["wo"] + params["bo"]     # f32
    for _ in range(num_iters):
        z = jax.nn.sigmoid(mm(h, params["wzh"]) + mm(pf, params["wzx"]) + params["bz"])
        r = jax.nn.sigmoid(mm(h, params["wrh"]) + mm(pf, params["wrx"]) + params["br"])
        q = jnp.tanh(mm(r * h, params["wqh"]) + mm(pf, params["wqx"]) + params["bq"])
        h = (1.0 - z) * h + z * q
    d = mm(h, params["w1h"]) + mm(pf, params["w1x"]) + params["b1"]
    d = jax.nn.gelu(d, approximate=False)
    return mm(d, params["w2"]) + params["b2"]


if __name__ == "__main__":
    B, Cp, H, W = 2, 64, 16, 16
    NUM_ITERS = 4
    TILE_N = 256                      # small tile for the demo so the grid has >= 2 steps
    N_PER_SAMPLE = [250, 256]         # ragged on purpose (exercises padding path)

    key = jax.random.PRNGKey(0)
    kp, kb, ka, ko, kv = jax.random.split(key, 5)

    params = init_params(kp, pseudoimage_channels=Cp)
    before = jax.random.normal(kb, (B, Cp, H, W), jnp.float32)
    after = jax.random.normal(ka, (B, Cp, H, W), jnp.float32)

    voxelizer_infos = []
    koffs = jax.random.split(ko, B)
    kvoxs = jax.random.split(kv, B)
    for b in range(B):
        n_b = N_PER_SAMPLE[b]
        coords_hw = jax.random.randint(kvoxs[b], (n_b, 2), 0, H).astype(jnp.int32)
        voxel_coords = jnp.concatenate(
            [jnp.zeros((n_b, 1), jnp.int32), coords_hw], axis=1)        # (N, 3)
        point_offsets = jax.random.normal(koffs[b], (n_b, 3), jnp.float32)
        voxelizer_infos.append(
            dict(voxel_coords=voxel_coords, point_offsets=point_offsets))

    # 1) f32 path: exact semantic check vs. the PyTorch-equivalent reference.
    flows_f32 = conv_gru_decoder_forward(params, before, after, voxelizer_infos,
                                         num_iters=NUM_ITERS, tile_n=TILE_N,
                                         compute_dtype=jnp.float32)
    flows_f32 = [jax.block_until_ready(f) for f in flows_f32]

    # 2) bf16 path (default fast path): checked vs. a cast-matching reference.
    flows_bf16 = conv_gru_decoder_forward(params, before, after, voxelizer_infos,
                                          num_iters=NUM_ITERS, tile_n=TILE_N,
                                          compute_dtype=jnp.bfloat16)
    flows_bf16 = [jax.block_until_ready(f) for f in flows_bf16]

    for b in range(B):
        vc = voxelizer_infos[b]["voxel_coords"]
        po = voxelizer_infos[b]["point_offsets"]
        bv = before[b][:, vc[:, 1], vc[:, 2]].T
        av = after[b][:, vc[:, 1], vc[:, 2]].T
        h0 = jnp.concatenate([bv, av], axis=1)

        ref_f32 = _reference_points(params, h0, po, NUM_ITERS, jnp.float32)
        err = float(jnp.max(jnp.abs(flows_f32[b] - ref_f32)))
        assert err < 2e-4, f"f32 mismatch on sample {b}: max abs err {err}"

        ref_bf16 = _reference_points(params, h0, po, NUM_ITERS, jnp.bfloat16)
        err = float(jnp.max(jnp.abs(flows_bf16[b] - ref_bf16)))
        assert err < 3e-3, f"bf16 mismatch on sample {b}: max abs err {err}"

    print("KERNEL_OK")
</pallas_src>

<mosaic_0001>
module attributes {stable_mosaic.version = 11 : i64} {
  func.func @_decoder_kernel(%arg0: i32, %arg1: memref<256x1xi32, #tpu.memory_space<vmem>>, %arg2: memref<256x3xf32, #tpu.memory_space<vmem>>, %arg3: memref<512x128xf32, #tpu.memory_space<vmem>>, %arg4: memref<3x64xf32, #tpu.memory_space<vmem>>, %arg5: memref<1x64xf32, #tpu.memory_space<vmem>>, %arg6: memref<128x256xf32, #tpu.memory_space<vmem>>, %arg7: memref<128x128xf32, #tpu.memory_space<vmem>>, %arg8: memref<64x384xf32, #tpu.memory_space<vmem>>, %arg9: memref<1x384xf32, #tpu.memory_space<vmem>>, %arg10: memref<128x32xf32, #tpu.memory_space<vmem>>, %arg11: memref<64x32xf32, #tpu.memory_space<vmem>>, %arg12: memref<1x32xf32, #tpu.memory_space<vmem>>, %arg13: memref<32x128xf32, #tpu.memory_space<vmem>>, %arg14: memref<1x3xf32, #tpu.memory_space<vmem>>, %arg15: memref<256x3xf32, #tpu.memory_space<vmem>>) attributes {dimension_semantics = [#tpu.dimension_semantics<parallel>], iteration_bounds = array<i64: 2>, scalar_prefetch = 0 : i64, scratch_operands = 0 : i64, tpu.core_type = #tpu.core_type<tc>, window_params = [{transform_indices = @transform_0, window_bounds = array<i64: 256, 1>}, {transform_indices = @transform_1, window_bounds = array<i64: 256, 3>}, {pipeline_mode = #tpu.pipeline_mode<synchronous>, transform_indices = @transform_2, window_bounds = array<i64: 512, 128>}, {pipeline_mode = #tpu.pipeline_mode<synchronous>, transform_indices = @transform_3, window_bounds = array<i64: 3, 64>}, {pipeline_mode = #tpu.pipeline_mode<synchronous>, transform_indices = @transform_4, window_bounds = array<i64: 1, 64>}, {pipeline_mode = #tpu.pipeline_mode<synchronous>, transform_indices = @transform_5, window_bounds = array<i64: 128, 256>}, {pipeline_mode = #tpu.pipeline_mode<synchronous>, transform_indices = @transform_6, window_bounds = array<i64: 128, 128>}, {pipeline_mode = #tpu.pipeline_mode<synchronous>, transform_indices = @transform_7, window_bounds = array<i64: 64, 384>}, {pipeline_mode = #tpu.pipeline_mode<synchronous>, transform_indices = @transform_8, window_bounds = array<i64: 1, 384>}, {pipeline_mode = #tpu.pipeline_mode<synchronous>, transform_indices = @transform_9, window_bounds = array<i64: 128, 32>}, {pipeline_mode = #tpu.pipeline_mode<synchronous>, transform_indices = @transform_10, window_bounds = array<i64: 64, 32>}, {pipeline_mode = #tpu.pipeline_mode<synchronous>, transform_indices = @transform_11, window_bounds = array<i64: 1, 32>}, {pipeline_mode = #tpu.pipeline_mode<synchronous>, transform_indices = @transform_12, window_bounds = array<i64: 32, 128>}, {pipeline_mode = #tpu.pipeline_mode<synchronous>, transform_indices = @transform_13, window_bounds = array<i64: 1, 3>}, {transform_indices = @transform_14, window_bounds = array<i64: 256, 3>}]} {
    %c0 = arith.constant 0 : index
    %c0_0 = arith.constant 0 : index
    %0 = vector.load %arg3[%c0, %c0_0] : memref<512x128xf32, #tpu.memory_space<vmem>>, vector<512x128xf32>
    %c0_1 = arith.constant 0 : index
    %c0_2 = arith.constant 0 : index
    %1 = vector.load %arg1[%c0_1, %c0_2] : memref<256x1xi32, #tpu.memory_space<vmem>>, vector<256x1xi32>
    %2 = tpu.iota {dimensions = array<i32: 1>} : vector<256x512xi32>
    %3 = vector.broadcast %1 : vector<256x1xi32> to vector<256x512xi32>
    %4 = arith.cmpi eq, %2, %3 : vector<256x512xi32>
    %cst = arith.constant 1.000000e+00 : f32
    %cst_3 = arith.constant 0.000000e+00 : f32
    %5 = vector.broadcast %cst : f32 to vector<256x512xf32>
    %6 = vector.broadcast %cst_3 : f32 to vector<256x512xf32>
    %7 = arith.select %4, %5, %6 : vector<256x512xi1>, vector<256x512xf32>
    %cst_4 = arith.constant dense<0.000000e+00> : vector<256x128xf32>
    %8 = tpu.matmul %7, %0, %cst_4 {dimension_numbers = #tpu.dot_dimension_numbers<[1], [0], [0], [1], [0, 0, 1, 1], [], []>} : vector<256x512xf32>, vector<512x128xf32>, vector<256x128xf32> -> vector<256x128xf32>
    %c0_5 = arith.constant 0 : index
    %c0_6 = arith.constant 0 : index
    %9 = vector.load %arg2[%c0_5, %c0_6] : memref<256x3xf32, #tpu.memory_space<vmem>>, vector<256x3xf32>
    %c0_7 = arith.constant 0 : index
    %c0_8 = arith.constant 0 : index
    %10 = vector.load %arg4[%c0_7, %c0_8] : memref<3x64xf32, #tpu.memory_space<vmem>>, vector<3x64xf32>
    %11 = vector.extract_strided_slice %9 {offsets = [0, 0], sizes = [256, 1], strides = [1, 1]} : vector<256x3xf32> to vector<256x1xf32>
    %12 = vector.extract_strided_slice %10 {offsets = [0, 0], sizes = [1, 64], strides = [1, 1]} : vector<3x64xf32> to vector<1x64xf32>
    %13 = vector.broadcast %11 : vector<256x1xf32> to vector<256x64xf32>
    %14 = vector.broadcast %12 : vector<1x64xf32> to vector<256x64xf32>
    %15 = arith.mulf %13, %14 : vector<256x64xf32>
    %16 = vector.extract_strided_slice %9 {offsets = [0, 1], sizes = [256, 1], strides = [1, 1]} : vector<256x3xf32> to vector<256x1xf32>
    %17 = vector.extract_strided_slice %10 {offsets = [1, 0], sizes = [1, 64], strides = [1, 1]} : vector<3x64xf32> to vector<1x64xf32>
    %18 = vector.broadcast %16 : vector<256x1xf32> to vector<256x64xf32>
    %19 = vector.broadcast %17 : vector<1x64xf32> to vector<256x64xf32>
    %20 = arith.mulf %18, %19 : vector<256x64xf32>
    %21 = arith.addf %15, %20 : vector<256x64xf32>
    %22 = vector.extract_strided_slice %9 {offsets = [0, 2], sizes = [256, 1], strides = [1, 1]} : vector<256x3xf32> to vector<256x1xf32>
    %23 = vector.extract_strided_slice %10 {offsets = [2, 0], sizes = [1, 64], strides = [1, 1]} : vector<3x64xf32> to vector<1x64xf32>
    %24 = vector.broadcast %22 : vector<256x1xf32> to vector<256x64xf32>
    %25 = vector.broadcast %23 : vector<1x64xf32> to vector<256x64xf32>
    %26 = arith.mulf %24, %25 : vector<256x64xf32>
    %27 = arith.addf %21, %26 : vector<256x64xf32>
    %c0_9 = arith.constant 0 : index
    %c0_10 = arith.constant 0 : index
    %28 = vector.load %arg5[%c0_9, %c0_10] : memref<1x64xf32, #tpu.memory_space<vmem>>, vector<1x64xf32>
    %29 = vector.broadcast %28 : vector<1x64xf32> to vector<256x64xf32>
    %30 = arith.addf %27, %29 : vector<256x64xf32>
    %c0_11 = arith.constant 0 : index
    %c0_12 = arith.constant 0 : index
    %31 = vector.load %arg8[%c0_11, %c0_12] : memref<64x384xf32, #tpu.memory_space<vmem>>, vector<64x384xf32>
    %cst_13 = arith.constant dense<0.000000e+00> : vector<256x384xf32>
    %32 = tpu.matmul %30, %31, %cst_13 {dimension_numbers = #tpu.dot_dimension_numbers<[1], [0], [0], [1], [0, 0, 1, 1], [], []>} : vector<256x64xf32>, vector<64x384xf32>, vector<256x384xf32> -> vector<256x384xf32>
    %c0_14 = arith.constant 0 : index
    %c0_15 = arith.constant 0 : index
    %33 = vector.load %arg9[%c0_14, %c0_15] : memref<1x384xf32, #tpu.memory_space<vmem>>, vector<1x384xf32>
    %34 = vector.broadcast %33 : vector<1x384xf32> to vector<256x384xf32>
    %35 = arith.addf %32, %34 : vector<256x384xf32>
    %36 = vector.extract_strided_slice %35 {offsets = [0, 0], sizes = [256, 256], strides = [1, 1]} : vector<256x384xf32> to vector<256x256xf32>
    %37 = vector.extract_strided_slice %35 {offsets = [0, 256], sizes = [256, 128], strides = [1, 1]} : vector<256x384xf32> to vector<256x128xf32>
    %c0_16 = arith.constant 0 : index
    %c0_17 = arith.constant 0 : index
    %38 = vector.load %arg6[%c0_16, %c0_17] : memref<128x256xf32, #tpu.memory_space<vmem>>, vector<128x256xf32>
    %c0_18 = arith.constant 0 : index
    %c0_19 = arith.constant 0 : index
    %39 = vector.load %arg7[%c0_18, %c0_19] : memref<128x128xf32, #tpu.memory_space<vmem>>, vector<128x128xf32>
    %cst_20 = arith.constant dense<0.000000e+00> : vector<256x256xf32>
    %40 = tpu.matmul %8, %38, %cst_20 {dimension_numbers = #tpu.dot_dimension_numbers<[1], [0], [0], [1], [0, 0, 1, 1], [], []>} : vector<256x128xf32>, vector<128x256xf32>, vector<256x256xf32> -> vector<256x256xf32>
    %41 = arith.addf %40, %36 : vector<256x256xf32>
    %42 = arith.negf %41 : vector<256x256xf32>
    %43 = math.exp %42 : vector<256x256xf32>
    %cst_21 = arith.constant 1.000000e+00 : f32
    %44 = vector.broadcast %cst_21 : f32 to vector<256x256xf32>
    %45 = arith.addf %44, %43 : vector<256x256xf32>
    %46 = arith.divf %44, %45 : vector<256x256xf32>
    %47 = vector.extract_strided_slice %46 {offsets = [0, 0], sizes = [256, 128], strides = [1, 1]} : vector<256x256xf32> to vector<256x128xf32>
    %48 = vector.extract_strided_slice %46 {offsets = [0, 128], sizes = [256, 128], strides = [1, 1]} : vector<256x256xf32> to vector<256x128xf32>
    %49 = arith.mulf %48, %8 : vector<256x128xf32>
    %cst_22 = arith.constant dense<0.000000e+00> : vector<256x128xf32>
    %50 = tpu.matmul %49, %39, %cst_22 {dimension_numbers = #tpu.dot_dimension_numbers<[1], [0], [0], [1], [0, 0, 1, 1], [], []>} : vector<256x128xf32>, vector<128x128xf32>, vector<256x128xf32> -> vector<256x128xf32>
    %51 = arith.addf %50, %37 : vector<256x128xf32>
    %52 = math.tanh %51 : vector<256x128xf32>
    %cst_23 = arith.constant 1.000000e+00 : f32
    %53 = vector.broadcast %cst_23 : f32 to vector<256x128xf32>
    %54 = arith.subf %53, %47 : vector<256x128xf32>
    %55 = arith.mulf %54, %8 : vector<256x128xf32>
    %56 = arith.mulf %47, %52 : vector<256x128xf32>
    %57 = arith.addf %55, %56 : vector<256x128xf32>
    %cst_24 = arith.constant dense<0.000000e+00> : vector<256x256xf32>
    %58 = tpu.matmul %57, %38, %cst_24 {dimension_numbers = #tpu.dot_dimension_numbers<[1], [0], [0], [1], [0, 0, 1, 1], [], []>} : vector<256x128xf32>, vector<128x256xf32>, vector<256x256xf32> -> vector<256x256xf32>
    %59 = arith.addf %58, %36 : vector<256x256xf32>
    %60 = arith.negf %59 : vector<256x256xf32>
    %61 = math.exp %60 : vector<256x256xf32>
    %cst_25 = arith.constant 1.000000e+00 : f32
    %62 = vector.broadcast %cst_25 : f32 to vector<256x256xf32>
    %63 = arith.addf %62, %61 : vector<256x256xf32>
    %64 = arith.divf %62, %63 : vector<256x256xf32>
    %65 = vector.extract_strided_slice %64 {offsets = [0, 0], sizes = [256, 128], strides = [1, 1]} : vector<256x256xf32> to vector<256x128xf32>
    %66 = vector.extract_strided_slice %64 {offsets = [0, 128], sizes = [256, 128], strides = [1, 1]} : vector<256x256xf32> to vector<256x128xf32>
    %67 = arith.mulf %66, %57 : vector<256x128xf32>
    %cst_26 = arith.constant dense<0.000000e+00> : vector<256x128xf32>
    %68 = tpu.matmul %67, %39, %cst_26 {dimension_numbers = #tpu.dot_dimension_numbers<[1], [0], [0], [1], [0, 0, 1, 1], [], []>} : vector<256x128xf32>, vector<128x128xf32>, vector<256x128xf32> -> vector<256x128xf32>
    %69 = arith.addf %68, %37 : vector<256x128xf32>
    %70 = math.tanh %69 : vector<256x128xf32>
    %cst_27 = arith.constant 1.000000e+00 : f32
    %71 = vector.broadcast %cst_27 : f32 to vector<256x128xf32>
    %72 = arith.subf %71, %65 : vector<256x128xf32>
    %73 = arith.mulf %72, %57 : vector<256x128xf32>
    %74 = arith.mulf %65, %70 : vector<256x128xf32>
    %75 = arith.addf %73, %74 : vector<256x128xf32>
    %cst_28 = arith.constant dense<0.000000e+00> : vector<256x256xf32>
    %76 = tpu.matmul %75, %38, %cst_28 {dimension_numbers = #tpu.dot_dimension_numbers<[1], [0], [0], [1], [0, 0, 1, 1], [], []>} : vector<256x128xf32>, vector<128x256xf32>, vector<256x256xf32> -> vector<256x256xf32>
    %77 = arith.addf %76, %36 : vector<256x256xf32>
    %78 = arith.negf %77 : vector<256x256xf32>
    %79 = math.exp %78 : vector<256x256xf32>
    %cst_29 = arith.constant 1.000000e+00 : f32
    %80 = vector.broadcast %cst_29 : f32 to vector<256x256xf32>
    %81 = arith.addf %80, %79 : vector<256x256xf32>
    %82 = arith.divf %80, %81 : vector<256x256xf32>
    %83 = vector.extract_strided_slice %82 {offsets = [0, 0], sizes = [256, 128], strides = [1, 1]} : vector<256x256xf32> to vector<256x128xf32>
    %84 = vector.extract_strided_slice %82 {offsets = [0, 128], sizes = [256, 128], strides = [1, 1]} : vector<256x256xf32> to vector<256x128xf32>
    %85 = arith.mulf %84, %75 : vector<256x128xf32>
    %cst_30 = arith.constant dense<0.000000e+00> : vector<256x128xf32>
    %86 = tpu.matmul %85, %39, %cst_30 {dimension_numbers = #tpu.dot_dimension_numbers<[1], [0], [0], [1], [0, 0, 1, 1], [], []>} : vector<256x128xf32>, vector<128x128xf32>, vector<256x128xf32> -> vector<256x128xf32>
    %87 = arith.addf %86, %37 : vector<256x128xf32>
    %88 = math.tanh %87 : vector<256x128xf32>
    %cst_31 = arith.constant 1.000000e+00 : f32
    %89 = vector.broadcast %cst_31 : f32 to vector<256x128xf32>
    %90 = arith.subf %89, %83 : vector<256x128xf32>
    %91 = arith.mulf %90, %75 : vector<256x128xf32>
    %92 = arith.mulf %83, %88 : vector<256x128xf32>
    %93 = arith.addf %91, %92 : vector<256x128xf32>
    %cst_32 = arith.constant dense<0.000000e+00> : vector<256x256xf32>
    %94 = tpu.matmul %93, %38, %cst_32 {dimension_numbers = #tpu.dot_dimension_numbers<[1], [0], [0], [1], [0, 0, 1, 1], [], []>} : vector<256x128xf32>, vector<128x256xf32>, vector<256x256xf32> -> vector<256x256xf32>
    %95 = arith.addf %94, %36 : vector<256x256xf32>
    %96 = arith.negf %95 : vector<256x256xf32>
    %97 = math.exp %96 : vector<256x256xf32>
    %cst_33 = arith.constant 1.000000e+00 : f32
    %98 = vector.broadcast %cst_33 : f32 to vector<256x256xf32>
    %99 = arith.addf %98, %97 : vector<256x256xf32>
    %100 = arith.divf %98, %99 : vector<256x256xf32>
    %101 = vector.extract_strided_slice %100 {offsets = [0, 0], sizes = [256, 128], strides = [1, 1]} : vector<256x256xf32> to vector<256x128xf32>
    %102 = vector.extract_strided_slice %100 {offsets = [0, 128], sizes = [256, 128], strides = [1, 1]} : vector<256x256xf32> to vector<256x128xf32>
    %103 = arith.mulf %102, %93 : vector<256x128xf32>
    %cst_34 = arith.constant dense<0.000000e+00> : vector<256x128xf32>
    %104 = tpu.matmul %103, %39, %cst_34 {dimension_numbers = #tpu.dot_dimension_numbers<[1], [0], [0], [1], [0, 0, 1, 1], [], []>} : vector<256x128xf32>, vector<128x128xf32>, vector<256x128xf32> -> vector<256x128xf32>
    %105 = arith.addf %104, %37 : vector<256x128xf32>
    %106 = math.tanh %105 : vector<256x128xf32>
    %cst_35 = arith.constant 1.000000e+00 : f32
    %107 = vector.broadcast %cst_35 : f32 to vector<256x128xf32>
    %108 = arith.subf %107, %101 : vector<256x128xf32>
    %109 = arith.mulf %108, %93 : vector<256x128xf32>
    %110 = arith.mulf %101, %106 : vector<256x128xf32>
    %111 = arith.addf %109, %110 : vector<256x128xf32>
    %c0_36 = arith.constant 0 : index
    %c0_37 = arith.constant 0 : index
    %112 = vector.load %arg10[%c0_36, %c0_37] : memref<128x32xf32, #tpu.memory_space<vmem>>, vector<128x32xf32>
    %cst_38 = arith.constant dense<0.000000e+00> : vector<256x32xf32>
    %113 = tpu.matmul %111, %112, %cst_38 {dimension_numbers = #tpu.dot_dimension_numbers<[1], [0], [0], [1], [0, 0, 1, 1], [], []>} : vector<256x128xf32>, vector<128x32xf32>, vector<256x32xf32> -> vector<256x32xf32>
    %c0_39 = arith.constant 0 : index
    %c0_40 = arith.constant 0 : index
    %114 = vector.load %arg11[%c0_39, %c0_40] : memref<64x32xf32, #tpu.memory_space<vmem>>, vector<64x32xf32>
    %cst_41 = arith.constant dense<0.000000e+00> : vector<256x32xf32>
    %115 = tpu.matmul %30, %114, %cst_41 {dimension_numbers = #tpu.dot_dimension_numbers<[1], [0], [0], [1], [0, 0, 1, 1], [], []>} : vector<256x64xf32>, vector<64x32xf32>, vector<256x32xf32> -> vector<256x32xf32>
    %116 = arith.addf %113, %115 : vector<256x32xf32>
    %c0_42 = arith.constant 0 : index
    %c0_43 = arith.constant 0 : index
    %117 = vector.load %arg12[%c0_42, %c0_43] : memref<1x32xf32, #tpu.memory_space<vmem>>, vector<1x32xf32>
    %118 = vector.broadcast %117 : vector<1x32xf32> to vector<256x32xf32>
    %119 = arith.addf %116, %118 : vector<256x32xf32>
    %cst_44 = arith.constant 5.000000e-01 : f32
    %120 = vector.broadcast %cst_44 : f32 to vector<256x32xf32>
    %121 = arith.mulf %120, %119 : vector<256x32xf32>
    %cst_45 = arith.constant 0.707106769 : f32
    %122 = vector.broadcast %cst_45 : f32 to vector<256x32xf32>
    %123 = arith.mulf %119, %122 : vector<256x32xf32>
    %124 = math.erf %123 : vector<256x32xf32>
    %cst_46 = arith.constant 1.000000e+00 : f32
    %125 = vector.broadcast %cst_46 : f32 to vector<256x32xf32>
    %126 = arith.addf %125, %124 : vector<256x32xf32>
    %127 = arith.mulf %121, %126 : vector<256x32xf32>
    %c0_47 = arith.constant 0 : index
    %c0_48 = arith.constant 0 : index
    %128 = vector.load %arg13[%c0_47, %c0_48] : memref<32x128xf32, #tpu.memory_space<vmem>>, vector<32x128xf32>
    %cst_49 = arith.constant dense<0.000000e+00> : vector<256x128xf32>
    %129 = tpu.matmul %127, %128, %cst_49 {dimension_numbers = #tpu.dot_dimension_numbers<[1], [0], [0], [1], [0, 0, 1, 1], [], []>} : vector<256x32xf32>, vector<32x128xf32>, vector<256x128xf32> -> vector<256x128xf32>
    %130 = vector.extract_strided_slice %129 {offsets = [0, 0], sizes = [256, 3], strides = [1, 1]} : vector<256x128xf32> to vector<256x3xf32>
    %c0_50 = arith.constant 0 : index
    %c0_51 = arith.constant 0 : index
    %131 = vector.load %arg14[%c0_50, %c0_51] : memref<1x3xf32, #tpu.memory_space<vmem>>, vector<1x3xf32>
    %132 = vector.broadcast %131 : vector<1x3xf32> to vector<256x3xf32>
    %133 = arith.addf %130, %132 : vector<256x3xf32>
    %c0_52 = arith.constant 0 : index
    %c0_53 = arith.constant 0 : index
    %134 = vector.load %arg15[%c0_52, %c0_53] : memref<256x3xf32, #tpu.memory_space<vmem>>, vector<256x3xf32>
    tpu.vector_store %arg15[%c0_52, %c0_53], %133 {strides = array<i32>} : memref<256x3xf32, #tpu.memory_space<vmem>>, vector<256x3xf32>,
    return
  }
  func.func @transform_0(%arg0: i32) -> (i32, i32) {
    %c0_i32 = arith.constant 0 : i32
    %c0_i32_0 = arith.constant 0 : i32
    return %arg0, %c0_i32 : i32, i32
  }
  func.func @transform_1(%arg0: i32) -> (i32, i32) {
    %c0_i32 = arith.constant 0 : i32
    %c0_i32_0 = arith.constant 0 : i32
    return %arg0, %c0_i32 : i32, i32
  }
  func.func @transform_2(%arg0: i32) -> (i32, i32) {
    %c0_i32 = arith.constant 0 : i32
    %c0_i32_0 = arith.constant 0 : i32
    %c0_i32_1 = arith.constant 0 : i32
    return %c0_i32, %c0_i32_0 : i32, i32
  }
  func.func @transform_3(%arg0: i32) -> (i32, i32) {
    %c0_i32 = arith.constant 0 : i32
    %c0_i32_0 = arith.constant 0 : i32
    %c0_i32_1 = arith.constant 0 : i32
    return %c0_i32, %c0_i32_0 : i32, i32
  }
  func.func @transform_4(%arg0: i32) -> (i32, i32) {
    %c0_i32 = arith.constant 0 : i32
    %c0_i32_0 = arith.constant 0 : i32
    %c0_i32_1 = arith.constant 0 : i32
    return %c0_i32, %c0_i32_0 : i32, i32
  }
  func.func @transform_5(%arg0: i32) -> (i32, i32) {
    %c0_i32 = arith.constant 0 : i32
    %c0_i32_0 = arith.constant 0 : i32
    %c0_i32_1 = arith.constant 0 : i32
    return %c0_i32, %c0_i32_0 : i32, i32
  }
  func.func @transform_6(%arg0: i32) -> (i32, i32) {
    %c0_i32 = arith.constant 0 : i32
    %c0_i32_0 = arith.constant 0 : i32
    %c0_i32_1 = arith.constant 0 : i32
    return %c0_i32, %c0_i32_0 : i32, i32
  }
  func.func @transform_7(%arg0: i32) -> (i32, i32) {
    %c0_i32 = arith.constant 0 : i32
    %c0_i32_0 = arith.constant 0 : i32
    %c0_i32_1 = arith.constant 0 : i32
    return %c0_i32, %c0_i32_0 : i32, i32
  }
  func.func @transform_8(%arg0: i32) -> (i32, i32) {
    %c0_i32 = arith.constant 0 : i32
    %c0_i32_0 = arith.constant 0 : i32
    %c0_i32_1 = arith.constant 0 : i32
    return %c0_i32, %c0_i32_0 : i32, i32
  }
  func.func @transform_9(%arg0: i32) -> (i32, i32) {
    %c0_i32 = arith.constant 0 : i32
    %c0_i32_0 = arith.constant 0 : i32
    %c0_i32_1 = arith.constant 0 : i32
    return %c0_i32, %c0_i32_0 : i32, i32
  }
  func.func @transform_10(%arg0: i32) -> (i32, i32) {
    %c0_i32 = arith.constant 0 : i32
    %c0_i32_0 = arith.constant 0 : i32
    %c0_i32_1 = arith.constant 0 : i32
    return %c0_i32, %c0_i32_0 : i32, i32
  }
  func.func @transform_11(%arg0: i32) -> (i32, i32) {
    %c0_i32 = arith.constant 0 : i32
    %c0_i32_0 = arith.constant 0 : i32
    %c0_i32_1 = arith.constant 0 : i32
    return %c0_i32, %c0_i32_0 : i32, i32
  }
  func.func @transform_12(%arg0: i32) -> (i32, i32) {
    %c0_i32 = arith.constant 0 : i32
    %c0_i32_0 = arith.constant 0 : i32
    %c0_i32_1 = arith.constant 0 : i32
    return %c0_i32, %c0_i32_0 : i32, i32
  }
  func.func @transform_13(%arg0: i32) -> (i32, i32) {
    %c0_i32 = arith.constant 0 : i32
    %c0_i32_0 = arith.constant 0 : i32
    %c0_i32_1 = arith.constant 0 : i32
    return %c0_i32, %c0_i32_0 : i32, i32
  }
  func.func @transform_14(%arg0: i32) -> (i32, i32) {
    %c0_i32 = arith.constant 0 : i32
    %c0_i32_0 = arith.constant 0 : i32
    return %arg0, %c0_i32 : i32, i32
  }
}

</mosaic_0001>

<bundles_post_ra>
// kernel: tpu_custom_call.1
= control target key start
LH: loop header
LB: loop body
LE: loop exit
PB: predicated region body
PF: predicated region fallthrough
CT: control target
= control target key end

     0   :  { %s11629_s29 = smov 0   ;;  %s16029_s0 = inlined_call_operand.vmem [shape: s32[512,1], index: 0, kind: input, shape index: {}]   ;;  %s16030_s1 = inlined_call_operand.vmem [shape: f32[512,3], index: 1, kind: input, shape index: {}]   ;;  %s16031_s2 = inlined_call_operand.vmem [shape: f32[512,128], index: 2, kind: input, shape index: {}]   ;;  %s16032_s3 = inlined_call_operand.vmem [shape: f32[3,64], index: 3, kind: input, shape index: {}]   ;;  %s16033_s4 = inlined_call_operand.vmem [shape: f32[1,64], index: 4, kind: input, shape index: {}]   ;;  %s16034_s5 = inlined_call_operand.vmem [shape: f32[128,256], index: 5, kind: input, shape index: {}]   ;;  %s16035_s6 = inlined_call_operand.vmem [shape: f32[128,128], index: 6, kind: input, shape index: {}]   ;;  %s16036_s7 = inlined_call_operand.vmem [shape: f32[64,384], index: 7, kind: input, shape index: {}]   ;;  %s16037_s8 = inlined_call_operand.vmem [shape: f32[1,384], index: 8, kind: input, shape index: {}]   ;;  %s16038_s9 = inlined_call_operand.vmem [shape: f32[128,32], index: 9, kind: input, shape index: {}]   ;;  %s16039_s10 = inlined_call_operand.vmem [shape: f32[64,32], index: 10, kind: input, shape index: {}]   ;;  %s16040_s11 = inlined_call_operand.vmem [shape: f32[1,32], index: 11, kind: input, shape index: {}]   ;;  %s16041_s12 = inlined_call_operand.vmem [shape: f32[32,128], index: 12, kind: input, shape index: {}]   ;;  %s16042_s13 = inlined_call_operand.vmem [shape: f32[1,3], index: 13, kind: input, shape index: {}]   ;;  %s16043_s14 = inlined_call_operand.vmem [shape: f32[512,3], index: 14, kind: output, shape index: {}]  }
   0x1 LB: > { %s8095_s30 = sadd.s32 4294967295, %s11546_s29   ;;  %p8099_p0 = scmp.ge.s32.totalorder %s11546_s29, 1  ;;  %s11546_s29 = sphi %s11629_s29, %s24_s29  }
   0x2   : > { %p424_p1 = scmp.lt.s32.totalorder %s11546_s29, 3 }
   0x4   : > { %p425_p2 = pnand %p8099_p0, %p424_p1 }
   0x6   : > { %428 = sbr.rel (%p425_p2) target bundleno = 3055 (0xbef), region = 76 }
   0xd   : > { %s8100_s15 = sshll.u32 %s8095_s30, 5  ;;  %v493_v0 = vld [vmem:[%s16031_s2] sm:$0xff]  ;;  %v494_v1 = vld [vmem:[%s16031_s2 + $0x8] sm:$0xff]  ;;  %v16048_v2 = vmov 0   ;;  %v495_v4 = vld [vmem:[%s16031_s2 + $0x10] sm:$0xff]  ;;  %v11549_v6 = vmov 0.0|0.0  }
   0xe   : > { %10130 = vset.pattern.permute.xlu1 %v16048_v2  ;;  %10129 = vset.pattern.permute.xlu0 %v16048_v2  ;;  %p476_p3 = scmp.lt.s32.totalorder %s8100_s15, 63  ;;  %v9564_v3 = vpack.c.bf16 %v494_v1, %v493_v0  ;;  %v496_v5 = vld [vmem:[%s16031_s2 + $0x18] sm:$0xff]  ;;  %v497_v8 = vld [vmem:[%s16031_s2 + $0x20] sm:$0xff]  ;;  %v498_v9 = vld [vmem:[%s16031_s2 + $0x28] sm:$0xff] }
   0xf   : > { %9563 = vmatprep.subr.bf16.mxu0 %v11549_v6  ;;  %v9567_v7 = vpack.c.bf16 %v496_v5, %v495_v4  ;;  %v9570_v12 = vpack.c.bf16 %v498_v9, %v497_v8  ;;  %v499_v13 = vld [vmem:[%s16031_s2 + $0x30] sm:$0xff]  ;;  %v500_v14 = vld [vmem:[%s16031_s2 + $0x38] sm:$0xff]  ;;  %v501_v18 = vld [vmem:[%s16031_s2 + $0x40] sm:$0xff] }
  0x10   : > { %s17356_s15 = smov (!%p476_p3, %s8100_s15), 63  ;;  %9565 = vmatpush1.bf16.msra.mxu0 %v9564_v3  ;;  %v9573_v17 = vpack.c.bf16 %v500_v14, %v499_v13  ;;  %v502_v19 = vld [vmem:[%s16031_s2 + $0x48] sm:$0xff]  ;;  %v503_v23 = vld [vmem:[%s16031_s2 + $0x50] sm:$0xff]  ;;  %v504_v24 = vld [vmem:[%s16031_s2 + $0x58] sm:$0xff] }
  0x11   : > { %9566 = vmatprep.subr.bf16.mxu0 %v11549_v6  ;;  %s11659_s28 = sshll.u32 %s17356_s15, 3  ;;  %v9576_v22 = vpack.c.bf16 %v502_v19, %v501_v18  ;;  %v9579_v27 = vpack.c.bf16 %v504_v24, %v503_v23  ;;  %v505_v28 = vld [vmem:[%s16031_s2 + $0x60] sm:$0xff]  ;;  %v506_v29 = vld [vmem:[%s16031_s2 + $0x68] sm:$0xff]  ;;  %v507_v33 = vld [vmem:[%s16031_s2 + $0x70] sm:$0xff] }
  0x12   : > { %s11665_s17 = scalar_lea.vmem %s16029_s0, %s11659_s28  ;;  %v9582_v32 = vpack.c.bf16 %v506_v29, %v505_v28  ;;  %v508_v34 = vld [vmem:[%s16031_s2 + $0x78] sm:$0xff]  ;;  %v509_v38 = vld [vmem:[%s16031_s2 + $0x80] sm:$0xff]  ;;  %v510_v39 = vld [vmem:[%s16031_s2 + $0x88] sm:$0xff]  ;;  %s11796_s19 = scalar_lea.vmem %s16030_s1, %s11659_s28 }
  0x13   : > { %v559_v10 = vld [vmem:[%s11665_s17 + $0x10] sm:$0xff]  ;;  %v557_v11 = vld [vmem:[%s11665_s17] sm:$0xff]  ;;  %v560_v15 = vld [vmem:[%s11665_s17 + $0x18] sm:$0xff]  ;;  %v9585_v37 = vpack.c.bf16 %v508_v34, %v507_v33  ;;  %v9588_v42 = vpack.c.bf16 %v510_v39, %v509_v38  ;;  %s15928_s24 = scalar_lea.vmem %s16043_s14, %s11659_s28 }
  0x14   : > { %9568 = vmatpush1.bf16.msra.mxu0 %v9567_v7  ;;  %601 = vperm.xlu1 %10130, %v559_v10   ;;  %v558_v16 = vld [vmem:[%s11665_s17 + $0x8] sm:$0xff]  ;;  %v561_v21 = vld [vmem:[%s11665_s17 + $0x20] sm:$0xff]  ;;  %v564_v25 = vld [vmem:[%s11665_s17 + $0x38] sm:$0xff] }
  0x15   : > { %595 = vperm.xlu0 %10129, %v557_v11   ;;  %9569 = vmatprep.subr.bf16.mxu0 %v11549_v6  ;;  %v562_v20 = vld [vmem:[%s11665_s17 + $0x28] sm:$0xff]  ;;  %v563_v26 = vld [vmem:[%s11665_s17 + $0x30] sm:$0xff]  ;;  %v565_v31 = vld [vmem:[%s11665_s17 + $0x40] sm:$0xff] }
  0x16   : > { %v566_v30 = vld [vmem:[%s11665_s17 + $0x48] sm:$0xff]  ;;  %v568_v35 = vld [vmem:[%s11665_s17 + $0x58] sm:$0xff]  ;;  %v567_v36 = vld [vmem:[%s11665_s17 + $0x50] sm:$0xff] }
  0x17   : > { %v570_v40 = vld [vmem:[%s11665_s17 + $0x68] sm:$0xff]  ;;  %v569_v41 = vld [vmem:[%s11665_s17 + $0x60] sm:$0xff]  ;;  %v511_v43 = vld [vmem:[%s16031_s2 + $0x90] sm:$0xff] }
  0x18   : > { %9571 = vmatpush1.bf16.msra.mxu0 %v9570_v12  ;;  %604 = vperm.xlu1 %10130, %v560_v15   ;;  %v512_v44 = vld [vmem:[%s16031_s2 + $0x98] sm:$0xff]  ;;  %v571_v46 = vld [vmem:[%s11665_s17 + $0x70] sm:$0xff]  ;;  %v513_v48 = vld [vmem:[%s16031_s2 + $0xa0] sm:$0xff] }
  0x19   : > { %598 = vperm.xlu0 %10129, %v558_v16   ;;  %9572 = vmatprep.subr.bf16.mxu0 %v11549_v6  ;;  %v572_v45 = vld [vmem:[%s11665_s17 + $0x78] sm:$0xff]  ;;  %v9591_v47 = vpack.c.bf16 %v512_v44, %v511_v43  ;;  %v514_v49 = vld [vmem:[%s16031_s2 + $0xa8] sm:$0xff]  ;;  %v573_v51 = vld [vmem:[%s11665_s17 + $0x80] sm:$0xff] }
  0x1a   : > { %v574_v50 = vld [vmem:[%s11665_s17 + $0x88] sm:$0xff]  ;;  %v9594_v52 = vpack.c.bf16 %v514_v49, %v513_v48  ;;  %v515_v53 = vld [vmem:[%s16031_s2 + $0xb0] sm:$0xff]  ;;  %v516_v54 = vld [vmem:[%s16031_s2 + $0xb8] sm:$0xff] }
  0x1b   : > { %v576_v55 = vld [vmem:[%s11665_s17 + $0x98] sm:$0xff]  ;;  %v575_v56 = vld [vmem:[%s11665_s17 + $0x90] sm:$0xff]  ;;  %v9597_v57 = vpack.c.bf16 %v516_v54, %v515_v53  ;;  %v517_v58 = vld [vmem:[%s16031_s2 + $0xc0] sm:$0xff]  ;;  %v16044_v54 = vmov 0.0  }
  0x1c   : > { %9574 = vmatpush1.bf16.msra.mxu0 %v9573_v17  ;;  %610 = vperm.xlu1 %10130, %v562_v20   ;;  %v518_v59 = vld [vmem:[%s16031_s2 + $0xc8] sm:$0xff]  ;;  %v577_v61 = vld [vmem:[%s11665_s17 + $0xa0] sm:$0xff]  ;;  %v519_v63 = vld [vmem:[%s16031_s2 + $0xd0] sm:$0xff] }
  0x1d   : > { %607 = vperm.xlu0 %10129, %v561_v21   ;;  %9575 = vmatprep.subr.bf16.mxu0 %v11549_v6  ;;  %v578_v60 = vld [vmem:[%s11665_s17 + $0xa8] sm:$0xff]  ;;  %v9600_v62 = vpack.c.bf16 %v518_v59, %v517_v58  ;;  %v520_v0 = vld [vmem:[%s16031_s2 + $0xd8] sm:$0xff]  ;;  %v579_v3 = vld [vmem:[%s11665_s17 + $0xb0] sm:$0xff]  ;;  %v16050_v21 = vmov 1   ;;  %v589_v59 = vlaneseq }
  0x1e   : > { %v580_v1 = vld [vmem:[%s11665_s17 + $0xb8] sm:$0xff]  ;;  %v9603_v4 = vpack.c.bf16 %v520_v0, %v519_v63  ;;  %v521_v5 = vld [vmem:[%s16031_s2 + $0xe0] sm:$0xff]  ;;  %v522_v7 = vld [vmem:[%s16031_s2 + $0xe8] sm:$0xff]  ;;  %2258 = vmatprep.mubr.f32.mxu1 %v16044_v54 }
  0x1f   : > { %v582_v8 = vld [vmem:[%s11665_s17 + $0xc8] sm:$0xff]  ;;  %v581_v9 = vld [vmem:[%s11665_s17 + $0xc0] sm:$0xff]  ;;  %v9606_v10 = vpack.c.bf16 %v522_v7, %v521_v5  ;;  %v523_v11 = vld [vmem:[%s16031_s2 + $0xf0] sm:$0xff]  ;;  %v16065_v7 = vmov 1.0  }
  0x20   : > { %9577 = vmatpush1.bf16.msra.mxu0 %v9576_v22  ;;  %616 = vperm.xlu1 %10130, %v564_v25   ;;  %v524_v12 = vld [vmem:[%s16031_s2 + $0xf8] sm:$0xff]  ;;  %v583_v14 = vld [vmem:[%s11665_s17 + $0xd0] sm:$0xff]  ;;  %v586_v16 = vld [vmem:[%s11665_s17 + $0xe8] sm:$0xff] }
  0x21   : > { %613 = vperm.xlu0 %10129, %v563_v26   ;;  %9578 = vmatprep.subr.bf16.mxu0 %v11549_v6  ;;  %v584_v13 = vld [vmem:[%s11665_s17 + $0xd8] sm:$0xff]  ;;  %v9609_v15 = vpack.c.bf16 %v524_v12, %v523_v11  ;;  %v585_v17 = vld [vmem:[%s11665_s17 + $0xe0] sm:$0xff]  ;;  %v587_v19 = vld [vmem:[%s11665_s17 + $0xf0] sm:$0xff] }
  0x22   : > { %v588_v18 = vld [vmem:[%s11665_s17 + $0xf8] sm:$0xff]  ;;  %v1396_v20 = vld [vmem:[%s11796_s19] sm:$0xff]  ;;  %v1397_v23 = vld [vmem:[%s11796_s19 + $0x8] sm:$0xff] }
  0x23   : > { %v11801_v22 = vld [vmem:[%s11796_s19 + $0x20] sm:$0xff]  ;;  %v11807_v24 = vld [vmem:[%s11796_s19 + $0x28] sm:$0xff]  ;;  %v2059_v29 = vld [vmem:[%s16036_s7 + $0x18] sm:$0xff] }
  0x24   : > { %9580 = vmatpush1.bf16.msra.mxu0 %v9579_v27  ;;  %622 = vperm.xlu1 %10130, %v566_v30   ;;  %v11811_v25 = vld [vmem:[%s11796_s19 + $0x48] sm:$0xff]  ;;  %v2060_v27 = vld [vmem:[%s16036_s7 + $0x20] sm:$0xff]  ;;  %v2063_v33 = vld [vmem:[%s16036_s7 + $0x38] sm:$0xff] }
  0x25   : > { %619 = vperm.xlu0 %10129, %v565_v31   ;;  %9581 = vmatprep.subr.bf16.mxu0 %v11549_v6  ;;  %v2057_v26 = vld [vmem:[%s16036_s7 + $0x8] sm:$0xff]  ;;  %v2056_v28 = vld [vmem:[%s16036_s7] sm:$0xff]  ;;  %v2066_v34 = vld [vmem:[%s16036_s7 + $0x50] sm:$0xff] }
  0x26   : > { %v9659_v30 = vpack.c.bf16 %v2060_v27, %v2057_v26  ;;  %v9661_v31 = vpack.c.bf16 %v2059_v29, %v2056_v28  ;;  %v2065_v38 = vld [vmem:[%s16036_s7 + $0x48] sm:$0xff]  ;;  %v2071_v43 = vld [vmem:[%s16036_s7 + $0x78] sm:$0xff]  ;;  %v2078_v48 = vld [vmem:[%s16036_s7 + $0xb0] sm:$0xff] }
  0x27   : > { %v11897_v58 = vld [vmem:[%s11796_s19 + $0x80] sm:$0xff]  ;;  %v526_v0 = vld [vmem:[%s16031_s2 + $0x108] sm:$0xff] }
  0x28   : > { %9583 = vmatpush1.bf16.msra.mxu0 %v9582_v32  ;;  %628 = vperm.xlu1 %10130, %v568_v35   ;;  %v11828_v32 = vld [vmem:[%s11796_s19 + $0x10] sm:$0xff]  ;;  %v525_v63 = vld [vmem:[%s16031_s2 + $0x100] sm:$0xff]  ;;  %v11993_v26 = vld [vmem:[%s11796_s19 + $0x88] sm:$0xff] }
  0x29   : > { %625 = vperm.xlu0 %10129, %v567_v36   ;;  %9584 = vmatprep.subr.bf16.mxu0 %v11549_v6  ;;  %v11837_v35 = vld [vmem:[%s11796_s19 + $0x50] sm:$0xff]  ;;  %v9663_v36 = vpack.c.bf16 %v2066_v34, %v2063_v33  ;;  %v1404_v5 = vld [vmem:[%s11796_s19 + $0x40] sm:$0xff] }
  0x2a   : > { %9660 = vmatprep.subr.bf16.mxu1 %v9659_v30  ;;  %v11947_v12 = vld [vmem:[%s11796_s19 + $0x60] sm:$0xff] }
  0x2b   : > { %9662 = vmatpush1.bf16.msra.mxu1 %v9661_v31  ;;  %v533_v30 = vld [vmem:[%s16031_s2 + $0x140] sm:$0xff]  ;;  %v534_v31 = vld [vmem:[%s16031_s2 + $0x148] sm:$0xff] }
  0x2c   : > { %9586 = vmatpush1.bf16.msra.mxu0 %v9585_v37  ;;  %634 = vperm.xlu1 %10130, %v570_v40   ;;  %v2062_v37 = vld [vmem:[%s16036_s7 + $0x30] sm:$0xff]  ;;  %v2069_v40 = vld [vmem:[%s16036_s7 + $0x68] sm:$0xff] }
  0x2d   : > { %631 = vperm.xlu0 %10129, %v569_v41   ;;  %9587 = vmatprep.subr.bf16.mxu0 %v11549_v6  ;;  %v9665_v39 = vpack.c.bf16 %v2065_v38, %v2062_v37  ;;  %v2072_v41 = vld [vmem:[%s16036_s7 + $0x80] sm:$0xff]  ;;  %v535_v37 = vld [vmem:[%s16031_s2 + $0x150] sm:$0xff]  ;;  %v536_v38 = vld [vmem:[%s16031_s2 + $0x158] sm:$0xff] }
  0x2e   : > { %9664 = vmatprep.subr.bf16.mxu1 %v9663_v36  ;;  %v9667_v44 = vpack.c.bf16 %v2072_v41, %v2069_v40  ;;  %v9624_v36 = vpack.c.bf16 %v534_v31, %v533_v30  ;;  %v545_v30 = vld [vmem:[%s16031_s2 + $0x1a0] sm:$0xff]  ;;  %v546_v31 = vld [vmem:[%s16031_s2 + $0x1a8] sm:$0xff] }
  0x2f   : > { %9666 = vmatpush1.bf16.msra.mxu1 %v9665_v39  ;;  %v12039_v39 = vld [vmem:[%s11796_s19 + $0xb0] sm:$0xff] }
  0x30   : > { %9589 = vmatpush1.bf16.msra.mxu0 %v9588_v42  ;;  %640 = vperm.xlu1 %10130, %v572_v45   ;;  %v2068_v42 = vld [vmem:[%s16036_s7 + $0x60] sm:$0xff] }
  0x31   : > { %637 = vperm.xlu0 %10129, %v571_v46   ;;  %9590 = vmatprep.subr.bf16.mxu0 %v11549_v6  ;;  %v9669_v45 = vpack.c.bf16 %v2071_v43, %v2068_v42  ;;  %v16046_v46 = vmov 2   ;;  %v9627_v42 = vpack.c.bf16 %v536_v38, %v535_v37  ;;  %v537_v43 = vld [vmem:[%s16031_s2 + $0x160] sm:$0xff]  ;;  %v9642_v38 = vpack.c.bf16 %v546_v31, %v545_v30 }
  0x32   : > { %9668 = vmatprep.subr.bf16.mxu1 %v9667_v44  ;;  %v538_v44 = vld [vmem:[%s16031_s2 + $0x168] sm:$0xff] }
  0x33   : > { %9670 = vmatpush1.bf16.msra.mxu1 %v9669_v45 }
  0x34   : > { %9592 = vmatpush1.bf16.msra.mxu0 %v9591_v47  ;;  %646 = vperm.xlu1 %10130, %v574_v50   ;;  %v2075_v47 = vld [vmem:[%s16036_s7 + $0x98] sm:$0xff]  ;;  %v2074_v50 = vld [vmem:[%s16036_s7 + $0x90] sm:$0xff] }
  0x35   : > { %643 = vperm.xlu0 %10129, %v573_v51   ;;  %9593 = vmatprep.subr.bf16.mxu0 %v11549_v6  ;;  %v9671_v49 = vpack.c.bf16 %v2078_v48, %v2075_v47  ;;  %v2077_v51 = vld [vmem:[%s16036_s7 + $0xa8] sm:$0xff]  ;;  %v9630_v48 = vpack.c.bf16 %v538_v44, %v537_v43  ;;  %v12209_v43 = vld [vmem:[%s11796_s19 + $0xc0] sm:$0xff] }
  0x36   : > { %v9673_v53 = vpack.c.bf16 %v2077_v51, %v2074_v50 }
  0x37   : > { %9672 = vmatprep.subr.bf16.mxu1 %v9671_v49  ;;  %v540_v49 = vld [vmem:[%s16031_s2 + $0x178] sm:$0xff] }
  0x38   : > { %9595 = vmatpush1.bf16.msra.mxu0 %v9594_v52  ;;  %652 = vperm.xlu1 %10130, %v576_v55   ;;  %v1399_v52 = vld [vmem:[%s11796_s19 + $0x18] sm:$0xff]  ;;  %v1402_v55 = vld [vmem:[%s11796_s19 + $0x30] sm:$0xff] }
  0x39   : > { %649 = vperm.xlu0 %10129, %v575_v56   ;;  %9596 = vmatprep.subr.bf16.mxu0 %v11549_v6  ;;  %v11885_v56 = vld [vmem:[%s11796_s19 + $0x58] sm:$0xff] }
  0x3a   : > { %9674 = vmatpush1.bf16.msra.mxu1 %v9673_v53 }
  0x3c   : > { %9598 = vmatpush1.bf16.msra.mxu0 %v9597_v57  ;;  %658 = vperm.xlu1 %10130, %v578_v60   ;;  %v11891_v57 = vld [vmem:[%s11796_s19 + $0x78] sm:$0xff]  ;;  %v11905_v60 = vand.u32 127, %v589_v59 }
  0x3d   : > { %655 = vperm.xlu0 %10129, %v577_v61   ;;  %9599 = vmatprep.subr.bf16.mxu0 %v11549_v6  ;;  %v1403_v61 = vld [vmem:[%s11796_s19 + $0x38] sm:$0xff] }
  0x3e   : > { %v12094_v53 = vadd.s32 384, %v11905_v60 }
  0x40   : > { %9601 = vmatpush1.bf16.msra.mxu0 %v9600_v62  ;;  %664 = vperm.xlu1 %10130, %v580_v1   ;;  %v11910_v62 = vadd.s32 128, %v11905_v60 }
  0x41   : > { %661 = vperm.xlu0 %10129, %v579_v3   ;;  %9602 = vmatprep.subr.bf16.mxu0 %v11549_v6 }
  0x44   : > { %9604 = vmatpush1.bf16.msra.mxu0 %v9603_v4  ;;  %670 = vperm.xlu1 %10130, %v582_v8   ;;  %v9612_v4 = vpack.c.bf16 %v526_v0, %v525_v63  ;;  %v527_v8 = vld [vmem:[%s16031_s2 + $0x110] sm:$0xff]  ;;  %v541_v63 = vld [vmem:[%s16031_s2 + $0x180] sm:$0xff]  ;;  %v542_v0 = vld [vmem:[%s16031_s2 + $0x188] sm:$0xff] }
  0x45   : > { %667 = vperm.xlu0 %10129, %v581_v9   ;;  %9605 = vmatprep.subr.bf16.mxu0 %v11549_v6  ;;  %v528_v9 = vld [vmem:[%s16031_s2 + $0x118] sm:$0xff] }
  0x48   : > { %9607 = vmatpush1.bf16.msra.mxu0 %v9606_v10  ;;  %676 = vperm.xlu1 %10130, %v584_v13   ;;  %v9615_v13 = vpack.c.bf16 %v528_v9, %v527_v8  ;;  %v9636_v8 = vpack.c.bf16 %v542_v0, %v541_v63  ;;  %v543_v9 = vld [vmem:[%s16031_s2 + $0x190] sm:$0xff]  ;;  %v12236_v63 = vld [vmem:[%s11796_s19 + $0xc8] sm:$0xff] }
  0x49   : > { %673 = vperm.xlu0 %10129, %v583_v14   ;;  %9608 = vmatprep.subr.bf16.mxu0 %v11549_v6  ;;  %v529_v14 = vld [vmem:[%s16031_s2 + $0x120] sm:$0xff] }
  0x4c   : > { %9610 = vmatpush1.bf16.msra.mxu0 %v9609_v15  ;;  %682 = vperm.xlu1 %10130, %v586_v16   ;;  %v530_v15 = vld [vmem:[%s16031_s2 + $0x128] sm:$0xff] }
  0x4d   : > { %679 = vperm.xlu0 %10129, %v585_v17   ;;  %9611 = vmatprep.subr.bf16.mxu0 %v11549_v6 }
  0x50   : > { %688 = vperm.xlu1 %10130, %v588_v18   ;;  %v9618_v18 = vpack.c.bf16 %v530_v15, %v529_v14  ;;  %v12148_v15 = vld [vmem:[%s11796_s19 + $0x98] sm:$0xff] }
  0x51   : > { %685 = vperm.xlu0 %10129, %v587_v19   ;;  %v11971_v19 = vld [vmem:[%s11796_s19 + $0x68] sm:$0xff] }
  0x54   : > { %10131 = vset.pattern.permute.xlu1 %v16050_v21 }
  0x55   : > { %1431 = vperm.xlu0 %10129, %v1396_v20   ;;  %1626 = vperm.xlu1 %10131, %v1396_v20  }
  0x59   : > { %1451 = vperm.xlu0 %10129, %v11801_v22   ;;  %10132 = vset.pattern.permute.xlu1 %v16048_v2 }
  0x5a   : > { %1436 = vperm.xlu1 %10132, %v1397_v23  }
  0x5d   : > { %1456 = vperm.xlu0 %10129, %v11807_v24  }
  0x5e   : > { %10133 = vset.pattern.permute.xlu1 %v16050_v21 }
  0x5f   : > { %1630 = vperm.xlu1 %10133, %v1397_v23  }
  0x61   : > { %1476 = vperm.xlu0 %10129, %v11811_v25  }
  0x63   : > { %10134 = vset.pattern.permute.xlu1 %v16048_v2 }
  0x64   : > { %1441 = vperm.xlu1 %10134, %v11828_v32  }
  0x65   : > { %1481 = vperm.xlu0 %10129, %v11837_v35  }
  0x68   : > { %10135 = vset.pattern.permute.xlu1 %v16046_v46 }
  0x69   : > { %10149 = vset.pattern.permute.xlu0 %v16046_v46  ;;  %1830 = vperm.xlu1 %10135, %v11828_v32  }
  0x6a   : > { %1822 = vperm.xlu0 %10149, %v1396_v20  }
  0x6d   : > { %10136 = vset.pattern.permute.xlu1 %v16048_v2 }
  0x6e   : > { %1826 = vperm.xlu0 %10149, %v1397_v23   ;;  %1446 = vperm.xlu1 %10136, %v1399_v52   ;;  %v531_v23 = vld [vmem:[%s16031_s2 + $0x130] sm:$0xff] }
  0x72   : > { %1842 = vperm.xlu0 %10149, %v11807_v24   ;;  %10137 = vset.pattern.permute.xlu1 %v16046_v46 }
  0x73   : > { %1834 = vperm.xlu1 %10137, %v1399_v52  }
  0x76   : > { %1846 = vperm.xlu0 %10149, %v1402_v55  }
  0x77   : > { %10138 = vset.pattern.permute.xlu1 %v16050_v21 }
  0x78   : > { %1642 = vperm.xlu1 %10138, %v11801_v22  }
  0x7a   : > { %1862 = vperm.xlu0 %10149, %v11837_v35  }
  0x7c   : > { %10139 = vset.pattern.permute.xlu1 %v16046_v46 }
  0x7d   : > { %1838 = vperm.xlu1 %10139, %v11801_v22  }
  0x7e   : > { %1866 = vperm.xlu0 %10149, %v11885_v56  }
  0x81   : > { %10140 = vset.pattern.permute.xlu1 %v16050_v21 }
  0x82   : > { %1882 = vperm.xlu0 %10149, %v11891_v57   ;;  %1646 = vperm.xlu1 %10140, %v11807_v24   ;;  %v532_v24 = vld [vmem:[%s16031_s2 + $0x138] sm:$0xff] }
  0x83   : > { %v9621_v29 = vpack.c.bf16 %v532_v24, %v531_v23 }
  0x86   : > { %1886 = vperm.xlu0 %10149, %v11897_v58   ;;  %10141 = vset.pattern.permute.xlu1 %v16048_v2 }
  0x87   : > { %1461 = vperm.xlu1 %10141, %v1402_v55  }
  0x8a   : > { %10162 = vset.pattern.permute.xlu0 %v16050_v21 }
  0x8b   : > { %1634 = vperm.xlu0 %10162, %v11828_v32   ;;  %10142 = vset.pattern.permute.xlu1 %v16050_v21  ;;  %v12016_v32 = vld [vmem:[%s11796_s19 + $0x90] sm:$0xff] }
  0x8c   : > { %1650 = vperm.xlu1 %10142, %v1402_v55   ;;  %v12097_v55 = vadd.s32 256, %v11905_v60 }
  0x8f   : > { %1638 = vperm.xlu0 %10162, %v1399_v52   ;;  %v12091_v52 = vld [vmem:[%s11796_s19 + $0x70] sm:$0xff] }
  0x90   : > { %10143 = vset.pattern.permute.xlu1 %v16048_v2 }
  0x91   : > { %1466 = vperm.xlu1 %10143, %v1403_v61  }
  0x93   : > { %1654 = vperm.xlu0 %10162, %v1403_v61   ;;  %v11918_v1 = vpop.permute.xlu1 %601 }
  0x94   : > { %v11920_v3 = vpop.permute.xlu0 %595  ;;  %vm699_vm4 = vcmp.eq.s32.totalorder %v11910_v62, %v11918_v1  ;;  %vm698_vm5 = vcmp.eq.s32.totalorder %v11905_v60, %v11918_v1 }
  0x95   : > { %vm691_vm0 = vcmp.eq.s32.totalorder %v11910_v62, %v11920_v3  ;;  %vm690_vm1 = vcmp.eq.s32.totalorder %v11905_v60, %v11920_v3  ;;  %10144 = vset.pattern.permute.xlu1 %v16046_v46 }
  0x96   : > { %8106 = vmatprep.mubr.msk.f32.mxu0 %vm691_vm0, %v16065_v7  ;;  %1850 = vperm.xlu1 %10144, %v1403_v61  }
  0x97   : > { %8107 = vmatmul.mubr.msk.f32.vlgmr.msra.gmra.mrb[0].mxu0 %vm690_vm1, %v16065_v7  ;;  %v11936_v10 = vpop.permute.xlu1 %604  ;;  %1658 = vperm.xlu0 %10162, %v1404_v5  }
  0x98   : > { %v11938_v11 = vpop.permute.xlu0 %598  ;;  %9613 = vmatpush1.bf16.msra.mxu0 %v9612_v4  ;;  %vm703_vm6 = vcmp.eq.s32.totalorder %v11910_v62, %v11936_v10  ;;  %vm702_vm8 = vcmp.eq.s32.totalorder %v11905_v60, %v11936_v10 }
  0x99   : > { %vm695_vm2 = vcmp.eq.s32.totalorder %v11910_v62, %v11938_v11  ;;  %vm694_vm3 = vcmp.eq.s32.totalorder %v11905_v60, %v11938_v11  ;;  %9614 = vmatprep.subr.bf16.mxu0 %v11549_v6 }
  0x9a   : > { %8108 = vmatprep.mubr.msk.f32.mxu0 %vm695_vm2, %v16065_v7  ;;  %10145 = vset.pattern.permute.xlu1 %v16048_v2 }
  0x9b   : > { %8109 = vmatmul.mubr.msk.f32.gmra.mrb[2].mxu0 %vm694_vm3, %v16065_v7  ;;  %1471 = vperm.xlu1 %10145, %v1404_v5   ;;  %v11959_v16 = vpop.permute.xlu1 %610 }
  0x9c   : > { %8110 = vmatprep.mubr.msk.f32.mxu0 %vm699_vm4, %v16065_v7  ;;  %v11962_v17 = vpop.permute.xlu0 %607  ;;  %1674 = vperm.xlu0 %10162, %v11947_v12   ;;  %vm711_vm10 = vcmp.eq.s32.totalorder %v11910_v62, %v11959_v16  ;;  %vm710_vm12 = vcmp.eq.s32.totalorder %v11905_v60, %v11959_v16 }
  0x9d   : > { %9616 = vmatpush1.bf16.msra.mxu0 %v9615_v13  ;;  %vm707_vm7 = vcmp.eq.s32.totalorder %v11910_v62, %v11962_v17  ;;  %vm706_vm9 = vcmp.eq.s32.totalorder %v11905_v60, %v11962_v17 }
  0x9e   : > { %9617 = vmatprep.subr.bf16.mxu0 %v11549_v6 }
  0x9f   : > { %8111 = vmatmul.mubr.msk.f32.gmra.mrb[4].mxu0 %vm698_vm5, %v16065_v7  ;;  %10146 = vset.pattern.permute.xlu1 %v16046_v46  ;;  %v11975_v20 = vpop.permute.xlu1 %616 }
  0xa0   : > { %8112 = vmatprep.mubr.msk.f32.mxu0 %vm703_vm6, %v16065_v7  ;;  %v11978_v22 = vpop.permute.xlu0 %613  ;;  %1854 = vperm.xlu1 %10146, %v1404_v5   ;;  %vm719_vm14 = vcmp.eq.s32.totalorder %v11910_v62, %v11975_v20  ;;  %vm718_vm0 = vcmp.eq.s32.totalorder %v11905_v60, %v11975_v20 }
  0xa1   : > { %1678 = vperm.xlu0 %10162, %v11971_v19   ;;  %9619 = vmatpush1.bf16.msra.mxu0 %v9618_v18  ;;  %vm715_vm11 = vcmp.eq.s32.totalorder %v11910_v62, %v11978_v22  ;;  %vm714_vm13 = vcmp.eq.s32.totalorder %v11905_v60, %v11978_v22 }
  0xa2   : > { %9620 = vmatprep.subr.bf16.mxu0 %v11549_v6 }
  0xa3   : > { %8113 = vmatmul.mubr.msk.f32.gmra.mrb[6].mxu0 %vm702_vm8, %v16065_v7  ;;  %v11996_v27 = vpop.permute.xlu1 %622 }
  0xa4   : > { %v11998_v28 = vpop.permute.xlu0 %619  ;;  %8114 = vmatprep.mubr.msk.f32.mxu0 %vm707_vm7, %v16065_v7  ;;  %10147 = vset.pattern.permute.xlu1 %v16050_v21  ;;  %vm727_vm4 = vcmp.eq.s32.totalorder %v11910_v62, %v11996_v27  ;;  %vm726_vm6 = vcmp.eq.s32.totalorder %v11905_v60, %v11996_v27 }
  0xa5   : > { %1662 = vperm.xlu1 %10147, %v11811_v25   ;;  %1694 = vperm.xlu0 %10162, %v11993_v26   ;;  %vm723_vm15 = vcmp.eq.s32.totalorder %v11910_v62, %v11998_v28  ;;  %vm722_vm1 = vcmp.eq.s32.totalorder %v11905_v60, %v11998_v28 }
  0xa6   : > { %9622 = vmatpush1.bf16.msra.mxu0 %v9621_v29  ;;  %v12171_v29 = vld [vmem:[%s11796_s19 + $0xa0] sm:$0xff] }
  0xa7   : > { %8115 = vmatmul.mubr.msk.f32.gmra.mrb[8].mxu0 %vm706_vm9, %v16065_v7  ;;  %v12018_v33 = vpop.permute.xlu1 %628  ;;  %9623 = vmatprep.subr.bf16.mxu0 %v11549_v6 }
  0xa8   : > { %8116 = vmatprep.mubr.msk.f32.mxu0 %vm711_vm10, %v16065_v7  ;;  %v12021_v34 = vpop.permute.xlu0 %625 }
  0xa9   : > { %10148 = vset.pattern.permute.xlu1 %v16046_v46  ;;  %1698 = vperm.xlu0 %10162, %v12016_v32   ;;  %vm731_vm5 = vcmp.eq.s32.totalorder %v11910_v62, %v12021_v34  ;;  %vm730_vm9 = vcmp.eq.s32.totalorder %v11905_v60, %v12021_v34 }
  0xaa   : > { %1858 = vperm.xlu1 %10148, %v11811_v25   ;;  %9625 = vmatpush1.bf16.msra.mxu0 %v9624_v36  ;;  %v12055_v25 = vld [vmem:[%s11796_s19 + $0xb8] sm:$0xff] }
  0xab   : > { %8117 = vmatmul.mubr.msk.f32.gmra.mrb[10].mxu0 %vm710_vm12, %v16065_v7  ;;  %v12041_v40 = vpop.permute.xlu1 %634  ;;  %9626 = vmatprep.subr.bf16.mxu0 %v11549_v6  ;;  %vm735_vm12 = vcmp.eq.s32.totalorder %v11910_v62, %v12018_v33 }
  0xac   : > { %v12043_v41 = vpop.permute.xlu0 %631  ;;  %8118 = vmatprep.mubr.msk.f32.mxu0 %vm715_vm11, %v16065_v7 }
  0xad   : > { %1714 = vperm.xlu0 %10162, %v12039_v39  }
  0xae   : > { %10150 = vset.pattern.permute.xlu1 %v16050_v21  ;;  %9628 = vmatpush1.bf16.msra.mxu0 %v9627_v42  ;;  %v547_v42 = vld [vmem:[%s16031_s2 + $0x1b0] sm:$0xff] }
  0xaf   : > { %8119 = vmatmul.mubr.msk.f32.gmra.mrb[12].mxu0 %vm714_vm13, %v16065_v7  ;;  %1666 = vperm.xlu1 %10150, %v11837_v35   ;;  %v12064_v45 = vpop.permute.xlu1 %640  ;;  %v539_v35 = vld [vmem:[%s16031_s2 + $0x170] sm:$0xff]  ;;  %vm739_vm13 = vcmp.eq.s32.totalorder %v11910_v62, %v12043_v41 }
  0xb0   : > { %16465 = vst [vmem:[#allocation2_spill] sm:$0xff] %v12064_v45  ;;  %8120 = vmatprep.mubr.msk.f32.mxu0 %vm719_vm14, %v16065_v7  ;;  %v12067_v47 = vpop.permute.xlu0 %637  ;;  %9629 = vmatprep.subr.bf16.mxu0 %v11549_v6  ;;  %v9633_v61 = vpack.c.bf16 %v540_v49, %v539_v35  ;;  %vm734_vm14 = vcmp.eq.s32.totalorder %v11905_v60, %v12018_v33  ;;  %v549_v49 = vld [vmem:[%s16031_s2 + $0x1c0] sm:$0xff] }
  0xb1   : > { %16466 = vst [vmem:[#allocation3_spill] sm:$0xff] %v12067_v47  ;;  %1718 = vperm.xlu0 %10162, %v12055_v25  }
  0xb2   : > { %9631 = vmatpush1.bf16.msra.mxu0 %v9630_v48 }
  0xb3   : > { %8121 = vmatmul.mubr.msk.f32.gmra.mrb[14].mxu0 %vm718_vm0, %v16065_v7  ;;  %10151 = vset.pattern.permute.xlu1 %v16048_v2  ;;  %v12083_v50 = vpop.permute.xlu1 %646 }
  0xb4   : > { %16467 = vst [vmem:[#allocation4_spill] sm:$0xff] %v12083_v50  ;;  %v12085_v51 = vpop.permute.xlu0 %643  ;;  %8122 = vmatprep.mubr.msk.f32.mxu0 %vm723_vm15, %v16065_v7  ;;  %1486 = vperm.xlu1 %10151, %v11885_v56  }
  0xb5   : > { %16468 = vst [vmem:[#allocation5_spill] sm:$0xff] %v12085_v51  ;;  %10175 = vset.pattern.permute.xlu0 %v16048_v2  ;;  %vm757_vm2 = vcmp.eq.s32.totalorder %v12094_v53, %v12085_v51  ;;  %vm756_vm3 = vcmp.eq.s32.totalorder %v12097_v55, %v12085_v51  ;;  %9632 = vmatprep.subr.bf16.mxu0 %v11549_v6 }
  0xb6   : > { %1501 = vperm.xlu0 %10175, %v12091_v52   ;;  %9634 = vmatpush1.bf16.msra.mxu0 %v9633_v61  ;;  %v550_v61 = vld [vmem:[%s16031_s2 + $0x1c8] sm:$0xff] }
  0xb7   : > { %8123 = vmatmul.mubr.msk.f32.gmra.mrb[16].mxu0 %vm722_vm1, %v16065_v7  ;;  %v12115_v4 = vpop.permute.xlu1 %652  ;;  %9635 = vmatprep.subr.bf16.mxu0 %v11549_v6  ;;  %vm738_vm1 = vcmp.eq.s32.totalorder %v11905_v60, %v12043_v41 }
  0xb8   : > { %16469 = vst [vmem:[#allocation6_spill] sm:$0xff] %v12115_v4  ;;  %8124 = vmatprep.mubr.msk.f32.mxu0 %vm727_vm4, %v16065_v7  ;;  %v12118_v5 = vpop.permute.xlu0 %649  ;;  %10152 = vset.pattern.permute.xlu1 %v16050_v21 }
  0xb9   : > { %16470 = vst [vmem:[#allocation7_spill] sm:$0xff] %v12118_v5  ;;  %1670 = vperm.xlu1 %10152, %v11885_v56   ;;  %vm765_vm7 = vcmp.eq.s32.totalorder %v12094_v53, %v12118_v5  ;;  %vm764_vm8 = vcmp.eq.s32.totalorder %v12097_v55, %v12118_v5  ;;  %v544_v56 = vld [vmem:[%s16031_s2 + $0x198] sm:$0xff] }
  0xba   : > { %1506 = vperm.xlu0 %10175, %v11891_v57   ;;  %9637 = vmatpush1.bf16.msra.mxu0 %v9636_v8  ;;  %v9639_v18 = vpack.c.bf16 %v544_v56, %v543_v9  ;;  %v9648_v9 = vpack.c.bf16 %v550_v61, %v549_v49  ;;  %v551_v56 = vld [vmem:[%s16031_s2 + $0x1d0] sm:$0xff] }
  0xbb   : > { %8125 = vmatmul.mubr.msk.f32.gmra.mrb[18].mxu0 %vm726_vm6, %v16065_v7  ;;  %v12139_v13 = vpop.permute.xlu1 %658  ;;  %9638 = vmatprep.subr.bf16.mxu0 %v11549_v6  ;;  %vm743_vm6 = vcmp.eq.s32.totalorder %v11910_v62, %v12041_v40  ;;  %v555_v61 = vld [vmem:[%s16031_s2 + $0x1f0] sm:$0xff] }
  0xbc   : > { %16471 = vst [vmem:[#allocation8_spill] sm:$0xff] %v12139_v13  ;;  %v12141_v14 = vpop.permute.xlu0 %655  ;;  %8126 = vmatprep.mubr.msk.f32.mxu0 %vm731_vm5, %v16065_v7 }
  0xbd   : > { %16472 = vst [vmem:[#allocation9_spill] sm:$0xff] %v12141_v14  ;;  %10153 = vset.pattern.permute.xlu1 %v16048_v2  ;;  %vm773_vm10 = vcmp.eq.s32.totalorder %v12094_v53, %v12141_v14  ;;  %vm772_vm11 = vcmp.eq.s32.totalorder %v12097_v55, %v12141_v14 }
  0xbe   : > { %1491 = vperm.xlu1 %10153, %v11947_v12   ;;  %1526 = vperm.xlu0 %10175, %v12148_v15  }
  0xbf   : > { %8127 = vmatmul.mubr.msk.f32.gmra.mrb[20].mxu0 %vm730_vm9, %v16065_v7  ;;  %v12159_v23 = vpop.permute.xlu1 %664  ;;  %vm747_vm9 = vcmp.eq.s32.totalorder %v11910_v62, %v12067_v47 }
  0xc0   : > { %16473 = vst [vmem:[#allocation10_spill] sm:$0xff] %v12159_v23  ;;  %8128 = vmatprep.mubr.msk.f32.mxu0 %vm735_vm12, %v16065_v7  ;;  %v12162_v24 = vpop.permute.xlu0 %661  ;;  %9640 = vmatpush1.bf16.msra.mxu0 %v9639_v18  ;;  %vm742_vm12 = vcmp.eq.s32.totalorder %v11905_v60, %v12041_v40  ;;  %v552_v18 = vld [vmem:[%s16031_s2 + $0x1d8] sm:$0xff] }
  0xc1   : > { %16474 = vst [vmem:[#allocation11_spill] sm:$0xff] %v12162_v24  ;;  %vm781_vm15 = vcmp.eq.s32.totalorder %v12094_v53, %v12162_v24  ;;  %vm780_vm0 = vcmp.eq.s32.totalorder %v12097_v55, %v12162_v24  ;;  %9641 = vmatprep.subr.bf16.mxu0 %v11549_v6  ;;  %v9651_v31 = vpack.c.bf16 %v552_v18, %v551_v56  ;;  %v12306_v18 = vld [vmem:[%s11796_s19 + $0xa8] sm:$0xff] }
  0xc2   : > { %10154 = vset.pattern.permute.xlu1 %v16046_v46  ;;  %1531 = vperm.xlu0 %10175, %v12171_v29  }
  0xc3   : > { %8129 = vmatmul.mubr.msk.f32.gmra.mrb[22].mxu0 %vm734_vm14, %v16065_v7  ;;  %1870 = vperm.xlu1 %10154, %v11947_v12   ;;  %v12186_v36 = vpop.permute.xlu1 %670  ;;  %v548_v12 = vld [vmem:[%s16031_s2 + $0x1b8] sm:$0xff]  ;;  %vm755_vm14 = vcmp.eq.s32.totalorder %v11910_v62, %v12085_v51 }
  0xc4   : > { %16475 = vst [vmem:[#allocation12_spill] sm:$0xff] %v12186_v36  ;;  %v12188_v37 = vpop.permute.xlu0 %667  ;;  %8130 = vmatprep.mubr.msk.f32.mxu0 %vm739_vm13, %v16065_v7  ;;  %9643 = vmatpush1.bf16.msra.mxu0 %v9642_v38  ;;  %v9645_v35 = vpack.c.bf16 %v548_v12, %v547_v42  ;;  %v553_v38 = vld [vmem:[%s16031_s2 + $0x1e0] sm:$0xff]  ;;  %v554_v42 = vld [vmem:[%s16031_s2 + $0x1e8] sm:$0xff] }
  0xc5   : > { %16476 = vst [vmem:[#allocation13_spill] sm:$0xff] %v12188_v37  ;;  %vm789_vm4 = vcmp.eq.s32.totalorder %v12094_v53, %v12188_v37  ;;  %vm788_vm5 = vcmp.eq.s32.totalorder %v12097_v55, %v12188_v37  ;;  %9644 = vmatprep.subr.bf16.mxu0 %v11549_v6  ;;  %v9654_v49 = vpack.c.bf16 %v554_v42, %v553_v38  ;;  %v12312_v38 = vshrl.u32 %v589_v59, 7 }
  0xc6   : > { %1551 = vperm.xlu0 %10175, %v12209_v43  }
  0xc7   : > { %8131 = vmatmul.mubr.msk.f32.gmra.mrb[24].mxu0 %vm738_vm1, %v16065_v7  ;;  %10155 = vset.pattern.permute.xlu1 %v16048_v2  ;;  %v12212_v44 = vpop.permute.xlu1 %676  ;;  %vm746_vm1 = vcmp.eq.s32.totalorder %v11905_v60, %v12067_v47  ;;  %16482 = vst [vmem:[#allocation19_spill] sm:$0xff] %v12312_v38  ;;  %v16052_v59 = vsub.s32 0, %v12312_v38 }
  0xc8   : > { %16477 = vst [vmem:[#allocation14_spill] sm:$0xff] %v12212_v44  ;;  %8132 = vmatprep.mubr.msk.f32.mxu0 %vm743_vm6, %v16065_v7  ;;  %v12215_v48 = vpop.permute.xlu0 %673  ;;  %1496 = vperm.xlu1 %10155, %v11971_v19   ;;  %vm754_vm6 = vcmp.eq.s32.totalorder %v11905_v60, %v12085_v51  ;;  %v16485_v51 = vmov 1.0  }
  0xc9   : > { %16478 = vst [vmem:[#allocation15_spill] sm:$0xff] %v12215_v48  ;;  %vm797_vm13 = vcmp.eq.s32.totalorder %v12094_v53, %v12215_v48  ;;  %9646 = vmatpush1.bf16.msra.mxu0 %v9645_v35 }
  0xca   : > { %1556 = vperm.xlu0 %10175, %v12236_v63   ;;  %9647 = vmatprep.subr.bf16.mxu0 %v11549_v6 }
  0xcb   : > { %8133 = vmatmul.mubr.msk.f32.gmra.mrb[26].mxu0 %vm742_vm12, %v16065_v7  ;;  %v12238_v0 = vpop.permute.xlu1 %682  ;;  %vm751_vm12 = vcmp.eq.s32.totalorder %v11910_v62, %v12064_v45 }
  0xcc   : > { %16479 = vst [vmem:[#allocation16_spill] sm:$0xff] %v12238_v0  ;;  %v12240_v8 = vpop.permute.xlu0 %679  ;;  %8134 = vmatprep.mubr.msk.f32.mxu0 %vm747_vm9, %v16065_v7  ;;  %10156 = vset.pattern.permute.xlu1 %v16046_v46  ;;  %vm794_vm9 = vcmp.eq.s32.totalorder %v11905_v60, %v12215_v48 }
  0xcd   : > { %16480 = vst [vmem:[#allocation17_spill] sm:$0xff] %v12240_v8  ;;  %1874 = vperm.xlu1 %10156, %v11971_v19   ;;  %9649 = vmatpush1.bf16.msra.mxu0 %v9648_v9  ;;  %v556_v9 = vld [vmem:[%s16031_s2 + $0x1f8] sm:$0xff] }
  0xce   : > { %10179 = vset.pattern.permute.xlu0 %v16046_v46  ;;  %9650 = vmatprep.subr.bf16.mxu0 %v11549_v6 }
  0xcf   : > { %8135 = vmatmul.mubr.msk.f32.gmra.mrb[28].mxu0 %vm746_vm1, %v16065_v7  ;;  %v12262_v19 = vpop.permute.xlu1 %688  ;;  %vm750_vm1 = vcmp.eq.s32.totalorder %v11905_v60, %v12064_v45  ;;  %1902 = vperm.xlu0 %10179, %v12171_v29  }
  0xd0   : > { %8136 = vmatprep.mubr.msk.f32.mxu0 %vm751_vm12, %v16065_v7  ;;  %v12265_v30 = vpop.permute.xlu0 %685  ;;  %vm815_vm12 = vcmp.eq.s32.totalorder %v11910_v62, %v12262_v19 }
  0xd1   : > { %16481 = vst [vmem:[#allocation18_spill] sm:$0xff] %v12265_v30  ;;  %10157 = vset.pattern.permute.xlu1 %v16050_v21  ;;  %9652 = vmatpush1.bf16.msra.mxu0 %v9651_v31  ;;  %v9657_v31 = vpack.c.bf16 %v556_v9, %v555_v61  ;;  %v16060_v9 = vsub.s32 2, %v12312_v38 }
  0xd2   : > { %1682 = vperm.xlu1 %10157, %v12091_v52   ;;  %9653 = vmatprep.subr.bf16.mxu0 %v11549_v6 }
  0xd3   : > { %8137 = vmatmul.mubr.msk.f32.gmra.mrb[30].mxu0 %vm750_vm1, %v16065_v7  ;;  %vm763_vm1 = vcmp.eq.s32.totalorder %v11910_v62, %v12118_v5  ;;  %1906 = vperm.xlu0 %10179, %v12306_v18  }
  0xd4   : > { %v1432_v12 = vpop.permute.xlu0 %1431  ;;  %8138 = vmatprep.mubr.msk.f32.mxu0 %vm755_vm14, %v16065_v7  ;;  %v1627_v35 = vpop.permute.xlu1 %1626  ;;  %vm759_vm14 = vcmp.eq.s32.totalorder %v11910_v62, %v12083_v50 }
  0xd5   : > { %9655 = vmatpush1.bf16.msra.mxu0 %v9654_v49  ;;  %v16053_v49 = vsub.s32 1, %v12312_v38 }
  0xd6   : > { %10158 = vset.pattern.permute.xlu1 %v16046_v46  ;;  %9656 = vmatprep.subr.bf16.mxu0 %v11549_v6  ;;  %v1428_v6 = vld [vmem:[%s16032_s3] sm:$0x7] }
  0xd7   : > { %8139 = vmatmul.mubr.msk.f32.gmra.mrb[32].mxu0 %vm754_vm6, %v16065_v7  ;;  %1878 = vperm.xlu1 %10158, %v12091_v52   ;;  %vm758_vm6 = vcmp.eq.s32.totalorder %v11905_v60, %v12083_v50  ;;  %v12346_v54 = vrot.slane %v1428_v6, %v16052_v59  ;;  %v12350_v46 = vrot.slane %v1428_v6, %v16053_v49  ;;  %v12367_v49 = vld [vmem:[%s11796_s19 + $0xd8] sm:$0xff]  ;;  %v16483_v50 = vmov 1  }
  0xd8   : > { %8140 = vmatprep.mubr.msk.f32.mxu0 %vm759_vm14, %v16065_v7  ;;  %v12303_v56 = vpop.permute.xlu0 %1451  ;;  %vm762_vm14 = vcmp.eq.s32.totalorder %v11905_v60, %v12118_v5  ;;  %1922 = vperm.xlu0 %10179, %v12236_v63   ;;  %v12364_v59 = vrot.slane %v1428_v6, %v16060_v9 }
  0xd9   : > { %v1437_v42 = vpop.permute.xlu1 %1436  ;;  %9658 = vmatpush1.bf16.msra.mxu0 %v9657_v31  ;;  %v12342_v31 = vld [vmem:[%s11796_s19 + $0xd0] sm:$0xff]  ;;  %v1593_v5 = vmul.f32 %v12346_v54, %v1432_v12 }
  0xdb   : > { %8141 = vmatmul.mubr.msk.f32.gmra.mrb[34].mxu0 %vm758_vm6, %v16065_v7  ;;  %10159 = vset.pattern.permute.xlu1 %v16050_v21  ;;  %vm771_vm6 = vcmp.eq.s32.totalorder %v11910_v62, %v12141_v14 }
  0xdc   : > { %v12319_v52 = vpop.permute.xlu0 %1456  ;;  %8142 = vmatprep.mubr.msk.f32.mxu0 %vm763_vm1, %v16065_v7  ;;  %1686 = vperm.xlu1 %10159, %v11891_v57   ;;  %vm767_vm1 = vcmp.eq.s32.totalorder %v11910_v62, %v12115_v4 }
  0xdd   : > { %1926 = vperm.xlu0 %10179, %v12342_v31  }
  0xde   : > { %v1631_v61 = vpop.permute.xlu1 %1630 }
  0xdf   : > { %8143 = vmatmul.mubr.msk.f32.gmra.mrb[36].mxu0 %vm762_vm14, %v16065_v7  ;;  %vm766_vm14 = vcmp.eq.s32.totalorder %v11905_v60, %v12115_v4  ;;  %v1757_v4 = vmul.f32 %v12350_v46, %v1627_v35  ;;  %v1758_v9 = vmul.f32 %v12350_v46, %v1631_v61 }
  0xe0   : > { %8144 = vmatprep.mubr.msk.f32.mxu0 %vm767_vm1, %v16065_v7  ;;  %v12335_v57 = vpop.permute.xlu0 %1476  ;;  %10160 = vset.pattern.permute.xlu1 %v16048_v2  ;;  %vm770_vm1 = vcmp.eq.s32.totalorder %v11905_v60, %v12141_v14  ;;  %v12393_v14 = vld [vmem:[%s16033_s4] ss:$0 sm:$0xff] }
  0xe1   : > { %1511 = vperm.xlu1 %10160, %v11897_v58   ;;  %10184 = vset.pattern.permute.xlu0 %v16483_v50  ;;  %v1789_v6 = vadd.f32 %v1757_v4, %v1593_v5  ;;  %v1594_v4 = vmul.f32 %v12346_v54, %v1437_v42  ;;  %v16487_v42 = vmov 2  }
  0xe2   : > { %1734 = vperm.xlu0 %10184, %v12367_v49  }
  0xe3   : > { %8145 = vmatmul.mubr.msk.f32.gmra.mrb[38].mxu0 %vm766_vm14, %v16065_v7  ;;  %v12357_v2 = vpop.permute.xlu1 %1441  ;;  %vm774_vm14 = vcmp.eq.s32.totalorder %v11905_v60, %v12139_v13 }
  0xe4   : > { %v12359_v21 = vpop.permute.xlu0 %1481  ;;  %8146 = vmatprep.mubr.msk.f32.mxu0 %vm771_vm6, %v16065_v7  ;;  %vm775_vm6 = vcmp.eq.s32.totalorder %v11910_v62, %v12139_v13 }
  0xe5   : > { %10161 = vset.pattern.permute.xlu1 %v16483_v50 }
  0xe6   : > { %1690 = vperm.xlu1 %10161, %v11897_v58   ;;  %v12388_v58 = vld [vmem:[%s11796_s19 + $0xe0] sm:$0xff] }
  0xe7   : > { %8147 = vmatmul.mubr.msk.f32.gmra.mrb[40].mxu0 %vm770_vm1, %v16065_v7  ;;  %vm779_vm1 = vcmp.eq.s32.totalorder %v11910_v62, %v12162_v24  ;;  %1738 = vperm.xlu0 %10184, %v12388_v58  }
  0xe8   : > { %8148 = vmatprep.mubr.msk.f32.mxu0 %vm775_vm6, %v16065_v7  ;;  %v12381_v12 = vpop.permute.xlu1 %1830  ;;  %v16484_v7 = vmov 0   ;;  %vm2097_vm6 = vcmask 523264  }
  0xe9   : > { %v1823_v35 = vpop.permute.xlu0 %1822 }
  0xea   : > { %v1953_v38 = vmul.f32 %v12364_v59, %v1823_v35  ;;  %10163 = vset.pattern.permute.xlu1 %v16484_v7  ;;  %v1790_v35 = vadd.f32 %v1758_v9, %v1594_v4  ;;  %v12417_v9 = vld [vmem:[%s11796_s19 + $0xe8] sm:$0xff] }
  0xeb   : > { %8149 = vmatmul.mubr.msk.f32.gmra.mrb[42].mxu0 %vm774_vm14, %v16485_v51  ;;  %1516 = vperm.xlu1 %10163, %v11993_v26   ;;  %vm778_vm14 = vcmp.eq.s32.totalorder %v11905_v60, %v12162_v24 }
  0xec   : > { %v1985_v5 = vadd.f32 %v1953_v38, %v1789_v6  ;;  %8150 = vmatprep.mubr.msk.f32.mxu0 %vm779_vm1, %v16485_v51  ;;  %vm783_vm1 = vcmp.eq.s32.totalorder %v11910_v62, %v12159_v23  ;;  %10188 = vset.pattern.permute.xlu0 %v16484_v7 }
  0xed   : > { %v1827_v61 = vpop.permute.xlu0 %1826  ;;  %v12407_v47 = vpop.permute.xlu1 %1446  ;;  %1576 = vperm.xlu0 %10188, %v12417_v9  }
  0xee   : > { %v12404_v13 = vadd.f32 %v12393_v14, %v1985_v5  ;;  %v1954_v45 = vmul.f32 %v12364_v59, %v1827_v61 }
  0xef   : > { %8151 = vmatmul.mubr.msk.f32.gmra.mrb[44].mxu0 %vm778_vm14, %v16485_v51  ;;  %10164 = vset.pattern.permute.xlu1 %v16487_v42  ;;  %vm782_vm14 = vcmp.eq.s32.totalorder %v11905_v60, %v12159_v23 }
  0xf0   : > { %16486 = vst [vmem:[#allocation20_spill] sm:$0xff] %v12404_v13  ;;  %v1986_v38 = vadd.f32 %v1954_v45, %v1790_v35  ;;  %8152 = vmatprep.mubr.msk.f32.mxu0 %vm783_vm1, %v16485_v51  ;;  %8235 = vmatmul.mubr.msk.f32.vlgmr.msra.gmra.mrb[0].mxu1 %vm2097_vm6, %v12404_v13  ;;  %v16489_v45 = vmov 0.0   ;;  %vm787_vm1 = vcmp.eq.s32.totalorder %v11910_v62, %v12188_v37 }
  0xf1   : > { %1890 = vperm.xlu1 %10164, %v11993_v26   ;;  %v12422_v6 = vpop.permute.xlu0 %1842  ;;  %2264 = vmatprep.mubr.f32.mxu1 %v16489_v45  ;;  %v12439_v26 = vld [vmem:[%s11796_s19 + $0xf0] sm:$0xff] }
  0xf2   : > { %v12425_v4 = vadd.f32 %v12393_v14, %v1986_v38  ;;  %v12431_v5 = vpop.permute.xlu1 %1834  ;;  %1581 = vperm.xlu0 %10188, %v12439_v26   ;;  %v2058_v38 = vld [vmem:[%s16036_s7 + $0x10] sm:$0xff] }
  0xf3   : > { %8153 = vmatmul.mubr.msk.f32.gmra.mrb[46].mxu0 %vm782_vm14, %v16485_v51  ;;  %vm786_vm14 = vcmp.eq.s32.totalorder %v11905_v60, %v12188_v37 }
  0xf4   : > { %16488 = vst [vmem:[#allocation21_spill] sm:$0xff] %v12425_v4  ;;  %8154 = vmatprep.mubr.msk.f32.mxu0 %vm787_vm1, %v16485_v51  ;;  %8236 = vmatmul.mubr.msk.f32.gmra.mrb[2].mxu1 %vm2097_vm6, %v12425_v4  ;;  %vm791_vm1 = vcmp.eq.s32.totalorder %v11910_v62, %v12186_v36  ;;  %v2061_v4 = vld [vmem:[%s16036_s7 + $0x28] sm:$0xff] }
  0xf5   : > { %10165 = vset.pattern.permute.xlu1 %v16484_v7  ;;  %v12444_v61 = vpop.permute.xlu0 %1846  ;;  %2270 = vmatprep.mubr.f32.mxu1 %v16489_v45  ;;  %v9675_v37 = vpack.c.bf16 %v2061_v4, %v2058_v38 }
  0xf6   : > { %1521 = vperm.xlu1 %10165, %v12016_v32   ;;  %10192 = vset.pattern.permute.xlu0 %v16487_v42 }
  0xf7   : > { %8155 = vmatmul.mubr.msk.f32.gmra.mrb[48].mxu0 %vm786_vm14, %v16485_v51  ;;  %v1643_v35 = vpop.permute.xlu1 %1642  ;;  %vm790_vm14 = vcmp.eq.s32.totalorder %v11905_v60, %v12186_v36  ;;  %1942 = vperm.xlu0 %10192, %v12439_v26  }
  0xf8   : > { %8156 = vmatprep.mubr.msk.f32.mxu0 %vm791_vm1, %v16485_v51  ;;  %vm795_vm1 = vcmp.eq.s32.totalorder %v11910_v62, %v12215_v48  ;;  %9676 = vmatprep.subr.bf16.mxu1 %v9675_v37 }
  0xf9   : > { %v12461_v13 = vpop.permute.xlu0 %1862  ;;  %9678 = vmatpush3.bf16.msra.mxu1 %v9675_v37 }
  0xfa   : > { %10166 = vset.pattern.permute.xlu1 %v16487_v42 }
  0xfb   : > { %1894 = vperm.xlu1 %10166, %v12016_v32   ;;  %8157 = vmatmul.mubr.msk.f32.gmra.mrb[50].mxu0 %vm790_vm14, %v16485_v51  ;;  %vm799_vm14 = vcmp.eq.s32.totalorder %v11910_v62, %v12212_v44  ;;  %v12484_v32 = vld [vmem:[%s11796_s19 + $0xf8] sm:$0xff] }
  0xfc   : > { %8158 = vmatprep.mubr.msk.f32.mxu0 %vm795_vm1, %v16485_v51  ;;  %v1839_v23 = vpop.permute.xlu1 %1838  ;;  %16490 = vst [vmem:[#allocation22_spill] sm:$0xff] %v12484_v32  ;;  %1946 = vperm.xlu0 %10192, %v12484_v32   ;;  %vm798_vm1 = vcmp.eq.s32.totalorder %v11905_v60, %v12212_v44 }
  0xfd   : > { %v12472_v24 = vpop.permute.xlu0 %1866 }
  0xff   : > { %10167 = vset.pattern.permute.xlu1 %v16483_v50  ;;  %8159 = vmatmul.mubr.msk.f32.gmra.mrb[52].mxu0 %vm794_vm9, %v16485_v51  ;;  %vm803_vm9 = vcmp.eq.s32.totalorder %v11910_v62, %v12240_v8 }
 0x100   : > { %1702 = vperm.xlu1 %10167, %v12148_v15   ;;  %8160 = vmatprep.mubr.msk.f32.mxu0 %vm799_vm14, %v16485_v51  ;;  %vm802_vm14 = vcmp.eq.s32.totalorder %v11905_v60, %v12240_v8 }
 0x101   : > { %v12486_v4 = vpop.permute.xlu0 %1882  ;;  %v1647_v38 = vpop.permute.xlu1 %1646 }
 0x103   : > { %8161 = vmatmul.mubr.msk.f32.gmra.mrb[54].mxu0 %vm798_vm1, %v16485_v51  ;;  %vm807_vm1 = vcmp.eq.s32.totalorder %v11910_v62, %v12238_v0 }
 0x104   : > { %10168 = vset.pattern.permute.xlu1 %v16487_v42  ;;  %8162 = vmatprep.mubr.msk.f32.mxu0 %vm803_vm9, %v16485_v51  ;;  %vm806_vm9 = vcmp.eq.s32.totalorder %v11905_v60, %v12238_v0 }
 0x105   : > { %1898 = vperm.xlu1 %10168, %v12148_v15   ;;  %v12497_v37 = vpop.permute.xlu0 %1886  ;;  %v1595_v15 = vmul.f32 %v12346_v54, %v12357_v2  ;;  %v1596_v2 = vmul.f32 %v12346_v54, %v12407_v47  ;;  %v1597_v47 = vmul.f32 %v12346_v54, %v12303_v56 }
 0x106   : > { %16491 = vst [vmem:[#allocation23_spill] sm:$0xff] %v12497_v37  ;;  %v1462_v48 = vpop.permute.xlu1 %1461 }
 0x107   : > { %8163 = vmatmul.mubr.msk.f32.gmra.mrb[56].mxu0 %vm802_vm14, %v16485_v51  ;;  %vm811_vm14 = vcmp.eq.s32.totalorder %v11910_v62, %v12265_v30 }
 0x108   : > { %8164 = vmatprep.mubr.msk.f32.mxu0 %vm807_vm1, %v16485_v51  ;;  %vm810_vm1 = vcmp.eq.s32.totalorder %v11905_v60, %v12265_v30 }
 0x109   : > { %10169 = vset.pattern.permute.xlu1 %v16483_v50 }
 0x10a   : > { %1706 = vperm.xlu1 %10169, %v12171_v29   ;;  %v1635_v44 = vpop.permute.xlu0 %1634  ;;  %v1955_v29 = vmul.f32 %v12364_v59, %v12381_v12  ;;  %v1956_v12 = vmul.f32 %v12364_v59, %v12431_v5  ;;  %v1598_v5 = vmul.f32 %v12346_v54, %v12319_v52 }
 0x10b   : > { %v1759_v8 = vmul.f32 %v12350_v46, %v1635_v44  ;;  %8165 = vmatmul.mubr.msk.f32.gmra.mrb[58].mxu0 %vm806_vm9, %v16485_v51  ;;  %v1651_v36 = vpop.permute.xlu1 %1650  ;;  %vm814_vm9 = vcmp.eq.s32.totalorder %v11905_v60, %v12262_v19  ;;  %v1958_v60 = vmul.f32 %v12364_v59, %v12422_v6 }
 0x10c   : > { %8166 = vmatprep.mubr.msk.f32.mxu0 %vm811_vm14, %v16485_v51  ;;  %vm692_vm14 = vcmp.eq.s32.totalorder %v12097_v55, %v11920_v3 }
 0x10d   : > { %v1791_v32 = vadd.f32 %v1759_v8, %v1595_v15  ;;  %v1761_v8 = vmul.f32 %v12350_v46, %v1643_v35 }
 0x10e   : > { %10170 = vset.pattern.permute.xlu1 %v16484_v7  ;;  %v1639_v0 = vpop.permute.xlu0 %1638 }
 0x10f   : > { %v1987_v44 = vadd.f32 %v1955_v29, %v1791_v32  ;;  %v1760_v37 = vmul.f32 %v12350_v46, %v1639_v0  ;;  %1536 = vperm.xlu1 %10170, %v12306_v18   ;;  %8167 = vmatmul.mubr.msk.f32.gmra.mrb[60].mxu0 %vm810_vm1, %v16485_v51  ;;  %v1957_v0 = vmul.f32 %v12364_v59, %v1839_v23 }
 0x110   : > { %8168 = vmatprep.mubr.msk.f32.mxu0 %vm815_vm12, %v16485_v51  ;;  %v1467_v30 = vpop.permute.xlu1 %1466  ;;  %v1762_v32 = vmul.f32 %v12350_v46, %v1647_v38  ;;  %vm693_vm12 = vcmp.eq.s32.totalorder %v12094_v53, %v11920_v3  ;;  %v1599_v29 = vmul.f32 %v12346_v54, %v1462_v48  ;;  %vm697_vm1 = vcmp.eq.s32.totalorder %v12094_v53, %v11938_v11 }
 0x111   : > { %v12533_v15 = vadd.f32 %v12393_v14, %v1987_v44  ;;  %v1792_v62 = vadd.f32 %v1760_v37, %v1596_v2  ;;  %v1793_v37 = vadd.f32 %v1761_v8, %v1597_v47  ;;  %v1600_v8 = vmul.f32 %v12346_v54, %v1467_v30 }
 0x112   : > { %v1794_v52 = vadd.f32 %v1762_v32, %v1598_v5  ;;  %v1655_v3 = vpop.permute.xlu0 %1654 }
 0x113   : > { %16492 = vst [vmem:[#allocation24_spill] sm:$0xff] %v12533_v15  ;;  %v1988_v35 = vadd.f32 %v1956_v12, %v1792_v62  ;;  %10171 = vset.pattern.permute.xlu1 %v16483_v50  ;;  %8169 = vmatmul.mubr.msk.f32.gmra.mrb[62].mxu0 %vm814_vm9, %v16485_v51  ;;  %v1989_v56 = vadd.f32 %v1957_v0, %v1793_v37 }
 0x114   : > { %8237 = vmatmul.mubr.msk.f32.gmra.mrb[4].mxu1 %vm2097_vm6, %v12533_v15  ;;  %1710 = vperm.xlu1 %10171, %v12306_v18   ;;  %v1763_v18 = vmul.f32 %v12350_v46, %v1651_v36  ;;  %vm696_vm9 = vcmp.eq.s32.totalorder %v12097_v55, %v11938_v11  ;;  %v1959_v36 = vmul.f32 %v12364_v59, %v12444_v61  ;;  %v2064_v11 = vld [vmem:[%s16036_s7 + $0x40] sm:$0xff]  ;;  %v2067_v61 = vld [vmem:[%s16036_s7 + $0x58] sm:$0xff] }
 0x115   : > { %v12551_v23 = vadd.f32 %v12393_v14, %v1988_v35  ;;  %8170 = vmatprep.mubr.msk.f32.mxu0 %vm693_vm12, %v16485_v51  ;;  %2276 = vmatprep.mubr.f32.mxu1 %v16489_v45  ;;  %v1851_v38 = vpop.permute.xlu1 %1850  ;;  %v12574_v48 = vadd.f32 %v12393_v14, %v1989_v56  ;;  %v1990_v6 = vadd.f32 %v1958_v60, %v1794_v52 }
 0x116   : > { %v1795_v2 = vadd.f32 %v1763_v18, %v1599_v29  ;;  %vm701_vm12 = vcmp.eq.s32.totalorder %v12094_v53, %v11918_v1  ;;  %v1764_v12 = vmul.f32 %v12350_v46, %v1655_v3  ;;  %v9679_v62 = vpack.c.bf16 %v2067_v61, %v2064_v11  ;;  %v1659_v47 = vpop.permute.xlu0 %1658 }
 0x117   : > { %16493 = vst [vmem:[#allocation25_spill] sm:$0xff] %v12551_v23  ;;  %8171 = vmatmul.mubr.msk.f32.vlgmr.msra.gmra.mrb[0].mxu0 %vm692_vm14, %v16485_v51  ;;  %16494 = vst [vmem:[#allocation26_spill] sm:$0xff] %v12574_v48  ;;  %vm700_vm14 = vcmp.eq.s32.totalorder %v12097_v55, %v11918_v1  ;;  %v12596_v0 = vadd.f32 %v12393_v14, %v1990_v6  ;;  %v1960_v32 = vmul.f32 %v12364_v59, %v1851_v38 }
 0x118   : > { %8238 = vmatmul.mubr.msk.f32.gmra.mrb[6].mxu1 %vm2097_vm6, %v12551_v23  ;;  %10172 = vset.pattern.permute.xlu1 %v16484_v7  ;;  %v1991_v30 = vadd.f32 %v1959_v36, %v1795_v2  ;;  %v1796_v35 = vadd.f32 %v1764_v12, %v1600_v8  ;;  %v1765_v1 = vmul.f32 %v12350_v46, %v1659_v47 }
 0x119   : > { %8172 = vmatprep.mubr.msk.f32.mxu0 %vm697_vm1, %v16485_v51  ;;  %1541 = vperm.xlu1 %10172, %v12039_v39   ;;  %16495 = vst [vmem:[#allocation27_spill] sm:$0xff] %v12596_v0  ;;  %vm705_vm1 = vcmp.eq.s32.totalorder %v12094_v53, %v11936_v10  ;;  %v1602_v3 = vmul.f32 %v12346_v54, %v12335_v57 }
 0x11a   : > { %2282 = vmatprep.mubr.f32.mxu1 %v16489_v45  ;;  %v1472_v44 = vpop.permute.xlu1 %1471  ;;  %9680 = vmatprep.subr.bf16.mxu1 %v9679_v62  ;;  %v1992_v60 = vadd.f32 %v1960_v32, %v1796_v35  ;;  %v1603_v11 = vmul.f32 %v12346_v54, %v12359_v21  ;;  %v1963_v61 = vmul.f32 %v12364_v59, %v12461_v13 }
 0x11b   : > { %8173 = vmatmul.mubr.msk.f32.gmra.mrb[2].mxu0 %vm696_vm9, %v16485_v51  ;;  %9682 = vmatpush3.bf16.msra.mxu1 %v9679_v62  ;;  %v1601_v5 = vmul.f32 %v12346_v54, %v1472_v44  ;;  %vm704_vm9 = vcmp.eq.s32.totalorder %v12097_v55, %v11936_v10  ;;  %v1675_v2 = vpop.permute.xlu0 %1674 }
 0x11c   : > { %8239 = vmatmul.mubr.msk.f32.gmra.mrb[8].mxu1 %vm2097_vm6, %v12574_v48  ;;  %8174 = vmatprep.mubr.msk.f32.mxu0 %vm701_vm12, %v16485_v51  ;;  %vm709_vm12 = vcmp.eq.s32.totalorder %v12094_v53, %v11962_v17  ;;  %v12625_v38 = vadd.f32 %v12393_v14, %v1992_v60  ;;  %v1769_v60 = vmul.f32 %v12350_v46, %v1675_v2 }
 0x11d   : > { %10173 = vset.pattern.permute.xlu1 %v16487_v42  ;;  %2288 = vmatprep.mubr.f32.mxu1 %v16489_v45  ;;  %v1797_v52 = vadd.f32 %v1765_v1, %v1601_v5 }
 0x11e   : > { %1910 = vperm.xlu1 %10173, %v12039_v39   ;;  %v12610_v39 = vadd.f32 %v12393_v14, %v1991_v30  ;;  %16497 = vst [vmem:[#allocation29_spill] sm:$0xff] %v12625_v38 }
 0x11f   : > { %8175 = vmatmul.mubr.msk.f32.gmra.mrb[4].mxu0 %vm700_vm14, %v16485_v51  ;;  %v1855_v37 = vpop.permute.xlu1 %1854  ;;  %vm708_vm14 = vcmp.eq.s32.totalorder %v12097_v55, %v11962_v17 }
 0x120   : > { %8240 = vmatmul.mubr.msk.f32.gmra.mrb[10].mxu1 %vm2097_vm6, %v12596_v0  ;;  %8176 = vmatprep.mubr.msk.f32.mxu0 %vm705_vm1, %v16485_v51  ;;  %16496 = vst [vmem:[#allocation28_spill] sm:$0xff] %v12610_v39  ;;  %v1961_v56 = vmul.f32 %v12364_v59, %v1855_v37  ;;  %vm713_vm1 = vcmp.eq.s32.totalorder %v12094_v53, %v11959_v16  ;;  %v1679_v21 = vpop.permute.xlu0 %1678 }
 0x121   : > { %2294 = vmatprep.mubr.f32.mxu1 %v16489_v45 }
 0x122   : > { %10174 = vset.pattern.permute.xlu1 %v16484_v7  ;;  %v1993_v10 = vadd.f32 %v1961_v56, %v1797_v52 }
 0x123   : > { %1546 = vperm.xlu1 %10174, %v12055_v25   ;;  %8177 = vmatmul.mubr.msk.f32.gmra.mrb[6].mxu0 %vm704_vm9, %v16485_v51  ;;  %vm712_vm9 = vcmp.eq.s32.totalorder %v12097_v55, %v11959_v16 }
 0x124   : > { %8241 = vmatmul.mubr.msk.f32.gmra.mrb[12].mxu1 %vm2097_vm6, %v12610_v39  ;;  %8178 = vmatprep.mubr.msk.f32.mxu0 %vm709_vm12, %v16485_v51  ;;  %v1663_v18 = vpop.permute.xlu1 %1662  ;;  %v12642_v17 = vadd.f32 %v12393_v14, %v1993_v10  ;;  %vm717_vm12 = vcmp.eq.s32.totalorder %v12094_v53, %v11978_v22 }
 0x125   : > { %2300 = vmatprep.mubr.f32.mxu1 %v16489_v45  ;;  %v1766_v29 = vmul.f32 %v12350_v46, %v1663_v18 }
 0x126   : > { %16498 = vst [vmem:[#allocation30_spill] sm:$0xff] %v12642_v17 }
 0x127   : > { %10176 = vset.pattern.permute.xlu1 %v16487_v42  ;;  %8179 = vmatmul.mubr.msk.f32.gmra.mrb[8].mxu0 %vm708_vm14, %v16485_v51  ;;  %v1798_v6 = vadd.f32 %v1766_v29, %v1602_v3  ;;  %vm716_vm14 = vcmp.eq.s32.totalorder %v12097_v55, %v11978_v22  ;;  %v1770_v3 = vmul.f32 %v12350_v46, %v1679_v21 }
 0x128   : > { %8242 = vmatmul.mubr.msk.f32.gmra.mrb[14].mxu1 %vm2097_vm6, %v12625_v38  ;;  %1914 = vperm.xlu1 %10176, %v12055_v25  }
 0x129   : > { %8180 = vmatprep.mubr.msk.f32.mxu0 %vm713_vm1, %v16485_v51  ;;  %2306 = vmatprep.mubr.f32.mxu1 %v16489_v45  ;;  %v1859_v36 = vpop.permute.xlu1 %1858  ;;  %vm721_vm1 = vcmp.eq.s32.totalorder %v12094_v53, %v11975_v20 }
 0x12a   : > { %v1962_v25 = vmul.f32 %v12364_v59, %v1859_v36 }
 0x12b   : > { %8181 = vmatmul.mubr.msk.f32.gmra.mrb[10].mxu0 %vm712_vm9, %v16485_v51  ;;  %vm720_vm9 = vcmp.eq.s32.totalorder %v12097_v55, %v11975_v20 }
 0x12c   : > { %8243 = vmatmul.mubr.msk.f32.gmra.mrb[16].mxu1 %vm2097_vm6, %v12642_v17  ;;  %10177 = vset.pattern.permute.xlu1 %v16483_v50  ;;  %v1994_v57 = vadd.f32 %v1962_v25, %v1798_v6 }
 0x12d   : > { %8182 = vmatprep.mubr.msk.f32.mxu0 %vm717_vm12, %v16485_v51  ;;  %1722 = vperm.xlu1 %10177, %v12209_v43   ;;  %vm725_vm12 = vcmp.eq.s32.totalorder %v12094_v53, %v11998_v28 }
 0x12e   : > { %2312 = vmatprep.mubr.f32.mxu1 %v16489_v45  ;;  %v12659_v16 = vadd.f32 %v12393_v14, %v1994_v57  ;;  %v1667_v44 = vpop.permute.xlu1 %1666 }
 0x12f   : > { %8183 = vmatmul.mubr.msk.f32.gmra.mrb[12].mxu0 %vm716_vm14, %v16485_v51  ;;  %v1767_v8 = vmul.f32 %v12350_v46, %v1667_v44  ;;  %vm724_vm14 = vcmp.eq.s32.totalorder %v12097_v55, %v11998_v28  ;;  %v1964_v28 = vmul.f32 %v12364_v59, %v12472_v24  ;;  %v2070_v24 = vld [vmem:[%s16036_s7 + $0x70] sm:$0xff] }
 0x130   : > { %16499 = vst [vmem:[#allocation31_spill] sm:$0xff] %v12659_v16  ;;  %8184 = vmatprep.mubr.msk.f32.mxu0 %vm721_vm1, %v16485_v51  ;;  %8244 = vmatmul.mubr.msk.f32.gmra.mrb[18].mxu1 %vm2097_vm6, %v12659_v16  ;;  %vm729_vm1 = vcmp.eq.s32.totalorder %v12094_v53, %v11996_v27 }
 0x131   : > { %10178 = vset.pattern.permute.xlu1 %v16487_v42  ;;  %v1799_v22 = vadd.f32 %v1767_v8, %v1603_v11  ;;  %2318 = vmatprep.mubr.f32.mxu1 %v16489_v45 }
 0x132   : > { %1918 = vperm.xlu1 %10178, %v12209_v43   ;;  %v12695_v43 = vpop.permute.xlu0 %1694 }
 0x133   : > { %8185 = vmatmul.mubr.msk.f32.gmra.mrb[14].mxu0 %vm720_vm9, %v16485_v51  ;;  %v1995_v13 = vadd.f32 %v1963_v61, %v1799_v22  ;;  %v1487_v12 = vpop.permute.xlu1 %1486  ;;  %vm728_vm9 = vcmp.eq.s32.totalorder %v12097_v55, %v11996_v27  ;;  %v2073_v27 = vld [vmem:[%s16036_s7 + $0x88] sm:$0xff] }
 0x134   : > { %8186 = vmatprep.mubr.msk.f32.mxu0 %vm725_vm12, %v16485_v51  ;;  %vm733_vm12 = vcmp.eq.s32.totalorder %v12094_v53, %v12021_v34  ;;  %v9683_v5 = vpack.c.bf16 %v2073_v27, %v2070_v24 }
 0x135   : > { %v12682_v62 = vadd.f32 %v12393_v14, %v1995_v13 }
 0x136   : > { %10180 = vset.pattern.permute.xlu1 %v16483_v50  ;;  %v12720_v1 = vpop.permute.xlu0 %1698  ;;  %9684 = vmatprep.subr.bf16.mxu1 %v9683_v5 }
 0x137   : > { %16500 = vst [vmem:[#allocation32_spill] sm:$0xff] %v12682_v62  ;;  %1726 = vperm.xlu1 %10180, %v12236_v63   ;;  %8187 = vmatmul.mubr.msk.f32.gmra.mrb[16].mxu0 %vm724_vm14, %v16485_v51  ;;  %v1604_v63 = vmul.f32 %v12346_v54, %v1487_v12  ;;  %vm732_vm14 = vcmp.eq.s32.totalorder %v12097_v55, %v12021_v34  ;;  %v16507_v12 = vld [vmem:[#allocation4_spill] sm:$0xff] }
 0x138   : > { %8188 = vmatprep.mubr.msk.f32.mxu0 %vm729_vm1, %v16485_v51  ;;  %8245 = vmatmul.mubr.msk.f32.gmra.mrb[20].mxu1 %vm2097_vm6, %v12682_v62  ;;  %v1671_v20 = vpop.permute.xlu1 %1670  ;;  %vm737_vm1 = vcmp.eq.s32.totalorder %v12094_v53, %v12018_v33 }
 0x139   : > { %2324 = vmatprep.mubr.f32.mxu1 %v16489_v45  ;;  %v1768_v47 = vmul.f32 %v12350_v46, %v1671_v20  ;;  %9686 = vmatpush3.bf16.msra.mxu1 %v9683_v5 }
 0x13b   : > { %10181 = vset.pattern.permute.xlu1 %v16484_v7  ;;  %8189 = vmatmul.mubr.msk.f32.gmra.mrb[18].mxu0 %vm728_vm9, %v16485_v51  ;;  %v1800_v30 = vadd.f32 %v1768_v47, %v1604_v63  ;;  %vm736_vm9 = vcmp.eq.s32.totalorder %v12097_v55, %v12018_v33  ;;  %v2076_v47 = vld [vmem:[%s16036_s7 + $0xa0] sm:$0xff] }
 0x13c   : > { %1561 = vperm.xlu1 %10181, %v12342_v31   ;;  %8190 = vmatprep.mubr.msk.f32.mxu0 %vm733_vm12, %v16485_v51  ;;  %vm741_vm12 = vcmp.eq.s32.totalorder %v12094_v53, %v12043_v41 }
 0x13d   : > { %v1996_v32 = vadd.f32 %v1964_v28, %v1800_v30  ;;  %v1492_v35 = vpop.permute.xlu1 %1491  ;;  %v2079_v30 = vld [vmem:[%s16036_s7 + $0xb8] sm:$0xff] }
 0x13e   : > { %v1605_v56 = vmul.f32 %v12346_v54, %v1492_v35  ;;  %v9687_v27 = vpack.c.bf16 %v2079_v30, %v2076_v47  ;;  %v16521_v30 = vld [vmem:[#allocation12_spill] sm:$0xff] }
 0x13f   : > { %8191 = vmatmul.mubr.msk.f32.gmra.mrb[20].mxu0 %vm732_vm14, %v16485_v51  ;;  %v12723_v37 = vadd.f32 %v12393_v14, %v1996_v32  ;;  %vm740_vm14 = vcmp.eq.s32.totalorder %v12097_v55, %v12043_v41  ;;  %v16503_v41 = vld [vmem:[#allocation3_spill] sm:$0xff] }
 0x140   : > { %10182 = vset.pattern.permute.xlu1 %v16483_v50  ;;  %8192 = vmatprep.mubr.msk.f32.mxu0 %vm737_vm1, %v16485_v51  ;;  %v1801_v52 = vadd.f32 %v1769_v60, %v1605_v56  ;;  %vm745_vm1 = vcmp.eq.s32.totalorder %v12094_v53, %v12041_v40  ;;  %v1968_v56 = vmul.f32 %v12364_v59, %v12486_v4  ;;  %v16526_v4 = vld [vmem:[#allocation14_spill] sm:$0xff] }
 0x141   : > { %16501 = vst [vmem:[#allocation33_spill] sm:$0xff] %v12723_v37  ;;  %1730 = vperm.xlu1 %10182, %v12342_v31   ;;  %8246 = vmatmul.mubr.msk.f32.gmra.mrb[22].mxu1 %vm2097_vm6, %v12723_v37  ;;  %v12741_v31 = vpop.permute.xlu0 %1714 }
 0x142   : > { %v1871_v34 = vpop.permute.xlu1 %1870  ;;  %2330 = vmatprep.mubr.f32.mxu1 %v16489_v45  ;;  %9688 = vmatprep.subr.bf16.mxu1 %v9687_v27 }
 0x143   : > { %8193 = vmatmul.mubr.msk.f32.gmra.mrb[22].mxu0 %vm736_vm9, %v16485_v51  ;;  %v1965_v18 = vmul.f32 %v12364_v59, %v1871_v34  ;;  %vm744_vm9 = vcmp.eq.s32.totalorder %v12097_v55, %v12041_v40  ;;  %v16504_v40 = vld [vmem:[#allocation2_spill] sm:$0xff]  ;;  %9690 = vmatpush3.bf16.msra.mxu1 %v9687_v27 }
 0x144   : > { %8194 = vmatprep.mubr.msk.f32.mxu0 %vm741_vm12, %v16485_v51  ;;  %vm749_vm12 = vcmp.eq.s32.totalorder %v12094_v53, %v16503_v41 }
 0x145   : > { %10183 = vset.pattern.permute.xlu1 %v16484_v7  ;;  %v1997_v10 = vadd.f32 %v1965_v18, %v1801_v52  ;;  %v12764_v6 = vpop.permute.xlu0 %1718  ;;  %v16510_v52 = vld [vmem:[#allocation6_spill] sm:$0xff] }
 0x146   : > { %1566 = vperm.xlu1 %10183, %v12367_v49  }
 0x147   : > { %8195 = vmatmul.mubr.msk.f32.gmra.mrb[24].mxu0 %vm740_vm14, %v16485_v51  ;;  %v12750_v33 = vadd.f32 %v12393_v14, %v1997_v10  ;;  %v1497_v29 = vpop.permute.xlu1 %1496  ;;  %vm748_vm14 = vcmp.eq.s32.totalorder %v12097_v55, %v16503_v41 }
 0x148   : > { %8196 = vmatprep.mubr.msk.f32.mxu0 %vm745_vm1, %v16485_v51  ;;  %v1606_v36 = vmul.f32 %v12346_v54, %v1497_v29  ;;  %vm753_vm1 = vcmp.eq.s32.totalorder %v12094_v53, %v16504_v40 }
 0x149   : > { %16502 = vst [vmem:[#allocation34_spill] sm:$0xff] %v12750_v33  ;;  %8247 = vmatmul.mubr.msk.f32.gmra.mrb[24].mxu1 %vm2097_vm6, %v12750_v33  ;;  %v1502_v44 = vpop.permute.xlu0 %1501 }
 0x14a   : > { %10185 = vset.pattern.permute.xlu1 %v16487_v42  ;;  %2336 = vmatprep.mubr.f32.mxu1 %v16489_v45  ;;  %v1802_v57 = vadd.f32 %v1770_v3, %v1606_v36  ;;  %v1607_v22 = vmul.f32 %v12346_v54, %v1502_v44  ;;  %v16514_v36 = vld [vmem:[#allocation23_spill] sm:$0xff] }
 0x14b   : > { %1930 = vperm.xlu1 %10185, %v12367_v49   ;;  %8197 = vmatmul.mubr.msk.f32.gmra.mrb[26].mxu0 %vm744_vm9, %v16485_v51  ;;  %vm752_vm9 = vcmp.eq.s32.totalorder %v12097_v55, %v16504_v40  ;;  %v1969_v41 = vmul.f32 %v12364_v59, %v16514_v36  ;;  %v16527_v36 = vld [vmem:[#allocation17_spill] sm:$0xff] }
 0x14c   : > { %8198 = vmatprep.mubr.msk.f32.mxu0 %vm749_vm12, %v16485_v51  ;;  %v1875_v25 = vpop.permute.xlu1 %1874  ;;  %vm761_vm12 = vcmp.eq.s32.totalorder %v12094_v53, %v16507_v12 }
 0x14d   : > { %v1966_v2 = vmul.f32 %v12364_v59, %v1875_v25  ;;  %v1507_v63 = vpop.permute.xlu0 %1506 }
 0x14e   : > { %v1608_v24 = vmul.f32 %v12346_v54, %v1507_v63 }
 0x14f   : > { %10186 = vset.pattern.permute.xlu1 %v16484_v7  ;;  %8199 = vmatmul.mubr.msk.f32.gmra.mrb[28].mxu0 %vm748_vm14, %v16485_v51  ;;  %v1998_v49 = vadd.f32 %v1966_v2, %v1802_v57  ;;  %v16515_v57 = vld [vmem:[#allocation22_spill] sm:$0xff]  ;;  %vm801_vm14 = vcmp.eq.s32.totalorder %v12094_v53, %v16526_v4 }
 0x150   : > { %1571 = vperm.xlu1 %10186, %v12388_v58   ;;  %8200 = vmatprep.mubr.msk.f32.mxu0 %vm753_vm1, %v16485_v51  ;;  %vm16528_vm1 = vcmp.eq.s32.totalorder %v12094_v53, %v16527_v36 }
 0x151   : > { %v12778_v11 = vadd.f32 %v12393_v14, %v1998_v49  ;;  %v1683_v61 = vpop.permute.xlu1 %1682 }
 0x152   : > { %v1771_v8 = vmul.f32 %v12350_v46, %v1683_v61 }
 0x153   : > { %16505 = vst [vmem:[#allocation3_spill] sm:$0xff] %v12778_v11  ;;  %8201 = vmatmul.mubr.msk.f32.gmra.mrb[30].mxu0 %vm752_vm9, %v16485_v51  ;;  %8248 = vmatmul.mubr.msk.f32.gmra.mrb[26].mxu1 %vm2097_vm6, %v12778_v11  ;;  %vm16529_vm9 = vcmp.eq.s32.totalorder %v12097_v55, %v16527_v36 }
 0x154   : > { %10187 = vset.pattern.permute.xlu1 %v16487_v42  ;;  %8202 = vmatprep.mubr.msk.f32.mxu0 %vm757_vm2, %v16485_v51  ;;  %v1803_v20 = vadd.f32 %v1771_v8, %v1607_v22  ;;  %vm760_vm2 = vcmp.eq.s32.totalorder %v12097_v55, %v16507_v12  ;;  %v16518_v8 = vld [vmem:[#allocation10_spill] sm:$0xff] }
 0x155   : > { %1934 = vperm.xlu1 %10187, %v12388_v58   ;;  %2342 = vmatprep.mubr.f32.mxu1 %v16489_v45 }
 0x156   : > { %v1879_v13 = vpop.permute.xlu1 %1878 }
 0x157   : > { %8203 = vmatmul.mubr.msk.f32.gmra.mrb[32].mxu0 %vm756_vm3, %v16485_v51  ;;  %v1967_v28 = vmul.f32 %v12364_v59, %v1879_v13  ;;  %vm769_vm3 = vcmp.eq.s32.totalorder %v12094_v53, %v16510_v52 }
 0x158   : > { %8204 = vmatprep.mubr.msk.f32.mxu0 %vm761_vm12, %v16485_v51 }
 0x159   : > { %10189 = vset.pattern.permute.xlu1 %v16483_v50  ;;  %v1999_v58 = vadd.f32 %v1967_v28, %v1803_v20 }
 0x15a   : > { %1742 = vperm.xlu1 %10189, %v12417_v9  }
 0x15b   : > { %8205 = vmatmul.mubr.msk.f32.gmra.mrb[34].mxu0 %vm760_vm2, %v16485_v51  ;;  %v12815_v32 = vadd.f32 %v12393_v14, %v1999_v58  ;;  %v1687_v35 = vpop.permute.xlu1 %1686  ;;  %v1775_v58 = vmul.f32 %v12350_v46, %v12720_v1  ;;  %v2677_v1 = vld [vmem:[%s16034_s5 + $0x8] sm:$0xff] }
 0x15c   : > { %8206 = vmatprep.mubr.msk.f32.mxu0 %vm765_vm7, %v16485_v51  ;;  %v1772_v60 = vmul.f32 %v12350_v46, %v1687_v35  ;;  %vm768_vm7 = vcmp.eq.s32.totalorder %v12097_v55, %v16510_v52 }
 0x15d   : > { %16508 = vst [vmem:[#allocation2_spill] sm:$0xff] %v12815_v32  ;;  %8249 = vmatmul.mubr.msk.f32.gmra.mrb[28].mxu1 %vm2097_vm6, %v12815_v32 }
 0x15e   : > { %10190 = vset.pattern.permute.xlu1 %v16487_v42  ;;  %v1804_v34 = vadd.f32 %v1772_v60, %v1608_v24  ;;  %2348 = vmatprep.mubr.f32.mxu1 %v16489_v45  ;;  %v2679_v24 = vld [vmem:[%s16034_s5 + $0x18] sm:$0xff] }
 0x15f   : > { %1938 = vperm.xlu1 %10190, %v12417_v9   ;;  %8207 = vmatmul.mubr.msk.f32.gmra.mrb[36].mxu0 %vm764_vm8, %v16485_v51  ;;  %v12921_v35 = vpack.c.bf16 %v2679_v24, %v2677_v1 }
 0x160   : > { %8208 = vmatprep.mubr.msk.f32.mxu0 %vm769_vm3, %v16485_v51  ;;  %v2000_v42 = vadd.f32 %v1968_v56, %v1804_v34  ;;  %v1512_v18 = vpop.permute.xlu1 %1511  ;;  %v16523_v34 = vld [vmem:[#allocation15_spill] sm:$0xff] }
 0x161   : > { %v1609_v29 = vmul.f32 %v12346_v54, %v1512_v18  ;;  %16522 = vst [vmem:[#allocation6_spill] sm:$0xff] %v12921_v35  ;;  %9692 = vmatprep.subr.bf16.mxu1 %v12921_v35 }
 0x162   : > { %v12839_v9 = vadd.f32 %v12393_v14, %v2000_v42 }
 0x163   : > { %10191 = vset.pattern.permute.xlu1 %v16483_v50  ;;  %8209 = vmatmul.mubr.msk.f32.gmra.mrb[38].mxu0 %vm768_vm7, %v16485_v51 }
 0x164   : > { %16511 = vst [vmem:[#allocation5_spill] sm:$0xff] %v12839_v9  ;;  %1746 = vperm.xlu1 %10191, %v12439_v26   ;;  %8210 = vmatprep.mubr.msk.f32.mxu0 %vm773_vm10, %v16485_v51  ;;  %v16513_v26 = vld [vmem:[#allocation8_spill] sm:$0xff] }
 0x165   : > { %8250 = vmatmul.mubr.msk.f32.gmra.mrb[30].mxu1 %vm2097_vm6, %v12839_v9  ;;  %v1691_v10 = vpop.permute.xlu1 %1690  ;;  %vm777_vm8 = vcmp.eq.s32.totalorder %v12094_v53, %v16513_v26  ;;  %vm776_vm10 = vcmp.eq.s32.totalorder %v12097_v55, %v16513_v26 }
 0x166   : > { %2354 = vmatprep.mubr.f32.mxu1 %v16489_v45  ;;  %v1773_v3 = vmul.f32 %v12350_v46, %v1691_v10 }
 0x167   : > { %8211 = vmatmul.mubr.msk.f32.gmra.mrb[40].mxu0 %vm772_vm11, %v16485_v51  ;;  %vm785_vm11 = vcmp.eq.s32.totalorder %v12094_v53, %v16518_v8 }
 0x168   : > { %10193 = vset.pattern.permute.xlu1 %v16484_v7  ;;  %8212 = vmatprep.mubr.msk.f32.mxu0 %vm777_vm8, %v16485_v51  ;;  %v1805_v25 = vadd.f32 %v1773_v3, %v1609_v29  ;;  %v1774_v7 = vmul.f32 %v12350_v46, %v12695_v43  ;;  %v1527_v43 = vpop.permute.xlu0 %1526  ;;  %vm817_vm8 = vcmp.eq.s32.totalorder %v12094_v53, %v12262_v19 }
 0x169   : > { %1586 = vperm.xlu1 %10193, %v16515_v57   ;;  %v1612_v10 = vmul.f32 %v12346_v54, %v1527_v43 }
 0x16a   : > { %v2001_v2 = vadd.f32 %v1969_v41, %v1805_v25  ;;  %v1517_v40 = vpop.permute.xlu1 %1516 }
 0x16b   : > { %8213 = vmatmul.mubr.msk.f32.gmra.mrb[42].mxu0 %vm776_vm10, %v16485_v51  ;;  %v1610_v61 = vmul.f32 %v12346_v54, %v1517_v40  ;;  %vm816_vm10 = vcmp.eq.s32.totalorder %v12097_v55, %v12262_v19 }
 0x16c   : > { %8214 = vmatprep.mubr.msk.f32.mxu0 %vm781_vm15, %v16485_v51  ;;  %v12874_v44 = vadd.f32 %v12393_v14, %v2001_v2  ;;  %vm784_vm15 = vcmp.eq.s32.totalorder %v12097_v55, %v16518_v8  ;;  %v1532_v63 = vpop.permute.xlu0 %1531  ;;  %v16530_v2 = vld [vmem:[#allocation16_spill] sm:$0xff] }
 0x16d   : > { %10194 = vset.pattern.permute.xlu1 %v16483_v50  ;;  %v1806_v50 = vadd.f32 %v1774_v7, %v1610_v61  ;;  %vm809_vm12 = vcmp.eq.s32.totalorder %v12094_v53, %v16530_v2  ;;  %v1613_v49 = vmul.f32 %v12346_v54, %v1532_v63  ;;  %vm808_vm2 = vcmp.eq.s32.totalorder %v12097_v55, %v16530_v2 }
 0x16e   : > { %16517 = vst [vmem:[#allocation4_spill] sm:$0xff] %v12874_v44  ;;  %1750 = vperm.xlu1 %10194, %v16515_v57   ;;  %8251 = vmatmul.mubr.msk.f32.gmra.mrb[32].mxu1 %vm2097_vm6, %v12874_v44 }
 0x16f   : > { %8215 = vmatmul.mubr.msk.f32.gmra.mrb[44].mxu0 %vm780_vm0, %v16485_v51  ;;  %2360 = vmatprep.mubr.f32.mxu1 %v16489_v45  ;;  %vm793_vm0 = vcmp.eq.s32.totalorder %v12094_v53, %v16521_v30 }
 0x170   : > { %v1891_v22 = vpop.permute.xlu1 %1890  ;;  %8216 = vmatprep.mubr.msk.f32.mxu0 %vm785_vm11, %v16485_v51  ;;  %v12925_v56 = vpop.permute.xlu0 %1551  ;;  %vm7994_vm11 = vcmask 23552  }
 0x171   : > { %v1970_v21 = vmul.f32 %v12364_v59, %v1891_v22  ;;  %v1617_v2 = vmul.f32 %v12346_v54, %v12925_v56 }
 0x173   : > { %v2002_v13 = vadd.f32 %v1970_v21, %v1806_v50  ;;  %8217 = vmatmul.mubr.msk.f32.gmra.mrb[46].mxu0 %vm784_vm15, %v16485_v51  ;;  %v16532_v50 = vld [vmem:[#allocation18_spill] sm:$0xff] }
 0x174   : > { %8218 = vmatprep.mubr.msk.f32.mxu0 %vm789_vm4, %v16485_v51  ;;  %vm792_vm4 = vcmp.eq.s32.totalorder %v12097_v55, %v16521_v30  ;;  %v12946_v3 = vpop.permute.xlu0 %1556  ;;  %vm16533_vm3 = vcmp.eq.s32.totalorder %v12094_v53, %v16532_v50  ;;  %vm16534_vm7 = vcmp.eq.s32.totalorder %v12097_v55, %v16532_v50 }
 0x175   : > { %v12898_v20 = vadd.f32 %v12393_v14, %v2002_v13  ;;  %v1522_v28 = vpop.permute.xlu1 %1521  ;;  %v1618_v50 = vmul.f32 %v12346_v54, %v12946_v3 }
 0x176   : > { %v1611_v47 = vmul.f32 %v12346_v54, %v1522_v28 }
 0x177   : > { %16520 = vst [vmem:[#allocation7_spill] sm:$0xff] %v12898_v20  ;;  %8219 = vmatmul.mubr.msk.f32.gmra.mrb[48].mxu0 %vm788_vm5, %v16485_v51  ;;  %8252 = vmatmul.mubr.msk.f32.gmra.mrb[34].mxu1 %vm2097_vm6, %v12898_v20  ;;  %vm16525_vm5 = vcmp.eq.s32.totalorder %v12097_v55, %v16523_v34 }
 0x178   : > { %8220 = vmatprep.mubr.msk.f32.mxu0 %vm793_vm0, %v16485_v51  ;;  %2366 = vmatprep.mubr.f32.mxu1 %v16489_v45  ;;  %v1807_v5 = vadd.f32 %v1775_v58, %v1611_v47  ;;  %v1903_v40 = vpop.permute.xlu0 %1902 }
 0x179   : > { %v1973_v43 = vmul.f32 %v12364_v59, %v1903_v40 }
 0x17a   : > { %v1895_v27 = vpop.permute.xlu1 %1894 }
 0x17b   : > { %v1971_v60 = vmul.f32 %v12364_v59, %v1895_v27  ;;  %8221 = vmatmul.mubr.msk.f32.gmra.mrb[50].mxu0 %vm792_vm4, %v16485_v51 }
 0x17c   : > { %8222 = vmatprep.mubr.msk.f32.mxu0 %vm797_vm13, %v16485_v51  ;;  %vm800_vm13 = vcmp.eq.s32.totalorder %v12097_v55, %v16526_v4  ;;  %v1907_v28 = vpop.permute.xlu0 %1906  ;;  %v1779_v55 = vmul.f32 %v12350_v46, %v12741_v31  ;;  %v1780_v31 = vmul.f32 %v12350_v46, %v12764_v6 }
 0x17d   : > { %v2003_v52 = vadd.f32 %v1971_v60, %v1807_v5  ;;  %v1974_v47 = vmul.f32 %v12364_v59, %v1907_v28 }
 0x17f   : > { %v12933_v42 = vadd.f32 %v12393_v14, %v2003_v52  ;;  %v1703_v18 = vpop.permute.xlu1 %1702  ;;  %8223 = vmatmul.mubr.msk.f32.gmra.mrb[52].mxu0 %vm16525_vm5, %v16485_v51 }
 0x180   : > { %8224 = vmatprep.mubr.msk.f32.mxu0 %vm801_vm14, %v16485_v51  ;;  %v1776_v29 = vmul.f32 %v12350_v46, %v1703_v18 }
 0x181   : > { %16524 = vst [vmem:[#allocation9_spill] sm:$0xff] %v12933_v42  ;;  %8253 = vmatmul.mubr.msk.f32.gmra.mrb[36].mxu1 %vm2097_vm6, %v12933_v42 }
 0x182   : > { %2372 = vmatprep.mubr.f32.mxu1 %v16489_v45  ;;  %v1808_v41 = vadd.f32 %v1776_v29, %v1612_v10 }
 0x183   : > { %8225 = vmatmul.mubr.msk.f32.gmra.mrb[54].mxu0 %vm800_vm13, %v16485_v51 }
 0x184   : > { %v1899_v26 = vpop.permute.xlu1 %1898  ;;  %8226 = vmatprep.mubr.msk.f32.mxu0 %vm16528_vm1, %v16485_v51 }
 0x185   : > { %v1972_v25 = vmul.f32 %v12364_v59, %v1899_v26 }
 0x187   : > { %v2004_v57 = vadd.f32 %v1972_v25, %v1808_v41  ;;  %8227 = vmatmul.mubr.msk.f32.gmra.mrb[56].mxu0 %vm16529_vm9, %v16485_v51 }
 0x188   : > { %8228 = vmatprep.mubr.msk.f32.mxu0 %vm809_vm12, %v16485_v51 }
 0x189   : > { %v12966_v7 = vadd.f32 %v12393_v14, %v2004_v57  ;;  %v1707_v61 = vpop.permute.xlu1 %1706 }
 0x18a   : > { %v1777_v8 = vmul.f32 %v12350_v46, %v1707_v61 }
 0x18b   : > { %16531 = vst [vmem:[#allocation8_spill] sm:$0xff] %v12966_v7  ;;  %8229 = vmatmul.mubr.msk.f32.gmra.mrb[58].mxu0 %vm808_vm2, %v16485_v51  ;;  %8254 = vmatmul.mubr.msk.f32.gmra.mrb[38].mxu1 %vm2097_vm6, %v12966_v7 }
 0x18c   : > { %v1809_v22 = vadd.f32 %v1777_v8, %v1613_v49  ;;  %8230 = vmatprep.mubr.msk.f32.mxu0 %vm16533_vm3, %v16485_v51  ;;  %2378 = vmatprep.mubr.f32.mxu1 %v16489_v45  ;;  %v1923_v8 = vpop.permute.xlu0 %1922 }
 0x18e   : > { %v2005_v21 = vadd.f32 %v1973_v43, %v1809_v22  ;;  %v1537_v13 = vpop.permute.xlu1 %1536 }
 0x18f   : > { %8231 = vmatmul.mubr.msk.f32.gmra.mrb[60].mxu0 %vm16534_vm7, %v16485_v51  ;;  %v1614_v58 = vmul.f32 %v12346_v54, %v1537_v13  ;;  %v1978_v13 = vmul.f32 %v12364_v59, %v1923_v8 }
 0x190   : > { %v12987_v12 = vadd.f32 %v12393_v14, %v2005_v21  ;;  %8232 = vmatprep.mubr.msk.f32.mxu0 %vm817_vm8, %v16485_v51 }
 0x192   : > { %16535 = vst [vmem:[#allocation23_spill] sm:$0xff] %v12987_v12  ;;  %8255 = vmatmul.mubr.msk.f32.gmra.mrb[40].mxu1 %vm2097_vm6, %v12987_v12 }
 0x193   : > { %v1711_v63 = vpop.permute.xlu1 %1710  ;;  %8233 = vmatmul.mubr.msk.f32.gmra.mrb[62].mxu0 %vm816_vm10, %v16485_v51  ;;  %2384 = vmatprep.mubr.f32.mxu1 %v16489_v45 }
 0x194   : > { %v1778_v53 = vmul.f32 %v12350_v46, %v1711_v63 }
 0x196   : > { %v1810_v30 = vadd.f32 %v1778_v53, %v1614_v58  ;;  %v1927_v53 = vpop.permute.xlu0 %1926 }
 0x198   : > { %v2006_v1 = vadd.f32 %v1974_v47, %v1810_v30  ;;  %v1542_v24 = vpop.permute.xlu1 %1541 }
 0x199   : > { %v1615_v5 = vmul.f32 %v12346_v54, %v1542_v24 }
 0x19a   : > { %v13000_v27 = vadd.f32 %v12393_v14, %v2006_v1  ;;  %v1979_v1 = vmul.f32 %v12364_v59, %v1927_v53 }
 0x19b   : > { %v1811_v19 = vadd.f32 %v1779_v55, %v1615_v5  ;;  %v1735_v55 = vpop.permute.xlu0 %1734 }
 0x19c   : > { %16536 = vst [vmem:[#allocation22_spill] sm:$0xff] %v13000_v27  ;;  %8256 = vmatmul.mubr.msk.f32.gmra.mrb[42].mxu1 %vm2097_vm6, %v13000_v27 }
 0x19d   : > { %v1911_v51 = vpop.permute.xlu1 %1910  ;;  %2390 = vmatprep.mubr.f32.mxu1 %v16489_v45 }
 0x19e   : > { %v1975_v60 = vmul.f32 %v12364_v59, %v1911_v51 }
 0x1a0   : > { %v2007_v34 = vadd.f32 %v1975_v60, %v1811_v19  ;;  %v13055_v60 = vld [vmem:[%s16033_s4] ss:$0 sm:$0xff] }
 0x1a2   : > { %v13010_v52 = vadd.f32 %v12393_v14, %v2007_v34  ;;  %v1547_v18 = vpop.permute.xlu1 %1546 }
 0x1a3   : > { %v1616_v4 = vmul.f32 %v12346_v54, %v1547_v18 }
 0x1a4   : > { %16537 = vst [vmem:[#allocation11_spill] sm:$0xff] %v13010_v52  ;;  %8257 = vmatmul.mubr.msk.f32.gmra.mrb[44].mxu1 %vm2097_vm6, %v13010_v52 }
 0x1a5   : > { %2396 = vmatprep.mubr.f32.mxu1 %v16489_v45  ;;  %v1812_v29 = vadd.f32 %v1780_v31, %v1616_v4  ;;  %v1784_v4 = vmul.f32 %v12350_v46, %v1735_v55 }
 0x1a7   : > { %v1915_v10 = vpop.permute.xlu1 %1914 }
 0x1a8   : > { %v1976_v26 = vmul.f32 %v12364_v59, %v1915_v10 }
 0x1aa   : > { %v2008_v36 = vadd.f32 %v1976_v26, %v1812_v29 }
 0x1ac   : > { %v13020_v41 = vadd.f32 %v12393_v14, %v2008_v36  ;;  %v1723_v25 = vpop.permute.xlu1 %1722 }
 0x1ad   : > { %v1781_v57 = vmul.f32 %v12350_v46, %v1723_v25 }
 0x1ae   : > { %16538 = vst [vmem:[#allocation10_spill] sm:$0xff] %v13020_v41  ;;  %8258 = vmatmul.mubr.msk.f32.gmra.mrb[46].mxu1 %vm2097_vm6, %v13020_v41 }
 0x1af   : > { %2402 = vmatprep.mubr.f32.mxu1 %v16489_v45  ;;  %v1813_v40 = vadd.f32 %v1781_v57, %v1617_v2  ;;  %v1739_v57 = vpop.permute.xlu0 %1738 }
 0x1b1   : > { %v1919_v6 = vpop.permute.xlu1 %1918 }
 0x1b2   : > { %v1977_v49 = vmul.f32 %v12364_v59, %v1919_v6 }
 0x1b4   : > { %v2009_v61 = vadd.f32 %v1977_v49, %v1813_v40  ;;  %v1785_v49 = vmul.f32 %v12350_v46, %v1739_v57 }
 0x1b6   : > { %v13030_v43 = vadd.f32 %v12393_v14, %v2009_v61  ;;  %v1727_v22 = vpop.permute.xlu1 %1726 }
 0x1b7   : > { %v1782_v21 = vmul.f32 %v12350_v46, %v1727_v22 }
 0x1b8   : > { %16539 = vst [vmem:[#allocation13_spill] sm:$0xff] %v13030_v43  ;;  %8259 = vmatmul.mubr.msk.f32.gmra.mrb[48].mxu1 %vm2097_vm6, %v13030_v43 }
 0x1b9   : > { %v1814_v56 = vadd.f32 %v1782_v21, %v1618_v50  ;;  %2408 = vmatprep.mubr.f32.mxu1 %v16489_v45  ;;  %v1577_v21 = vpop.permute.xlu0 %1576 }
 0x1bb   : > { %v2010_v28 = vadd.f32 %v1978_v13, %v1814_v56  ;;  %v1562_v63 = vpop.permute.xlu1 %1561 }
 0x1bc   : > { %v1619_v47 = vmul.f32 %v12346_v54, %v1562_v63  ;;  %v1622_v63 = vmul.f32 %v12346_v54, %v1577_v21 }
 0x1bd   : > { %v13040_v58 = vadd.f32 %v12393_v14, %v2010_v28  ;;  %v1582_v53 = vpop.permute.xlu0 %1581 }
 0x1be   : > { %v1623_v55 = vmul.f32 %v12346_v54, %v1582_v53 }
 0x1bf   : > { %16540 = vst [vmem:[#allocation12_spill] sm:$0xff] %v13040_v58  ;;  %8260 = vmatmul.mubr.msk.f32.gmra.mrb[50].mxu1 %vm2097_vm6, %v13040_v58 }
 0x1c0   : > { %v1731_v3 = vpop.permute.xlu1 %1730  ;;  %2414 = vmatprep.mubr.f32.mxu1 %v16489_v45 }
 0x1c1   : > { %v1783_v30 = vmul.f32 %v12350_v46, %v1731_v3 }
 0x1c3   : > { %v1815_v24 = vadd.f32 %v1783_v30, %v1619_v47  ;;  %v13048_v5 = vpop.f32.mrb[0].mxu1 }
 0x1c4   : > { %v13050_v14 = vpop.f32.mrb[1].mxu1 }
 0x1c5   : > { %v2011_v51 = vadd.f32 %v1979_v1, %v1815_v24  ;;  %v1567_v19 = vpop.permute.xlu1 %1566  ;;  %v1943_v24 = vpop.permute.xlu0 %1942 }
 0x1c6   : > { %v1620_v18 = vmul.f32 %v12346_v54, %v1567_v19 }
 0x1c7   : > { %v13058_v34 = vadd.f32 %v13055_v60, %v2011_v51  ;;  %v13062_v31 = vpop.f32.mrb[2].mxu1 }
 0x1c8   : > { %v13064_v10 = vpop.f32.mrb[3].mxu1  ;;  %v1816_v26 = vadd.f32 %v1784_v4, %v1620_v18  ;;  %v1983_v4 = vmul.f32 %v12364_v59, %v1943_v24 }
 0x1c9   : > { %16541 = vst [vmem:[#allocation15_spill] sm:$0xff] %v13058_v34  ;;  %8261 = vmatmul.mubr.msk.f32.gmra.mrb[52].mxu1 %vm2097_vm6, %v13058_v34 }
 0x1ca   : > { %v1931_v29 = vpop.permute.xlu1 %1930  ;;  %2420 = vmatprep.mubr.f32.mxu1 %v16489_v45 }
 0x1cb   : > { %v1980_v36 = vmul.f32 %v12364_v59, %v1931_v29 }
 0x1cd   : > { %v2012_v25 = vadd.f32 %v1980_v36, %v1816_v26 }
 0x1cf   : > { %v13071_v2 = vadd.f32 %v13055_v60, %v2012_v25  ;;  %v1572_v6 = vpop.permute.xlu1 %1571 }
 0x1d0   : > { %v1621_v40 = vmul.f32 %v12346_v54, %v1572_v6 }
 0x1d1   : > { %16542 = vst [vmem:[#allocation14_spill] sm:$0xff] %v13071_v2  ;;  %8262 = vmatmul.mubr.msk.f32.gmra.mrb[54].mxu1 %vm2097_vm6, %v13071_v2 }
 0x1d2   : > { %2426 = vmatprep.mubr.f32.mxu1 %v16489_v45  ;;  %v1817_v8 = vadd.f32 %v1785_v49, %v1621_v40 }
 0x1d4   : > { %v1935_v61 = vpop.permute.xlu1 %1934 }
 0x1d5   : > { %v1981_v22 = vmul.f32 %v12364_v59, %v1935_v61 }
 0x1d7   : > { %v2013_v50 = vadd.f32 %v1981_v22, %v1817_v8  ;;  %v1947_v22 = vpop.permute.xlu0 %1946 }
 0x1d9   : > { %v13080_v13 = vadd.f32 %v13055_v60, %v2013_v50  ;;  %v1743_v56 = vpop.permute.xlu1 %1742 }
 0x1da   : > { %v1786_v28 = vmul.f32 %v12350_v46, %v1743_v56 }
 0x1db   : > { %16543 = vst [vmem:[#allocation17_spill] sm:$0xff] %v13080_v13  ;;  %8263 = vmatmul.mubr.msk.f32.gmra.mrb[56].mxu1 %vm2097_vm6, %v13080_v13 }
 0x1dc   : > { %2432 = vmatprep.mubr.f32.mxu1 %v16489_v45  ;;  %v1818_v47 = vadd.f32 %v1786_v28, %v1622_v63 }
 0x1de   : > { %v1939_v3 = vpop.permute.xlu1 %1938 }
 0x1df   : > { %v1982_v30 = vmul.f32 %v12364_v59, %v1939_v3  ;;  %v1984_v3 = vmul.f32 %v12364_v59, %v1947_v22  ;;  %v2678_v59 = vld [vmem:[%s16034_s5 + $0x10] sm:$0xff] }
 0x1e1   : > { %v2014_v1 = vadd.f32 %v1982_v30, %v1818_v47 }
 0x1e3   : > { %v13090_v51 = vadd.f32 %v13055_v60, %v2014_v1  ;;  %v1747_v19 = vpop.permute.xlu1 %1746 }
 0x1e4   : > { %v1787_v18 = vmul.f32 %v12350_v46, %v1747_v19 }
 0x1e5   : > { %16544 = vst [vmem:[#allocation16_spill] sm:$0xff] %v13090_v51  ;;  %8264 = vmatmul.mubr.msk.f32.gmra.mrb[58].mxu1 %vm2097_vm6, %v13090_v51 }
 0x1e6   : > { %v1819_v29 = vadd.f32 %v1787_v18, %v1623_v55  ;;  %2438 = vmatprep.mubr.f32.mxu1 %v16489_v45  ;;  %v2676_v18 = vld [vmem:[%s16034_s5] sm:$0xff] }
 0x1e7   : > { %v13097_v26 = vpop.f32.mrb[4].mxu1  ;;  %v13151_v22 = vpack.c.bf16 %v2678_v59, %v2676_v18 }
 0x1e8   : > { %v2015_v36 = vadd.f32 %v1983_v4, %v1819_v29  ;;  %v13099_v25 = vpop.f32.mrb[5].mxu1  ;;  %v1587_v57 = vpop.permute.xlu1 %1586  ;;  %v2681_v4 = vld [vmem:[%s16034_s5 + $0x28] sm:$0xff]  ;;  %v2683_v29 = vld [vmem:[%s16034_s5 + $0x38] sm:$0xff] }
 0x1e9   : > { %v1624_v21 = vmul.f32 %v12346_v54, %v1587_v57  ;;  %16550 = vst [vmem:[#allocation38_spill] sm:$0xff] %v13151_v22 }
 0x1ea   : > { %v13102_v6 = vadd.f32 %v13055_v60, %v2015_v36  ;;  %v13104_v40 = vpop.f32.mrb[0].mxu0 }
 0x1eb   : > { %v13106_v49 = vpop.f32.mrb[6].mxu1  ;;  %v1239_v61 = vpop.f32.mrb[1].mxu0 }
 0x1ec   : > { %16545 = vst [vmem:[#allocation18_spill] sm:$0xff] %v13102_v6  ;;  %v13108_v8 = vpop.f32.mrb[7].mxu1  ;;  %8265 = vmatmul.mubr.msk.f32.gmra.mrb[60].mxu1 %vm2097_vm6, %v13102_v6  ;;  %v16549_v61 = vld [vmem:[#allocation20_spill] sm:$0xff] }
 0x1ed   : > { %v1751_v50 = vpop.permute.xlu1 %1750  ;;  %2444 = vmatprep.mubr.f32.mxu1 %v16489_v45 }
 0x1ee   : > { %v1788_v56 = vmul.f32 %v12350_v46, %v1751_v50  ;;  %v13115_v28 = vpop.f32.mrb[2].mxu0 }
 0x1ef   : > { %v13117_v63 = vpop.f32.mrb[8].mxu1  ;;  %v1244_v53 = vpop.f32.mrb[3].mxu0 }
 0x1f0   : > { %v1820_v47 = vadd.f32 %v1788_v56, %v1624_v21  ;;  %v13120_v30 = vpop.f32.mrb[9].mxu1  ;;  %v13155_v21 = vpack.c.bf16 %v2683_v29, %v2681_v4  ;;  %v2680_v56 = vld [vmem:[%s16034_s5 + $0x20] sm:$0xff]  ;;  %v2682_v53 = vld [vmem:[%s16034_s5 + $0x30] sm:$0xff] }
 0x1f1   : > { %v13178_v4 = vpack.c.bf16 %v2682_v53, %v2680_v56  ;;  %v2691_v56 = vld [vmem:[%s16034_s5 + $0x78] sm:$0xff] }
 0x1f2   : > { %v2016_v1 = vadd.f32 %v1984_v3, %v1820_v47  ;;  %v13122_v24 = vpop.f32.mrb[4].mxu0  ;;  %16552 = vst [vmem:[#allocation40_spill] sm:$0xff] %v13155_v21  ;;  %v2685_v3 = vld [vmem:[%s16034_s5 + $0x48] sm:$0xff]  ;;  %v2687_v47 = vld [vmem:[%s16034_s5 + $0x58] sm:$0xff] }
 0x1f3   : > { %v13124_v55 = vpop.f32.mrb[10].mxu1  ;;  %v1249_v19 = vpop.f32.mrb[5].mxu0  ;;  %16555 = vst [vmem:[#allocation42_spill] sm:$0xff] %v13178_v4 }
 0x1f4   : > { %v13127_v54 = vadd.f32 %v13055_v60, %v2016_v1  ;;  %v13129_v46 = vpop.f32.mrb[11].mxu1  ;;  %v16553_v19 = vld [vmem:[#allocation21_spill] sm:$0xff] }
 0x1f5   : > { %16547 = vst [vmem:[#allocation36_spill] sm:$0xff] %v13129_v46 }
 0x1f6   : > { %16546 = vst [vmem:[#allocation35_spill] sm:$0xff] %v13127_v54  ;;  %v13143_v60 = vpop.f32.mrb[6].mxu0  ;;  %8266 = vmatmul.mubr.msk.f32.gmra.mrb[62].mxu1 %vm2097_vm6, %v13127_v54 }
 0x1f7   : > { %v13147_v36 = vpop.f32.mrb[12].mxu1  ;;  %v1254_v57 = vpop.f32.mrb[7].mxu0  ;;  %8995 = vmatprep.mubr.msk.f32.mxu1 %vm2097_vm6, %v16549_v61  ;;  %v2686_v61 = vld [vmem:[%s16034_s5 + $0x50] sm:$0xff] }
 0x1f8   : > { %16548 = vst [vmem:[#allocation37_spill] sm:$0xff] %v13147_v36  ;;  %v13153_v50 = vpop.f32.mrb[13].mxu1  ;;  %v13183_v57 = vpack.c.bf16 %v2687_v47, %v2685_v3 }
 0x1f9   : > { %16551 = vst [vmem:[#allocation39_spill] sm:$0xff] %v13153_v50  ;;  %v2692_v50 = vld [vmem:[%s16034_s5 + $0x80] sm:$0xff] }
 0x1fa   : > { %v13169_v1 = vpop.f32.mrb[8].mxu0  ;;  %8996 = vmatmul.mubr.msk.f32.vlgmr.msra.gmra.mrb[64].mxu1 %vm2097_vm6, %v16553_v19  ;;  %16557 = vst [vmem:[#allocation44_spill] sm:$0xff] %v13183_v57  ;;  %v2684_v19 = vld [vmem:[%s16034_s5 + $0x40] sm:$0xff] }
 0x1fb   : > { %v13173_v18 = vpop.f32.mrb[14].mxu1  ;;  %9694 = vmatpush1.bf16.msra.mxu1 %v13151_v22  ;;  %v1259_v59 = vpop.f32.mrb[9].mxu0  ;;  %8998 = vmatprep.mubr.msk.f32.mxu1 %vm2097_vm6, %v12533_v15  ;;  %v13206_v15 = vpack.c.bf16 %v2686_v61, %v2684_v19  ;;  %v2695_v61 = vld [vmem:[%s16034_s5 + $0x98] sm:$0xff] }
 0x1fc   : > { %16554 = vst [vmem:[#allocation41_spill] sm:$0xff] %v13173_v18  ;;  %v13180_v29 = vpop.f32.mrb[15].mxu1  ;;  %9696 = vmatprep.subr.bf16.mxu1 %v13155_v21  ;;  %v2689_v59 = vld [vmem:[%s16034_s5 + $0x68] sm:$0xff] }
 0x1fd   : > { %16556 = vst [vmem:[#allocation43_spill] sm:$0xff] %v13180_v29  ;;  %16559 = vst [vmem:[#allocation46_spill] sm:$0xff] %v13206_v15  ;;  %v13211_v18 = vpack.c.bf16 %v2691_v56, %v2689_v59 }
 0x1fe   : > { %v13197_v53 = vpop.f32.mrb[10].mxu0  ;;  %8999 = vmatmul.mubr.msk.f32.gmra.mrb[66].mxu1 %vm2097_vm6, %v12551_v23  ;;  %v2688_v23 = vld [vmem:[%s16034_s5 + $0x60] sm:$0xff] }
 0x1ff   : > { %v13201_v3 = vpop.f32.mrb[16].mxu1  ;;  %v1264_v47 = vpop.f32.mrb[11].mxu0  ;;  %9001 = vmatprep.mubr.msk.f32.mxu1 %vm2097_vm6, %v12574_v48  ;;  %9698 = vmatpush1.bf16.msra.mxu1 %v13178_v4  ;;  %16561 = vst [vmem:[#allocation48_spill] sm:$0xff] %v13211_v18  ;;  %v2693_v48 = vld [vmem:[%s16034_s5 + $0x88] sm:$0xff] }
 0x200   : > { %16558 = vst [vmem:[#allocation45_spill] sm:$0xff] %v13201_v3  ;;  %v13208_v29 = vpop.f32.mrb[17].mxu1  ;;  %9700 = vmatprep.subr.bf16.mxu1 %v13183_v57  ;;  %v2690_v47 = vld [vmem:[%s16034_s5 + $0x70] sm:$0xff]  ;;  %v13237_v3 = vpack.c.bf16 %v2695_v61, %v2693_v48 }
 0x201   : > { %16560 = vst [vmem:[#allocation47_spill] sm:$0xff] %v13208_v29  ;;  %v13232_v56 = vpack.c.bf16 %v2690_v47, %v2688_v23  ;;  %v2697_v23 = vld [vmem:[%s16034_s5 + $0xa8] sm:$0xff]  ;;  %v2699_v47 = vld [vmem:[%s16034_s5 + $0xb8] sm:$0xff] }
 0x202   : > { %v13225_v19 = vpop.f32.mrb[12].mxu0  ;;  %9002 = vmatmul.mubr.msk.f32.gmra.mrb[68].mxu1 %vm2097_vm6, %v12596_v0  ;;  %16564 = vst [vmem:[#allocation51_spill] sm:$0xff] %v13237_v3 }
 0x203   : > { %v1269_v59 = vpop.f32.mrb[13].mxu0  ;;  %9004 = vmatprep.mubr.msk.f32.mxu1 %vm2097_vm6, %v12610_v39  ;;  %9702 = vmatpush1.bf16.msra.mxu1 %v13206_v15  ;;  %16562 = vst [vmem:[#allocation49_spill] sm:$0xff] %v13232_v56  ;;  %v13234_v29 = vpop.f32.mrb[18].mxu1 }
 0x204   : > { %16563 = vst [vmem:[#allocation50_spill] sm:$0xff] %v13234_v29  ;;  %9704 = vmatprep.subr.bf16.mxu1 %v13211_v18  ;;  %v2694_v59 = vld [vmem:[%s16034_s5 + $0x90] sm:$0xff]  ;;  %v13245_v0 = vpop.f32.mrb[19].mxu1  ;;  %v2696_v29 = vld [vmem:[%s16034_s5 + $0xa0] sm:$0xff] }
 0x205   : > { %16565 = vst [vmem:[#allocation52_spill] sm:$0xff] %v13245_v0  ;;  %v13260_v39 = vpack.c.bf16 %v2694_v59, %v2692_v50  ;;  %v13263_v0 = vpack.c.bf16 %v2699_v47, %v2697_v23  ;;  %v2703_v50 = vld [vmem:[%s16034_s5 + $0xd8] sm:$0xff] }
 0x206   : > { %v13253_v48 = vpop.f32.mrb[14].mxu0  ;;  %9005 = vmatmul.mubr.msk.f32.gmra.mrb[70].mxu1 %vm2097_vm6, %v12625_v38  ;;  %v2698_v38 = vld [vmem:[%s16034_s5 + $0xb0] sm:$0xff] }
 0x207   : > { %v1274_v61 = vpop.f32.mrb[15].mxu0  ;;  %9007 = vmatprep.mubr.msk.f32.mxu1 %vm2097_vm6, %v12642_v17  ;;  %9706 = vmatpush1.bf16.msra.mxu1 %v13232_v56  ;;  %16566 = vst [vmem:[#allocation53_spill] sm:$0xff] %v13260_v39  ;;  %16567 = vst [vmem:[#allocation54_spill] sm:$0xff] %v13263_v0  ;;  %v13286_v17 = vpack.c.bf16 %v2698_v38, %v2696_v29  ;;  %v2707_v38 = vld [vmem:[%s16034_s5 + $0xf8] sm:$0xff] }
 0x208   : > { %9708 = vmatprep.subr.bf16.mxu1 %v13237_v3  ;;  %v2701_v61 = vld [vmem:[%s16034_s5 + $0xc8] sm:$0xff] }
 0x209   : > { %16569 = vst [vmem:[#allocation56_spill] sm:$0xff] %v13286_v17  ;;  %v13291_v46 = vpack.c.bf16 %v2703_v50, %v2701_v61 }
 0x20a   : > { %v13277_v59 = vpop.f32.mrb[16].mxu0  ;;  %9008 = vmatmul.mubr.msk.f32.gmra.mrb[72].mxu1 %vm2097_vm6, %v12659_v16  ;;  %v2700_v16 = vld [vmem:[%s16034_s5 + $0xc0] sm:$0xff] }
 0x20b   : > { %v1279_v23 = vpop.f32.mrb[17].mxu0  ;;  %v13281_v47 = vpop.f32.mrb[20].mxu1  ;;  %9010 = vmatprep.mubr.msk.f32.mxu1 %vm2097_vm6, %v12682_v62  ;;  %9710 = vmatpush1.bf16.msra.mxu1 %v13260_v39  ;;  %16571 = vst [vmem:[#allocation58_spill] sm:$0xff] %v13291_v46  ;;  %v2705_v62 = vld [vmem:[%s16034_s5 + $0xe8] sm:$0xff] }
 0x20c   : > { %16568 = vst [vmem:[#allocation55_spill] sm:$0xff] %v13281_v47  ;;  %v13288_v36 = vpop.f32.mrb[21].mxu1  ;;  %9712 = vmatprep.subr.bf16.mxu1 %v13263_v0  ;;  %v2702_v23 = vld [vmem:[%s16034_s5 + $0xd0] sm:$0xff]  ;;  %v2704_v47 = vld [vmem:[%s16034_s5 + $0xe0] sm:$0xff] }
 0x20d   : > { %16570 = vst [vmem:[#allocation57_spill] sm:$0xff] %v13288_v36  ;;  %v13312_v50 = vpack.c.bf16 %v2702_v23, %v2700_v16  ;;  %v13315_v36 = vpack.c.bf16 %v2707_v38, %v2705_v62 }
 0x20e   : > { %v13305_v29 = vpop.f32.mrb[18].mxu0  ;;  %9011 = vmatmul.mubr.msk.f32.gmra.mrb[74].mxu1 %vm2097_vm6, %v12723_v37  ;;  %v2706_v37 = vld [vmem:[%s16034_s5 + $0xf0] sm:$0xff] }
 0x20f   : > { %16572 = vst [vmem:[#allocation59_spill] sm:$0xff] %v13305_v29  ;;  %v1284_v61 = vpop.f32.mrb[19].mxu0  ;;  %9013 = vmatprep.mubr.msk.f32.mxu1 %vm2097_vm6, %v12750_v33  ;;  %9714 = vmatpush1.bf16.msra.mxu1 %v13286_v17  ;;  %16573 = vst [vmem:[#allocation60_spill] sm:$0xff] %v13312_v50  ;;  %v13330_v16 = vpack.c.bf16 %v2706_v37, %v2704_v47 }
 0x210   : > { %9716 = vmatprep.subr.bf16.mxu1 %v13291_v46  ;;  %16574 = vst [vmem:[#allocation61_spill] sm:$0xff] %v13315_v36 }
 0x211   : > { %16575 = vst [vmem:[#allocation62_spill] sm:$0xff] %v13330_v16 }
 0x212   : > { %v13323_v61 = vpop.f32.mrb[20].mxu0  ;;  %9014 = vmatmul.mubr.msk.f32.gmra.mrb[76].mxu1 %vm2097_vm6, %v12778_v11 }
 0x213   : > { %v1289_v33 = vpop.f32.mrb[21].mxu0  ;;  %9016 = vmatprep.mubr.msk.f32.mxu1 %vm2097_vm6, %v12815_v32  ;;  %9718 = vmatpush1.bf16.msra.mxu1 %v13312_v50 }
 0x214   : > { %9720 = vmatprep.subr.bf16.mxu1 %v13315_v36  ;;  %v13333_v62 = vpop.f32.mrb[22].mxu1 }
 0x215   : > { %v13337_v38 = vpop.f32.mrb[23].mxu1 }
 0x216   : > { %v13335_v23 = vpop.f32.mrb[22].mxu0  ;;  %9017 = vmatmul.mubr.msk.f32.gmra.mrb[78].mxu1 %vm2097_vm6, %v12839_v9 }
 0x217   : > { %v1294_v11 = vpop.f32.mrb[23].mxu0  ;;  %9019 = vmatprep.mubr.msk.f32.mxu1 %vm2097_vm6, %v12874_v44  ;;  %9722 = vmatpush1.bf16.msra.mxu1 %v13330_v16 }
 0x218   : > { %9756 = vmatprep.subr.bf16.mxu1 %v12921_v35 }
 0x21a   : > { %v13345_v37 = vpop.f32.mrb[24].mxu0  ;;  %9020 = vmatmul.mubr.msk.f32.gmra.mrb[80].mxu1 %vm2097_vm6, %v12898_v20 }
 0x21b   : > { %v1299_v33 = vpop.f32.mrb[25].mxu0  ;;  %9022 = vmatprep.mubr.msk.f32.mxu1 %vm2097_vm6, %v12933_v42 }
 0x21c   : > { %v13351_v47 = vpop.f32.mrb[24].mxu1 }
 0x21d   : > { %v13355_v11 = vpop.f32.mrb[25].mxu1 }
 0x21e   : > { %v13353_v9 = vpop.f32.mrb[26].mxu0  ;;  %9023 = vmatmul.mubr.msk.f32.gmra.mrb[82].mxu1 %vm2097_vm6, %v12966_v7 }
 0x21f   : > { %16576 = vst [vmem:[#allocation63_spill] sm:$0xff] %v13353_v9  ;;  %v1304_v44 = vpop.f32.mrb[27].mxu0  ;;  %9025 = vmatprep.mubr.msk.f32.mxu1 %vm2097_vm6, %v12987_v12 }
 0x222   : > { %v13361_v32 = vpop.f32.mrb[28].mxu0  ;;  %9026 = vmatmul.mubr.msk.f32.gmra.mrb[84].mxu1 %vm2097_vm6, %v13000_v27 }
 0x223   : > { %16577 = vst [vmem:[#allocation64_spill] sm:$0xff] %v13361_v32  ;;  %v1309_v33 = vpop.f32.mrb[29].mxu0  ;;  %9028 = vmatprep.mubr.msk.f32.mxu1 %vm2097_vm6, %v13010_v52 }
 0x226   : > { %v13367_v42 = vpop.f32.mrb[30].mxu0  ;;  %9029 = vmatmul.mubr.msk.f32.gmra.mrb[86].mxu1 %vm2097_vm6, %v13020_v41  ;;  %v13373_v44 = vpop.f32.mrb[26].mxu1 }
 0x227   : > { %16578 = vst [vmem:[#allocation65_spill] sm:$0xff] %v13367_v42  ;;  %v1314_v20 = vpop.f32.mrb[31].mxu0  ;;  %9031 = vmatprep.mubr.msk.f32.mxu1 %vm2097_vm6, %v13030_v43  ;;  %v13375_v12 = vpop.f32.mrb[27].mxu1  ;;  %v2708_v43 = vld [vmem:[%s16035_s6] sm:$0xff] }
 0x22a   : > { %v13377_v7 = vpop.f32.mrb[32].mxu0  ;;  %9032 = vmatmul.mubr.msk.f32.gmra.mrb[88].mxu1 %vm2097_vm6, %v13040_v58 }
 0x22b   : > { %v1319_v33 = vpop.f32.mrb[33].mxu0  ;;  %9034 = vmatprep.mubr.msk.f32.mxu1 %vm2097_vm6, %v13058_v34 }
 0x22c   : > { %v2709_v33 = vld [vmem:[%s16035_s6 + $0x8] sm:$0xff] }
 0x22d   : > { %v13397_v34 = vpack.c.bf16 %v2709_v33, %v2708_v43 }
 0x22e   : > { %v13383_v52 = vpop.f32.mrb[34].mxu0  ;;  %9035 = vmatmul.mubr.msk.f32.gmra.mrb[90].mxu1 %vm2097_vm6, %v13071_v2 }
 0x22f   : > { %16579 = vst [vmem:[#allocation66_spill] sm:$0xff] %v13383_v52  ;;  %v1324_v20 = vpop.f32.mrb[35].mxu0  ;;  %9037 = vmatprep.mubr.msk.f32.mxu1 %vm2097_vm6, %v13080_v13  ;;  %9724 = vmatprep.subr.bf16.mxu0 %v13397_v34 }
 0x230   : > { %v13395_v58 = vpop.f32.mrb[28].mxu1  ;;  %9726 = vmatpush3.bf16.msra.mxu0 %v13397_v34 }
 0x231   : > { %v13401_v27 = vpop.f32.mrb[29].mxu1 }
 0x232   : > { %v13399_v41 = vpop.f32.mrb[36].mxu0  ;;  %9038 = vmatmul.mubr.msk.f32.gmra.mrb[92].mxu1 %vm2097_vm6, %v13090_v51 }
 0x233   : > { %16580 = vst [vmem:[#allocation67_spill] sm:$0xff] %v13399_v41  ;;  %v1329_v20 = vpop.f32.mrb[37].mxu0  ;;  %9040 = vmatprep.mubr.msk.f32.mxu1 %vm2097_vm6, %v13102_v6 }
 0x236   : > { %v13409_v13 = vpop.f32.mrb[38].mxu0  ;;  %9041 = vmatmul.mubr.msk.f32.gmra.mrb[94].mxu1 %vm2097_vm6, %v13127_v54  ;;  %v2711_v54 = vld [vmem:[%s16035_s6 + $0x18] sm:$0xff] }
 0x237   : > { %16581 = vst [vmem:[#allocation68_spill] sm:$0xff] %v13409_v13  ;;  %v1334_v43 = vpop.f32.mrb[39].mxu0  ;;  %2788 = vmatprep.mubr.f32.mxu1 %v16489_v45 }
 0x238   : > { %v13414_v33 = vpop.f32.mrb[30].mxu1 }
 0x239   : > { %v13416_v2 = vpop.f32.mrb[31].mxu1 }
 0x23a   : > { %v13418_v20 = vpop.f32.mrb[40].mxu0  ;;  %2789 = vmatmul.mubr.f32.vlgmr.msra.gmra.mrb[96].mxu1 %v13104_v40 }
 0x23b   : > { %16582 = vst [vmem:[#allocation69_spill] sm:$0xff] %v13418_v20  ;;  %v1339_v6 = vpop.f32.mrb[41].mxu0  ;;  %2794 = vmatprep.mubr.f32.mxu1 %v16489_v45  ;;  %9758 = vmatpush1.bf16.msra.mxu1 %v13151_v22 }
 0x23c   : > { %9760 = vmatprep.subr.bf16.mxu1 %v13155_v21  ;;  %v2710_v6 = vld [vmem:[%s16035_s6 + $0x10] sm:$0xff] }
 0x23e   : > { %v13424_v51 = vpop.f32.mrb[42].mxu0  ;;  %2795 = vmatmul.mubr.f32.gmra.mrb[98].mxu1 %v13115_v28 }
 0x23f   : > { %16583 = vst [vmem:[#allocation70_spill] sm:$0xff] %v13424_v51  ;;  %v1344_v43 = vpop.f32.mrb[43].mxu0  ;;  %2800 = vmatprep.mubr.f32.mxu1 %v16489_v45  ;;  %9762 = vmatpush1.bf16.msra.mxu1 %v13178_v4 }
 0x240   : > { %9764 = vmatprep.subr.bf16.mxu1 %v13183_v57  ;;  %v13441_v43 = vpack.c.bf16 %v2711_v54, %v2710_v6 }
 0x241   : > { %v13438_v22 = vpop.f32.mrb[32].mxu1 }
 0x242   : > { %v13436_v21 = vpop.f32.mrb[44].mxu0  ;;  %16585 = vst [vmem:[#allocation72_spill] sm:$0xff] %v13438_v22  ;;  %2801 = vmatmul.mubr.f32.gmra.mrb[100].mxu1 %v13122_v24  ;;  %16586 = vst [vmem:[#allocation73_spill] sm:$0xff] %v13441_v43  ;;  %v13443_v4 = vpop.f32.mrb[33].mxu1  ;;  %9728 = vmatprep.subr.bf16.mxu0 %v13441_v43 }
 0x243   : > { %16584 = vst [vmem:[#allocation71_spill] sm:$0xff] %v13436_v21  ;;  %v1349_v35 = vpop.f32.mrb[45].mxu0  ;;  %2806 = vmatprep.mubr.f32.mxu1 %v16489_v45  ;;  %9766 = vmatpush1.bf16.msra.mxu1 %v13206_v15 }
 0x244   : > { %9768 = vmatprep.subr.bf16.mxu1 %v13211_v18  ;;  %9730 = vmatpush3.bf16.msra.mxu0 %v13441_v43 }
 0x246   : > { %v13450_v57 = vpop.f32.mrb[46].mxu0  ;;  %2807 = vmatmul.mubr.f32.gmra.mrb[102].mxu1 %v13143_v60 }
 0x247   : > { %16587 = vst [vmem:[#allocation74_spill] sm:$0xff] %v13450_v57  ;;  %v1354_v22 = vpop.f32.mrb[47].mxu0  ;;  %2812 = vmatprep.mubr.f32.mxu1 %v16489_v45  ;;  %9770 = vmatpush1.bf16.msra.mxu1 %v13232_v56  ;;  %v2712_v56 = vld [vmem:[%s16035_s6 + $0x20] sm:$0xff] }
 0x248   : > { %9772 = vmatprep.subr.bf16.mxu1 %v13237_v3 }
 0x24a   : > { %v13456_v35 = vpop.f32.mrb[48].mxu0  ;;  %v13458_v54 = vpop.f32.mrb[34].mxu1  ;;  %2813 = vmatmul.mubr.f32.gmra.mrb[104].mxu1 %v13169_v1 }
 0x24b   : > { %16588 = vst [vmem:[#allocation75_spill] sm:$0xff] %v13456_v35  ;;  %v1359_v6 = vpop.f32.mrb[49].mxu0  ;;  %v13461_v18 = vpop.f32.mrb[35].mxu1  ;;  %2818 = vmatprep.mubr.f32.mxu1 %v16489_v45  ;;  %9774 = vmatpush1.bf16.msra.mxu1 %v13260_v39 }
 0x24c   : > { %16589 = vst [vmem:[#allocation76_spill] sm:$0xff] %v13461_v18  ;;  %9776 = vmatprep.subr.bf16.mxu1 %v13263_v0  ;;  %v2713_v6 = vld [vmem:[%s16035_s6 + $0x28] sm:$0xff] }
 0x24d   : > { %v13477_v39 = vpack.c.bf16 %v2713_v6, %v2712_v56 }
 0x24e   : > { %v13466_v22 = vpop.f32.mrb[50].mxu0  ;;  %2819 = vmatmul.mubr.f32.gmra.mrb[106].mxu1 %v13197_v53 }
 0x24f   : > { %16590 = vst [vmem:[#allocation77_spill] sm:$0xff] %v13466_v22  ;;  %v1364_v3 = vpop.f32.mrb[51].mxu0  ;;  %2824 = vmatprep.mubr.f32.mxu1 %v16489_v45  ;;  %9778 = vmatpush1.bf16.msra.mxu1 %v13286_v17  ;;  %16591 = vst [vmem:[#allocation78_spill] sm:$0xff] %v13477_v39 }
 0x250   : > { %9780 = vmatprep.subr.bf16.mxu1 %v13291_v46  ;;  %9732 = vmatprep.subr.bf16.mxu0 %v13477_v39 }
 0x251   : > { %9734 = vmatpush3.bf16.msra.mxu0 %v13477_v39 }
 0x252   : > { %v13480_v0 = vpop.f32.mrb[52].mxu0  ;;  %2825 = vmatmul.mubr.f32.gmra.mrb[108].mxu1 %v13225_v19 }
 0x253   : > { %16592 = vst [vmem:[#allocation79_spill] sm:$0xff] %v13480_v0  ;;  %v1369_v3 = vpop.f32.mrb[53].mxu0  ;;  %2830 = vmatprep.mubr.f32.mxu1 %v16489_v45  ;;  %9782 = vmatpush1.bf16.msra.mxu1 %v13312_v50 }
 0x254   : > { %v13486_v15 = vpop.f32.mrb[36].mxu1  ;;  %9784 = vmatprep.subr.bf16.mxu1 %v13315_v36 }
 0x255   : > { %16593 = vst [vmem:[#allocation80_spill] sm:$0xff] %v13486_v15  ;;  %v13489_v17 = vpop.f32.mrb[37].mxu1 }
 0x256   : > { %16594 = vst [vmem:[#allocation81_spill] sm:$0xff] %v13489_v17  ;;  %v13492_v56 = vpop.f32.mrb[54].mxu0  ;;  %2831 = vmatmul.mubr.f32.gmra.mrb[110].mxu1 %v13253_v48 }
 0x257   : > { %16595 = vst [vmem:[#allocation82_spill] sm:$0xff] %v13492_v56  ;;  %v1374_v6 = vpop.f32.mrb[55].mxu0  ;;  %2836 = vmatprep.mubr.f32.mxu1 %v16489_v45  ;;  %9786 = vmatpush1.bf16.msra.mxu1 %v13330_v16  ;;  %v2714_v16 = vld [vmem:[%s16035_s6 + $0x30] sm:$0xff] }
 0x258   : > { %9852 = vmatprep.subr.bf16.mxu1 %v13397_v34 }
 0x25a   : > { %v13498_v3 = vpop.f32.mrb[56].mxu0  ;;  %2837 = vmatmul.mubr.f32.gmra.mrb[112].mxu1 %v13277_v59 }
 0x25b   : > { %16596 = vst [vmem:[#allocation83_spill] sm:$0xff] %v13498_v3  ;;  %v1379_v50 = vpop.f32.mrb[57].mxu0  ;;  %2842 = vmatprep.mubr.f32.mxu1 %v16489_v45 }
 0x25c   : > { %v2715_v50 = vld [vmem:[%s16035_s6 + $0x38] sm:$0xff] }
 0x25d   : > { %v13516_v15 = vpack.c.bf16 %v2715_v50, %v2714_v16 }
 0x25e   : > { %v13502_v46 = vpop.f32.mrb[58].mxu0  ;;  %v13504_v36 = vpop.f32.mrb[38].mxu1  ;;  %2843 = vmatmul.mubr.f32.gmra.mrb[114].mxu1 %v13305_v29 }
 0x25f   : > { %16597 = vst [vmem:[#allocation84_spill] sm:$0xff] %v13502_v46  ;;  %16598 = vst [vmem:[#allocation85_spill] sm:$0xff] %v13504_v36  ;;  %v1384_v6 = vpop.f32.mrb[59].mxu0  ;;  %v13507_v17 = vpop.f32.mrb[39].mxu1  ;;  %2848 = vmatprep.mubr.f32.mxu1 %v16489_v45  ;;  %9736 = vmatprep.subr.bf16.mxu0 %v13516_v15 }
 0x260   : > { %16599 = vst [vmem:[#allocation86_spill] sm:$0xff] %v13507_v17  ;;  %16600 = vst [vmem:[#allocation87_spill] sm:$0xff] %v13516_v15  ;;  %9738 = vmatpush3.bf16.msra.mxu0 %v13516_v15 }
 0x262   : > { %v13518_v18 = vpop.f32.mrb[60].mxu0  ;;  %2849 = vmatmul.mubr.f32.gmra.mrb[116].mxu1 %v13323_v61 }
 0x263   : > { %16601 = vst [vmem:[#allocation88_spill] sm:$0xff] %v13518_v18  ;;  %v1389_v6 = vpop.f32.mrb[61].mxu0  ;;  %2854 = vmatprep.mubr.f32.mxu1 %v16489_v45 }
 0x264   : > { %v2716_v6 = vld [vmem:[%s16035_s6 + $0x40] sm:$0xff] }
 0x265   : > { %v13524_v17 = vpop.f32.mrb[40].mxu1 }
 0x266   : > { %16602 = vst [vmem:[#allocation89_spill] sm:$0xff] %v13524_v17  ;;  %v13526_v36 = vpop.f32.mrb[62].mxu0  ;;  %v13528_v29 = vpop.f32.mrb[41].mxu1  ;;  %2855 = vmatmul.mubr.f32.gmra.mrb[118].mxu1 %v13335_v23 }
 0x267   : > { %16603 = vst [vmem:[#allocation90_spill] sm:$0xff] %v13526_v36  ;;  %16604 = vst [vmem:[#allocation91_spill] sm:$0xff] %v13528_v29  ;;  %v1394_v16 = vpop.f32.mrb[63].mxu0  ;;  %2860 = vmatprep.mubr.f32.mxu1 %v16489_v45 }
 0x268   : > { %v2717_v16 = vld [vmem:[%s16035_s6 + $0x48] sm:$0xff] }
 0x269   : > { %v13546_v17 = vpack.c.bf16 %v2717_v16, %v2716_v6  ;;  %v2718_v6 = vld [vmem:[%s16035_s6 + $0x50] sm:$0xff]  ;;  %v2719_v16 = vld [vmem:[%s16035_s6 + $0x58] sm:$0xff] }
 0x26a   : > { %2861 = vmatmul.mubr.f32.gmra.mrb[120].mxu1 %v13345_v37 }
 0x26b   : > { %2866 = vmatprep.mubr.f32.mxu1 %v16489_v45  ;;  %16606 = vst [vmem:[#allocation93_spill] sm:$0xff] %v13546_v17  ;;  %9740 = vmatprep.subr.bf16.mxu0 %v13546_v17 }
 0x26c   : > { %9742 = vmatpush3.bf16.msra.mxu0 %v13546_v17 }
 0x26e   : > { %2867 = vmatmul.mubr.f32.gmra.mrb[122].mxu1 %v13353_v9 }
 0x26f   : > { %v13535_v50 = vpop.f32.mrb[42].mxu1  ;;  %2872 = vmatprep.mubr.f32.mxu1 %v16489_v45 }
 0x270   : > { %16605 = vst [vmem:[#allocation92_spill] sm:$0xff] %v13535_v50  ;;  %v13544_v29 = vpop.f32.mrb[43].mxu1 }
 0x272   : > { %2873 = vmatmul.mubr.f32.gmra.mrb[124].mxu1 %v13361_v32 }
 0x273   : > { %2878 = vmatprep.mubr.f32.mxu1 %v16489_v45 }
 0x276   : > { %2879 = vmatmul.mubr.f32.gmra.mrb[126].mxu1 %v13367_v42  ;;  %v13568_v42 = vpack.c.bf16 %v2719_v16, %v2718_v6 }
 0x277   : > { %v13553_v9 = vpop.f32.mrb[44].mxu1  ;;  %2884 = vmatprep.mubr.f32.mxu1 %v16489_v45 }
 0x278   : > { %v13556_v50 = vpop.f32.mrb[45].mxu1  ;;  %16608 = vst [vmem:[#allocation95_spill] sm:$0xff] %v13568_v42  ;;  %9744 = vmatprep.subr.bf16.mxu0 %v13568_v42 }
 0x279   : > { %16607 = vst [vmem:[#allocation94_spill] sm:$0xff] %v13556_v50  ;;  %9746 = vmatpush3.bf16.msra.mxu0 %v13568_v42 }
 0x27a   : > { %2885 = vmatmul.mubr.f32.gmra.mrb[128].mxu1 %v13377_v7 }
 0x27b   : > { %2890 = vmatprep.mubr.f32.mxu1 %v16489_v45 }
 0x27e   : > { %2891 = vmatmul.mubr.f32.gmra.mrb[130].mxu1 %v13383_v52 }
 0x27f   : > { %2896 = vmatprep.mubr.f32.mxu1 %v16489_v45 }
 0x281   : > { %v13570_v32 = vpop.f32.mrb[46].mxu1 }
 0x282   : > { %v13572_v50 = vpop.f32.mrb[47].mxu1  ;;  %2897 = vmatmul.mubr.f32.gmra.mrb[132].mxu1 %v13399_v41 }
 0x283   : > { %2902 = vmatprep.mubr.f32.mxu1 %v16489_v45 }
 0x286   : > { %2903 = vmatmul.mubr.f32.gmra.mrb[134].mxu1 %v13409_v13 }
 0x287   : > { %2908 = vmatprep.mubr.f32.mxu1 %v16489_v45 }
 0x28a   : > { %2909 = vmatmul.mubr.f32.gmra.mrb[136].mxu1 %v13418_v20 }
 0x28b   : > { %v13581_v6 = vpop.f32.mrb[48].mxu1  ;;  %2914 = vmatprep.mubr.f32.mxu1 %v16489_v45 }
 0x28c   : > { %v13584_v16 = vpop.f32.mrb[49].mxu1 }
 0x28e   : > { %2915 = vmatmul.mubr.f32.gmra.mrb[138].mxu1 %v13424_v51 }
 0x28f   : > { %2920 = vmatprep.mubr.f32.mxu1 %v16489_v45 }
 0x292   : > { %v13588_v41 = vpop.f32.mrb[50].mxu1  ;;  %2921 = vmatmul.mubr.f32.gmra.mrb[140].mxu1 %v13436_v21  ;;  %v2720_v21 = vld [vmem:[%s16035_s6 + $0x60] sm:$0xff] }
 0x293   : > { %16609 = vst [vmem:[#allocation96_spill] sm:$0xff] %v13588_v41  ;;  %v13591_v52 = vpop.f32.mrb[51].mxu1  ;;  %2926 = vmatprep.mubr.f32.mxu1 %v16489_v45 }
 0x294   : > { %16610 = vst [vmem:[#allocation97_spill] sm:$0xff] %v13591_v52 }
 0x296   : > { %2927 = vmatmul.mubr.f32.gmra.mrb[142].mxu1 %v13450_v57  ;;  %v2721_v57 = vld [vmem:[%s16035_s6 + $0x68] sm:$0xff] }
 0x297   : > { %2932 = vmatprep.mubr.f32.mxu1 %v16489_v45  ;;  %v13610_v13 = vpack.c.bf16 %v2721_v57, %v2720_v21  ;;  %v2722_v21 = vld [vmem:[%s16035_s6 + $0x70] sm:$0xff]  ;;  %v2723_v57 = vld [vmem:[%s16035_s6 + $0x78] sm:$0xff] }
 0x299   : > { %16613 = vst [vmem:[#allocation100_spill] sm:$0xff] %v13610_v13  ;;  %9748 = vmatprep.subr.bf16.mxu0 %v13610_v13 }
 0x29a   : > { %2933 = vmatmul.mubr.f32.gmra.mrb[144].mxu1 %v13456_v35  ;;  %9750 = vmatpush3.bf16.msra.mxu0 %v13610_v13 }
 0x29b   : > { %2938 = vmatprep.mubr.f32.mxu1 %v16489_v45 }
 0x29c   : > { %v13598_v20 = vpop.f32.mrb[52].mxu1 }
 0x29d   : > { %16611 = vst [vmem:[#allocation98_spill] sm:$0xff] %v13598_v20  ;;  %v13600_v51 = vpop.f32.mrb[53].mxu1 }
 0x29e   : > { %16612 = vst [vmem:[#allocation99_spill] sm:$0xff] %v13600_v51  ;;  %2939 = vmatmul.mubr.f32.gmra.mrb[146].mxu1 %v13466_v22 }
 0x29f   : > { %2944 = vmatprep.mubr.f32.mxu1 %v16489_v45 }
 0x2a2   : > { %2945 = vmatmul.mubr.f32.gmra.mrb[148].mxu1 %v13480_v0  ;;  %v13630_v0 = vpack.c.bf16 %v2723_v57, %v2722_v21 }
 0x2a3   : > { %2950 = vmatprep.mubr.f32.mxu1 %v16489_v45 }
 0x2a4   : > { %v13615_v35 = vpop.f32.mrb[54].mxu1  ;;  %16616 = vst [vmem:[#allocation103_spill] sm:$0xff] %v13630_v0  ;;  %9752 = vmatprep.subr.bf16.mxu0 %v13630_v0 }
 0x2a5   : > { %16614 = vst [vmem:[#allocation101_spill] sm:$0xff] %v13615_v35  ;;  %v13618_v22 = vpop.f32.mrb[55].mxu1  ;;  %9754 = vmatpush3.bf16.msra.mxu0 %v13630_v0 }
 0x2a6   : > { %16615 = vst [vmem:[#allocation102_spill] sm:$0xff] %v13618_v22  ;;  %2951 = vmatmul.mubr.f32.gmra.mrb[150].mxu1 %v13492_v56  ;;  %9788 = vmatprep.subr.bf16.mxu0 %v13397_v34 }
 0x2a7   : > { %2956 = vmatprep.mubr.f32.mxu1 %v16489_v45 }
 0x2aa   : > { %2957 = vmatmul.mubr.f32.gmra.mrb[152].mxu1 %v13498_v3 }
 0x2ab   : > { %2962 = vmatprep.mubr.f32.mxu1 %v16489_v45 }
 0x2ae   : > { %v13632_v35 = vpop.f32.mrb[56].mxu1  ;;  %2963 = vmatmul.mubr.f32.gmra.mrb[154].mxu1 %v13502_v46 }
 0x2af   : > { %16617 = vst [vmem:[#allocation104_spill] sm:$0xff] %v13632_v35  ;;  %v13635_v56 = vpop.f32.mrb[57].mxu1  ;;  %2968 = vmatprep.mubr.f32.mxu1 %v16489_v45 }
 0x2b0   : > { %16618 = vst [vmem:[#allocation105_spill] sm:$0xff] %v13635_v56 }
 0x2b2   : > { %2969 = vmatmul.mubr.f32.gmra.mrb[156].mxu1 %v13518_v18 }
 0x2b3   : > { %2974 = vmatprep.mubr.f32.mxu1 %v16489_v45 }
 0x2b6   : > { %2975 = vmatmul.mubr.f32.gmra.mrb[158].mxu1 %v13526_v36 }
 0x2b7   : > { %3846 = vmatprep.mubr.f32.mxu1 %v16489_v45 }
 0x2b8   : > { %v13645_v21 = vpop.f32.mrb[58].mxu1 }
 0x2b9   : > { %16619 = vst [vmem:[#allocation106_spill] sm:$0xff] %v13645_v21  ;;  %v13647_v57 = vpop.f32.mrb[59].mxu1 }
 0x2ba   : > { %16620 = vst [vmem:[#allocation107_spill] sm:$0xff] %v13647_v57 }
 0x2bf   : > { %v13649_v46 = vpop.f32.mrb[60].mxu1 }
 0x2c0   : > { %16621 = vst [vmem:[#allocation108_spill] sm:$0xff] %v13649_v46  ;;  %v13651_v3 = vpop.f32.mrb[61].mxu1 }
 0x2c1   : > { %16622 = vst [vmem:[#allocation109_spill] sm:$0xff] %v13651_v3 }
 0x2c9   : > { %v13653_v56 = vpop.f32.mrb[62].mxu1 }
 0x2ca   : > { %16623 = vst [vmem:[#allocation110_spill] sm:$0xff] %v13653_v56  ;;  %v13655_v35 = vpop.f32.mrb[63].mxu1 }
 0x2cb   : > { %16624 = vst [vmem:[#allocation111_spill] sm:$0xff] %v13655_v35 }
 0x2cd   : > { %v13657_v22 = vpop.f32.mrb[64].mxu1 }
 0x2ce   : > { %16625 = vst [vmem:[#allocation112_spill] sm:$0xff] %v13657_v22  ;;  %v13659_v18 = vpop.f32.mrb[65].mxu1 }
 0x2cf   : > { %16626 = vst [vmem:[#allocation113_spill] sm:$0xff] %v13659_v18 }
 0x2d1   : > { %v13661_v51 = vpop.f32.mrb[66].mxu1 }
 0x2d2   : > { %16627 = vst [vmem:[#allocation114_spill] sm:$0xff] %v13661_v51  ;;  %v13663_v36 = vpop.f32.mrb[67].mxu1 }
 0x2d3   : > { %16628 = vst [vmem:[#allocation115_spill] sm:$0xff] %v13663_v36 }
 0x2d5   : > { %v13665_v45 = vpop.f32.mrb[68].mxu1 }
 0x2d6   : > { %16629 = vst [vmem:[#allocation116_spill] sm:$0xff] %v13665_v45  ;;  %v13667_v21 = vpop.f32.mrb[69].mxu1  ;;  %v16639_v45 = vld [vmem:[#allocation19_spill] sm:$0xff] }
 0x2d7   : > { %16630 = vst [vmem:[#allocation117_spill] sm:$0xff] %v13667_v21  ;;  %v2080_v21 = vld [vmem:[%s16037_s8] sm:$0x7] }
 0x2d9   : > { %v13669_v57 = vpop.f32.mrb[70].mxu1 }
 0x2da   : > { %16631 = vst [vmem:[#allocation118_spill] sm:$0xff] %v13669_v57  ;;  %v13671_v46 = vpop.f32.mrb[71].mxu1  ;;  %v16640_v57 = vsub.s32 2, %v16639_v45 }
 0x2db   : > { %16632 = vst [vmem:[#allocation119_spill] sm:$0xff] %v13671_v46 }
 0x2dc   : > { %v13690_v36 = vrot.slane %v2080_v21, %v16640_v57 }
 0x2dd   : > { %v13673_v3 = vpop.f32.mrb[72].mxu1 }
 0x2de   : > { %16633 = vst [vmem:[#allocation120_spill] sm:$0xff] %v13673_v3  ;;  %v13675_v56 = vpop.f32.mrb[73].mxu1 }
 0x2df   : > { %16634 = vst [vmem:[#allocation121_spill] sm:$0xff] %v13675_v56 }
 0x2e1   : > { %v13677_v35 = vpop.f32.mrb[74].mxu1 }
 0x2e2   : > { %16635 = vst [vmem:[#allocation122_spill] sm:$0xff] %v13677_v35  ;;  %v13679_v22 = vpop.f32.mrb[75].mxu1 }
 0x2e3   : > { %16636 = vst [vmem:[#allocation123_spill] sm:$0xff] %v13679_v22 }
 0x2e5   : > { %v13681_v18 = vpop.f32.mrb[76].mxu1 }
 0x2e6   : > { %16637 = vst [vmem:[#allocation124_spill] sm:$0xff] %v13681_v18  ;;  %v13683_v51 = vpop.f32.mrb[77].mxu1 }
 0x2e7   : > { %16638 = vst [vmem:[#allocation125_spill] sm:$0xff] %v13683_v51 }
 0x2e9   : > { %v9018_v46 = vpop.f32.mrb[78].mxu1 }
 0x2ea   : > { %v13693_v3 = vadd.f32 %v9018_v46, %v13690_v36  ;;  %v13695_v56 = vpop.f32.mrb[79].mxu1 }
 0x2eb   : > { %16642 = vst [vmem:[#allocation126_spill] sm:$0xff] %v13695_v56 }
 0x2ec   : > { %16641 = vst [vmem:[#allocation19_spill] sm:$0xff] %v13693_v3 }
 0x2ed   : > { %v9021_v35 = vpop.f32.mrb[80].mxu1 }
 0x2ee   : > { %v13698_v22 = vadd.f32 %v9021_v35, %v13690_v36  ;;  %v2597_v18 = vpop.f32.mrb[81].mxu1 }
 0x2ef   : > { %v13701_v51 = vadd.f32 %v2597_v18, %v13690_v36 }
 0x2f0   : > { %16643 = vst [vmem:[#allocation127_spill] sm:$0xff] %v13698_v22 }
 0x2f1   : > { %16644 = vst [vmem:[#allocation128_spill] sm:$0xff] %v13701_v51  ;;  %v9024_v20 = vpop.f32.mrb[82].mxu1 }
 0x2f2   : > { %v13704_v52 = vadd.f32 %v9024_v20, %v13690_v36  ;;  %v2607_v57 = vpop.f32.mrb[83].mxu1 }
 0x2f3   : > { %v13707_v41 = vadd.f32 %v2607_v57, %v13690_v36 }
 0x2f4   : > { %16645 = vst [vmem:[#allocation129_spill] sm:$0xff] %v13704_v52 }
 0x2f5   : > { %16646 = vst [vmem:[#allocation130_spill] sm:$0xff] %v13707_v41  ;;  %v9027_v46 = vpop.f32.mrb[84].mxu1 }
 0x2f6   : > { %v13710_v3 = vadd.f32 %v9027_v46, %v13690_v36  ;;  %v2617_v56 = vpop.f32.mrb[85].mxu1 }
 0x2f7   : > { %v13713_v35 = vadd.f32 %v2617_v56, %v13690_v36 }
 0x2f8   : > { %16647 = vst [vmem:[#allocation131_spill] sm:$0xff] %v13710_v3 }
 0x2f9   : > { %16648 = vst [vmem:[#allocation132_spill] sm:$0xff] %v13713_v35  ;;  %v9030_v22 = vpop.f32.mrb[86].mxu1 }
 0x2fa   : > { %v13716_v18 = vadd.f32 %v9030_v22, %v13690_v36  ;;  %v2627_v51 = vpop.f32.mrb[87].mxu1 }
 0x2fb   : > { %v13719_v20 = vadd.f32 %v2627_v51, %v13690_v36 }
 0x2fc   : > { %16649 = vst [vmem:[#allocation133_spill] sm:$0xff] %v13716_v18 }
 0x2fd   : > { %16650 = vst [vmem:[#allocation134_spill] sm:$0xff] %v13719_v20  ;;  %v9033_v52 = vpop.f32.mrb[88].mxu1 }
 0x2fe   : > { %v13722_v57 = vadd.f32 %v9033_v52, %v13690_v36  ;;  %v2637_v41 = vpop.f32.mrb[89].mxu1 }
 0x2ff   : > { %v13725_v46 = vadd.f32 %v2637_v41, %v13690_v36 }
 0x300   : > { %16651 = vst [vmem:[#allocation135_spill] sm:$0xff] %v13722_v57  ;;  %v16657_v57 = vsub.s32 0, %v16639_v45 }
 0x301   : > { %16652 = vst [vmem:[#allocation136_spill] sm:$0xff] %v13725_v46  ;;  %v9036_v3 = vpop.f32.mrb[90].mxu1  ;;  %v16658_v46 = vsub.s32 1, %v16639_v45 }
 0x302   : > { %v13728_v56 = vadd.f32 %v9036_v3, %v13690_v36  ;;  %v2647_v35 = vpop.f32.mrb[91].mxu1  ;;  %v13741_v41 = vrot.slane %v2080_v21, %v16657_v57 }
 0x303   : > { %v13731_v22 = vadd.f32 %v2647_v35, %v13690_v36  ;;  %v13745_v3 = vrot.slane %v2080_v21, %v16658_v46 }
 0x304   : > { %16653 = vst [vmem:[#allocation137_spill] sm:$0xff] %v13728_v56 }
 0x305   : > { %16654 = vst [vmem:[#allocation138_spill] sm:$0xff] %v13731_v22  ;;  %v9039_v18 = vpop.f32.mrb[92].mxu1  ;;  %v13759_v57 = vadd.f32 %v13050_v14, %v13745_v3 }
 0x306   : > { %v13734_v51 = vadd.f32 %v9039_v18, %v13690_v36  ;;  %v2657_v20 = vpop.f32.mrb[93].mxu1 }
 0x307   : > { %v13737_v52 = vadd.f32 %v2657_v20, %v13690_v36  ;;  %v13755_v20 = vadd.f32 %v13048_v5, %v13741_v41  ;;  %16662 = vst [vmem:[#allocation144_spill] sm:$0xff] %v13759_v57 }
 0x308   : > { %16655 = vst [vmem:[#allocation139_spill] sm:$0xff] %v13734_v51 }
 0x309   : > { %16656 = vst [vmem:[#allocation140_spill] sm:$0xff] %v13737_v52  ;;  %v9042_v56 = vpop.f32.mrb[94].mxu1  ;;  %16661 = vst [vmem:[#allocation143_spill] sm:$0xff] %v13755_v20 }
 0x30a   : > { %v13748_v35 = vadd.f32 %v9042_v56, %v13690_v36  ;;  %v2667_v22 = vpop.f32.mrb[95].mxu1  ;;  %v13765_v56 = vadd.f32 %v13062_v31, %v13741_v41 }
 0x30b   : > { %v13751_v18 = vadd.f32 %v2667_v22, %v13690_v36 }
 0x30c   : > { %16659 = vst [vmem:[#allocation141_spill] sm:$0xff] %v13748_v35  ;;  %16663 = vst [vmem:[#allocation145_spill] sm:$0xff] %v13765_v56 }
 0x30d   : > { %16660 = vst [vmem:[#allocation142_spill] sm:$0xff] %v13751_v18  ;;  %v2790_v52 = vpop.f32.mrb[96].mxu1  ;;  %v13769_v18 = vadd.f32 %v13064_v10, %v13745_v3 }
 0x30e   : > { %v2791_v45 = vadd.f32 %v2790_v52, %v13755_v20  ;;  %v2792_v21 = vpop.f32.mrb[97].mxu1 }
 0x30f   : > { %v2793_v46 = vadd.f32 %v2792_v21, %v13759_v57  ;;  %16664 = vst [vmem:[#allocation146_spill] sm:$0xff] %v13769_v18  ;;  %v13775_v21 = vadd.f32 %v13097_v26, %v13741_v41 }
 0x310   : > { %v8299_v22 = vmul.f32 -1.442695, %v2791_v45  ;;  %v13779_v45 = vadd.f32 %v13099_v25, %v13745_v3 }
 0x311   : > { %v8300_v5 = vmul.f32 -1.442695, %v2793_v46  ;;  %v2796_v35 = vpop.f32.mrb[98].mxu1  ;;  %16665 = vst [vmem:[#allocation147_spill] sm:$0xff] %v13775_v21 }
 0x312   : > { %10195 = vpow2.f32 %v8299_v22  ;;  %v2797_v14 = vadd.f32 %v2796_v35, %v13765_v56  ;;  %v2798_v51 = vpop.f32.mrb[99].mxu1  ;;  %16666 = vst [vmem:[#allocation148_spill] sm:$0xff] %v13779_v45 }
 0x313   : > { %10197 = vpow2.f32 %v8300_v5  ;;  %v2799_v52 = vadd.f32 %v2798_v51, %v13769_v18  ;;  %v13785_v51 = vadd.f32 %v13106_v49, %v13741_v41  ;;  %v13789_v5 = vadd.f32 %v13108_v8, %v13745_v3 }
 0x314   : > { %v8301_v31 = vmul.f32 -1.442695, %v2797_v14  ;;  %v13799_v8 = vadd.f32 %v13120_v30, %v13745_v3 }
 0x315   : > { %v8302_v10 = vmul.f32 -1.442695, %v2799_v52  ;;  %v2802_v20 = vpop.f32.mrb[100].mxu1  ;;  %16667 = vst [vmem:[#allocation149_spill] sm:$0xff] %v13785_v51  ;;  %16668 = vst [vmem:[#allocation150_spill] sm:$0xff] %v13789_v5 }
 0x316   : > { %10199 = vpow2.f32 %v8301_v31  ;;  %v2803_v46 = vadd.f32 %v2802_v20, %v13775_v21  ;;  %v2804_v22 = vpop.f32.mrb[101].mxu1  ;;  %16670 = vst [vmem:[#allocation152_spill] sm:$0xff] %v13799_v8 }
 0x317   : > { %10201 = vpow2.f32 %v8302_v10  ;;  %v2805_v35 = vadd.f32 %v2804_v22, %v13779_v45  ;;  %v13795_v22 = vadd.f32 %v13117_v63, %v13741_v41  ;;  %v13805_v63 = vadd.f32 %v13124_v55, %v13741_v41 }
 0x318   : > { %v8303_v26 = vmul.f32 -1.442695, %v2803_v46 }
 0x319   : > { %v8304_v25 = vmul.f32 -1.442695, %v2805_v35  ;;  %v2808_v14 = vpop.f32.mrb[102].mxu1  ;;  %16669 = vst [vmem:[#allocation151_spill] sm:$0xff] %v13795_v22  ;;  %16671 = vst [vmem:[#allocation153_spill] sm:$0xff] %v13805_v63 }
 0x31a   : > { %10203 = vpow2.f32 %v8303_v26  ;;  %v2809_v52 = vadd.f32 %v2808_v14, %v13785_v51  ;;  %v2810_v31 = vpop.f32.mrb[103].mxu1 }
 0x31b   : > { %10205 = vpow2.f32 %v8304_v25  ;;  %v2811_v20 = vadd.f32 %v2810_v31, %v13789_v5 }
 0x31c   : > { %v10196_v10 = vpop.eup %10195  ;;  %v8305_v49 = vmul.f32 -1.442695, %v2809_v52 }
 0x31d   : > { %v10198_v46 = vpop.eup %10197  ;;  %v3173_v35 = vadd.f32 1.0, %v10196_v10  ;;  %v8306_v21 = vmul.f32 -1.442695, %v2811_v20  ;;  %v2814_v26 = vpop.f32.mrb[104].mxu1  ;;  %v16672_v10 = vld [vmem:[#allocation36_spill] sm:$0xff] }
 0x31e   : > { %v3174_v56 = vadd.f32 1.0, %v10198_v46  ;;  %10207 = vpow2.f32 %v8305_v49  ;;  %v2815_v25 = vadd.f32 %v2814_v26, %v13795_v22  ;;  %v2816_v14 = vpop.f32.mrb[105].mxu1  ;;  %v13809_v20 = vadd.f32 %v16672_v10, %v13745_v3 }
 0x31f   : > { %10209 = vrcp.f32 %v3173_v35  ;;  %v2817_v31 = vadd.f32 %v2816_v14, %v13799_v8 }
 0x320   : > { %v10200_v51 = vpop.eup %10199  ;;  %10211 = vrcp.f32 %v3174_v56  ;;  %v8307_v52 = vmul.f32 -1.442695, %v2815_v25  ;;  %16673 = vst [vmem:[#allocation36_spill] sm:$0xff] %v13809_v20  ;;  %v16674_v56 = vld [vmem:[#allocation37_spill] sm:$0xff] }
 0x321   : > { %v10202_v30 = vpop.eup %10201  ;;  %v3175_v46 = vadd.f32 1.0, %v10200_v51  ;;  %10213 = vpow2.f32 %v8306_v21  ;;  %v8308_v49 = vmul.f32 -1.442695, %v2817_v31  ;;  %v2820_v26 = vpop.f32.mrb[106].mxu1  ;;  %v13815_v25 = vadd.f32 %v16674_v56, %v13741_v41  ;;  %v16676_v21 = vld [vmem:[#allocation39_spill] sm:$0xff] }
 0x322   : > { %v3176_v22 = vadd.f32 1.0, %v10202_v30  ;;  %10215 = vpow2.f32 %v8307_v52  ;;  %v2821_v35 = vadd.f32 %v2820_v26, %v13805_v63  ;;  %v2822_v14 = vpop.f32.mrb[107].mxu1  ;;  %v13819_v51 = vadd.f32 %v16676_v21, %v13745_v3 }
 0x323   : > { %10217 = vrcp.f32 %v3175_v46  ;;  %v2823_v55 = vadd.f32 %v2822_v14, %v13809_v20  ;;  %16675 = vst [vmem:[#allocation37_spill] sm:$0xff] %v13815_v25 }
 0x324   : > { %v10204_v8 = vpop.eup %10203  ;;  %10219 = vrcp.f32 %v3176_v22  ;;  %v8309_v10 = vmul.f32 -1.442695, %v2821_v35  ;;  %16677 = vst [vmem:[#allocation39_spill] sm:$0xff] %v13819_v51  ;;  %v16678_v22 = vld [vmem:[#allocation41_spill] sm:$0xff] }
 0x325   : > { %v10206_v5 = vpop.eup %10205  ;;  %v3177_v31 = vadd.f32 1.0, %v10204_v8  ;;  %10221 = vpow2.f32 %v8308_v49  ;;  %v8310_v52 = vmul.f32 -1.442695, %v2823_v55  ;;  %v2826_v30 = vpop.f32.mrb[108].mxu1  ;;  %v13825_v35 = vadd.f32 %v16678_v22, %v13741_v41  ;;  %v16680_v8 = vld [vmem:[#allocation43_spill] sm:$0xff] }
 0x326   : > { %v3178_v26 = vadd.f32 1.0, %v10206_v5  ;;  %10223 = vpow2.f32 %v8309_v10  ;;  %v2827_v46 = vadd.f32 %v2826_v30, %v13815_v25  ;;  %v2828_v14 = vpop.f32.mrb[109].mxu1  ;;  %v13831_v49 = vadd.f32 %v16680_v8, %v13745_v3 }
 0x327   : > { %10225 = vrcp.f32 %v3177_v31  ;;  %v2829_v56 = vadd.f32 %v2828_v14, %v13819_v51  ;;  %16679 = vst [vmem:[#allocation41_spill] sm:$0xff] %v13825_v35 }
 0x328   : > { %v10208_v63 = vpop.eup %10207  ;;  %10227 = vrcp.f32 %v3178_v26  ;;  %v8311_v21 = vmul.f32 -1.442695, %v2827_v46  ;;  %16681 = vst [vmem:[#allocation43_spill] sm:$0xff] %v13831_v49  ;;  %v16682_v26 = vld [vmem:[#allocation45_spill] sm:$0xff] }
 0x329   : > { %v13827_v20 = vpop.eup %10209  ;;  %v3179_v5 = vadd.f32 1.0, %v10208_v63  ;;  %10229 = vpow2.f32 %v8310_v52  ;;  %v8312_v55 = vmul.f32 -1.442695, %v2829_v56  ;;  %v2832_v10 = vpop.f32.mrb[110].mxu1  ;;  %v13837_v46 = vadd.f32 %v16682_v26, %v13741_v41 }
 0x32a   : > { %v10212_v31 = vpop.eup %10211  ;;  %10231 = vpow2.f32 %v8311_v21  ;;  %v2833_v30 = vadd.f32 %v2832_v10, %v13825_v35  ;;  %v2834_v14 = vpop.f32.mrb[111].mxu1  ;;  %v3654_v22 = vsub.f32 1.0, %v13827_v20  ;;  %v16685_v35 = vld [vmem:[#allocation47_spill] sm:$0xff] }
 0x32b   : > { %v10214_v25 = vpop.eup %10213  ;;  %16683 = vst [vmem:[#allocation45_spill] sm:$0xff] %v13837_v46  ;;  %10233 = vrcp.f32 %v3179_v5  ;;  %v2835_v8 = vadd.f32 %v2834_v14, %v13831_v49  ;;  %v3365_v63 = vmul.f32 %v10212_v31, %v13104_v40  ;;  %v13848_v45 = vadd.f32 %v16685_v35, %v13745_v3 }
 0x32c   : > { %v10216_v52 = vpop.eup %10215  ;;  %v3180_v56 = vadd.f32 1.0, %v10214_v25  ;;  %10235 = vpow2.f32 %v8312_v55  ;;  %v8313_v51 = vmul.f32 -1.442695, %v2833_v30  ;;  %v13842_v21 = vmul.f32 %v3654_v22, %v13104_v40  ;;  %v16687_v40 = vld [vmem:[#allocation50_spill] sm:$0xff] }
 0x32d   : > { %v13844_v10 = vpop.eup %10217  ;;  %16686 = vst [vmem:[#allocation47_spill] sm:$0xff] %v13848_v45  ;;  %v3181_v26 = vadd.f32 1.0, %v10216_v52  ;;  %v8314_v18 = vmul.f32 -1.442695, %v2835_v8  ;;  %v2838_v5 = vpop.f32.mrb[112].mxu1  ;;  %9075 = vmatprep.mubr.f32.mxu0 %v3365_v63  ;;  %v13854_v22 = vadd.f32 %v16687_v40, %v13741_v41 }
 0x32e   : > { %16684 = vst [vmem:[#allocation154_spill] sm:$0xff] %v13842_v21  ;;  %v10220_v14 = vpop.eup %10219  ;;  %10237 = vrcp.f32 %v3180_v56  ;;  %v2839_v31 = vadd.f32 %v2838_v5, %v13837_v46  ;;  %v2840_v25 = vpop.f32.mrb[113].mxu1  ;;  %v3655_v55 = vsub.f32 1.0, %v13844_v10  ;;  %v16689_v46 = vld [vmem:[#allocation52_spill] sm:$0xff] }
 0x32f   : > { %v10222_v30 = vpop.eup %10221  ;;  %16688 = vst [vmem:[#allocation50_spill] sm:$0xff] %v13854_v22  ;;  %10239 = vrcp.f32 %v3181_v26  ;;  %v2841_v35 = vadd.f32 %v2840_v25, %v13848_v45  ;;  %v3366_v52 = vmul.f32 %v10220_v14, %v13115_v28  ;;  %v13865_v57 = vadd.f32 %v16689_v46, %v13745_v3 }
 0x330   : > { %v10224_v8 = vpop.eup %10223  ;;  %v3182_v49 = vadd.f32 1.0, %v10222_v30  ;;  %10241 = vpow2.f32 %v8313_v51  ;;  %v8315_v63 = vmul.f32 -1.442695, %v2839_v31  ;;  %v13859_v56 = vmul.f32 %v3655_v55, %v13115_v28  ;;  %v16691_v55 = vld [vmem:[#allocation55_spill] sm:$0xff] }
 0x331   : > { %v13861_v5 = vpop.eup %10225  ;;  %16690 = vst [vmem:[#allocation52_spill] sm:$0xff] %v13865_v57  ;;  %v3183_v40 = vadd.f32 1.0, %v10224_v8  ;;  %10243 = vpow2.f32 %v8314_v18  ;;  %v8316_v26 = vmul.f32 -1.442695, %v2841_v35  ;;  %v2844_v21 = vpop.f32.mrb[114].mxu1  ;;  %9076 = vmatmul.mubr.f32.vlgmr.msra.gmra.mrb[64].mxu0 %v3366_v52  ;;  %v13872_v30 = vadd.f32 %v16691_v55, %v13741_v41 }
 0x332   : > { %v10228_v25 = vpop.eup %10227  ;;  %10245 = vrcp.f32 %v3182_v49  ;;  %v2845_v14 = vadd.f32 %v2844_v21, %v13854_v22  ;;  %v2846_v51 = vpop.f32.mrb[115].mxu1  ;;  %v3656_v31 = vsub.f32 1.0, %v13861_v5  ;;  %9790 = vmatpush3.bf16.msra.mxu0 %v13397_v34  ;;  %v16693_v22 = vld [vmem:[#allocation57_spill] sm:$0xff] }
 0x333   : > { %v10230_v28 = vpop.eup %10229  ;;  %16692 = vst [vmem:[#allocation55_spill] sm:$0xff] %v13872_v30  ;;  %10247 = vrcp.f32 %v3183_v40  ;;  %v2847_v18 = vadd.f32 %v2846_v51, %v13865_v57  ;;  %v3367_v46 = vmul.f32 %v10228_v25, %v13122_v24  ;;  %9792 = vmatprep.subr.bf16.mxu0 %v13441_v43  ;;  %v13884_v55 = vadd.f32 %v16693_v22, %v13745_v3 }
 0x334   : > { %v10232_v49 = vpop.eup %10231  ;;  %v3184_v35 = vadd.f32 1.0, %v10230_v28  ;;  %10249 = vpow2.f32 %v8315_v63  ;;  %v8317_v21 = vmul.f32 -1.442695, %v2845_v14  ;;  %v13878_v52 = vmul.f32 %v3656_v31, %v13122_v24 }
 0x335   : > { %v13880_v8 = vpop.eup %10233  ;;  %16694 = vst [vmem:[#allocation57_spill] sm:$0xff] %v13884_v55  ;;  %v3185_v40 = vadd.f32 1.0, %v10232_v49  ;;  %10251 = vpow2.f32 %v8316_v26  ;;  %v2850_v51 = vpop.f32.mrb[116].mxu1  ;;  %9078 = vmatprep.mubr.f32.mxu0 %v3367_v46  ;;  %v8318_v57 = vmul.f32 -1.442695, %v2847_v18  ;;  %v13893_v26 = vadd.f32 %v13333_v62, %v13741_v41 }
 0x336   : > { %v10236_v25 = vpop.eup %10235  ;;  %10253 = vrcp.f32 %v3184_v35  ;;  %v2851_v28 = vadd.f32 %v2850_v51, %v13872_v30  ;;  %v2852_v63 = vpop.f32.mrb[117].mxu1  ;;  %v3657_v14 = vsub.f32 1.0, %v13880_v8  ;;  %9794 = vmatpush3.bf16.msra.mxu0 %v13441_v43  ;;  %v13902_v35 = vadd.f32 %v13337_v38, %v13745_v3 }
 0x337   : > { %10255 = vrcp.f32 %v3185_v40  ;;  %v3186_v24 = vadd.f32 1.0, %v10236_v25  ;;  %v2853_v31 = vadd.f32 %v2852_v63, %v13884_v55  ;;  %9796 = vmatprep.subr.bf16.mxu0 %v13477_v39  ;;  %16695 = vst [vmem:[#allocation155_spill] sm:$0xff] %v13893_v26  ;;  %v13910_v30 = vadd.f32 %v13351_v47, %v13741_v41 }
 0x338   : > { %v10238_v22 = vpop.eup %10237  ;;  %10257 = vpow2.f32 %v8317_v21  ;;  %v8319_v18 = vmul.f32 -1.442695, %v2851_v28  ;;  %v13896_v46 = vmul.f32 %v3657_v14, %v13143_v60  ;;  %16696 = vst [vmem:[#allocation156_spill] sm:$0xff] %v13902_v35  ;;  %v13921_v47 = vadd.f32 %v13355_v11, %v13745_v3 }
 0x339   : > { %v13898_v49 = vpop.eup %10239  ;;  %10259 = vrcp.f32 %v3186_v24  ;;  %v8320_v40 = vmul.f32 -1.442695, %v2853_v31  ;;  %v2856_v51 = vpop.f32.mrb[118].mxu1  ;;  %v3368_v25 = vmul.f32 %v10238_v22, %v13143_v60  ;;  %16697 = vst [vmem:[#allocation157_spill] sm:$0xff] %v13910_v30 }
 0x33a   : > { %v10242_v63 = vpop.eup %10241  ;;  %10261 = vpow2.f32 %v8318_v57  ;;  %v2857_v62 = vadd.f32 %v2856_v51, %v13893_v26  ;;  %v2858_v21 = vpop.f32.mrb[119].mxu1  ;;  %v3658_v28 = vsub.f32 1.0, %v13898_v49  ;;  %9798 = vmatpush3.bf16.msra.mxu0 %v13477_v39  ;;  %16698 = vst [vmem:[#allocation158_spill] sm:$0xff] %v13921_v47  ;;  %v13929_v26 = vadd.f32 %v13373_v44, %v13741_v41 }
 0x33b   : > { %v10244_v14 = vpop.eup %10243  ;;  %v3187_v38 = vadd.f32 1.0, %v10242_v63  ;;  %10263 = vpow2.f32 %v8319_v18  ;;  %9079 = vmatmul.mubr.f32.gmra.mrb[66].mxu0 %v3368_v25  ;;  %v2859_v24 = vadd.f32 %v2858_v21, %v13902_v35  ;;  %9800 = vmatprep.subr.bf16.mxu0 %v13516_v15  ;;  %v13940_v44 = vadd.f32 %v13375_v12, %v13745_v3 }
 0x33c   : > { %v10246_v60 = vpop.eup %10245  ;;  %v3188_v57 = vadd.f32 1.0, %v10244_v14  ;;  %10265 = vpow2.f32 %v8320_v40  ;;  %v8321_v31 = vmul.f32 -1.442695, %v2857_v62  ;;  %v13915_v22 = vmul.f32 %v3658_v28, %v13169_v1  ;;  %16699 = vst [vmem:[#allocation159_spill] sm:$0xff] %v13929_v26 }
 0x33d   : > { %v13917_v51 = vpop.eup %10247  ;;  %10267 = vrcp.f32 %v3187_v38  ;;  %v8322_v18 = vmul.f32 -1.442695, %v2859_v24  ;;  %v2862_v25 = vpop.f32.mrb[120].mxu1  ;;  %v3369_v63 = vmul.f32 %v10246_v60, %v13169_v1  ;;  %16700 = vst [vmem:[#allocation160_spill] sm:$0xff] %v13940_v44 }
 0x33e   : > { %v10250_v21 = vpop.eup %10249  ;;  %10269 = vrcp.f32 %v3188_v57  ;;  %v2863_v14 = vadd.f32 %v2862_v25, %v13910_v30  ;;  %v2864_v40 = vpop.f32.mrb[121].mxu1  ;;  %v3659_v62 = vsub.f32 1.0, %v13917_v51  ;;  %9802 = vmatpush3.bf16.msra.mxu0 %v13516_v15  ;;  %v13948_v30 = vadd.f32 %v13395_v58, %v13741_v41 }
 0x33f   : > { %v10252_v28 = vpop.eup %10251  ;;  %v3189_v11 = vadd.f32 1.0, %v10250_v21  ;;  %10271 = vpow2.f32 %v8321_v31  ;;  %9081 = vmatprep.mubr.f32.mxu0 %v3369_v63  ;;  %v2865_v38 = vadd.f32 %v2864_v40, %v13921_v47  ;;  %9804 = vmatprep.subr.bf16.mxu0 %v13546_v17  ;;  %v13958_v58 = vadd.f32 %v13401_v27, %v13745_v3  ;;  %v16713_v47 = vld [vmem:[#allocation80_spill] sm:$0xff] }
 0x340   : > { %v10254_v1 = vpop.eup %10253  ;;  %v3190_v24 = vadd.f32 1.0, %v10252_v28  ;;  %10273 = vpow2.f32 %v8322_v18  ;;  %v8323_v60 = vmul.f32 -1.442695, %v2863_v14  ;;  %v13934_v57 = vmul.f32 %v3659_v62, %v13197_v53  ;;  %16701 = vst [vmem:[#allocation161_spill] sm:$0xff] %v13948_v30 }
 0x341   : > { %v13936_v25 = vpop.eup %10255  ;;  %10275 = vrcp.f32 %v3189_v11  ;;  %v8324_v31 = vmul.f32 -1.442695, %v2865_v38  ;;  %v2868_v63 = vpop.f32.mrb[122].mxu1  ;;  %v3370_v21 = vmul.f32 %v10254_v1, %v13197_v53  ;;  %16702 = vst [vmem:[#allocation162_spill] sm:$0xff] %v13958_v58 }
 0x342   : > { %v10258_v40 = vpop.eup %10257  ;;  %10277 = vrcp.f32 %v3190_v24  ;;  %v2869_v28 = vadd.f32 %v2868_v63, %v13929_v26  ;;  %v2870_v18 = vpop.f32.mrb[123].mxu1  ;;  %v3660_v14 = vsub.f32 1.0, %v13936_v25  ;;  %9806 = vmatpush3.bf16.msra.mxu0 %v13546_v17 }
 0x343   : > { %v10260_v62 = vpop.eup %10259  ;;  %v3191_v12 = vadd.f32 1.0, %v10258_v40  ;;  %10279 = vpow2.f32 %v8323_v60  ;;  %9082 = vmatmul.mubr.f32.gmra.mrb[68].mxu0 %v3370_v21  ;;  %v2871_v11 = vadd.f32 %v2870_v18, %v13940_v44  ;;  %9808 = vmatprep.subr.bf16.mxu0 %v13568_v42 }
 0x344   : > { %v10262_v53 = vpop.eup %10261  ;;  %10281 = vpow2.f32 %v8324_v31  ;;  %v8325_v38 = vmul.f32 -1.442695, %v2869_v28  ;;  %v3371_v1 = vmul.f32 %v10260_v62, %v13225_v19  ;;  %v13954_v24 = vmul.f32 %v3660_v14, %v13225_v19 }
 0x345   : > { %v10264_v63 = vpop.eup %10263  ;;  %10283 = vrcp.f32 %v3191_v12  ;;  %v3192_v60 = vadd.f32 1.0, %v10262_v53  ;;  %v2874_v21 = vpop.f32.mrb[124].mxu1  ;;  %v8326_v26 = vmul.f32 -1.442695, %v2871_v11  ;;  %v13968_v12 = vadd.f32 %v13414_v33, %v13741_v41 }
 0x346   : > { %v10266_v40 = vpop.eup %10265  ;;  %v3193_v18 = vadd.f32 1.0, %v10264_v63  ;;  %10285 = vpow2.f32 %v8325_v38  ;;  %v2875_v31 = vadd.f32 %v2874_v21, %v13948_v30  ;;  %9084 = vmatprep.mubr.f32.mxu0 %v3371_v1  ;;  %v2876_v28 = vpop.f32.mrb[125].mxu1  ;;  %9810 = vmatpush3.bf16.msra.mxu0 %v13568_v42  ;;  %v13973_v1 = vadd.f32 %v13416_v2, %v13745_v3 }
 0x347   : > { %v13962_v19 = vpop.eup %10267  ;;  %10287 = vrcp.f32 %v3192_v60  ;;  %v3194_v14 = vadd.f32 1.0, %v10266_v40  ;;  %v2877_v27 = vadd.f32 %v2876_v28, %v13958_v58  ;;  %9812 = vmatprep.subr.bf16.mxu0 %v13610_v13  ;;  %16703 = vst [vmem:[#allocation163_spill] sm:$0xff] %v13968_v12 }
 0x348   : > { %v10270_v62 = vpop.eup %10269  ;;  %10289 = vrcp.f32 %v3193_v18  ;;  %v8327_v11 = vmul.f32 -1.442695, %v2875_v31  ;;  %v3661_v53 = vsub.f32 1.0, %v13962_v19  ;;  %16704 = vst [vmem:[#allocation164_spill] sm:$0xff] %v13973_v1 }
 0x349   : > { %v10272_v38 = vpop.eup %10271  ;;  %10291 = vrcp.f32 %v3194_v14  ;;  %v8328_v63 = vmul.f32 -1.442695, %v2877_v27  ;;  %v2880_v60 = vpop.f32.mrb[126].mxu1  ;;  %v3372_v21 = vmul.f32 %v10270_v62, %v13253_v48 }
 0x34a   : > { %v10274_v40 = vpop.eup %10273  ;;  %v3195_v28 = vadd.f32 1.0, %v10272_v38  ;;  %10293 = vpow2.f32 %v8326_v26  ;;  %v2881_v33 = vadd.f32 %v2880_v60, %v13968_v12  ;;  %v2882_v30 = vpop.f32.mrb[127].mxu1  ;;  %v13978_v18 = vmul.f32 %v3661_v53, %v13253_v48  ;;  %9814 = vmatpush3.bf16.msra.mxu0 %v13610_v13  ;;  %v16705_v26 = vld [vmem:[#allocation72_spill] sm:$0xff] }
 0x34b   : > { %v13981_v31 = vpop.eup %10275  ;;  %v3196_v2 = vadd.f32 1.0, %v10274_v40  ;;  %10295 = vpow2.f32 %v8327_v11  ;;  %9085 = vmatmul.mubr.f32.gmra.mrb[70].mxu0 %v3372_v21  ;;  %v2883_v14 = vadd.f32 %v2882_v30, %v13973_v1  ;;  %9816 = vmatprep.subr.bf16.mxu0 %v13630_v0  ;;  %v13987_v62 = vadd.f32 %v16705_v26, %v13741_v41 }
 0x34c   : > { %v10278_v27 = vpop.eup %10277  ;;  %10297 = vrcp.f32 %v3195_v28  ;;  %v8329_v38 = vmul.f32 -1.442695, %v2881_v33  ;;  %v3662_v48 = vsub.f32 1.0, %v13981_v31  ;;  %v13992_v60 = vadd.f32 %v13443_v4, %v13745_v3 }
 0x34d   : > { %16706 = vst [vmem:[#allocation72_spill] sm:$0xff] %v13987_v62  ;;  %v10280_v53 = vpop.eup %10279  ;;  %10299 = vrcp.f32 %v3196_v2  ;;  %v8330_v11 = vmul.f32 -1.442695, %v2883_v14  ;;  %v2886_v21 = vpop.f32.mrb[128].mxu1  ;;  %v3373_v30 = vmul.f32 %v10278_v27, %v13277_v59  ;;  %v16708_v14 = vld [vmem:[#allocation6_spill] sm:$0xff] }
 0x34e   : > { %16707 = vst [vmem:[#allocation165_spill] sm:$0xff] %v13992_v60  ;;  %v10282_v40 = vpop.eup %10281  ;;  %v3197_v12 = vadd.f32 1.0, %v10280_v53  ;;  %10301 = vpow2.f32 %v8328_v63  ;;  %v2887_v26 = vadd.f32 %v2886_v21, %v13987_v62  ;;  %v2888_v1 = vpop.f32.mrb[129].mxu1  ;;  %v13997_v28 = vmul.f32 %v3662_v48, %v13277_v59  ;;  %9818 = vmatpush3.bf16.msra.mxu0 %v13630_v0  ;;  %v16710_v21 = vld [vmem:[#allocation76_spill] sm:$0xff] }
 0x34f   : > { %v14000_v33 = vpop.eup %10283  ;;  %v3198_v4 = vadd.f32 1.0, %v10282_v40  ;;  %10303 = vpow2.f32 %v8329_v38  ;;  %9087 = vmatprep.mubr.f32.mxu0 %v3373_v30  ;;  %v2889_v2 = vadd.f32 %v2888_v1, %v13992_v60  ;;  %9820 = vmatprep.subr.bf16.mxu0 %v16708_v14  ;;  %v14006_v63 = vadd.f32 %v13458_v54, %v13741_v41  ;;  %v16712_v54 = vld [vmem:[#allocation59_spill] sm:$0xff] }
 0x350   : > { %v10286_v27 = vpop.eup %10285  ;;  %10305 = vrcp.f32 %v3197_v12  ;;  %v8331_v53 = vmul.f32 -1.442695, %v2887_v26  ;;  %v3663_v59 = vsub.f32 1.0, %v14000_v33  ;;  %v14011_v62 = vadd.f32 %v16710_v21, %v13745_v3 }
 0x351   : > { %16709 = vst [vmem:[#allocation6_spill] sm:$0xff] %v14006_v63  ;;  %v10288_v48 = vpop.eup %10287  ;;  %10307 = vrcp.f32 %v3198_v4  ;;  %v3199_v38 = vadd.f32 1.0, %v10286_v27  ;;  %v8332_v30 = vmul.f32 -1.442695, %v2889_v2  ;;  %v2892_v1 = vpop.f32.mrb[130].mxu1  ;;  %v14022_v21 = vadd.f32 %v16713_v47, %v13741_v41 }
 0x352   : > { %16711 = vst [vmem:[#allocation76_spill] sm:$0xff] %v14011_v62  ;;  %v14013_v40 = vpop.eup %10289  ;;  %10309 = vpow2.f32 %v8330_v11  ;;  %v2893_v60 = vadd.f32 %v2892_v1, %v14006_v63  ;;  %v3374_v58 = vmul.f32 %v10288_v48, %v16712_v54  ;;  %v2894_v12 = vpop.f32.mrb[131].mxu1  ;;  %v14018_v26 = vmul.f32 %v3663_v59, %v16712_v54  ;;  %v16715_v11 = vld [vmem:[#allocation81_spill] sm:$0xff] }
 0x353   : > { %v10292_v44 = vpop.eup %10291  ;;  %16714 = vst [vmem:[#allocation59_spill] sm:$0xff] %v14022_v21  ;;  %10311 = vrcp.f32 %v3199_v38  ;;  %v2895_v4 = vadd.f32 %v2894_v12, %v14011_v62  ;;  %v3664_v2 = vsub.f32 1.0, %v14013_v40  ;;  %v14028_v1 = vadd.f32 %v16715_v11, %v13745_v3 }
 0x354   : > { %v10294_v27 = vpop.eup %10293  ;;  %10313 = vpow2.f32 %v8331_v53  ;;  %v8333_v48 = vmul.f32 -1.442695, %v2893_v60  ;;  %9088 = vmatmul.mubr.f32.gmra.mrb[72].mxu0 %v3374_v58  ;;  %v3375_v59 = vmul.f32 %v10292_v44, %v13323_v61  ;;  %v16717_v58 = vld [vmem:[#allocation85_spill] sm:$0xff] }
 0x355   : > { %16716 = vst [vmem:[#allocation80_spill] sm:$0xff] %v14028_v1  ;;  %v10296_v54 = vpop.eup %10295  ;;  %v3200_v63 = vadd.f32 1.0, %v10294_v27  ;;  %10315 = vpow2.f32 %v8332_v30  ;;  %v8334_v47 = vmul.f32 -1.442695, %v2895_v4  ;;  %v2898_v35 = vpop.f32.mrb[132].mxu1  ;;  %v14032_v38 = vmul.f32 %v3664_v2, %v13323_v61  ;;  %v16719_v2 = vld [vmem:[#allocation86_spill] sm:$0xff] }
 0x356   : > { %v14034_v12 = vpop.eup %10297  ;;  %v3201_v62 = vadd.f32 1.0, %v10296_v54  ;;  %10317 = vpow2.f32 %v8333_v48  ;;  %v2899_v11 = vadd.f32 %v2898_v35, %v14022_v21  ;;  %9090 = vmatprep.mubr.f32.mxu0 %v3375_v59  ;;  %v2900_v53 = vpop.f32.mrb[133].mxu1  ;;  %v14039_v44 = vadd.f32 %v16717_v58, %v13741_v41 }
 0x357   : > { %v10300_v60 = vpop.eup %10299  ;;  %10319 = vrcp.f32 %v3200_v63  ;;  %v2901_v30 = vadd.f32 %v2900_v53, %v14028_v1  ;;  %v3665_v4 = vsub.f32 1.0, %v14034_v12  ;;  %v14045_v27 = vadd.f32 %v16719_v2, %v13745_v3 }
 0x358   : > { %16718 = vst [vmem:[#allocation81_spill] sm:$0xff] %v14039_v44  ;;  %v10302_v61 = vpop.eup %10301  ;;  %10321 = vrcp.f32 %v3201_v62  ;;  %v8335_v48 = vmul.f32 -1.442695, %v2899_v11  ;;  %v3376_v35 = vmul.f32 %v10300_v60, %v13335_v23  ;;  %v16722_v11 = vld [vmem:[#allocation89_spill] sm:$0xff] }
 0x359   : > { %16720 = vst [vmem:[#allocation85_spill] sm:$0xff] %v14045_v27  ;;  %v10304_v59 = vpop.eup %10303  ;;  %v3202_v54 = vadd.f32 1.0, %v10302_v61  ;;  %10323 = vpow2.f32 %v8334_v47  ;;  %v8336_v21 = vmul.f32 -1.442695, %v2901_v30  ;;  %v2904_v58 = vpop.f32.mrb[134].mxu1  ;;  %v14049_v63 = vmul.f32 %v3665_v4, %v13335_v23  ;;  %v16724_v4 = vld [vmem:[#allocation91_spill] sm:$0xff] }
 0x35a   : > { %v14051_v53 = vpop.eup %10305  ;;  %v3203_v1 = vadd.f32 1.0, %v10304_v59  ;;  %10325 = vpow2.f32 %v8335_v48  ;;  %v2905_v55 = vadd.f32 %v2904_v58, %v14039_v44  ;;  %9091 = vmatmul.mubr.f32.gmra.mrb[74].mxu0 %v3376_v35  ;;  %v2906_v2 = vpop.f32.mrb[135].mxu1  ;;  %v14056_v60 = vadd.f32 %v16722_v11, %v13741_v41 }
 0x35b   : > { %16721 = vst [vmem:[#allocation86_spill] sm:$0xff] %v14051_v53  ;;  %v10308_v62 = vpop.eup %10307  ;;  %10327 = vrcp.f32 %v3202_v54  ;;  %v2907_v47 = vadd.f32 %v2906_v2, %v14045_v27  ;;  %v3666_v30 = vsub.f32 1.0, %v14051_v53  ;;  %v14062_v61 = vadd.f32 %v16724_v4, %v13745_v3 }
 0x35c   : > { %16723 = vst [vmem:[#allocation89_spill] sm:$0xff] %v14056_v60  ;;  %v10310_v23 = vpop.eup %10309  ;;  %10329 = vrcp.f32 %v3203_v1  ;;  %v8337_v48 = vmul.f32 -1.442695, %v2905_v55  ;;  %v3377_v35 = vmul.f32 %v10308_v62, %v13345_v37  ;;  %v16727_v62 = vld [vmem:[#allocation92_spill] sm:$0xff] }
 0x35d   : > { %16725 = vst [vmem:[#allocation91_spill] sm:$0xff] %v14062_v61  ;;  %v14065_v59 = vpop.eup %10311  ;;  %v3204_v58 = vadd.f32 1.0, %v10310_v23  ;;  %10331 = vpow2.f32 %v8336_v21  ;;  %v8338_v11 = vmul.f32 -1.442695, %v2907_v47  ;;  %v2910_v44 = vpop.f32.mrb[136].mxu1  ;;  %v14068_v54 = vmul.f32 %v3666_v30, %v13345_v37 }
 0x35e   : > { %v10314_v2 = vpop.eup %10313  ;;  %10333 = vpow2.f32 %v8337_v48  ;;  %v2911_v27 = vadd.f32 %v2910_v44, %v14056_v60  ;;  %9093 = vmatprep.mubr.f32.mxu0 %v3377_v35  ;;  %v2912_v4 = vpop.f32.mrb[137].mxu1  ;;  %v3667_v1 = vsub.f32 1.0, %v14065_v59  ;;  %v14074_v45 = vadd.f32 %v16727_v62, %v13741_v41  ;;  %v16729_v48 = vld [vmem:[#allocation63_spill] sm:$0xff] }
 0x35f   : > { %16726 = vst [vmem:[#allocation166_spill] sm:$0xff] %v14068_v54  ;;  %v10316_v55 = vpop.eup %10315  ;;  %10335 = vrcp.f32 %v3204_v58  ;;  %v3205_v21 = vadd.f32 1.0, %v10314_v2  ;;  %v2913_v47 = vadd.f32 %v2912_v4, %v14062_v61  ;;  %v14082_v35 = vadd.f32 %v13544_v29, %v13745_v3  ;;  %v16735_v61 = vld [vmem:[#allocation64_spill] sm:$0xff] }
 0x360   : > { %16728 = vst [vmem:[#allocation92_spill] sm:$0xff] %v14074_v45  ;;  %v10318_v23 = vpop.eup %10317  ;;  %v3206_v37 = vadd.f32 1.0, %v10316_v55  ;;  %10337 = vpow2.f32 %v8338_v11  ;;  %v8339_v30 = vmul.f32 -1.442695, %v2911_v27  ;;  %v14078_v54 = vmul.f32 %v3667_v1, %v16729_v48 }
 0x361   : > { %v10320_v44 = vpop.eup %10319  ;;  %16730 = vst [vmem:[#allocation63_spill] sm:$0xff] %v14082_v35  ;;  %10339 = vrcp.f32 %v3205_v21  ;;  %v3207_v60 = vadd.f32 1.0, %v10318_v23  ;;  %v8340_v62 = vmul.f32 -1.442695, %v2913_v47  ;;  %v2916_v53 = vpop.f32.mrb[138].mxu1  ;;  %v14090_v1 = vadd.f32 %v13553_v9, %v13741_v41  ;;  %v16733_v47 = vld [vmem:[#allocation94_spill] sm:$0xff] }
 0x362   : > { %v14084_v58 = vpop.eup %10321  ;;  %10341 = vrcp.f32 %v3206_v37  ;;  %v2917_v2 = vadd.f32 %v2916_v53, %v14074_v45  ;;  %v3378_v11 = vmul.f32 %v10320_v44, %v16729_v48  ;;  %v2918_v27 = vpop.f32.mrb[139].mxu1  ;;  %v14096_v23 = vadd.f32 %v16733_v47, %v13745_v3 }
 0x363   : > { %16731 = vst [vmem:[#allocation167_spill] sm:$0xff] %v14084_v58  ;;  %v10324_v4 = vpop.eup %10323  ;;  %16732 = vst [vmem:[#allocation168_spill] sm:$0xff] %v14090_v1  ;;  %10343 = vrcp.f32 %v3207_v60  ;;  %v2919_v29 = vadd.f32 %v2918_v27, %v14082_v35  ;;  %v3668_v55 = vsub.f32 1.0, %v14084_v58 }
 0x364   : > { %v10326_v21 = vpop.eup %10325  ;;  %16734 = vst [vmem:[#allocation94_spill] sm:$0xff] %v14096_v23  ;;  %v3208_v37 = vadd.f32 1.0, %v10324_v4  ;;  %10345 = vpow2.f32 %v8339_v30  ;;  %v8341_v53 = vmul.f32 -1.442695, %v2917_v2  ;;  %9094 = vmatmul.mubr.f32.gmra.mrb[76].mxu0 %v3378_v11  ;;  %v14109_v11 = vadd.f32 %v13570_v32, %v13741_v41 }
 0x365   : > { %v10328_v48 = vpop.eup %10327  ;;  %v3209_v44 = vadd.f32 1.0, %v10326_v21  ;;  %10347 = vpow2.f32 %v8340_v62  ;;  %v8342_v45 = vmul.f32 -1.442695, %v2919_v29  ;;  %v2922_v9 = vpop.f32.mrb[140].mxu1  ;;  %v14099_v60 = vmul.f32 %v3668_v55, %v16735_v61 }
 0x366   : > { %v14101_v27 = vpop.eup %10329  ;;  %10349 = vrcp.f32 %v3208_v37  ;;  %v2923_v35 = vadd.f32 %v2922_v9, %v14090_v1  ;;  %v3379_v47 = vmul.f32 %v10328_v48, %v16735_v61  ;;  %v2924_v58 = vpop.f32.mrb[141].mxu1  ;;  %16736 = vst [vmem:[#allocation64_spill] sm:$0xff] %v14109_v11  ;;  %v14113_v61 = vadd.f32 %v13572_v50, %v13745_v3 }
 0x367   : > { %v10332_v4 = vpop.eup %10331  ;;  %10351 = vrcp.f32 %v3209_v44  ;;  %v2925_v30 = vadd.f32 %v2924_v58, %v14096_v23  ;;  %v3669_v2 = vsub.f32 1.0, %v14101_v27  ;;  %v16738_v58 = vld [vmem:[#allocation65_spill] sm:$0xff] }
 0x368   : > { %v10334_v62 = vpop.eup %10333  ;;  %v3210_v29 = vadd.f32 1.0, %v10332_v4  ;;  %10353 = vpow2.f32 %v8341_v53  ;;  %v8343_v55 = vmul.f32 -1.442695, %v2923_v35  ;;  %9096 = vmatprep.mubr.f32.mxu0 %v3379_v47  ;;  %16737 = vst [vmem:[#allocation169_spill] sm:$0xff] %v14113_v61 }
 0x369   : > { %v10336_v21 = vpop.eup %10335  ;;  %v3211_v37 = vadd.f32 1.0, %v10334_v62  ;;  %10355 = vpow2.f32 %v8342_v45  ;;  %v2928_v48 = vpop.f32.mrb[142].mxu1  ;;  %v14116_v44 = vmul.f32 %v3669_v2, %v16738_v58  ;;  %v8344_v1 = vmul.f32 -1.442695, %v2925_v30 }
 0x36a   : > { %v10338_v9 = vpop.eup %10337  ;;  %10357 = vrcp.f32 %v3210_v29  ;;  %v2929_v32 = vadd.f32 %v2928_v48, %v14109_v11  ;;  %v3380_v53 = vmul.f32 %v10336_v21, %v16738_v58  ;;  %v2930_v35 = vpop.f32.mrb[143].mxu1  ;;  %v14125_v45 = vadd.f32 %v13581_v6, %v13741_v41  ;;  %v16742_v11 = vld [vmem:[#allocation96_spill] sm:$0xff] }
 0x36b   : > { %v14120_v47 = vpop.eup %10339  ;;  %10359 = vrcp.f32 %v3211_v37  ;;  %v3212_v4 = vadd.f32 1.0, %v10338_v9  ;;  %v2931_v50 = vadd.f32 %v2930_v35, %v14113_v61  ;;  %v14132_v21 = vadd.f32 %v13584_v16, %v13745_v3 }
 0x36c   : > { %v10342_v62 = vpop.eup %10341  ;;  %16739 = vst [vmem:[#allocation65_spill] sm:$0xff] %v14125_v45  ;;  %10361 = vpow2.f32 %v8343_v55  ;;  %v8345_v2 = vmul.f32 -1.442695, %v2929_v32  ;;  %9097 = vmatmul.mubr.f32.gmra.mrb[78].mxu0 %v3380_v53  ;;  %v3670_v30 = vsub.f32 1.0, %v14120_v47  ;;  %v14142_v16 = vadd.f32 %v16742_v11, %v13741_v41 }
 0x36d   : > { %v14128_v29 = vpop.eup %10343  ;;  %16740 = vst [vmem:[#allocation170_spill] sm:$0xff] %v14132_v21  ;;  %10363 = vrcp.f32 %v3212_v4  ;;  %v8346_v37 = vmul.f32 -1.442695, %v2931_v50  ;;  %v2934_v48 = vpop.f32.mrb[144].mxu1  ;;  %v3381_v58 = vmul.f32 %v10342_v62, %v13377_v7 }
 0x36e   : > { %v10346_v9 = vpop.eup %10345  ;;  %10365 = vpow2.f32 %v8344_v1  ;;  %v2935_v6 = vadd.f32 %v2934_v48, %v14125_v45  ;;  %v2936_v55 = vpop.f32.mrb[145].mxu1  ;;  %v14137_v32 = vmul.f32 %v3670_v30, %v13377_v7  ;;  %v3671_v53 = vsub.f32 1.0, %v14128_v29  ;;  %16743 = vst [vmem:[#allocation96_spill] sm:$0xff] %v14142_v16  ;;  %v16744_v45 = vld [vmem:[#allocation66_spill] sm:$0xff]  ;;  %v16746_v30 = vld [vmem:[#allocation97_spill] sm:$0xff] }
 0x36f   : > { %v10348_v35 = vpop.eup %10347  ;;  %v3213_v4 = vadd.f32 1.0, %v10346_v9  ;;  %10367 = vpow2.f32 %v8345_v2  ;;  %9099 = vmatprep.mubr.f32.mxu0 %v3381_v58  ;;  %v2937_v50 = vadd.f32 %v2936_v55, %v14132_v21  ;;  %v14152_v23 = vadd.f32 %v16746_v30, %v13745_v3 }
 0x370   : > { %16741 = vst [vmem:[#allocation171_spill] sm:$0xff] %v14137_v32  ;;  %v10350_v62 = vpop.eup %10349  ;;  %v3214_v1 = vadd.f32 1.0, %v10348_v35  ;;  %10369 = vpow2.f32 %v8346_v37  ;;  %v8347_v48 = vmul.f32 -1.442695, %v2935_v6  ;;  %v14146_v61 = vmul.f32 %v3671_v53, %v16744_v45  ;;  %v16748_v35 = vld [vmem:[#allocation98_spill] sm:$0xff] }
 0x371   : > { %v14148_v7 = vpop.eup %10351  ;;  %16747 = vst [vmem:[#allocation97_spill] sm:$0xff] %v14152_v23  ;;  %10371 = vrcp.f32 %v3213_v4  ;;  %v8348_v11 = vmul.f32 -1.442695, %v2937_v50  ;;  %v2940_v9 = vpop.f32.mrb[146].mxu1  ;;  %v3382_v2 = vmul.f32 %v10350_v62, %v16744_v45  ;;  %v14159_v21 = vadd.f32 %v16748_v35, %v13741_v41  ;;  %v16750_v62 = vld [vmem:[#allocation67_spill] sm:$0xff] }
 0x372   : > { %16745 = vst [vmem:[#allocation66_spill] sm:$0xff] %v14148_v7  ;;  %v10354_v58 = vpop.eup %10353  ;;  %10373 = vrcp.f32 %v3214_v1  ;;  %v2941_v55 = vadd.f32 %v2940_v9, %v14142_v16  ;;  %v2942_v37 = vpop.f32.mrb[147].mxu1  ;;  %v3672_v6 = vsub.f32 1.0, %v14148_v7  ;;  %v16753_v16 = vld [vmem:[#allocation99_spill] sm:$0xff] }
 0x373   : > { %v10356_v53 = vpop.eup %10355  ;;  %16749 = vst [vmem:[#allocation98_spill] sm:$0xff] %v14159_v21  ;;  %v3215_v32 = vadd.f32 1.0, %v10354_v58  ;;  %10375 = vpow2.f32 %v8347_v48  ;;  %9100 = vmatmul.mubr.f32.gmra.mrb[80].mxu0 %v3382_v2  ;;  %v2943_v4 = vadd.f32 %v2942_v37, %v14152_v23  ;;  %v14169_v7 = vadd.f32 %v16753_v16, %v13745_v3 }
 0x374   : > { %v10358_v50 = vpop.eup %10357  ;;  %v3216_v30 = vadd.f32 1.0, %v10356_v53  ;;  %10377 = vpow2.f32 %v8348_v11  ;;  %v8349_v45 = vmul.f32 -1.442695, %v2941_v55  ;;  %v14163_v1 = vmul.f32 %v3672_v6, %v16750_v62  ;;  %v16755_v53 = vld [vmem:[#allocation101_spill] sm:$0xff] }
 0x375   : > { %v14165_v9 = vpop.eup %10359  ;;  %16754 = vst [vmem:[#allocation99_spill] sm:$0xff] %v14169_v7  ;;  %10379 = vrcp.f32 %v3215_v32  ;;  %v8350_v35 = vmul.f32 -1.442695, %v2943_v4  ;;  %v2946_v58 = vpop.f32.mrb[148].mxu1  ;;  %v3383_v48 = vmul.f32 %v10358_v50, %v16750_v62  ;;  %v14176_v23 = vadd.f32 %v16755_v53, %v13741_v41  ;;  %v16757_v50 = vld [vmem:[#allocation68_spill] sm:$0xff] }
 0x376   : > { %16751 = vst [vmem:[#allocation67_spill] sm:$0xff] %v14163_v1  ;;  %16752 = vst [vmem:[#allocation172_spill] sm:$0xff] %v14165_v9  ;;  %v10362_v2 = vpop.eup %10361  ;;  %10381 = vrcp.f32 %v3216_v30  ;;  %v2947_v37 = vadd.f32 %v2946_v58, %v14159_v21  ;;  %v2948_v11 = vpop.f32.mrb[149].mxu1  ;;  %v3673_v55 = vsub.f32 1.0, %v14165_v9  ;;  %v16759_v21 = vld [vmem:[#allocation102_spill] sm:$0xff] }
 0x377   : > { %v10364_v6 = vpop.eup %10363  ;;  %16756 = vst [vmem:[#allocation101_spill] sm:$0xff] %v14176_v23  ;;  %v3217_v1 = vadd.f32 1.0, %v10362_v2  ;;  %10383 = vpow2.f32 %v8349_v45  ;;  %9102 = vmatprep.mubr.f32.mxu0 %v3383_v48  ;;  %v2949_v32 = vadd.f32 %v2948_v11, %v14169_v7  ;;  %v14185_v9 = vadd.f32 %v16759_v21, %v13745_v3  ;;  %v16762_v21 = vld [vmem:[#allocation104_spill] sm:$0xff] }
 0x378   : > { %v10366_v16 = vpop.eup %10365  ;;  %10385 = vpow2.f32 %v8350_v35  ;;  %v8351_v4 = vmul.f32 -1.442695, %v2947_v37  ;;  %v3384_v30 = vmul.f32 %v10364_v6, %v16757_v50  ;;  %v14181_v62 = vmul.f32 %v3673_v55, %v16757_v50 }
 0x379   : > { %v10368_v58 = vpop.eup %10367  ;;  %16760 = vst [vmem:[#allocation102_spill] sm:$0xff] %v14185_v9  ;;  %10387 = vrcp.f32 %v3217_v1  ;;  %v3218_v53 = vadd.f32 1.0, %v10366_v16  ;;  %v2952_v2 = vpop.f32.mrb[150].mxu1  ;;  %v8352_v11 = vmul.f32 -1.442695, %v2949_v32  ;;  %v14193_v1 = vadd.f32 %v16762_v21, %v13741_v41 }
 0x37a   : > { %16758 = vst [vmem:[#allocation68_spill] sm:$0xff] %v14181_v62  ;;  %v10370_v45 = vpop.eup %10369  ;;  %v3219_v48 = vadd.f32 1.0, %v10368_v58  ;;  %10389 = vpow2.f32 %v8351_v4  ;;  %v2953_v35 = vadd.f32 %v2952_v2, %v14176_v23  ;;  %9103 = vmatmul.mubr.f32.gmra.mrb[82].mxu0 %v3384_v30  ;;  %v2954_v37 = vpop.f32.mrb[151].mxu1  ;;  %v16764_v58 = vld [vmem:[#allocation105_spill] sm:$0xff] }
 0x37b   : > { %v14188_v6 = vpop.eup %10371  ;;  %10391 = vrcp.f32 %v3218_v53  ;;  %v3220_v55 = vadd.f32 1.0, %v10370_v45  ;;  %v2955_v50 = vadd.f32 %v2954_v37, %v14185_v9  ;;  %16763 = vst [vmem:[#allocation104_spill] sm:$0xff] %v14193_v1  ;;  %v14198_v30 = vadd.f32 %v16764_v58, %v13745_v3  ;;  %v16766_v45 = vld [vmem:[#allocation69_spill] sm:$0xff]  ;;  %v16769_v58 = vld [vmem:[#allocation106_spill] sm:$0xff] }
 0x37c   : > { %16761 = vst [vmem:[#allocation173_spill] sm:$0xff] %v14188_v6  ;;  %v10374_v7 = vpop.eup %10373  ;;  %10393 = vrcp.f32 %v3219_v48  ;;  %v8353_v16 = vmul.f32 -1.442695, %v2953_v35  ;;  %v3674_v4 = vsub.f32 1.0, %v14188_v6 }
 0x37d   : > { %v10376_v32 = vpop.eup %10375  ;;  %16765 = vst [vmem:[#allocation105_spill] sm:$0xff] %v14198_v30  ;;  %10395 = vrcp.f32 %v3220_v55  ;;  %v8354_v2 = vmul.f32 -1.442695, %v2955_v50  ;;  %v2958_v53 = vpop.f32.mrb[152].mxu1  ;;  %v3385_v23 = vmul.f32 %v10374_v7, %v16766_v45  ;;  %v14210_v7 = vadd.f32 %v16769_v58, %v13741_v41 }
 0x37e   : > { %v10378_v37 = vpop.eup %10377  ;;  %v3221_v9 = vadd.f32 1.0, %v10376_v32  ;;  %10397 = vpow2.f32 %v8352_v11  ;;  %v2959_v21 = vadd.f32 %v2958_v53, %v14193_v1  ;;  %v2960_v62 = vpop.f32.mrb[153].mxu1  ;;  %v14203_v48 = vmul.f32 %v3674_v4, %v16766_v45  ;;  %v16771_v4 = vld [vmem:[#allocation107_spill] sm:$0xff] }
 0x37f   : > { %v14205_v35 = vpop.eup %10379  ;;  %v3222_v6 = vadd.f32 1.0, %v10378_v37  ;;  %10399 = vpow2.f32 %v8353_v16  ;;  %9105 = vmatprep.mubr.f32.mxu0 %v3385_v23  ;;  %v2961_v55 = vadd.f32 %v2960_v62, %v14198_v30  ;;  %16770 = vst [vmem:[#allocation106_spill] sm:$0xff] %v14210_v7  ;;  %v14215_v45 = vadd.f32 %v16771_v4, %v13745_v3  ;;  %v16773_v23 = vld [vmem:[#allocation70_spill] sm:$0xff]  ;;  %v16776_v4 = vld [vmem:[#allocation108_spill] sm:$0xff] }
 0x380   : > { %16767 = vst [vmem:[#allocation69_spill] sm:$0xff] %v14203_v48  ;;  %16768 = vst [vmem:[#allocation174_spill] sm:$0xff] %v14205_v35  ;;  %v10382_v50 = vpop.eup %10381  ;;  %10401 = vrcp.f32 %v3221_v9  ;;  %v8355_v11 = vmul.f32 -1.442695, %v2959_v21  ;;  %v3675_v32 = vsub.f32 1.0, %v14205_v35 }
 0x381   : > { %v10384_v53 = vpop.eup %10383  ;;  %16772 = vst [vmem:[#allocation107_spill] sm:$0xff] %v14215_v45  ;;  %10403 = vrcp.f32 %v3222_v6  ;;  %v8356_v37 = vmul.f32 -1.442695, %v2961_v55  ;;  %v2964_v16 = vpop.f32.mrb[154].mxu1  ;;  %v3386_v1 = vmul.f32 %v10382_v50, %v16773_v23  ;;  %v14227_v50 = vadd.f32 %v16776_v4, %v13741_v41  ;;  %v16780_v4 = vld [vmem:[#allocation71_spill] sm:$0xff] }
 0x382   : > { %v10386_v62 = vpop.eup %10385  ;;  %v3223_v30 = vadd.f32 1.0, %v10384_v53  ;;  %10405 = vpow2.f32 %v8354_v2  ;;  %v2965_v58 = vadd.f32 %v2964_v16, %v14210_v7  ;;  %v2966_v48 = vpop.f32.mrb[155].mxu1  ;;  %v14220_v9 = vmul.f32 %v3675_v32, %v16773_v23  ;;  %v16778_v32 = vld [vmem:[#allocation109_spill] sm:$0xff] }
 0x383   : > { %v14222_v21 = vpop.eup %10387  ;;  %v3224_v35 = vadd.f32 1.0, %v10386_v62  ;;  %10407 = vpow2.f32 %v8355_v11  ;;  %9106 = vmatmul.mubr.f32.gmra.mrb[84].mxu0 %v3386_v1  ;;  %v2967_v6 = vadd.f32 %v2966_v48, %v14215_v45  ;;  %16777 = vst [vmem:[#allocation108_spill] sm:$0xff] %v14227_v50  ;;  %v14232_v23 = vadd.f32 %v16778_v32, %v13745_v3 }
 0x384   : > { %16774 = vst [vmem:[#allocation70_spill] sm:$0xff] %v14220_v9  ;;  %16775 = vst [vmem:[#allocation175_spill] sm:$0xff] %v14222_v21  ;;  %v10390_v55 = vpop.eup %10389  ;;  %10409 = vrcp.f32 %v3223_v30  ;;  %v8357_v2 = vmul.f32 -1.442695, %v2965_v58  ;;  %v3676_v53 = vsub.f32 1.0, %v14222_v21  ;;  %v16782_v9 = vld [vmem:[#allocation110_spill] sm:$0xff] }
 0x385   : > { %v10392_v16 = vpop.eup %10391  ;;  %16779 = vst [vmem:[#allocation109_spill] sm:$0xff] %v14232_v23  ;;  %10411 = vrcp.f32 %v3224_v35  ;;  %v3225_v62 = vadd.f32 1.0, %v10390_v55  ;;  %v8358_v11 = vmul.f32 -1.442695, %v2967_v6  ;;  %v2970_v1 = vpop.f32.mrb[156].mxu1  ;;  %v14243_v32 = vadd.f32 %v16782_v9, %v13741_v41 }
 0x386   : > { %v14234_v7 = vpop.eup %10393  ;;  %10413 = vpow2.f32 %v8356_v37  ;;  %v2971_v48 = vadd.f32 %v2970_v1, %v14227_v50  ;;  %v3387_v45 = vmul.f32 %v10392_v16, %v16780_v4  ;;  %v2972_v30 = vpop.f32.mrb[157].mxu1  ;;  %v14239_v58 = vmul.f32 %v3676_v53, %v16780_v4  ;;  %v16784_v37 = vld [vmem:[#allocation111_spill] sm:$0xff]  ;;  %v16786_v53 = vld [vmem:[#allocation74_spill] sm:$0xff] }
 0x387   : > { %v10396_v21 = vpop.eup %10395  ;;  %16783 = vst [vmem:[#allocation110_spill] sm:$0xff] %v14243_v32  ;;  %10415 = vrcp.f32 %v3225_v62  ;;  %v2973_v35 = vadd.f32 %v2972_v30, %v14232_v23  ;;  %v3677_v6 = vsub.f32 1.0, %v14234_v7  ;;  %v14249_v1 = vadd.f32 %v16784_v37, %v13745_v3 }
 0x388   : > { %16781 = vst [vmem:[#allocation71_spill] sm:$0xff] %v14239_v58  ;;  %v10398_v55 = vpop.eup %10397  ;;  %10417 = vpow2.f32 %v8357_v2  ;;  %v8359_v16 = vmul.f32 -1.442695, %v2971_v48  ;;  %9108 = vmatprep.mubr.f32.mxu0 %v3387_v45  ;;  %v3388_v4 = vmul.f32 %v10396_v21, %v16786_v53 }
 0x389   : > { %16785 = vst [vmem:[#allocation111_spill] sm:$0xff] %v14249_v1  ;;  %v10400_v50 = vpop.eup %10399  ;;  %v3226_v58 = vadd.f32 1.0, %v10398_v55  ;;  %10419 = vpow2.f32 %v8358_v11  ;;  %v8360_v41 = vmul.f32 -1.442695, %v2973_v35  ;;  %v2976_v9 = vpop.f32.mrb[158].mxu1  ;;  %v14253_v62 = vmul.f32 %v3677_v6, %v16786_v53  ;;  %v16787_v55 = vld [vmem:[#allocation75_spill] sm:$0xff] }
 0x38a   : > { %v14255_v30 = vpop.eup %10401  ;;  %v3227_v23 = vadd.f32 1.0, %v10400_v50  ;;  %10421 = vpow2.f32 %v8359_v16  ;;  %v2977_v3 = vadd.f32 %v2976_v9, %v14243_v32  ;;  %9109 = vmatmul.mubr.f32.gmra.mrb[86].mxu0 %v3388_v4  ;;  %v2978_v2 = vpop.f32.mrb[159].mxu1 }
 0x38b   : > { %v10404_v48 = vpop.eup %10403  ;;  %10423 = vrcp.f32 %v3226_v58  ;;  %v2979_v45 = vadd.f32 %v2978_v2, %v14249_v1  ;;  %v3678_v21 = vsub.f32 1.0, %v14255_v30 }
 0x38c   : > { %v10406_v11 = vpop.eup %10405  ;;  %10425 = vrcp.f32 %v3227_v23  ;;  %v8361_v35 = vmul.f32 -1.442695, %v2977_v3  ;;  %v3389_v6 = vmul.f32 %v10404_v48, %v16787_v55  ;;  %v16788_v3 = vld [vmem:[#allocation77_spill] sm:$0xff] }
 0x38d   : > { %v10408_v37 = vpop.eup %10407  ;;  %v3228_v53 = vadd.f32 1.0, %v10406_v11  ;;  %10427 = vpow2.f32 %v8360_v41  ;;  %v8362_v50 = vmul.f32 -1.442695, %v2979_v45  ;;  %v14262_v16 = vmul.f32 %v3678_v21, %v16787_v55 }
 0x38e   : > { %v14264_v4 = vpop.eup %10409  ;;  %v3229_v9 = vadd.f32 1.0, %v10408_v37  ;;  %10429 = vpow2.f32 %v8361_v35  ;;  %9111 = vmatprep.mubr.f32.mxu0 %v3389_v6 }
 0x38f   : > { %v10412_v58 = vpop.eup %10411  ;;  %10431 = vrcp.f32 %v3228_v53  ;;  %v3679_v2 = vsub.f32 1.0, %v14264_v4  ;;  %v16790_v53 = vld [vmem:[#allocation79_spill] sm:$0xff] }
 0x390   : > { %v10414_v23 = vpop.eup %10413  ;;  %10433 = vrcp.f32 %v3229_v9  ;;  %v3390_v48 = vmul.f32 %v10412_v58, %v16788_v3 }
 0x391   : > { %v14268_v32 = vpop.eup %10415  ;;  %v3230_v41 = vadd.f32 1.0, %v10414_v23  ;;  %10435 = vpow2.f32 %v8362_v50  ;;  %v14271_v45 = vmul.f32 %v3679_v2, %v16788_v3 }
 0x392   : > { %16789 = vst [vmem:[#allocation74_spill] sm:$0xff] %v14268_v32  ;;  %v10418_v21 = vpop.eup %10417  ;;  %9112 = vmatmul.mubr.f32.gmra.mrb[88].mxu0 %v3390_v48  ;;  %v3680_v11 = vsub.f32 1.0, %v14268_v32  ;;  %v16792_v32 = vld [vmem:[#allocation82_spill] sm:$0xff] }
 0x393   : > { %v10420_v35 = vpop.eup %10419  ;;  %10437 = vrcp.f32 %v3230_v41  ;;  %v3231_v55 = vadd.f32 1.0, %v10418_v21 }
 0x394   : > { %v10422_v6 = vpop.eup %10421  ;;  %v3232_v37 = vadd.f32 1.0, %v10420_v35  ;;  %v14275_v9 = vmul.f32 %v3680_v11, %v16790_v53 }
 0x395   : > { %v10424_v58 = vpop.eup %10423  ;;  %10439 = vrcp.f32 %v3231_v55  ;;  %v3233_v1 = vadd.f32 1.0, %v10422_v6 }
 0x396   : > { %16791 = vst [vmem:[#allocation75_spill] sm:$0xff] %v14275_v9  ;;  %v14277_v23 = vpop.eup %10425  ;;  %10441 = vrcp.f32 %v3232_v37  ;;  %v3391_v50 = vmul.f32 %v10424_v58, %v16790_v53  ;;  %v16794_v58 = vld [vmem:[#allocation83_spill] sm:$0xff] }
 0x397   : > { %v10428_v2 = vpop.eup %10427  ;;  %10443 = vrcp.f32 %v3233_v1  ;;  %v3681_v3 = vsub.f32 1.0, %v14277_v23 }
 0x398   : > { %v10430_v48 = vpop.eup %10429  ;;  %v3234_v41 = vadd.f32 1.0, %v10428_v2  ;;  %9114 = vmatprep.mubr.f32.mxu0 %v3391_v50 }
 0x399   : > { %v10432_v21 = vpop.eup %10431  ;;  %v3235_v35 = vadd.f32 1.0, %v10430_v48  ;;  %v14282_v11 = vmul.f32 %v3681_v3, %v16792_v32 }
 0x39a   : > { %v14284_v9 = vpop.eup %10433  ;;  %10445 = vrcp.f32 %v3234_v41  ;;  %v3392_v55 = vmul.f32 %v10432_v21, %v16792_v32  ;;  %v16798_v21 = vld [vmem:[#allocation84_spill] sm:$0xff] }
 0x39b   : > { %16793 = vst [vmem:[#allocation77_spill] sm:$0xff] %v14284_v9  ;;  %v10436_v6 = vpop.eup %10435  ;;  %10447 = vrcp.f32 %v3235_v35  ;;  %v3682_v37 = vsub.f32 1.0, %v14284_v9 }
 0x39c   : > { %v3236_v1 = vadd.f32 1.0, %v10436_v6  ;;  %9115 = vmatmul.mubr.f32.gmra.mrb[90].mxu0 %v3392_v55 }
 0x39d   : > { %v10438_v53 = vpop.eup %10437  ;;  %v14289_v2 = vmul.f32 %v3682_v37, %v16794_v58 }
 0x39e   : > { %10449 = vrcp.f32 %v3236_v1  ;;  %v3393_v50 = vmul.f32 %v10438_v53, %v16794_v58  ;;  %v16799_v1 = vld [vmem:[#allocation88_spill] sm:$0xff] }
 0x39f   : > { %16795 = vst [vmem:[#allocation79_spill] sm:$0xff] %v14289_v2  ;;  %v14292_v3 = vpop.eup %10439 }
 0x3a0   : > { %16796 = vst [vmem:[#allocation82_spill] sm:$0xff] %v14292_v3  ;;  %v10442_v48 = vpop.eup %10441  ;;  %9117 = vmatprep.mubr.f32.mxu0 %v3393_v50  ;;  %v3683_v41 = vsub.f32 1.0, %v14292_v3  ;;  %v16802_v3 = vld [vmem:[#allocation90_spill] sm:$0xff] }
 0x3a1   : > { %v14295_v32 = vpop.eup %10443  ;;  %v3394_v35 = vmul.f32 %v10442_v48, %v16798_v21 }
 0x3a2   : > { %16797 = vst [vmem:[#allocation83_spill] sm:$0xff] %v14295_v32  ;;  %v14299_v6 = vmul.f32 %v3683_v41, %v16798_v21  ;;  %v3684_v55 = vsub.f32 1.0, %v14295_v32  ;;  %v16804_v21 = vld [vmem:[#allocation112_spill] sm:$0xff] }
 0x3a3   : > { %9118 = vmatmul.mubr.f32.gmra.mrb[92].mxu0 %v3394_v35  ;;  %v14315_v35 = vadd.f32 %v16804_v21, %v13690_v36 }
 0x3a4   : > { %v10446_v37 = vpop.eup %10445  ;;  %v14303_v2 = vmul.f32 %v3684_v55, %v16799_v1  ;;  %v16806_v55 = vld [vmem:[#allocation113_spill] sm:$0xff] }
 0x3a5   : > { %v14305_v53 = vpop.eup %10447  ;;  %v3395_v58 = vmul.f32 %v10446_v37, %v16799_v1  ;;  %16805 = vst [vmem:[#allocation112_spill] sm:$0xff] %v14315_v35 }
 0x3a6   : > { %16800 = vst [vmem:[#allocation84_spill] sm:$0xff] %v14303_v2  ;;  %16801 = vst [vmem:[#allocation88_spill] sm:$0xff] %v14305_v53  ;;  %v3685_v50 = vsub.f32 1.0, %v14305_v53  ;;  %v14319_v2 = vadd.f32 %v16806_v55, %v13690_v36 }
 0x3a7   : > { %9120 = vmatprep.mubr.f32.mxu0 %v3395_v58 }
 0x3a8   : > { %v10450_v9 = vpop.eup %10449  ;;  %v14310_v48 = vmul.f32 %v3685_v50, %v16802_v3  ;;  %16807 = vst [vmem:[#allocation113_spill] sm:$0xff] %v14319_v2  ;;  %v16808_v50 = vld [vmem:[#allocation114_spill] sm:$0xff] }
 0x3a9   : > { %v3396_v41 = vmul.f32 %v10450_v9, %v16802_v3  ;;  %v14325_v9 = vadd.f32 %v16808_v50, %v13690_v36  ;;  %v16810_v3 = vld [vmem:[#allocation115_spill] sm:$0xff]  ;;  %v16812_v50 = vld [vmem:[#allocation116_spill] sm:$0xff] }
 0x3aa   : > { %16803 = vst [vmem:[#allocation90_spill] sm:$0xff] %v14310_v48 }
 0x3ab   : > { %9121 = vmatmul.mubr.f32.gmra.mrb[94].mxu0 %v3396_v41  ;;  %16809 = vst [vmem:[#allocation114_spill] sm:$0xff] %v14325_v9  ;;  %v14329_v41 = vadd.f32 %v16810_v3, %v13690_v36  ;;  %v14340_v3 = vadd.f32 %v16812_v50, %v13690_v36 }
 0x3ad   : > { %16811 = vst [vmem:[#allocation115_spill] sm:$0xff] %v14329_v41  ;;  %16813 = vst [vmem:[#allocation116_spill] sm:$0xff] %v14340_v3 }
 0x404   : > { %v9077_v32 = vpop.f32.mrb[64].mxu0 }
 0x405   : > { %v3469_v37 = vadd.f32 %v9077_v32, %v14315_v35  ;;  %v3463_v1 = vpop.f32.mrb[65].mxu0 }
 0x406   : > { %v3464_v58 = vadd.f32 %v3463_v1, %v14319_v2  ;;  %v16814_v2 = vld [vmem:[#allocation154_spill] sm:$0xff] }
 0x407   : > { %10451 = vtanh.f32 %v3469_v37 }
 0x408   : > { %10453 = vtanh.f32 %v3464_v58 }
 0x40e   : > { %v9080_v21 = vpop.f32.mrb[66].mxu0 }
 0x40f   : > { %v3479_v55 = vadd.f32 %v9080_v21, %v14325_v9  ;;  %v3473_v48 = vpop.f32.mrb[67].mxu0 }
 0x410   : > { %v3474_v53 = vadd.f32 %v3473_v48, %v14329_v41  ;;  %v16815_v48 = vld [vmem:[#allocation117_spill] sm:$0xff] }
 0x411   : > { %v10452_v32 = vpop.eup %10451  ;;  %10455 = vtanh.f32 %v3479_v55  ;;  %v14347_v41 = vadd.f32 %v16815_v48, %v13690_v36  ;;  %v16820_v48 = vld [vmem:[#allocation119_spill] sm:$0xff] }
 0x412   : > { %v10454_v35 = vpop.eup %10453  ;;  %10457 = vtanh.f32 %v3474_v53  ;;  %v3719_v37 = vmul.f32 %v10452_v32, %v13844_v10 }
 0x413   : > { %v3718_v1 = vmul.f32 %v10454_v35, %v13827_v20  ;;  %16816 = vst [vmem:[#allocation154_spill] sm:$0xff] %v14347_v41 }
 0x414   : > { %v14336_v58 = vadd.f32 %v3719_v37, %v13859_v56  ;;  %v16817_v56 = vmov 0.0   ;;  %v16818_v37 = vld [vmem:[#allocation118_spill] sm:$0xff] }
 0x415   : > { %v14343_v21 = vadd.f32 %v3718_v1, %v16814_v2  ;;  %v14361_v1 = vadd.f32 %v16818_v37, %v13690_v36 }
 0x416   : > { %v9083_v55 = vpop.f32.mrb[68].mxu0 }
 0x417   : > { %v3489_v53 = vadd.f32 %v9083_v55, %v14340_v3  ;;  %v3483_v10 = vpop.f32.mrb[69].mxu0  ;;  %3847 = vmatmul.mubr.f32.vlgmr.msra.gmra.mrb[160].mxu1 %v14343_v21  ;;  %16819 = vst [vmem:[#allocation117_spill] sm:$0xff] %v14361_v1  ;;  %v14367_v55 = vadd.f32 %v16820_v48, %v13690_v36 }
 0x418   : > { %v3484_v20 = vadd.f32 %v3483_v10, %v14347_v41  ;;  %3852 = vmatprep.mubr.f32.mxu1 %v16817_v56  ;;  %9854 = vmatpush3.bf16.msra.mxu1 %v13397_v34  ;;  %v16908_v41 = vld [vmem:[#allocation57_spill] sm:$0xff] }
 0x419   : > { %10459 = vtanh.f32 %v3489_v53  ;;  %9856 = vmatprep.subr.bf16.mxu1 %v13441_v43  ;;  %16821 = vst [vmem:[#allocation118_spill] sm:$0xff] %v14367_v55 }
 0x41a   : > { %10461 = vtanh.f32 %v3484_v20 }
 0x41b   : > { %v10456_v2 = vpop.eup %10455  ;;  %3853 = vmatmul.mubr.f32.gmra.mrb[162].mxu1 %v14336_v58 }
 0x41c   : > { %v10458_v35 = vpop.eup %10457  ;;  %3858 = vmatprep.mubr.f32.mxu1 %v16817_v56  ;;  %v3721_v32 = vmul.f32 %v10456_v2, %v13880_v8  ;;  %9858 = vmatpush3.bf16.msra.mxu1 %v13441_v43 }
 0x41d   : > { %v3720_v50 = vmul.f32 %v10458_v35, %v13861_v5  ;;  %9860 = vmatprep.subr.bf16.mxu1 %v13477_v39 }
 0x41e   : > { %v9086_v53 = vpop.f32.mrb[70].mxu0  ;;  %v14370_v10 = vadd.f32 %v3721_v32, %v13896_v46  ;;  %v16824_v32 = vld [vmem:[#allocation120_spill] sm:$0xff] }
 0x41f   : > { %v3499_v8 = vadd.f32 %v9086_v53, %v14361_v1  ;;  %v3493_v20 = vpop.f32.mrb[71].mxu0  ;;  %v14374_v2 = vadd.f32 %v3720_v50, %v13878_v52  ;;  %v14388_v50 = vadd.f32 %v16824_v32, %v13690_v36  ;;  %v16827_v53 = vld [vmem:[#allocation121_spill] sm:$0xff]  ;;  %v16831_v32 = vld [vmem:[#allocation123_spill] sm:$0xff]  ;;  %v16903_v1 = vld [vmem:[#allocation38_spill] sm:$0xff] }
 0x420   : > { %16822 = vst [vmem:[#allocation119_spill] sm:$0xff] %v14370_v10  ;;  %v3494_v37 = vadd.f32 %v3493_v20, %v14367_v55  ;;  %9862 = vmatpush3.bf16.msra.mxu1 %v13477_v39  ;;  %v16906_v39 = vld [vmem:[#allocation42_spill] sm:$0xff] }
 0x421   : > { %16823 = vst [vmem:[#allocation176_spill] sm:$0xff] %v14374_v2  ;;  %10463 = vtanh.f32 %v3499_v8  ;;  %3859 = vmatmul.mubr.f32.gmra.mrb[164].mxu1 %v14374_v2  ;;  %9864 = vmatprep.subr.bf16.mxu1 %v13516_v15  ;;  %16825 = vst [vmem:[#allocation120_spill] sm:$0xff] %v14388_v50 }
 0x422   : > { %10465 = vtanh.f32 %v3494_v37  ;;  %3864 = vmatprep.mubr.f32.mxu1 %v16817_v56 }
 0x423   : > { %v10460_v5 = vpop.eup %10459 }
 0x424   : > { %v10462_v46 = vpop.eup %10461  ;;  %v3723_v35 = vmul.f32 %v10460_v5, %v13917_v51  ;;  %9866 = vmatpush3.bf16.msra.mxu1 %v13516_v15  ;;  %v14396_v51 = vadd.f32 %v16827_v53, %v13690_v36  ;;  %v14415_v53 = vadd.f32 %v16831_v32, %v13690_v36 }
 0x425   : > { %3865 = vmatmul.mubr.f32.gmra.mrb[166].mxu1 %v14370_v10  ;;  %v3722_v52 = vmul.f32 %v10462_v46, %v13898_v49  ;;  %9868 = vmatprep.subr.bf16.mxu1 %v13546_v17 }
 0x426   : > { %3870 = vmatprep.mubr.f32.mxu1 %v16817_v56  ;;  %v14392_v48 = vadd.f32 %v3723_v35, %v13934_v57  ;;  %16828 = vst [vmem:[#allocation121_spill] sm:$0xff] %v14396_v51  ;;  %16832 = vst [vmem:[#allocation123_spill] sm:$0xff] %v14415_v53 }
 0x427   : > { %v9089_v8 = vpop.f32.mrb[72].mxu0  ;;  %v14399_v20 = vadd.f32 %v3722_v52, %v13915_v22  ;;  %v16829_v22 = vld [vmem:[#allocation122_spill] sm:$0xff] }
 0x428   : > { %16826 = vst [vmem:[#allocation177_spill] sm:$0xff] %v14392_v48  ;;  %v3509_v49 = vadd.f32 %v9089_v8, %v14388_v50  ;;  %v3503_v37 = vpop.f32.mrb[73].mxu0  ;;  %9870 = vmatpush3.bf16.msra.mxu1 %v13546_v17  ;;  %v14409_v35 = vadd.f32 %v16829_v22, %v13690_v36  ;;  %v16900_v17 = vld [vmem:[#allocation39_spill] sm:$0xff] }
 0x429   : > { %v3504_v5 = vadd.f32 %v3503_v37, %v14396_v51  ;;  %3871 = vmatmul.mubr.f32.gmra.mrb[168].mxu1 %v14399_v20  ;;  %9872 = vmatprep.subr.bf16.mxu1 %v13568_v42 }
 0x42a   : > { %10467 = vtanh.f32 %v3509_v49  ;;  %3876 = vmatprep.mubr.f32.mxu1 %v16817_v56  ;;  %16830 = vst [vmem:[#allocation122_spill] sm:$0xff] %v14409_v35 }
 0x42b   : > { %v10464_v57 = vpop.eup %10463  ;;  %10469 = vtanh.f32 %v3504_v5 }
 0x42c   : > { %v10466_v46 = vpop.eup %10465  ;;  %v3725_v52 = vmul.f32 %v10464_v57, %v13962_v19  ;;  %9874 = vmatpush3.bf16.msra.mxu1 %v13568_v42  ;;  %v16899_v42 = vld [vmem:[#allocation36_spill] sm:$0xff] }
 0x42d   : > { %3877 = vmatmul.mubr.f32.gmra.mrb[170].mxu1 %v14392_v48  ;;  %v9092_v8 = vpop.f32.mrb[74].mxu0  ;;  %v3724_v49 = vmul.f32 %v10466_v46, %v13936_v25  ;;  %9876 = vmatprep.subr.bf16.mxu1 %v13610_v13 }
 0x42e   : > { %v3519_v37 = vadd.f32 %v9092_v8, %v14409_v35  ;;  %v3513_v5 = vpop.f32.mrb[75].mxu0  ;;  %3882 = vmatprep.mubr.f32.mxu1 %v16817_v56  ;;  %v14423_v19 = vadd.f32 %v3725_v52, %v13978_v18  ;;  %v16837_v8 = vld [vmem:[#allocation125_spill] sm:$0xff] }
 0x42f   : > { %v3514_v57 = vadd.f32 %v3513_v5, %v14415_v53  ;;  %v14427_v22 = vadd.f32 %v3724_v49, %v13954_v24  ;;  %v16835_v24 = vld [vmem:[#allocation124_spill] sm:$0xff]  ;;  %v14445_v49 = vadd.f32 %v16837_v8, %v13690_v36 }
 0x430   : > { %16833 = vst [vmem:[#allocation178_spill] sm:$0xff] %v14423_v19  ;;  %10471 = vtanh.f32 %v3519_v37  ;;  %9878 = vmatpush3.bf16.msra.mxu1 %v13610_v13  ;;  %v14439_v52 = vadd.f32 %v16835_v24, %v13690_v36 }
 0x431   : > { %16834 = vst [vmem:[#allocation179_spill] sm:$0xff] %v14427_v22  ;;  %10473 = vtanh.f32 %v3514_v57  ;;  %3883 = vmatmul.mubr.f32.gmra.mrb[172].mxu1 %v14427_v22  ;;  %9880 = vmatprep.subr.bf16.mxu1 %v13630_v0  ;;  %16838 = vst [vmem:[#allocation125_spill] sm:$0xff] %v14445_v49 }
 0x432   : > { %3888 = vmatprep.mubr.f32.mxu1 %v16817_v56  ;;  %16836 = vst [vmem:[#allocation124_spill] sm:$0xff] %v14439_v52 }
 0x434   : > { %v10468_v25 = vpop.eup %10467  ;;  %9882 = vmatpush3.bf16.msra.mxu1 %v13630_v0 }
 0x435   : > { %v10470_v18 = vpop.eup %10469  ;;  %3889 = vmatmul.mubr.f32.gmra.mrb[174].mxu1 %v14423_v19  ;;  %v3727_v46 = vmul.f32 %v10468_v25, %v14000_v33  ;;  %9884 = vmatprep.subr.bf16.mxu1 %v16708_v14 }
 0x436   : > { %3894 = vmatprep.mubr.f32.mxu1 %v16817_v56  ;;  %v3726_v32 = vmul.f32 %v10470_v18, %v13981_v31 }
 0x437   : > { %v9095_v37 = vpop.f32.mrb[76].mxu0  ;;  %v14448_v5 = vadd.f32 %v3727_v46, %v14018_v26 }
 0x438   : > { %v3529_v33 = vadd.f32 %v9095_v37, %v14439_v52  ;;  %v3523_v57 = vpop.f32.mrb[77].mxu0  ;;  %v14452_v14 = vadd.f32 %v3726_v32, %v13997_v28  ;;  %v16843_v32 = vld [vmem:[#allocation126_spill] sm:$0xff] }
 0x439   : > { %16839 = vst [vmem:[#allocation180_spill] sm:$0xff] %v14448_v5  ;;  %v3524_v25 = vadd.f32 %v3523_v57, %v14445_v49  ;;  %v14468_v8 = vadd.f32 %v16843_v32, %v13690_v36 }
 0x43a   : > { %16840 = vst [vmem:[#allocation181_spill] sm:$0xff] %v14452_v14  ;;  %v10472_v24 = vpop.eup %10471  ;;  %10475 = vtanh.f32 %v3529_v33  ;;  %3895 = vmatmul.mubr.f32.gmra.mrb[176].mxu1 %v14452_v14  ;;  %v16845_v33 = vld [vmem:[#allocation19_spill] sm:$0xff] }
 0x43b   : > { %v10474_v31 = vpop.eup %10473  ;;  %10477 = vtanh.f32 %v3524_v25  ;;  %3900 = vmatprep.mubr.f32.mxu1 %v16817_v56  ;;  %v3729_v18 = vmul.f32 %v10472_v24, %v14034_v12  ;;  %16844 = vst [vmem:[#allocation126_spill] sm:$0xff] %v14468_v8  ;;  %v16846_v24 = vld [vmem:[#allocation86_spill] sm:$0xff] }
 0x43c   : > { %v3728_v26 = vmul.f32 %v10474_v31, %v14013_v40 }
 0x43d   : > { %v14460_v46 = vadd.f32 %v3729_v18, %v14049_v63  ;;  %v16847_v18 = vld [vmem:[#allocation127_spill] sm:$0xff] }
 0x43e   : > { %3901 = vmatmul.mubr.f32.gmra.mrb[178].mxu1 %v14448_v5  ;;  %v14464_v28 = vadd.f32 %v3728_v26, %v14032_v38 }
 0x43f   : > { %16841 = vst [vmem:[#allocation182_spill] sm:$0xff] %v14460_v46  ;;  %v9098_v37 = vpop.f32.mrb[78].mxu0  ;;  %3906 = vmatprep.mubr.f32.mxu1 %v16817_v56 }
 0x440   : > { %16842 = vst [vmem:[#allocation183_spill] sm:$0xff] %v14464_v28  ;;  %v3539_v57 = vadd.f32 %v9098_v37, %v16845_v33  ;;  %v3533_v12 = vpop.f32.mrb[79].mxu0  ;;  %v16875_v33 = vld [vmem:[#allocation69_spill] sm:$0xff] }
 0x441   : > { %v3534_v40 = vadd.f32 %v3533_v12, %v14468_v8 }
 0x442   : > { %10479 = vtanh.f32 %v3539_v57  ;;  %3907 = vmatmul.mubr.f32.gmra.mrb[180].mxu1 %v14464_v28  ;;  %v16849_v57 = vld [vmem:[#allocation128_spill] sm:$0xff] }
 0x443   : > { %10481 = vtanh.f32 %v3534_v40  ;;  %3912 = vmatprep.mubr.f32.mxu1 %v16817_v56  ;;  %v16850_v40 = vld [vmem:[#allocation166_spill] sm:$0xff] }
 0x444   : > { %v10476_v38 = vpop.eup %10475 }
 0x445   : > { %v10478_v63 = vpop.eup %10477  ;;  %v3731_v25 = vmul.f32 %v10476_v38, %v14065_v59 }
 0x446   : > { %3913 = vmatmul.mubr.f32.gmra.mrb[182].mxu1 %v14460_v46  ;;  %v9101_v36 = vpop.f32.mrb[80].mxu0  ;;  %v3730_v31 = vmul.f32 %v10478_v63, %v16846_v24 }
 0x447   : > { %v3549_v26 = vadd.f32 %v9101_v36, %v16847_v18  ;;  %v3543_v32 = vpop.f32.mrb[81].mxu0  ;;  %3918 = vmatprep.mubr.f32.mxu1 %v16817_v56  ;;  %v14481_v37 = vadd.f32 %v3731_v25, %v14078_v54  ;;  %v16852_v54 = vld [vmem:[#allocation129_spill] sm:$0xff] }
 0x448   : > { %v3544_v12 = vadd.f32 %v3543_v32, %v16849_v57  ;;  %v14485_v8 = vadd.f32 %v3730_v31, %v16850_v40  ;;  %v16853_v32 = vld [vmem:[#allocation167_spill] sm:$0xff]  ;;  %v16854_v31 = vld [vmem:[#allocation130_spill] sm:$0xff] }
 0x449   : > { %16848 = vst [vmem:[#allocation86_spill] sm:$0xff] %v14481_v37  ;;  %10483 = vtanh.f32 %v3549_v26 }
 0x44a   : > { %16851 = vst [vmem:[#allocation166_spill] sm:$0xff] %v14485_v8  ;;  %10485 = vtanh.f32 %v3544_v12  ;;  %3919 = vmatmul.mubr.f32.gmra.mrb[184].mxu1 %v14485_v8 }
 0x44b   : > { %3924 = vmatprep.mubr.f32.mxu1 %v16817_v56 }
 0x44c   : > { %v10480_v59 = vpop.eup %10479 }
 0x44d   : > { %v10482_v38 = vpop.eup %10481  ;;  %v9104_v63 = vpop.f32.mrb[82].mxu0  ;;  %v3733_v36 = vmul.f32 %v10480_v59, %v14101_v27 }
 0x44e   : > { %3925 = vmatmul.mubr.f32.gmra.mrb[186].mxu1 %v14481_v37  ;;  %v3559_v25 = vadd.f32 %v9104_v63, %v16852_v54  ;;  %v3553_v24 = vpop.f32.mrb[83].mxu0  ;;  %v3732_v57 = vmul.f32 %v10482_v38, %v16853_v32 }
 0x44f   : > { %v3554_v40 = vadd.f32 %v3553_v24, %v16854_v31  ;;  %3930 = vmatprep.mubr.f32.mxu1 %v16817_v56  ;;  %v14496_v26 = vadd.f32 %v3733_v36, %v14116_v44  ;;  %v16858_v36 = vld [vmem:[#allocation131_spill] sm:$0xff] }
 0x450   : > { %10487 = vtanh.f32 %v3559_v25  ;;  %v14499_v12 = vadd.f32 %v3732_v57, %v14099_v60  ;;  %v16859_v25 = vld [vmem:[#allocation171_spill] sm:$0xff] }
 0x451   : > { %16855 = vst [vmem:[#allocation167_spill] sm:$0xff] %v14496_v26  ;;  %10489 = vtanh.f32 %v3554_v40  ;;  %v16861_v40 = vld [vmem:[#allocation132_spill] sm:$0xff] }
 0x452   : > { %16856 = vst [vmem:[#allocation184_spill] sm:$0xff] %v14499_v12  ;;  %3931 = vmatmul.mubr.f32.gmra.mrb[188].mxu1 %v14499_v12 }
 0x453   : > { %v10484_v27 = vpop.eup %10483  ;;  %3936 = vmatprep.mubr.f32.mxu1 %v16817_v56 }
 0x454   : > { %v10486_v59 = vpop.eup %10485  ;;  %v3735_v38 = vmul.f32 %v10484_v27, %v14128_v29 }
 0x455   : > { %v3734_v63 = vmul.f32 %v10486_v59, %v14120_v47  ;;  %v16863_v59 = vld [vmem:[#allocation66_spill] sm:$0xff] }
 0x456   : > { %3937 = vmatmul.mubr.f32.gmra.mrb[190].mxu1 %v14496_v26  ;;  %v9107_v24 = vpop.f32.mrb[84].mxu0  ;;  %v14507_v44 = vadd.f32 %v3735_v38, %v14146_v61  ;;  %v16862_v61 = vld [vmem:[#allocation172_spill] sm:$0xff] }
 0x457   : > { %v3569_v60 = vadd.f32 %v9107_v24, %v16858_v36  ;;  %v3563_v57 = vpop.f32.mrb[85].mxu0  ;;  %3942 = vmatprep.mubr.f32.mxu1 %v16817_v56  ;;  %v14512_v32 = vadd.f32 %v3734_v63, %v16859_v25  ;;  %v16864_v36 = vld [vmem:[#allocation68_spill] sm:$0xff]  ;;  %v16866_v63 = vld [vmem:[#allocation133_spill] sm:$0xff]  ;;  %v16867_v25 = vld [vmem:[#allocation67_spill] sm:$0xff] }
 0x458   : > { %16857 = vst [vmem:[#allocation185_spill] sm:$0xff] %v14507_v44  ;;  %v3564_v31 = vadd.f32 %v3563_v57, %v16861_v40  ;;  %v16869_v40 = vld [vmem:[#allocation134_spill] sm:$0xff] }
 0x459   : > { %16860 = vst [vmem:[#allocation171_spill] sm:$0xff] %v14512_v32  ;;  %10491 = vtanh.f32 %v3569_v60 }
 0x45a   : > { %v10488_v29 = vpop.eup %10487  ;;  %10493 = vtanh.f32 %v3564_v31  ;;  %3943 = vmatmul.mubr.f32.gmra.mrb[192].mxu1 %v14512_v32 }
 0x45b   : > { %v10490_v47 = vpop.eup %10489  ;;  %3948 = vmatprep.mubr.f32.mxu1 %v16817_v56  ;;  %v3737_v27 = vmul.f32 %v10488_v29, %v16862_v61 }
 0x45c   : > { %v3736_v38 = vmul.f32 %v10490_v47, %v16863_v59  ;;  %v16870_v47 = vld [vmem:[#allocation174_spill] sm:$0xff]  ;;  %v16871_v59 = vld [vmem:[#allocation173_spill] sm:$0xff] }
 0x45d   : > { %v9110_v24 = vpop.f32.mrb[86].mxu0  ;;  %v14520_v54 = vadd.f32 %v3737_v27, %v16864_v36 }
 0x45e   : > { %3949 = vmatmul.mubr.f32.gmra.mrb[194].mxu1 %v14507_v44  ;;  %v3579_v57 = vadd.f32 %v9110_v24, %v16866_v63  ;;  %v3573_v60 = vpop.f32.mrb[87].mxu0  ;;  %v14525_v31 = vadd.f32 %v3736_v38, %v16867_v25  ;;  %v16872_v38 = vld [vmem:[#allocation135_spill] sm:$0xff] }
 0x45f   : > { %16865 = vst [vmem:[#allocation172_spill] sm:$0xff] %v14520_v54  ;;  %v3574_v18 = vadd.f32 %v3573_v60, %v16869_v40  ;;  %3954 = vmatprep.mubr.f32.mxu1 %v16817_v56  ;;  %v16873_v40 = vld [vmem:[#allocation70_spill] sm:$0xff] }
 0x460   : > { %16868 = vst [vmem:[#allocation66_spill] sm:$0xff] %v14525_v31  ;;  %10495 = vtanh.f32 %v3579_v57 }
 0x461   : > { %10497 = vtanh.f32 %v3574_v18  ;;  %v16874_v18 = vld [vmem:[#allocation136_spill] sm:$0xff] }
 0x462   : > { %3955 = vmatmul.mubr.f32.gmra.mrb[196].mxu1 %v14525_v31 }
 0x463   : > { %v10492_v29 = vpop.eup %10491  ;;  %3960 = vmatprep.mubr.f32.mxu1 %v16817_v56 }
 0x464   : > { %v10494_v36 = vpop.eup %10493  ;;  %v3739_v61 = vmul.f32 %v10492_v29, %v16870_v47 }
 0x465   : > { %v9113_v27 = vpop.f32.mrb[88].mxu0  ;;  %v3738_v24 = vmul.f32 %v10494_v36, %v16871_v59  ;;  %v16878_v59 = vld [vmem:[#allocation71_spill] sm:$0xff] }
 0x466   : > { %3961 = vmatmul.mubr.f32.gmra.mrb[198].mxu1 %v14520_v54  ;;  %v3589_v25 = vadd.f32 %v9113_v27, %v16872_v38  ;;  %v3583_v60 = vpop.f32.mrb[89].mxu0  ;;  %v14536_v63 = vadd.f32 %v3739_v61, %v16873_v40  ;;  %v16877_v27 = vld [vmem:[#allocation175_spill] sm:$0xff] }
 0x467   : > { %v3584_v57 = vadd.f32 %v3583_v60, %v16874_v18  ;;  %3966 = vmatprep.mubr.f32.mxu1 %v16817_v56  ;;  %v14541_v49 = vadd.f32 %v3738_v24, %v16875_v33  ;;  %v16880_v18 = vld [vmem:[#allocation138_spill] sm:$0xff] }
 0x468   : > { %10499 = vtanh.f32 %v3589_v25  ;;  %v16879_v25 = vld [vmem:[#allocation137_spill] sm:$0xff] }
 0x469   : > { %16876 = vst [vmem:[#allocation68_spill] sm:$0xff] %v14541_v49  ;;  %10501 = vtanh.f32 %v3584_v57 }
 0x46a   : > { %v10496_v29 = vpop.eup %10495  ;;  %3967 = vmatmul.mubr.f32.gmra.mrb[200].mxu1 %v14541_v49 }
 0x46b   : > { %v10498_v36 = vpop.eup %10497  ;;  %3972 = vmatprep.mubr.f32.mxu1 %v16817_v56  ;;  %v3741_v47 = vmul.f32 %v10496_v29, %v14234_v7 }
 0x46c   : > { %v3740_v40 = vmul.f32 %v10498_v36, %v16877_v27 }
 0x46d   : > { %v14548_v61 = vadd.f32 %v3741_v47, %v14253_v62 }
 0x46e   : > { %3973 = vmatmul.mubr.f32.gmra.mrb[202].mxu1 %v14536_v63  ;;  %v14552_v33 = vadd.f32 %v3740_v40, %v16878_v59  ;;  %v16881_v40 = vld [vmem:[#allocation139_spill] sm:$0xff] }
 0x46f   : > { %v9116_v24 = vpop.f32.mrb[90].mxu0  ;;  %3978 = vmatprep.mubr.f32.mxu1 %v16817_v56 }
 0x470   : > { %v3599_v60 = vadd.f32 %v9116_v24, %v16879_v25  ;;  %v3593_v57 = vpop.f32.mrb[91].mxu0 }
 0x471   : > { %v3594_v38 = vadd.f32 %v3593_v57, %v16880_v18  ;;  %v16896_v18 = vld [vmem:[#allocation148_spill] sm:$0xff] }
 0x472   : > { %v10500_v52 = vpop.eup %10499  ;;  %10503 = vtanh.f32 %v3599_v60  ;;  %3979 = vmatmul.mubr.f32.gmra.mrb[204].mxu1 %v14552_v33 }
 0x473   : > { %v10502_v7 = vpop.eup %10501  ;;  %10505 = vtanh.f32 %v3594_v38  ;;  %3984 = vmatprep.mubr.f32.mxu1 %v16817_v56  ;;  %v3743_v62 = vmul.f32 %v10500_v52, %v14264_v4  ;;  %v16882_v38 = vld [vmem:[#allocation140_spill] sm:$0xff]  ;;  %v16883_v52 = vld [vmem:[#allocation74_spill] sm:$0xff] }
 0x474   : > { %v3742_v29 = vmul.f32 %v10502_v7, %v14255_v30  ;;  %v16884_v7 = vld [vmem:[#allocation141_spill] sm:$0xff] }
 0x475   : > { %v14562_v36 = vadd.f32 %v3743_v62, %v14271_v45 }
 0x476   : > { %3985 = vmatmul.mubr.f32.gmra.mrb[206].mxu1 %v14548_v61  ;;  %v9119_v47 = vpop.f32.mrb[92].mxu0  ;;  %v14566_v27 = vadd.f32 %v3742_v29, %v14262_v16 }
 0x477   : > { %v3609_v59 = vadd.f32 %v9119_v47, %v16881_v40  ;;  %v3603_v24 = vpop.f32.mrb[93].mxu0  ;;  %3990 = vmatprep.mubr.f32.mxu1 %v16817_v56 }
 0x478   : > { %v3604_v60 = vadd.f32 %v3603_v24, %v16882_v38 }
 0x479   : > { %10507 = vtanh.f32 %v3609_v59  ;;  %v16885_v59 = vld [vmem:[#allocation142_spill] sm:$0xff] }
 0x47a   : > { %10509 = vtanh.f32 %v3604_v60  ;;  %3991 = vmatmul.mubr.f32.gmra.mrb[208].mxu1 %v14566_v27  ;;  %v16886_v60 = vld [vmem:[#allocation75_spill] sm:$0xff] }
 0x47b   : > { %3996 = vmatprep.mubr.f32.mxu1 %v16817_v56 }
 0x47c   : > { %v10504_v30 = vpop.eup %10503 }
 0x47d   : > { %v10506_v4 = vpop.eup %10505  ;;  %v3745_v45 = vmul.f32 %v10504_v30, %v14277_v23 }
 0x47e   : > { %3997 = vmatmul.mubr.f32.gmra.mrb[210].mxu1 %v14562_v36  ;;  %v9122_v16 = vpop.f32.mrb[94].mxu0  ;;  %v3744_v57 = vmul.f32 %v10506_v4, %v16883_v52  ;;  %v16887_v4 = vld [vmem:[#allocation82_spill] sm:$0xff]  ;;  %v16888_v52 = vld [vmem:[#allocation77_spill] sm:$0xff] }
 0x47f   : > { %v3619_v62 = vadd.f32 %v9122_v16, %v16884_v7  ;;  %v3613_v29 = vpop.f32.mrb[95].mxu0  ;;  %4002 = vmatprep.mubr.f32.mxu1 %v16817_v56  ;;  %v14579_v47 = vadd.f32 %v3745_v45, %v14282_v11  ;;  %v16889_v45 = vld [vmem:[#allocation79_spill] sm:$0xff] }
 0x480   : > { %v3614_v24 = vadd.f32 %v3613_v29, %v16885_v59  ;;  %v14583_v38 = vadd.f32 %v3744_v57, %v16886_v60 }
 0x481   : > { %10511 = vtanh.f32 %v3619_v62 }
 0x482   : > { %10513 = vtanh.f32 %v3614_v24  ;;  %4003 = vmatmul.mubr.f32.gmra.mrb[212].mxu1 %v14583_v38  ;;  %v16890_v24 = vld [vmem:[#allocation88_spill] sm:$0xff] }
 0x483   : > { %v10508_v23 = vpop.eup %10507  ;;  %4008 = vmatprep.mubr.f32.mxu1 %v16817_v56 }
 0x484   : > { %v10510_v30 = vpop.eup %10509  ;;  %v3747_v16 = vmul.f32 %v10508_v23, %v16887_v4  ;;  %v16891_v23 = vld [vmem:[#allocation83_spill] sm:$0xff]  ;;  %v16892_v4 = vld [vmem:[#allocation90_spill] sm:$0xff] }
 0x485   : > { %v3746_v7 = vmul.f32 %v10510_v30, %v16888_v52 }
 0x486   : > { %4009 = vmatmul.mubr.f32.gmra.mrb[214].mxu1 %v14579_v47  ;;  %v14591_v11 = vadd.f32 %v3747_v16, %v14299_v6  ;;  %v16893_v16 = vld [vmem:[#allocation84_spill] sm:$0xff] }
 0x487   : > { %4014 = vmatprep.mubr.f32.mxu1 %v16817_v56  ;;  %v14595_v57 = vadd.f32 %v3746_v7, %v16889_v45 }
 0x48a   : > { %4015 = vmatmul.mubr.f32.gmra.mrb[216].mxu1 %v14595_v57 }
 0x48b   : > { %v10512_v62 = vpop.eup %10511  ;;  %4020 = vmatprep.mubr.f32.mxu1 %v16817_v56 }
 0x48c   : > { %v10514_v29 = vpop.eup %10513  ;;  %v3749_v60 = vmul.f32 %v10512_v62, %v16890_v24  ;;  %v16894_v62 = vld [vmem:[#allocation144_spill] sm:$0xff] }
 0x48d   : > { %v3748_v30 = vmul.f32 %v10514_v29, %v16891_v23 }
 0x48e   : > { %4021 = vmatmul.mubr.f32.gmra.mrb[218].mxu1 %v14591_v11  ;;  %v14603_v6 = vadd.f32 %v3749_v60, %v16892_v4  ;;  %v16895_v4 = vld [vmem:[#allocation146_spill] sm:$0xff] }
 0x48f   : > { %4026 = vmatprep.mubr.f32.mxu1 %v16817_v56  ;;  %v14607_v7 = vadd.f32 %v3748_v30, %v16893_v16 }
 0x492   : > { %4027 = vmatmul.mubr.f32.gmra.mrb[220].mxu1 %v14607_v7 }
 0x493   : > { %4032 = vmatprep.mubr.f32.mxu1 %v16817_v56 }
 0x496   : > { %4033 = vmatmul.mubr.f32.gmra.mrb[222].mxu1 %v14603_v6 }
 0x4ea   : > { %v14612_v52 = vpop.f32.mrb[160].mxu1 }
 0x4eb   : > { %v3850_v45 = vpop.f32.mrb[161].mxu1 }
 0x4ec   : > { %v3851_v29 = vadd.f32 %v3850_v45, %v16894_v62  ;;  %v16897_v45 = vld [vmem:[#allocation150_spill] sm:$0xff] }
 0x4ee   : > { %v8364_v24 = vmul.f32 -1.442695, %v3851_v29  ;;  %v14615_v23 = vpop.f32.mrb[162].mxu1 }
 0x4ef   : > { %v3856_v60 = vpop.f32.mrb[163].mxu1 }
 0x4f0   : > { %10515 = vpow2.f32 %v8364_v24  ;;  %v3857_v59 = vadd.f32 %v3856_v60, %v16895_v4 }
 0x4f2   : > { %v8366_v30 = vmul.f32 -1.442695, %v3857_v59 }
 0x4f4   : > { %10517 = vpow2.f32 %v8366_v30  ;;  %v14618_v16 = vpop.f32.mrb[164].mxu1  ;;  %v16898_v30 = vld [vmem:[#allocation152_spill] sm:$0xff] }
 0x4f5   : > { %v3862_v40 = vpop.f32.mrb[165].mxu1 }
 0x4f6   : > { %v3863_v25 = vadd.f32 %v3862_v40, %v16896_v18 }
 0x4f8   : > { %v8368_v0 = vmul.f32 -1.442695, %v3863_v25  ;;  %v14621_v53 = vpop.f32.mrb[166].mxu1 }
 0x4f9   : > { %v3868_v35 = vpop.f32.mrb[167].mxu1 }
 0x4fa   : > { %v10516_v13 = vpop.eup %10515  ;;  %10519 = vpow2.f32 %v8368_v0  ;;  %v3869_v29 = vadd.f32 %v3868_v35, %v16897_v45 }
 0x4fb   : > { %v4232_v62 = vadd.f32 1.0, %v10516_v13 }
 0x4fc   : > { %v8370_v51 = vmul.f32 -1.442695, %v3869_v29  ;;  %v14624_v24 = vpop.f32.mrb[168].mxu1 }
 0x4fd   : > { %10521 = vrcp.f32 %v4232_v62  ;;  %v3874_v59 = vpop.f32.mrb[169].mxu1 }
 0x4fe   : > { %v10518_v60 = vpop.eup %10517  ;;  %v3875_v4 = vadd.f32 %v3874_v59, %v16898_v30  ;;  %10523 = vpow2.f32 %v8370_v51 }
 0x4ff   : > { %v4234_v50 = vadd.f32 1.0, %v10518_v60 }
 0x500   : > { %v8372_v40 = vmul.f32 -1.442695, %v3875_v4  ;;  %v14627_v25 = vpop.f32.mrb[170].mxu1 }
 0x501   : > { %10525 = vrcp.f32 %v4234_v50  ;;  %v3880_v18 = vpop.f32.mrb[171].mxu1 }
 0x502   : > { %v3881_v0 = vadd.f32 %v3880_v18, %v16899_v42  ;;  %10527 = vpow2.f32 %v8372_v40  ;;  %v16901_v40 = vld [vmem:[#allocation43_spill] sm:$0xff] }
 0x504   : > { %v10520_v35 = vpop.eup %10519  ;;  %v8374_v13 = vmul.f32 -1.442695, %v3881_v0  ;;  %v14630_v29 = vpop.f32.mrb[172].mxu1 }
 0x505   : > { %v4236_v45 = vadd.f32 1.0, %v10520_v35  ;;  %v3886_v62 = vpop.f32.mrb[173].mxu1 }
 0x506   : > { %v3887_v15 = vadd.f32 %v3886_v62, %v16900_v17 }
 0x507   : > { %v10522_v55 = vpop.eup %10521  ;;  %10529 = vrcp.f32 %v4236_v45 }
 0x508   : > { %10531 = vpow2.f32 %v8374_v13  ;;  %v8376_v51 = vmul.f32 -1.442695, %v3887_v15  ;;  %v14633_v4 = vpop.f32.mrb[174].mxu1  ;;  %v4423_v50 = vmul.f32 %v10522_v55, %v14343_v21  ;;  %v10524_v59 = vpop.eup %10523  ;;  %v16902_v55 = vld [vmem:[#allocation47_spill] sm:$0xff] }
 0x509   : > { %v3892_v60 = vpop.f32.mrb[175].mxu1  ;;  %v4238_v18 = vadd.f32 1.0, %v10524_v59 }
 0x50a   : > { %10533 = vpow2.f32 %v8376_v51  ;;  %v3893_v0 = vadd.f32 %v3892_v60, %v16901_v40  ;;  %9155 = vmatprep.mubr.f32.mxu0 %v4423_v50  ;;  %v16904_v51 = vld [vmem:[#allocation40_spill] sm:$0xff] }
 0x50b   : > { %v10526_v42 = vpop.eup %10525  ;;  %10535 = vrcp.f32 %v4238_v18 }
 0x50c   : > { %v8378_v35 = vmul.f32 -1.442695, %v3893_v0  ;;  %v4424_v62 = vmul.f32 %v10526_v42, %v14336_v58  ;;  %v10528_v17 = vpop.eup %10527 }
 0x50d   : > { %v14638_v45 = vpop.f32.mrb[176].mxu1  ;;  %v4240_v15 = vadd.f32 1.0, %v10528_v17  ;;  %v16905_v17 = vld [vmem:[#allocation52_spill] sm:$0xff] }
 0x50e   : > { %10537 = vpow2.f32 %v8378_v35  ;;  %v3898_v13 = vpop.f32.mrb[177].mxu1  ;;  %9156 = vmatmul.mubr.f32.vlgmr.msra.gmra.mrb[96].mxu0 %v4424_v62 }
 0x50f   : > { %v3899_v30 = vadd.f32 %v3898_v13, %v16902_v55  ;;  %9822 = vmatpush1.bf16.msra.mxu0 %v16903_v1  ;;  %10539 = vrcp.f32 %v4240_v15  ;;  %v16907_v13 = vld [vmem:[#allocation44_spill] sm:$0xff] }
 0x510   : > { %9824 = vmatprep.subr.bf16.mxu0 %v16904_v51 }
 0x511   : > { %v10530_v50 = vpop.eup %10529  ;;  %v8380_v59 = vmul.f32 -1.442695, %v3899_v30  ;;  %v14643_v60 = vpop.f32.mrb[178].mxu1 }
 0x512   : > { %v10532_v18 = vpop.eup %10531  ;;  %v3904_v42 = vpop.f32.mrb[179].mxu1  ;;  %v4425_v0 = vmul.f32 %v10530_v50, %v14374_v2  ;;  %v16914_v2 = vld [vmem:[#allocation158_spill] sm:$0xff] }
 0x513   : > { %v4242_v40 = vadd.f32 1.0, %v10532_v18  ;;  %v3905_v35 = vadd.f32 %v3904_v42, %v16905_v17  ;;  %9826 = vmatpush1.bf16.msra.mxu0 %v16906_v39  ;;  %10541 = vpow2.f32 %v8380_v59  ;;  %v16909_v42 = vld [vmem:[#allocation46_spill] sm:$0xff]  ;;  %v16910_v39 = vld [vmem:[#allocation48_spill] sm:$0xff] }
 0x514   : > { %v10534_v62 = vpop.eup %10533  ;;  %9158 = vmatprep.mubr.f32.mxu0 %v4425_v0  ;;  %9828 = vmatprep.subr.bf16.mxu0 %v16907_v13  ;;  %v16911_v13 = vld [vmem:[#allocation156_spill] sm:$0xff] }
 0x515   : > { %10543 = vrcp.f32 %v4242_v40  ;;  %v4244_v15 = vadd.f32 1.0, %v10534_v62  ;;  %v8382_v55 = vmul.f32 -1.442695, %v3905_v35  ;;  %v14649_v30 = vpop.f32.mrb[180].mxu1  ;;  %v10536_v51 = vpop.eup %10535 }
 0x516   : > { %v3910_v1 = vpop.f32.mrb[181].mxu1  ;;  %v4426_v18 = vmul.f32 %v10536_v51, %v14370_v10  ;;  %v16913_v51 = vld [vmem:[#allocation51_spill] sm:$0xff]  ;;  %v16915_v10 = vld [vmem:[#allocation53_spill] sm:$0xff] }
 0x517   : > { %10545 = vrcp.f32 %v4244_v15  ;;  %v3911_v50 = vadd.f32 %v3910_v1, %v16908_v41  ;;  %9830 = vmatpush1.bf16.msra.mxu0 %v16909_v42  ;;  %v16912_v41 = vld [vmem:[#allocation49_spill] sm:$0xff] }
 0x518   : > { %v10538_v17 = vpop.eup %10537  ;;  %9832 = vmatprep.subr.bf16.mxu0 %v16910_v39  ;;  %10547 = vpow2.f32 %v8382_v55  ;;  %9159 = vmatmul.mubr.f32.gmra.mrb[98].mxu0 %v4426_v18 }
 0x519   : > { %v4246_v59 = vadd.f32 1.0, %v10538_v17  ;;  %v8384_v0 = vmul.f32 -1.442695, %v3911_v50  ;;  %v14655_v40 = vpop.f32.mrb[182].mxu1  ;;  %v10540_v35 = vpop.eup %10539 }
 0x51a   : > { %v3916_v62 = vpop.f32.mrb[183].mxu1  ;;  %v4427_v1 = vmul.f32 %v10540_v35, %v14399_v20 }
 0x51b   : > { %10549 = vrcp.f32 %v4246_v59  ;;  %v3917_v15 = vadd.f32 %v3916_v62, %v16911_v13  ;;  %9834 = vmatpush1.bf16.msra.mxu0 %v16912_v41  ;;  %v16916_v62 = vld [vmem:[#allocation54_spill] sm:$0xff] }
 0x51c   : > { %9836 = vmatprep.subr.bf16.mxu0 %v16913_v51  ;;  %10551 = vpow2.f32 %v8384_v0  ;;  %9161 = vmatprep.mubr.f32.mxu0 %v4427_v1 }
 0x51d   : > { %v8386_v42 = vmul.f32 -1.442695, %v3917_v15  ;;  %v14661_v39 = vpop.f32.mrb[184].mxu1  ;;  %v10542_v55 = vpop.eup %10541 }
 0x51e   : > { %v3922_v17 = vpop.f32.mrb[185].mxu1  ;;  %v4248_v18 = vadd.f32 1.0, %v10542_v55 }
 0x51f   : > { %v10544_v50 = vpop.eup %10543  ;;  %10553 = vpow2.f32 %v8386_v42  ;;  %v3923_v59 = vadd.f32 %v3922_v17, %v16914_v2  ;;  %9838 = vmatpush1.bf16.msra.mxu0 %v16915_v10  ;;  %v16917_v42 = vld [vmem:[#allocation160_spill] sm:$0xff] }
 0x520   : > { %v4428_v35 = vmul.f32 %v10544_v50, %v14392_v48  ;;  %9840 = vmatprep.subr.bf16.mxu0 %v16916_v62  ;;  %10555 = vrcp.f32 %v4248_v18  ;;  %v16918_v17 = vld [vmem:[#allocation56_spill] sm:$0xff]  ;;  %v16919_v50 = vld [vmem:[#allocation58_spill] sm:$0xff] }
 0x521   : > { %v10546_v13 = vpop.eup %10545  ;;  %v8388_v0 = vmul.f32 -1.442695, %v3923_v59  ;;  %v14667_v15 = vpop.f32.mrb[186].mxu1 }
 0x522   : > { %9162 = vmatmul.mubr.f32.gmra.mrb[100].mxu0 %v4428_v35  ;;  %v3928_v1 = vpop.f32.mrb[187].mxu1  ;;  %v4429_v51 = vmul.f32 %v10546_v13, %v14427_v22  ;;  %v10548_v41 = vpop.eup %10547  ;;  %v16921_v13 = vld [vmem:[#allocation162_spill] sm:$0xff] }
 0x523   : > { %10557 = vpow2.f32 %v8388_v0  ;;  %v3929_v55 = vadd.f32 %v3928_v1, %v16917_v42  ;;  %9842 = vmatpush1.bf16.msra.mxu0 %v16918_v17  ;;  %v4250_v2 = vadd.f32 1.0, %v10548_v41  ;;  %v16922_v0 = vld [vmem:[#allocation60_spill] sm:$0xff]  ;;  %v16923_v41 = vld [vmem:[#allocation61_spill] sm:$0xff] }
 0x524   : > { %9164 = vmatprep.mubr.f32.mxu0 %v4429_v51  ;;  %9844 = vmatprep.subr.bf16.mxu0 %v16919_v50 }
 0x525   : > { %v10550_v62 = vpop.eup %10549  ;;  %v8390_v10 = vmul.f32 -1.442695, %v3929_v55  ;;  %v14673_v18 = vpop.f32.mrb[188].mxu1  ;;  %10559 = vrcp.f32 %v4250_v2 }
 0x526   : > { %16920 = vst [vmem:[#allocation67_spill] sm:$0xff] %v14673_v18  ;;  %v3934_v59 = vpop.f32.mrb[189].mxu1  ;;  %v4430_v35 = vmul.f32 %v10550_v62, %v14423_v19  ;;  %v10552_v48 = vpop.eup %10551  ;;  %v16924_v18 = vld [vmem:[#allocation164_spill] sm:$0xff]  ;;  %v16925_v19 = vld [vmem:[#allocation62_spill] sm:$0xff] }
 0x527   : > { %v3935_v22 = vadd.f32 %v3934_v59, %v16921_v13  ;;  %9846 = vmatpush1.bf16.msra.mxu0 %v16922_v0  ;;  %v4252_v1 = vadd.f32 1.0, %v10552_v48  ;;  %10561 = vpow2.f32 %v8390_v10 }
 0x528   : > { %9165 = vmatmul.mubr.f32.gmra.mrb[102].mxu0 %v4430_v35  ;;  %9848 = vmatprep.subr.bf16.mxu0 %v16923_v41 }
 0x529   : > { %v10554_v51 = vpop.eup %10553  ;;  %v14679_v42 = vpop.f32.mrb[190].mxu1  ;;  %10563 = vrcp.f32 %v4252_v1  ;;  %v8392_v50 = vmul.f32 -1.442695, %v3935_v22  ;;  %v16926_v22 = vld [vmem:[#allocation165_spill] sm:$0xff] }
 0x52a   : > { %v4254_v55 = vadd.f32 1.0, %v10554_v51  ;;  %v3940_v2 = vpop.f32.mrb[191].mxu1  ;;  %v10556_v17 = vpop.eup %10555 }
 0x52b   : > { %v3941_v62 = vadd.f32 %v3940_v2, %v16924_v18  ;;  %9850 = vmatpush1.bf16.msra.mxu0 %v16925_v19  ;;  %v4431_v59 = vmul.f32 %v10556_v17, %v14452_v14  ;;  %v16927_v14 = vld [vmem:[#allocation76_spill] sm:$0xff] }
 0x52c   : > { %10565 = vrcp.f32 %v4254_v55  ;;  %9916 = vmatprep.subr.bf16.mxu0 %v13397_v34 }
 0x52d   : > { %v10558_v10 = vpop.eup %10557  ;;  %v14685_v48 = vpop.f32.mrb[192].mxu1  ;;  %10567 = vpow2.f32 %v8392_v50  ;;  %v8394_v13 = vmul.f32 -1.442695, %v3941_v62  ;;  %9167 = vmatprep.mubr.f32.mxu0 %v4431_v59 }
 0x52e   : > { %v4256_v35 = vadd.f32 1.0, %v10558_v10  ;;  %v3946_v1 = vpop.f32.mrb[193].mxu1 }
 0x52f   : > { %v3947_v51 = vadd.f32 %v3946_v1, %v16926_v22  ;;  %v10560_v41 = vpop.eup %10559 }
 0x530   : > { %10569 = vrcp.f32 %v4256_v35  ;;  %v4432_v55 = vmul.f32 %v10560_v41, %v14448_v5  ;;  %v16928_v41 = vld [vmem:[#allocation80_spill] sm:$0xff] }
 0x531   : > { %v14688_v2 = vpop.f32.mrb[194].mxu1  ;;  %v10562_v18 = vpop.eup %10561  ;;  %10571 = vpow2.f32 %v8394_v13  ;;  %v8396_v17 = vmul.f32 -1.442695, %v3947_v51 }
 0x532   : > { %v3952_v19 = vpop.f32.mrb[195].mxu1  ;;  %v4258_v0 = vadd.f32 1.0, %v10562_v18  ;;  %9168 = vmatmul.mubr.f32.gmra.mrb[104].mxu0 %v4432_v55 }
 0x533   : > { %v3953_v10 = vadd.f32 %v3952_v19, %v16927_v14  ;;  %v10564_v50 = vpop.eup %10563  ;;  %v16930_v14 = vld [vmem:[#allocation85_spill] sm:$0xff] }
 0x534   : > { %10573 = vrcp.f32 %v4258_v0  ;;  %v4433_v1 = vmul.f32 %v10564_v50, %v14464_v28 }
 0x535   : > { %v8398_v62 = vmul.f32 -1.442695, %v3953_v10  ;;  %v14692_v59 = vpop.f32.mrb[196].mxu1  ;;  %10575 = vpow2.f32 %v8396_v17 }
 0x536   : > { %v10566_v35 = vpop.eup %10565  ;;  %v3958_v22 = vpop.f32.mrb[197].mxu1  ;;  %9170 = vmatprep.mubr.f32.mxu0 %v4433_v1 }
 0x537   : > { %v3959_v5 = vadd.f32 %v3958_v22, %v16928_v41  ;;  %v4434_v13 = vmul.f32 %v10566_v35, %v14460_v46  ;;  %v10568_v51 = vpop.eup %10567  ;;  %10577 = vpow2.f32 %v8398_v62 }
 0x538   : > { %v4260_v18 = vadd.f32 1.0, %v10568_v51 }
 0x539   : > { %v8400_v55 = vmul.f32 -1.442695, %v3959_v5  ;;  %v14697_v19 = vpop.f32.mrb[198].mxu1  ;;  %9171 = vmatmul.mubr.f32.gmra.mrb[106].mxu0 %v4434_v13  ;;  %v16931_v5 = vld [vmem:[#allocation91_spill] sm:$0xff] }
 0x53a   : > { %16929 = vst [vmem:[#allocation174_spill] sm:$0xff] %v14697_v19  ;;  %v10570_v0 = vpop.eup %10569  ;;  %v3964_v10 = vpop.f32.mrb[199].mxu1  ;;  %10579 = vrcp.f32 %v4260_v18 }
 0x53b   : > { %v3965_v50 = vadd.f32 %v3964_v10, %v16930_v14  ;;  %v4435_v17 = vmul.f32 %v10570_v0, %v14485_v8  ;;  %v10572_v28 = vpop.eup %10571  ;;  %10581 = vpow2.f32 %v8400_v55  ;;  %v16933_v8 = vld [vmem:[#allocation94_spill] sm:$0xff] }
 0x53c   : > { %v4262_v1 = vadd.f32 1.0, %v10572_v28 }
 0x53d   : > { %v14701_v22 = vpop.f32.mrb[200].mxu1  ;;  %9173 = vmatprep.mubr.f32.mxu0 %v4435_v17  ;;  %v8402_v35 = vmul.f32 -1.442695, %v3965_v50  ;;  %v16932_v17 = vld [vmem:[#allocation63_spill] sm:$0xff] }
 0x53e   : > { %v3970_v62 = vpop.f32.mrb[201].mxu1  ;;  %v10574_v51 = vpop.eup %10573  ;;  %10583 = vrcp.f32 %v4262_v1 }
 0x53f   : > { %v3971_v41 = vadd.f32 %v3970_v62, %v16931_v5  ;;  %v10576_v13 = vpop.eup %10575  ;;  %v4436_v46 = vmul.f32 %v10574_v51, %v14481_v37  ;;  %10585 = vpow2.f32 %v8402_v35 }
 0x540   : > { %v4264_v18 = vadd.f32 1.0, %v10576_v13 }
 0x541   : > { %v14705_v19 = vpop.f32.mrb[202].mxu1  ;;  %v10578_v10 = vpop.eup %10577  ;;  %9174 = vmatmul.mubr.f32.gmra.mrb[108].mxu0 %v4436_v46  ;;  %v8404_v0 = vmul.f32 -1.442695, %v3971_v41 }
 0x542   : > { %v3976_v28 = vpop.f32.mrb[203].mxu1  ;;  %10587 = vrcp.f32 %v4264_v18  ;;  %v4266_v55 = vadd.f32 1.0, %v10578_v10 }
 0x543   : > { %v3977_v50 = vadd.f32 %v3976_v28, %v16932_v17 }
 0x544   : > { %v10580_v14 = vpop.eup %10579  ;;  %10589 = vrcp.f32 %v4266_v55  ;;  %v16934_v55 = vld [vmem:[#allocation169_spill] sm:$0xff] }
 0x545   : > { %v14708_v1 = vpop.f32.mrb[204].mxu1  ;;  %v4437_v62 = vmul.f32 %v10580_v14, %v14499_v12  ;;  %v10582_v51 = vpop.eup %10581  ;;  %10591 = vpow2.f32 %v8404_v0  ;;  %v8406_v13 = vmul.f32 -1.442695, %v3977_v50 }
 0x546   : > { %v3982_v5 = vpop.f32.mrb[205].mxu1  ;;  %v4268_v35 = vadd.f32 1.0, %v10582_v51 }
 0x547   : > { %v3983_v37 = vadd.f32 %v3982_v5, %v16933_v8  ;;  %9176 = vmatprep.mubr.f32.mxu0 %v4437_v62 }
 0x548   : > { %v10584_v46 = vpop.eup %10583  ;;  %10593 = vrcp.f32 %v4268_v35  ;;  %v16935_v35 = vld [vmem:[#allocation170_spill] sm:$0xff] }
 0x549   : > { %v8408_v18 = vmul.f32 -1.442695, %v3983_v37  ;;  %v14712_v10 = vpop.f32.mrb[206].mxu1  ;;  %v4438_v41 = vmul.f32 %v10584_v46, %v14496_v26  ;;  %10595 = vpow2.f32 %v8406_v13  ;;  %v10586_v14 = vpop.eup %10585 }
 0x54a   : > { %v3988_v28 = vpop.f32.mrb[207].mxu1  ;;  %v4270_v0 = vadd.f32 1.0, %v10586_v14 }
 0x54b   : > { %v3989_v17 = vadd.f32 %v3988_v28, %v16934_v55  ;;  %9177 = vmatmul.mubr.f32.gmra.mrb[110].mxu0 %v4438_v41  ;;  %10597 = vpow2.f32 %v8408_v18  ;;  %v16936_v18 = vld [vmem:[#allocation97_spill] sm:$0xff] }
 0x54c   : > { %v10588_v12 = vpop.eup %10587  ;;  %10599 = vrcp.f32 %v4270_v0 }
 0x54d   : > { %v8410_v50 = vmul.f32 -1.442695, %v3989_v17  ;;  %v14716_v5 = vpop.f32.mrb[208].mxu1  ;;  %v4439_v62 = vmul.f32 %v10588_v12, %v14512_v32 }
 0x54e   : > { %v3994_v37 = vpop.f32.mrb[209].mxu1  ;;  %v10590_v51 = vpop.eup %10589 }
 0x54f   : > { %v3995_v8 = vadd.f32 %v3994_v37, %v16935_v35  ;;  %9179 = vmatprep.mubr.f32.mxu0 %v4439_v62  ;;  %v4440_v13 = vmul.f32 %v10590_v51, %v14507_v44  ;;  %v10592_v46 = vpop.eup %10591  ;;  %10601 = vpow2.f32 %v8410_v50 }
 0x550   : > { %v4272_v41 = vadd.f32 1.0, %v10592_v46 }
 0x551   : > { %v14721_v28 = vpop.f32.mrb[210].mxu1  ;;  %v8412_v14 = vmul.f32 -1.442695, %v3995_v8  ;;  %9180 = vmatmul.mubr.f32.gmra.mrb[112].mxu0 %v4440_v13  ;;  %v16937_v8 = vld [vmem:[#allocation99_spill] sm:$0xff] }
 0x552   : > { %v4000_v17 = vpop.f32.mrb[211].mxu1  ;;  %v10594_v26 = vpop.eup %10593  ;;  %10603 = vrcp.f32 %v4272_v41 }
 0x553   : > { %v4001_v55 = vadd.f32 %v4000_v17, %v16936_v18  ;;  %v10596_v12 = vpop.eup %10595  ;;  %v4441_v0 = vmul.f32 %v10594_v26, %v14525_v31  ;;  %10605 = vpow2.f32 %v8412_v14  ;;  %v16939_v26 = vld [vmem:[#allocation102_spill] sm:$0xff] }
 0x554   : > { %v4274_v62 = vadd.f32 1.0, %v10596_v12 }
 0x555   : > { %v14724_v32 = vpop.f32.mrb[212].mxu1  ;;  %v10598_v51 = vpop.eup %10597  ;;  %v8414_v50 = vmul.f32 -1.442695, %v4001_v55  ;;  %9182 = vmatprep.mubr.f32.mxu0 %v4441_v0 }
 0x556   : > { %v4006_v37 = vpop.f32.mrb[213].mxu1  ;;  %10607 = vrcp.f32 %v4274_v62  ;;  %v4276_v46 = vadd.f32 1.0, %v10598_v51  ;;  %v10600_v35 = vpop.eup %10599 }
 0x557   : > { %v4007_v13 = vadd.f32 %v4006_v37, %v16937_v8  ;;  %v4442_v41 = vmul.f32 %v10600_v35, %v14520_v54  ;;  %v16940_v8 = vld [vmem:[#allocation105_spill] sm:$0xff] }
 0x558   : > { %10609 = vrcp.f32 %v4276_v46 }
 0x559   : > { %v14728_v44 = vpop.f32.mrb[214].mxu1  ;;  %v10602_v18 = vpop.eup %10601  ;;  %10611 = vpow2.f32 %v8414_v50  ;;  %v8416_v31 = vmul.f32 -1.442695, %v4007_v13  ;;  %9183 = vmatmul.mubr.f32.gmra.mrb[114].mxu0 %v4442_v41 }
 0x55a   : > { %16938 = vst [vmem:[#allocation173_spill] sm:$0xff] %v14728_v44  ;;  %v4012_v17 = vpop.f32.mrb[215].mxu1  ;;  %v4278_v14 = vadd.f32 1.0, %v10602_v18 }
 0x55b   : > { %v4013_v12 = vadd.f32 %v4012_v17, %v16939_v26 }
 0x55c   : > { %v10604_v0 = vpop.eup %10603  ;;  %10613 = vrcp.f32 %v4278_v14  ;;  %v16941_v14 = vld [vmem:[#allocation107_spill] sm:$0xff] }
 0x55d   : > { %v14732_v55 = vpop.f32.mrb[216].mxu1  ;;  %v8418_v62 = vmul.f32 -1.442695, %v4013_v12  ;;  %v4443_v51 = vmul.f32 %v10604_v0, %v14541_v49  ;;  %v10606_v44 = vpop.eup %10605  ;;  %10615 = vpow2.f32 %v8416_v31 }
 0x55e   : > { %v4018_v37 = vpop.f32.mrb[217].mxu1  ;;  %v4280_v35 = vadd.f32 1.0, %v10606_v44 }
 0x55f   : > { %v4019_v46 = vadd.f32 %v4018_v37, %v16940_v8  ;;  %9185 = vmatprep.mubr.f32.mxu0 %v4443_v51  ;;  %10617 = vpow2.f32 %v8418_v62  ;;  %v16942_v62 = vld [vmem:[#allocation109_spill] sm:$0xff] }
 0x560   : > { %v10608_v17 = vpop.eup %10607  ;;  %10619 = vrcp.f32 %v4280_v35 }
 0x561   : > { %v14736_v50 = vpop.f32.mrb[218].mxu1  ;;  %v8420_v18 = vmul.f32 -1.442695, %v4019_v46  ;;  %v4444_v41 = vmul.f32 %v10608_v17, %v14536_v63 }
 0x562   : > { %v4024_v13 = vpop.f32.mrb[219].mxu1  ;;  %v10610_v26 = vpop.eup %10609 }
 0x563   : > { %v4025_v12 = vadd.f32 %v4024_v13, %v16941_v14  ;;  %v10612_v54 = vpop.eup %10611  ;;  %9186 = vmatmul.mubr.f32.gmra.mrb[116].mxu0 %v4444_v41  ;;  %v4445_v31 = vmul.f32 %v10610_v26, %v14552_v33  ;;  %10621 = vpow2.f32 %v8420_v18  ;;  %v16943_v26 = vld [vmem:[#allocation111_spill] sm:$0xff] }
 0x564   : > { %v4282_v44 = vadd.f32 1.0, %v10612_v54 }
 0x565   : > { %v14740_v0 = vpop.f32.mrb[220].mxu1  ;;  %v8422_v37 = vmul.f32 -1.442695, %v4025_v12  ;;  %9188 = vmatprep.mubr.f32.mxu0 %v4445_v31 }
 0x566   : > { %v4030_v51 = vpop.f32.mrb[221].mxu1  ;;  %v10614_v8 = vpop.eup %10613  ;;  %10623 = vrcp.f32 %v4282_v44 }
 0x567   : > { %v4031_v46 = vadd.f32 %v4030_v51, %v16942_v62  ;;  %v4446_v13 = vmul.f32 %v10614_v8, %v14548_v61  ;;  %v10616_v14 = vpop.eup %10615  ;;  %10625 = vpow2.f32 %v8422_v37 }
 0x568   : > { %v4284_v49 = vadd.f32 1.0, %v10616_v14 }
 0x569   : > { %v8424_v35 = vmul.f32 -1.442695, %v4031_v46  ;;  %v14744_v17 = vpop.f32.mrb[222].mxu1  ;;  %9189 = vmatmul.mubr.f32.gmra.mrb[118].mxu0 %v4446_v13  ;;  %v10618_v18 = vpop.eup %10617 }
 0x56a   : > { %v4036_v41 = vpop.f32.mrb[223].mxu1  ;;  %v10620_v12 = vpop.eup %10619  ;;  %v4286_v31 = vadd.f32 1.0, %v10618_v18 }
 0x56b   : > { %v4037_v54 = vadd.f32 %v4036_v41, %v16943_v26  ;;  %10627 = vpow2.f32 %v8424_v35  ;;  %v4447_v44 = vmul.f32 %v10620_v12, %v14566_v27 }
 0x56c   : > { %10629 = vrcp.f32 %v4284_v49 }
 0x56d   : > { %v8426_v51 = vmul.f32 -1.442695, %v4037_v54  ;;  %10631 = vrcp.f32 %v4286_v31  ;;  %v10622_v46 = vpop.eup %10621  ;;  %9191 = vmatprep.mubr.f32.mxu0 %v4447_v44 }
 0x56e   : > { %v4288_v62 = vadd.f32 1.0, %v10622_v46 }
 0x56f   : > { %10633 = vpow2.f32 %v8426_v51 }
 0x570   : > { %v10624_v8 = vpop.eup %10623  ;;  %10635 = vrcp.f32 %v4288_v62 }
 0x571   : > { %v4448_v14 = vmul.f32 %v10624_v8, %v14562_v36  ;;  %v10626_v37 = vpop.eup %10625 }
 0x572   : > { %v4290_v13 = vadd.f32 1.0, %v10626_v37 }
 0x573   : > { %9192 = vmatmul.mubr.f32.gmra.mrb[120].mxu0 %v4448_v14 }
 0x574   : > { %10637 = vrcp.f32 %v4290_v13 }
 0x575   : > { %v10628_v41 = vpop.eup %10627 }
 0x576   : > { %v10630_v35 = vpop.eup %10629  ;;  %v4292_v49 = vadd.f32 1.0, %v10628_v41 }
 0x577   : > { %v4449_v54 = vmul.f32 %v10630_v35, %v14583_v38  ;;  %v10632_v18 = vpop.eup %10631  ;;  %v16944_v35 = vld [vmem:[#allocation145_spill] sm:$0xff] }
 0x578   : > { %10639 = vrcp.f32 %v4292_v49  ;;  %v4450_v12 = vmul.f32 %v10632_v18, %v14579_v47  ;;  %v3855_v49 = vadd.f32 %v14615_v23, %v16944_v35 }
 0x579   : > { %9194 = vmatprep.mubr.f32.mxu0 %v4449_v54  ;;  %v10634_v31 = vpop.eup %10633  ;;  %v16945_v54 = vld [vmem:[#allocation143_spill] sm:$0xff] }
 0x57a   : > { %v4294_v51 = vadd.f32 1.0, %v10634_v31  ;;  %9195 = vmatmul.mubr.f32.gmra.mrb[122].mxu0 %v4450_v12  ;;  %v10636_v62 = vpop.eup %10635  ;;  %v3849_v18 = vadd.f32 %v14612_v52, %v16945_v54  ;;  %v8365_v12 = vmul.f32 -1.442695, %v3855_v49  ;;  %v16949_v52 = vld [vmem:[#allocation153_spill] sm:$0xff] }
 0x57b   : > { %v4451_v44 = vmul.f32 %v10636_v62, %v14595_v57  ;;  %v3879_v49 = vadd.f32 %v14627_v25, %v16949_v52  ;;  %v16952_v25 = vld [vmem:[#allocation112_spill] sm:$0xff] }
 0x57c   : > { %10641 = vrcp.f32 %v4294_v51  ;;  %v8363_v31 = vmul.f32 -1.442695, %v3849_v18  ;;  %v16946_v51 = vld [vmem:[#allocation149_spill] sm:$0xff] }
 0x57d   : > { %9197 = vmatprep.mubr.f32.mxu0 %v4451_v44  ;;  %10643 = vpow2.f32 %v8365_v12  ;;  %v3867_v62 = vadd.f32 %v14621_v53, %v16946_v51  ;;  %v16947_v44 = vld [vmem:[#allocation147_spill] sm:$0xff]  ;;  %v16950_v12 = vld [vmem:[#allocation37_spill] sm:$0xff] }
 0x57e   : > { %v10638_v46 = vpop.eup %10637  ;;  %10645 = vpow2.f32 %v8363_v31  ;;  %v3885_v53 = vadd.f32 %v14630_v29, %v16950_v12  ;;  %v16951_v51 = vld [vmem:[#allocation41_spill] sm:$0xff] }
 0x57f   : > { %v4452_v8 = vmul.f32 %v10638_v46, %v14591_v11  ;;  %v3861_v46 = vadd.f32 %v14618_v16, %v16947_v44  ;;  %v3891_v16 = vadd.f32 %v14633_v4, %v16951_v51  ;;  %v16953_v29 = vld [vmem:[#allocation113_spill] sm:$0xff] }
 0x581   : > { %9198 = vmatmul.mubr.f32.gmra.mrb[124].mxu0 %v4452_v8  ;;  %v8369_v8 = vmul.f32 -1.442695, %v3867_v62  ;;  %v8373_v62 = vmul.f32 -1.442695, %v3879_v49 }
 0x582   : > { %v10640_v14 = vpop.eup %10639 }
 0x583   : > { %v4453_v37 = vmul.f32 %v10640_v14, %v14607_v7  ;;  %10647 = vpow2.f32 %v8369_v8 }
 0x585   : > { %9200 = vmatprep.mubr.f32.mxu0 %v4453_v37  ;;  %v8367_v37 = vmul.f32 -1.442695, %v3861_v46  ;;  %v8375_v46 = vmul.f32 -1.442695, %v3885_v53 }
 0x586   : > { %v10642_v13 = vpop.eup %10641 }
 0x587   : > { %v4454_v41 = vmul.f32 %v10642_v13, %v14603_v6  ;;  %v10644_v14 = vpop.eup %10643  ;;  %v16948_v13 = vld [vmem:[#allocation151_spill] sm:$0xff]  ;;  %10649 = vpow2.f32 %v8367_v37 }
 0x588   : > { %v10646_v23 = vpop.eup %10645  ;;  %v4233_v35 = vadd.f32 1.0, %v10644_v14 }
 0x589   : > { %9201 = vmatmul.mubr.f32.gmra.mrb[126].mxu0 %v4454_v41  ;;  %v3873_v41 = vadd.f32 %v14624_v24, %v16948_v13  ;;  %v4231_v31 = vadd.f32 1.0, %v10646_v23  ;;  %v8377_v24 = vmul.f32 -1.442695, %v3891_v16 }
 0x58a   : > { %4904 = vmatprep.mubr.f32.mxu0 %v16817_v56  ;;  %10651 = vrcp.f32 %v4233_v35 }
 0x58b   : > { %v8371_v18 = vmul.f32 -1.442695, %v3873_v41 }
 0x58d   : > { %10653 = vpow2.f32 %v8371_v18  ;;  %v10648_v14 = vpop.eup %10647 }
 0x58e   : > { %10655 = vrcp.f32 %v4231_v31  ;;  %v4237_v12 = vadd.f32 1.0, %v10648_v14 }
 0x58f   : > { %10657 = vpow2.f32 %v8373_v62  ;;  %v16954_v62 = vld [vmem:[#allocation50_spill] sm:$0xff] }
 0x590   : > { %10659 = vpow2.f32 %v8375_v46  ;;  %v3903_v46 = vadd.f32 %v14643_v60, %v16954_v62  ;;  %v16957_v60 = vld [vmem:[#allocation115_spill] sm:$0xff] }
 0x591   : > { %v10650_v52 = vpop.eup %10649  ;;  %10661 = vpow2.f32 %v8377_v24 }
 0x592   : > { %v4235_v35 = vadd.f32 1.0, %v10650_v52 }
 0x594   : > { %v10652_v4 = vpop.eup %10651 }
 0x595   : > { %v4713_v53 = vsub.f32 1.0, %v10652_v4 }
 0x597   : > { %v10654_v49 = vpop.eup %10653 }
 0x598   : > { %v10656_v18 = vpop.eup %10655  ;;  %v4239_v16 = vadd.f32 1.0, %v10654_v49  ;;  %v16956_v49 = vld [vmem:[#allocation55_spill] sm:$0xff] }
 0x599   : > { %v10658_v31 = vpop.eup %10657  ;;  %v3909_v13 = vadd.f32 %v14649_v30, %v16956_v49 }
 0x59a   : > { %v10660_v51 = vpop.eup %10659 }
 0x59b   : > { %v10662_v14 = vpop.eup %10661  ;;  %v4243_v26 = vadd.f32 1.0, %v10660_v51  ;;  %v8383_v30 = vmul.f32 -1.442695, %v3909_v13  ;;  %v16959_v13 = vld [vmem:[#allocation154_spill] sm:$0xff] }
 0x5e1   : > { %v9157_v8 = vpop.f32.mrb[96].mxu0 }
 0x5e2   : > { %v4527_v37 = vadd.f32 %v9157_v8, %v16952_v25  ;;  %v4521_v41 = vpop.f32.mrb[97].mxu0  ;;  %v16955_v8 = vld [vmem:[#allocation45_spill] sm:$0xff] }
 0x5e3   : > { %v4522_v23 = vadd.f32 %v4521_v41, %v16953_v29  ;;  %v3897_v24 = vadd.f32 %v14638_v45, %v16955_v8  ;;  %v4712_v41 = vsub.f32 1.0, %v10656_v18  ;;  %v16958_v8 = vld [vmem:[#allocation155_spill] sm:$0xff] }
 0x5e4   : > { %10663 = vtanh.f32 %v4527_v37  ;;  %v3915_v54 = vadd.f32 %v14655_v40, %v16958_v8 }
 0x5e5   : > { %10665 = vtanh.f32 %v4522_v23  ;;  %v4241_v23 = vadd.f32 1.0, %v10658_v31  ;;  %v8379_v45 = vmul.f32 -1.442695, %v3897_v24 }
 0x5e6   : > { %10667 = vrcp.f32 %v4237_v12  ;;  %v4745_v12 = vmul.f32 %v4713_v53, %v14336_v58  ;;  %v4744_v58 = vmul.f32 %v4712_v41, %v14343_v21  ;;  %v4245_v53 = vadd.f32 1.0, %v10662_v14  ;;  %v16961_v14 = vld [vmem:[#allocation157_spill] sm:$0xff] }
 0x5e7   : > { %10669 = vrcp.f32 %v4235_v35  ;;  %v8381_v35 = vmul.f32 -1.442695, %v3903_v46  ;;  %v8385_v24 = vmul.f32 -1.442695, %v3915_v54 }
 0x5e8   : > { %10671 = vrcp.f32 %v4239_v16 }
 0x5eb   : > { %v9160_v37 = vpop.f32.mrb[98].mxu0 }
 0x5ec   : > { %v4537_v52 = vadd.f32 %v9160_v37, %v14325_v9  ;;  %v4531_v29 = vpop.f32.mrb[99].mxu0 }
 0x5ed   : > { %v4532_v62 = vadd.f32 %v4531_v29, %v16957_v60 }
 0x5ee   : > { %v10664_v25 = vpop.eup %10663  ;;  %10673 = vtanh.f32 %v4537_v52  ;;  %v16962_v52 = vld [vmem:[#allocation119_spill] sm:$0xff] }
 0x5ef   : > { %v10666_v44 = vpop.eup %10665  ;;  %v4777_v31 = vmul.f32 %v10664_v25, %v10652_v4  ;;  %10675 = vtanh.f32 %v4532_v62 }
 0x5f0   : > { %v4776_v37 = vmul.f32 %v10666_v44, %v10656_v18  ;;  %10677 = vrcp.f32 %v4241_v23  ;;  %v10668_v29 = vpop.eup %10667  ;;  %v16960_v18 = vld [vmem:[#allocation159_spill] sm:$0xff]  ;;  %v3921_v23 = vadd.f32 %v14661_v39, %v16961_v14 }
 0x5f1   : > { %v14787_v16 = vadd.f32 %v4777_v31, %v4745_v12  ;;  %10679 = vpow2.f32 %v8381_v35  ;;  %v10670_v49 = vpop.eup %10669  ;;  %v4715_v44 = vsub.f32 1.0, %v10668_v29  ;;  %v3927_v62 = vadd.f32 %v14667_v15, %v16960_v18 }
 0x5f2   : > { %v14789_v46 = vadd.f32 %v4776_v37, %v4744_v58  ;;  %10681 = vpow2.f32 %v8379_v45  ;;  %v4714_v25 = vsub.f32 1.0, %v10670_v49  ;;  %v16963_v45 = vld [vmem:[#allocation78_spill] sm:$0xff]  ;;  %v16964_v58 = vld [vmem:[#allocation176_spill] sm:$0xff] }
 0x5f3   : > { %10683 = vrcp.f32 %v4243_v26  ;;  %v10672_v26 = vpop.eup %10671  ;;  %v4747_v12 = vmul.f32 %v4715_v44, %v16962_v52  ;;  %v8387_v44 = vmul.f32 -1.442695, %v3921_v23 }
 0x5f4   : > { %4905 = vmatmul.mubr.f32.vlgmr.msra.gmra.mrb[128].mxu0 %v14789_v46  ;;  %10685 = vrcp.f32 %v4245_v53  ;;  %v4746_v53 = vmul.f32 %v4714_v25, %v16964_v58  ;;  %v16970_v58 = vld [vmem:[#allocation177_spill] sm:$0xff] }
 0x5f5   : > { %v9163_v40 = vpop.f32.mrb[100].mxu0  ;;  %4910 = vmatprep.mubr.f32.mxu0 %v16817_v56  ;;  %9918 = vmatpush3.bf16.msra.mxu0 %v13397_v34  ;;  %10687 = vpow2.f32 %v8383_v30 }
 0x5f6   : > { %v4547_v21 = vadd.f32 %v9163_v40, %v14340_v3  ;;  %v4541_v51 = vpop.f32.mrb[101].mxu0  ;;  %9920 = vmatprep.subr.bf16.mxu0 %v13441_v43  ;;  %10689 = vpow2.f32 %v8385_v24  ;;  %v16965_v24 = vld [vmem:[#allocation117_spill] sm:$0xff]  ;;  %v16967_v3 = vld [vmem:[#allocation118_spill] sm:$0xff] }
 0x5f7   : > { %v4542_v54 = vadd.f32 %v4541_v51, %v16959_v13  ;;  %v8389_v13 = vmul.f32 -1.442695, %v3927_v62 }
 0x5f8   : > { %10691 = vtanh.f32 %v4547_v21  ;;  %4911 = vmatmul.mubr.f32.gmra.mrb[130].mxu0 %v14787_v16  ;;  %v10674_v4 = vpop.eup %10673 }
 0x5f9   : > { %10693 = vtanh.f32 %v4542_v54  ;;  %4916 = vmatprep.mubr.f32.mxu0 %v16817_v56  ;;  %9922 = vmatpush3.bf16.msra.mxu0 %v13441_v43  ;;  %v10676_v41 = vpop.eup %10675  ;;  %v4779_v35 = vmul.f32 %v10674_v4, %v10668_v29  ;;  %v4716_v4 = vsub.f32 1.0, %v10672_v26  ;;  %v16996_v43 = vld [vmem:[#allocation125_spill] sm:$0xff] }
 0x5fa   : > { %9924 = vmatprep.subr.bf16.mxu0 %v16963_v45  ;;  %v10678_v31 = vpop.eup %10677  ;;  %v4778_v30 = vmul.f32 %v10676_v41, %v10670_v49  ;;  %v16969_v49 = vld [vmem:[#allocation87_spill] sm:$0xff] }
 0x5fb   : > { %v9166_v37 = vpop.f32.mrb[102].mxu0  ;;  %v10680_v15 = vpop.eup %10679  ;;  %v14808_v51 = vadd.f32 %v4779_v35, %v4747_v12  ;;  %v4717_v25 = vsub.f32 1.0, %v10678_v31  ;;  %v4748_v23 = vmul.f32 %v4716_v4, %v14399_v20  ;;  %v16975_v4 = vld [vmem:[#allocation72_spill] sm:$0xff] }
 0x5fc   : > { %v4557_v40 = vadd.f32 %v9166_v37, %v16965_v24  ;;  %v4551_v21 = vpop.f32.mrb[103].mxu0  ;;  %v10682_v54 = vpop.eup %10681  ;;  %v14811_v18 = vadd.f32 %v4778_v30, %v4746_v53  ;;  %v4249_v52 = vadd.f32 1.0, %v10680_v15  ;;  %v16971_v30 = vld [vmem:[#allocation93_spill] sm:$0xff]  ;;  %v16974_v24 = vld [vmem:[#allocation67_spill] sm:$0xff] }
 0x5fd   : > { %16966 = vst [vmem:[#allocation70_spill] sm:$0xff] %v14808_v51  ;;  %v4552_v39 = vadd.f32 %v4551_v21, %v16967_v3  ;;  %9926 = vmatpush3.bf16.msra.mxu0 %v16963_v45  ;;  %v10684_v29 = vpop.eup %10683  ;;  %v4247_v62 = vadd.f32 1.0, %v10682_v54  ;;  %v4749_v53 = vmul.f32 %v4717_v25, %v16970_v58  ;;  %v16972_v21 = vld [vmem:[#allocation163_spill] sm:$0xff]  ;;  %v16973_v3 = vld [vmem:[#allocation161_spill] sm:$0xff]  ;;  %v3945_v25 = vadd.f32 %v14685_v48, %v16975_v4 }
 0x5fe   : > { %16968 = vst [vmem:[#allocation69_spill] sm:$0xff] %v14811_v18  ;;  %10695 = vtanh.f32 %v4557_v40  ;;  %9928 = vmatprep.subr.bf16.mxu0 %v16969_v49  ;;  %v10686_v41 = vpop.eup %10685  ;;  %4917 = vmatmul.mubr.f32.gmra.mrb[132].mxu0 %v14811_v18  ;;  %v3939_v54 = vadd.f32 %v14679_v42, %v16972_v21  ;;  %v16977_v42 = vld [vmem:[#allocation6_spill] sm:$0xff] }
 0x5ff   : > { %10697 = vtanh.f32 %v4552_v39  ;;  %v10688_v12 = vpop.eup %10687  ;;  %4922 = vmatprep.mubr.f32.mxu0 %v16817_v56 }
 0x600   : > { %v10690_v35 = vpop.eup %10689  ;;  %10699 = vpow2.f32 %v8389_v13  ;;  %v4251_v40 = vadd.f32 1.0, %v10688_v12  ;;  %v3951_v12 = vadd.f32 %v14688_v2, %v16977_v42  ;;  %v8395_v2 = vmul.f32 -1.442695, %v3945_v25 }
 0x601   : > { %9930 = vmatpush3.bf16.msra.mxu0 %v16969_v49  ;;  %10701 = vpow2.f32 %v8387_v44  ;;  %v4253_v13 = vadd.f32 1.0, %v10690_v35  ;;  %v3933_v44 = vadd.f32 %v16974_v24, %v16973_v3  ;;  %v4718_v35 = vsub.f32 1.0, %v10684_v29 }
 0x602   : > { %v10692_v37 = vpop.eup %10691  ;;  %9932 = vmatprep.subr.bf16.mxu0 %v16971_v30  ;;  %10703 = vrcp.f32 %v4249_v52  ;;  %4923 = vmatmul.mubr.f32.gmra.mrb[134].mxu0 %v14808_v51  ;;  %v4719_v52 = vsub.f32 1.0, %v10686_v41  ;;  %v8393_v24 = vmul.f32 -1.442695, %v3939_v54  ;;  %v16983_v54 = vld [vmem:[#allocation179_spill] sm:$0xff] }
 0x603   : > { %v10694_v15 = vpop.eup %10693  ;;  %v4781_v39 = vmul.f32 %v10692_v37, %v10678_v31  ;;  %10705 = vrcp.f32 %v4247_v62  ;;  %4928 = vmatprep.mubr.f32.mxu0 %v16817_v56  ;;  %v16979_v37 = vld [vmem:[#allocation95_spill] sm:$0xff] }
 0x604   : > { %v4780_v20 = vmul.f32 %v10694_v15, %v10672_v26  ;;  %10707 = vrcp.f32 %v4251_v40  ;;  %v16980_v26 = vld [vmem:[#allocation120_spill] sm:$0xff]  ;;  %v8397_v40 = vmul.f32 -1.442695, %v3951_v12  ;;  %v16987_v12 = vld [vmem:[#allocation122_spill] sm:$0xff] }
 0x605   : > { %v14829_v58 = vadd.f32 %v4781_v39, %v4749_v53  ;;  %9934 = vmatpush3.bf16.msra.mxu0 %v16971_v30  ;;  %v9169_v31 = vpop.f32.mrb[104].mxu0  ;;  %10709 = vrcp.f32 %v4253_v13  ;;  %v8391_v53 = vmul.f32 -1.442695, %v3933_v44  ;;  %v16981_v39 = vld [vmem:[#allocation121_spill] sm:$0xff]  ;;  %v16984_v44 = vld [vmem:[#allocation100_spill] sm:$0xff] }
 0x606   : > { %v14834_v62 = vadd.f32 %v4780_v20, %v4748_v23  ;;  %9936 = vmatprep.subr.bf16.mxu0 %v16979_v37  ;;  %v4567_v15 = vadd.f32 %v9169_v31, %v16980_v26  ;;  %v4561_v3 = vpop.f32.mrb[105].mxu0  ;;  %v16982_v23 = vld [vmem:[#allocation178_spill] sm:$0xff]  ;;  %v4750_v31 = vmul.f32 %v4718_v35, %v16983_v54 }
 0x607   : > { %16976 = vst [vmem:[#allocation175_spill] sm:$0xff] %v14829_v58  ;;  %v4562_v4 = vadd.f32 %v4561_v3, %v16981_v39  ;;  %v4751_v20 = vmul.f32 %v4719_v52, %v16982_v23 }
 0x608   : > { %16978 = vst [vmem:[#allocation71_spill] sm:$0xff] %v14834_v62  ;;  %v10696_v48 = vpop.eup %10695  ;;  %4929 = vmatmul.mubr.f32.gmra.mrb[136].mxu0 %v14834_v62  ;;  %10711 = vtanh.f32 %v4567_v15 }
 0x609   : > { %v10698_v21 = vpop.eup %10697  ;;  %4934 = vmatprep.mubr.f32.mxu0 %v16817_v56  ;;  %v4783_v42 = vmul.f32 %v10696_v48, %v10686_v41  ;;  %9938 = vmatpush3.bf16.msra.mxu0 %v16979_v37  ;;  %10713 = vtanh.f32 %v4562_v4 }
 0x60a   : > { %v4782_v13 = vmul.f32 %v10698_v21, %v10684_v29  ;;  %9940 = vmatprep.subr.bf16.mxu0 %v16984_v44  ;;  %v10700_v3 = vpop.eup %10699  ;;  %10715 = vpow2.f32 %v8393_v24  ;;  %v16989_v24 = vld [vmem:[#allocation103_spill] sm:$0xff] }
 0x60b   : > { %v14845_v39 = vadd.f32 %v4783_v42, %v4751_v20  ;;  %v10702_v25 = vpop.eup %10701  ;;  %10717 = vpow2.f32 %v8391_v53  ;;  %v4257_v21 = vadd.f32 1.0, %v10700_v3  ;;  %v16988_v42 = vld [vmem:[#allocation123_spill] sm:$0xff]  ;;  %v16991_v3 = vld [vmem:[#allocation81_spill] sm:$0xff] }
 0x60c   : > { %4935 = vmatmul.mubr.f32.gmra.mrb[138].mxu0 %v14829_v58  ;;  %v9172_v15 = vpop.f32.mrb[106].mxu0  ;;  %v14848_v52 = vadd.f32 %v4782_v13, %v4750_v31  ;;  %v10704_v41 = vpop.eup %10703  ;;  %10719 = vpow2.f32 %v8395_v2  ;;  %v4255_v53 = vadd.f32 1.0, %v10702_v25  ;;  %v16990_v31 = vld [vmem:[#allocation59_spill] sm:$0xff]  ;;  %v16992_v25 = vld [vmem:[#allocation174_spill] sm:$0xff] }
 0x60d   : > { %16985 = vst [vmem:[#allocation74_spill] sm:$0xff] %v14845_v39  ;;  %v4577_v4 = vadd.f32 %v9172_v15, %v16987_v12  ;;  %v4571_v48 = vpop.f32.mrb[107].mxu0  ;;  %4940 = vmatprep.mubr.f32.mxu0 %v16817_v56  ;;  %9942 = vmatpush3.bf16.msra.mxu0 %v16984_v44  ;;  %v10706_v29 = vpop.eup %10705  ;;  %10721 = vpow2.f32 %v8397_v40  ;;  %v4721_v2 = vsub.f32 1.0, %v10704_v41  ;;  %v3957_v40 = vadd.f32 %v14692_v59, %v16990_v31  ;;  %v16995_v31 = vld [vmem:[#allocation124_spill] sm:$0xff] }
 0x60e   : > { %16986 = vst [vmem:[#allocation75_spill] sm:$0xff] %v14848_v52  ;;  %v4572_v35 = vadd.f32 %v4571_v48, %v16988_v42  ;;  %9944 = vmatprep.subr.bf16.mxu0 %v16989_v24  ;;  %v10708_v23 = vpop.eup %10707  ;;  %v4720_v20 = vsub.f32 1.0, %v10706_v29  ;;  %v3963_v15 = vadd.f32 %v16992_v25, %v16991_v3  ;;  %v16993_v48 = vld [vmem:[#allocation180_spill] sm:$0xff] }
 0x60f   : > { %10723 = vtanh.f32 %v4577_v4  ;;  %v10710_v54 = vpop.eup %10709  ;;  %v8399_v59 = vmul.f32 -1.442695, %v3957_v40 }
 0x610   : > { %10725 = vtanh.f32 %v4572_v35  ;;  %4941 = vmatmul.mubr.f32.gmra.mrb[140].mxu0 %v14848_v52  ;;  %v4753_v35 = vmul.f32 %v4721_v2, %v16993_v48  ;;  %v4723_v25 = vsub.f32 1.0, %v10710_v54  ;;  %v8401_v45 = vmul.f32 -1.442695, %v3963_v15 }
 0x611   : > { %4946 = vmatprep.mubr.f32.mxu0 %v16817_v56  ;;  %9946 = vmatpush3.bf16.msra.mxu0 %v16989_v24  ;;  %10727 = vrcp.f32 %v4257_v21  ;;  %v16994_v24 = vld [vmem:[#allocation181_spill] sm:$0xff] }
 0x612   : > { %v10712_v13 = vpop.eup %10711  ;;  %10729 = vrcp.f32 %v4255_v53  ;;  %v4752_v21 = vmul.f32 %v4720_v20, %v16994_v24 }
 0x613   : > { %v10714_v4 = vpop.eup %10713  ;;  %v4785_v42 = vmul.f32 %v10712_v13, %v10704_v41  ;;  %v4722_v13 = vsub.f32 1.0, %v10708_v23 }
 0x614   : > { %4947 = vmatmul.mubr.f32.gmra.mrb[142].mxu0 %v14845_v39  ;;  %v10716_v12 = vpop.eup %10715  ;;  %v9175_v44 = vpop.f32.mrb[108].mxu0  ;;  %v4784_v26 = vmul.f32 %v10714_v4, %v10706_v29 }
 0x615   : > { %4952 = vmatprep.mubr.f32.mxu0 %v16817_v56  ;;  %v10718_v37 = vpop.eup %10717  ;;  %v4587_v53 = vadd.f32 %v9175_v44, %v16995_v31  ;;  %v4581_v30 = vpop.f32.mrb[109].mxu0  ;;  %v14867_v49 = vadd.f32 %v4785_v42, %v4753_v35  ;;  %v4261_v14 = vadd.f32 1.0, %v10716_v12  ;;  %v16998_v42 = vld [vmem:[#allocation182_spill] sm:$0xff]  ;;  %v17000_v35 = vld [vmem:[#allocation92_spill] sm:$0xff] }
 0x616   : > { %v10720_v3 = vpop.eup %10719  ;;  %v4582_v2 = vadd.f32 %v4581_v30, %v16996_v43  ;;  %v14870_v41 = vadd.f32 %v4784_v26, %v4752_v21  ;;  %v4259_v29 = vadd.f32 1.0, %v10718_v37  ;;  %v4755_v20 = vmul.f32 %v4723_v25, %v16998_v42  ;;  %v16999_v30 = vld [vmem:[#allocation183_spill] sm:$0xff]  ;;  %v17007_v42 = vld [vmem:[#allocation126_spill] sm:$0xff] }
 0x617   : > { %v10722_v48 = vpop.eup %10721  ;;  %10731 = vtanh.f32 %v4587_v53  ;;  %v4754_v26 = vmul.f32 %v4722_v13, %v16999_v30  ;;  %v4263_v12 = vadd.f32 1.0, %v10720_v3  ;;  %v3975_v37 = vadd.f32 %v14705_v19, %v17000_v35 }
 0x618   : > { %16997 = vst [vmem:[#allocation82_spill] sm:$0xff] %v14870_v41  ;;  %10733 = vtanh.f32 %v4582_v2  ;;  %4953 = vmatmul.mubr.f32.gmra.mrb[144].mxu0 %v14870_v41  ;;  %v17002_v2 = vld [vmem:[#allocation89_spill] sm:$0xff] }
 0x619   : > { %v10724_v24 = vpop.eup %10723  ;;  %10735 = vpow2.f32 %v8399_v59  ;;  %4958 = vmatprep.mubr.f32.mxu0 %v16817_v56  ;;  %v4265_v59 = vadd.f32 1.0, %v10722_v48  ;;  %v3969_v43 = vadd.f32 %v14701_v22, %v17002_v2  ;;  %v8405_v13 = vmul.f32 -1.442695, %v3975_v37  ;;  %v17006_v48 = vld [vmem:[#allocation19_spill] sm:$0xff]  ;;  %v17020_v2 = vld [vmem:[#allocation129_spill] sm:$0xff] }
 0x61a   : > { %v10726_v44 = vpop.eup %10725  ;;  %v4787_v40 = vmul.f32 %v10724_v24, %v10710_v54  ;;  %10737 = vpow2.f32 %v8401_v45  ;;  %v17004_v54 = vld [vmem:[#allocation168_spill] sm:$0xff] }
 0x61b   : > { %v4786_v15 = vmul.f32 %v10726_v44, %v10708_v23  ;;  %v10728_v4 = vpop.eup %10727  ;;  %10739 = vrcp.f32 %v4261_v14  ;;  %v3981_v23 = vadd.f32 %v14708_v1, %v17004_v54  ;;  %v17005_v14 = vld [vmem:[#allocation64_spill] sm:$0xff]  ;;  %v8403_v44 = vmul.f32 -1.442695, %v3969_v43 }
 0x61c   : > { %v14878_v21 = vadd.f32 %v4787_v40, %v4755_v20  ;;  %v10730_v53 = vpop.eup %10729  ;;  %10741 = vrcp.f32 %v4259_v29  ;;  %4959 = vmatmul.mubr.f32.gmra.mrb[146].mxu0 %v14867_v49  ;;  %v3987_v19 = vadd.f32 %v14712_v10, %v17005_v14  ;;  %v4725_v25 = vsub.f32 1.0, %v10728_v4 }
 0x61d   : > { %v14883_v45 = vadd.f32 %v4786_v15, %v4754_v26  ;;  %4964 = vmatprep.mubr.f32.mxu0 %v16817_v56  ;;  %10743 = vrcp.f32 %v4263_v12  ;;  %v4724_v22 = vsub.f32 1.0, %v10730_v53  ;;  %v8407_v40 = vmul.f32 -1.442695, %v3981_v23  ;;  %v17008_v26 = vld [vmem:[#allocation86_spill] sm:$0xff] }
 0x61e   : > { %17001 = vst [vmem:[#allocation77_spill] sm:$0xff] %v14878_v21  ;;  %v9178_v3 = vpop.f32.mrb[110].mxu0  ;;  %10745 = vrcp.f32 %v4265_v59  ;;  %v8409_v30 = vmul.f32 -1.442695, %v3987_v19  ;;  %v4757_v15 = vmul.f32 %v4725_v25, %v17008_v26 }
 0x61f   : > { %17003 = vst [vmem:[#allocation79_spill] sm:$0xff] %v14883_v45  ;;  %v4597_v24 = vadd.f32 %v9178_v3, %v17006_v48  ;;  %v4591_v29 = vpop.f32.mrb[111].mxu0  ;;  %v17009_v3 = vld [vmem:[#allocation166_spill] sm:$0xff] }
 0x620   : > { %v4592_v20 = vadd.f32 %v4591_v29, %v17007_v42  ;;  %4965 = vmatmul.mubr.f32.gmra.mrb[148].mxu0 %v14883_v45  ;;  %v4756_v59 = vmul.f32 %v4724_v22, %v17009_v3  ;;  %v17011_v42 = vld [vmem:[#allocation127_spill] sm:$0xff] }
 0x621   : > { %v10732_v1 = vpop.eup %10731  ;;  %10747 = vtanh.f32 %v4597_v24  ;;  %4970 = vmatprep.mubr.f32.mxu0 %v16817_v56 }
 0x622   : > { %v10734_v10 = vpop.eup %10733  ;;  %10749 = vtanh.f32 %v4592_v20  ;;  %v4789_v12 = vmul.f32 %v10732_v1, %v10728_v4  ;;  %v17014_v1 = vld [vmem:[#allocation65_spill] sm:$0xff] }
 0x623   : > { %v10736_v37 = vpop.eup %10735  ;;  %10751 = vpow2.f32 %v8405_v13  ;;  %v4788_v43 = vmul.f32 %v10734_v10, %v10730_v53  ;;  %v17013_v13 = vld [vmem:[#allocation128_spill] sm:$0xff]  ;;  %v3993_v10 = vadd.f32 %v14716_v5, %v17014_v1  ;;  %v17016_v5 = vld [vmem:[#allocation167_spill] sm:$0xff] }
 0x624   : > { %v10738_v48 = vpop.eup %10737  ;;  %10753 = vpow2.f32 %v8403_v44  ;;  %4971 = vmatmul.mubr.f32.gmra.mrb[150].mxu0 %v14878_v21  ;;  %v9181_v29 = vpop.f32.mrb[112].mxu0  ;;  %v14897_v23 = vadd.f32 %v4789_v12, %v4757_v15  ;;  %v4267_v44 = vadd.f32 1.0, %v10736_v37 }
 0x625   : > { %v10740_v24 = vpop.eup %10739  ;;  %10755 = vpow2.f32 %v8407_v40  ;;  %v4607_v19 = vadd.f32 %v9181_v29, %v17011_v42  ;;  %v4601_v20 = vpop.f32.mrb[113].mxu0  ;;  %4976 = vmatprep.mubr.f32.mxu0 %v16817_v56  ;;  %v14901_v4 = vadd.f32 %v4788_v43, %v4756_v59  ;;  %v4269_v22 = vadd.f32 1.0, %v10738_v48 }
 0x626   : > { %17010 = vst [vmem:[#allocation88_spill] sm:$0xff] %v14897_v23  ;;  %v10742_v25 = vpop.eup %10741  ;;  %10757 = vpow2.f32 %v8409_v30  ;;  %v4602_v53 = vadd.f32 %v4601_v20, %v17013_v13  ;;  %v4727_v40 = vsub.f32 1.0, %v10740_v24  ;;  %v17015_v30 = vld [vmem:[#allocation96_spill] sm:$0xff]  ;;  %v8411_v37 = vmul.f32 -1.442695, %v3993_v10  ;;  %v17019_v10 = vld [vmem:[#allocation98_spill] sm:$0xff] }
 0x627   : > { %17012 = vst [vmem:[#allocation83_spill] sm:$0xff] %v14901_v4  ;;  %10759 = vtanh.f32 %v4607_v19  ;;  %v10744_v26 = vpop.eup %10743  ;;  %v4726_v15 = vsub.f32 1.0, %v10742_v25  ;;  %v3999_v59 = vadd.f32 %v14721_v28, %v17015_v30  ;;  %v17017_v20 = vld [vmem:[#allocation184_spill] sm:$0xff]  ;;  %v4005_v54 = vadd.f32 %v14724_v32, %v17019_v10 }
 0x628   : > { %10761 = vtanh.f32 %v4602_v53  ;;  %4977 = vmatmul.mubr.f32.gmra.mrb[152].mxu0 %v14901_v4  ;;  %v10746_v12 = vpop.eup %10745  ;;  %v4759_v43 = vmul.f32 %v4727_v40, %v17016_v5  ;;  %v4728_v14 = vsub.f32 1.0, %v10744_v26 }
 0x629   : > { %4982 = vmatprep.mubr.f32.mxu0 %v16817_v56  ;;  %10763 = vrcp.f32 %v4269_v22  ;;  %v4758_v53 = vmul.f32 %v4726_v15, %v17017_v20  ;;  %v4729_v28 = vsub.f32 1.0, %v10746_v12  ;;  %v17023_v15 = vld [vmem:[#allocation173_spill] sm:$0xff] }
 0x62a   : > { %10765 = vrcp.f32 %v4267_v44  ;;  %v8413_v44 = vmul.f32 -1.442695, %v3999_v59 }
 0x62b   : > { %v10748_v3 = vpop.eup %10747  ;;  %10767 = vpow2.f32 %v8411_v37  ;;  %v8415_v37 = vmul.f32 -1.442695, %v4005_v54 }
 0x62c   : > { %v10750_v48 = vpop.eup %10749  ;;  %4983 = vmatmul.mubr.f32.gmra.mrb[154].mxu0 %v14897_v23  ;;  %v4791_v29 = vmul.f32 %v10748_v3, %v10740_v24  ;;  %v9184_v42 = vpop.f32.mrb[114].mxu0 }
 0x62d   : > { %v10752_v19 = vpop.eup %10751  ;;  %4988 = vmatprep.mubr.f32.mxu0 %v16817_v56  ;;  %v4790_v1 = vmul.f32 %v10750_v48, %v10742_v25  ;;  %v4617_v40 = vadd.f32 %v9184_v42, %v17020_v2  ;;  %v4611_v24 = vpop.f32.mrb[115].mxu0  ;;  %v17022_v25 = vld [vmem:[#allocation101_spill] sm:$0xff] }
 0x62e   : > { %v10754_v13 = vpop.eup %10753  ;;  %v14914_v22 = vadd.f32 %v4791_v29, %v4759_v43  ;;  %v4273_v35 = vadd.f32 1.0, %v10752_v19  ;;  %v4011_v48 = vadd.f32 %v17023_v15, %v17022_v25  ;;  %v17024_v43 = vld [vmem:[#allocation130_spill] sm:$0xff]  ;;  %v17025_v42 = vld [vmem:[#allocation185_spill] sm:$0xff]  ;;  %v17026_v19 = vld [vmem:[#allocation171_spill] sm:$0xff] }
 0x62f   : > { %v10756_v30 = vpop.eup %10755  ;;  %v14919_v3 = vadd.f32 %v4790_v1, %v4758_v53  ;;  %v4612_v29 = vadd.f32 %v4611_v24, %v17024_v43  ;;  %v4271_v31 = vadd.f32 1.0, %v10754_v13  ;;  %10769 = vtanh.f32 %v4617_v40  ;;  %v17067_v43 = vld [vmem:[#allocation48_spill] sm:$0xff] }
 0x630   : > { %17018 = vst [vmem:[#allocation90_spill] sm:$0xff] %v14914_v22  ;;  %v10758_v5 = vpop.eup %10757  ;;  %v4275_v32 = vadd.f32 1.0, %v10756_v30  ;;  %v4761_v1 = vmul.f32 %v4729_v28, %v17025_v42  ;;  %v4760_v10 = vmul.f32 %v4728_v14, %v17026_v19  ;;  %v8417_v24 = vmul.f32 -1.442695, %v4011_v48  ;;  %v17029_v14 = vld [vmem:[#allocation131_spill] sm:$0xff]  ;;  %v17030_v28 = vld [vmem:[#allocation132_spill] sm:$0xff] }
 0x631   : > { %17021 = vst [vmem:[#allocation84_spill] sm:$0xff] %v14919_v3  ;;  %v10760_v20 = vpop.eup %10759  ;;  %4989 = vmatmul.mubr.f32.gmra.mrb[156].mxu0 %v14919_v3  ;;  %10771 = vtanh.f32 %v4612_v29  ;;  %v4277_v40 = vadd.f32 1.0, %v10758_v5 }
 0x632   : > { %v10762_v59 = vpop.eup %10761  ;;  %4994 = vmatprep.mubr.f32.mxu0 %v16817_v56  ;;  %v4793_v53 = vmul.f32 %v10760_v20, %v10746_v12  ;;  %10773 = vpow2.f32 %v8413_v44 }
 0x633   : > { %v4792_v15 = vmul.f32 %v10762_v59, %v10744_v26  ;;  %10775 = vrcp.f32 %v4273_v35  ;;  %v10764_v13 = vpop.eup %10763  ;;  %v17032_v59 = vld [vmem:[#allocation104_spill] sm:$0xff] }
 0x634   : > { %v14928_v25 = vadd.f32 %v4793_v53, %v4761_v1  ;;  %10777 = vrcp.f32 %v4271_v31  ;;  %v10766_v29 = vpop.eup %10765  ;;  %v4731_v12 = vsub.f32 1.0, %v10764_v13  ;;  %v17033_v1 = vld [vmem:[#allocation172_spill] sm:$0xff] }
 0x635   : > { %4995 = vmatmul.mubr.f32.gmra.mrb[158].mxu0 %v14914_v22  ;;  %v14931_v30 = vadd.f32 %v4792_v15, %v4760_v10  ;;  %10779 = vrcp.f32 %v4275_v32  ;;  %v4730_v31 = vsub.f32 1.0, %v10766_v29  ;;  %v10768_v5 = vpop.eup %10767  ;;  %v17031_v10 = vld [vmem:[#allocation106_spill] sm:$0xff]  ;;  %v4017_v32 = vadd.f32 %v14732_v55, %v17032_v59 }
 0x636   : > { %17027 = vst [vmem:[#allocation115_spill] sm:$0xff] %v14928_v25  ;;  %5000 = vmatprep.mubr.f32.mxu0 %v16817_v56  ;;  %10781 = vpow2.f32 %v8415_v37  ;;  %v9187_v54 = vpop.f32.mrb[116].mxu0  ;;  %v4023_v48 = vadd.f32 %v14736_v50, %v17031_v10  ;;  %v4763_v53 = vmul.f32 %v4731_v12, %v17033_v1  ;;  %v17037_v12 = vld [vmem:[#allocation110_spill] sm:$0xff] }
 0x637   : > { %17028 = vst [vmem:[#allocation119_spill] sm:$0xff] %v14931_v30  ;;  %10783 = vpow2.f32 %v8417_v24  ;;  %v4627_v26 = vadd.f32 %v9187_v54, %v17029_v14  ;;  %v4621_v35 = vpop.f32.mrb[117].mxu0  ;;  %v17034_v24 = vld [vmem:[#allocation66_spill] sm:$0xff]  ;;  %v8419_v10 = vmul.f32 -1.442695, %v4017_v32 }
 0x638   : > { %10785 = vrcp.f32 %v4277_v40  ;;  %v4622_v44 = vadd.f32 %v4621_v35, %v17030_v28  ;;  %v4762_v40 = vmul.f32 %v4730_v31, %v17034_v24  ;;  %v17035_v35 = vld [vmem:[#allocation133_spill] sm:$0xff]  ;;  %v4279_v24 = vadd.f32 1.0, %v10768_v5 }
 0x639   : > { %5001 = vmatmul.mubr.f32.gmra.mrb[160].mxu0 %v14931_v30  ;;  %10787 = vtanh.f32 %v4627_v26  ;;  %v10770_v20 = vpop.eup %10769  ;;  %v8421_v26 = vmul.f32 -1.442695, %v4023_v48 }
 0x63a   : > { %5006 = vmatprep.mubr.f32.mxu0 %v16817_v56  ;;  %10789 = vtanh.f32 %v4622_v44  ;;  %v4795_v37 = vmul.f32 %v10770_v20, %v10764_v13  ;;  %v4035_v13 = vadd.f32 %v14744_v17, %v17037_v12  ;;  %v17038_v20 = vld [vmem:[#allocation134_spill] sm:$0xff] }
 0x63b   : > { %v10772_v42 = vpop.eup %10771 }
 0x63c   : > { %v10774_v19 = vpop.eup %10773  ;;  %v9190_v15 = vpop.f32.mrb[118].mxu0  ;;  %v4794_v54 = vmul.f32 %v10772_v42, %v10766_v29  ;;  %v14947_v55 = vadd.f32 %v4795_v37, %v4763_v53  ;;  %v17040_v42 = vld [vmem:[#allocation108_spill] sm:$0xff]  ;;  %v8425_v37 = vmul.f32 -1.442695, %v4035_v13 }
 0x63d   : > { %5007 = vmatmul.mubr.f32.gmra.mrb[162].mxu0 %v14928_v25  ;;  %v10776_v50 = vpop.eup %10775  ;;  %v4637_v28 = vadd.f32 %v9190_v15, %v17035_v35  ;;  %v4631_v14 = vpop.f32.mrb[119].mxu0  ;;  %v4281_v29 = vadd.f32 1.0, %v10774_v19  ;;  %v4029_v48 = vadd.f32 %v14740_v0, %v17040_v42 }
 0x63e   : > { %5012 = vmatprep.mubr.f32.mxu0 %v16817_v56  ;;  %17036 = vst [vmem:[#allocation176_spill] sm:$0xff] %v14947_v55  ;;  %v10778_v44 = vpop.eup %10777  ;;  %v4632_v1 = vadd.f32 %v4631_v14, %v17038_v20  ;;  %v14952_v59 = vadd.f32 %v4794_v54, %v4762_v40  ;;  %v4733_v53 = vsub.f32 1.0, %v10776_v50 }
 0x63f   : > { %v10780_v31 = vpop.eup %10779  ;;  %10791 = vtanh.f32 %v4637_v28  ;;  %v4732_v17 = vsub.f32 1.0, %v10778_v44  ;;  %v8423_v19 = vmul.f32 -1.442695, %v4029_v48 }
 0x640   : > { %17039 = vst [vmem:[#allocation177_spill] sm:$0xff] %v14952_v59  ;;  %v10782_v15 = vpop.eup %10781  ;;  %10793 = vtanh.f32 %v4632_v1  ;;  %v4765_v28 = vmul.f32 %v4733_v53, %v14536_v63  ;;  %v4734_v13 = vsub.f32 1.0, %v10780_v31  ;;  %v17044_v63 = vld [vmem:[#allocation136_spill] sm:$0xff] }
 0x641   : > { %5013 = vmatmul.mubr.f32.gmra.mrb[164].mxu0 %v14952_v59  ;;  %v10784_v32 = vpop.eup %10783  ;;  %10795 = vpow2.f32 %v8421_v26  ;;  %v17041_v26 = vld [vmem:[#allocation68_spill] sm:$0xff]  ;;  %v4283_v48 = vadd.f32 1.0, %v10782_v15 }
 0x642   : > { %5018 = vmatprep.mubr.f32.mxu0 %v16817_v56  ;;  %v10786_v14 = vpop.eup %10785  ;;  %10797 = vpow2.f32 %v8419_v10  ;;  %v4285_v0 = vadd.f32 1.0, %v10784_v32  ;;  %v4764_v1 = vmul.f32 %v4732_v17, %v17041_v26  ;;  %v17046_v26 = vld [vmem:[#allocation137_spill] sm:$0xff] }
 0x643   : > { %v10788_v40 = vpop.eup %10787  ;;  %10799 = vrcp.f32 %v4281_v29  ;;  %v4735_v29 = vsub.f32 1.0, %v10786_v14 }
 0x644   : > { %v10790_v54 = vpop.eup %10789  ;;  %10801 = vrcp.f32 %v4279_v24  ;;  %v4797_v5 = vmul.f32 %v10788_v40, %v10776_v50  ;;  %v17042_v24 = vld [vmem:[#allocation135_spill] sm:$0xff] }
 0x645   : > { %5019 = vmatmul.mubr.f32.gmra.mrb[166].mxu0 %v14947_v55  ;;  %v4796_v42 = vmul.f32 %v10790_v54, %v10778_v44  ;;  %10803 = vpow2.f32 %v8425_v37  ;;  %v4767_v17 = vmul.f32 %v4735_v29, %v14548_v61  ;;  %v17047_v29 = vld [vmem:[#allocation138_spill] sm:$0xff] }
 0x646   : > { %5024 = vmatprep.mubr.f32.mxu0 %v16817_v56  ;;  %v9193_v12 = vpop.f32.mrb[120].mxu0  ;;  %v14962_v10 = vadd.f32 %v4797_v5, %v4765_v28  ;;  %10805 = vpow2.f32 %v8423_v19 }
 0x647   : > { %v4647_v32 = vadd.f32 %v9193_v12, %v17042_v24  ;;  %v4641_v20 = vpop.f32.mrb[121].mxu0  ;;  %v14965_v35 = vadd.f32 %v4796_v42, %v4764_v1  ;;  %10807 = vrcp.f32 %v4285_v0  ;;  %v4766_v12 = vmul.f32 %v4734_v13, %v14552_v33  ;;  %v17065_v24 = vld [vmem:[#allocation52_spill] sm:$0xff] }
 0x648   : > { %v4642_v50 = vadd.f32 %v4641_v20, %v17044_v63 }
 0x649   : > { %17043 = vst [vmem:[#allocation67_spill] sm:$0xff] %v14965_v35  ;;  %v10792_v53 = vpop.eup %10791  ;;  %10809 = vtanh.f32 %v4647_v32  ;;  %5025 = vmatmul.mubr.f32.gmra.mrb[168].mxu0 %v14965_v35 }
 0x64a   : > { %v10794_v44 = vpop.eup %10793  ;;  %10811 = vtanh.f32 %v4642_v50  ;;  %5030 = vmatprep.mubr.f32.mxu0 %v16817_v56  ;;  %v4799_v15 = vmul.f32 %v10792_v53, %v10786_v14 }
 0x64b   : > { %v10796_v37 = vpop.eup %10795  ;;  %10813 = vrcp.f32 %v4283_v48  ;;  %v4798_v42 = vmul.f32 %v10794_v44, %v10780_v31 }
 0x64c   : > { %v10798_v40 = vpop.eup %10797  ;;  %v14972_v19 = vadd.f32 %v4799_v15, %v4767_v17  ;;  %v4289_v5 = vadd.f32 1.0, %v10796_v37 }
 0x64d   : > { %v10800_v20 = vpop.eup %10799  ;;  %5031 = vmatmul.mubr.f32.gmra.mrb[170].mxu0 %v14962_v10  ;;  %v9196_v54 = vpop.f32.mrb[122].mxu0  ;;  %v14975_v0 = vadd.f32 %v4798_v42, %v4766_v12  ;;  %v4287_v14 = vadd.f32 1.0, %v10798_v40 }
 0x64e   : > { %v10802_v28 = vpop.eup %10801  ;;  %v4657_v1 = vadd.f32 %v9196_v54, %v17046_v26  ;;  %v4651_v61 = vpop.f32.mrb[123].mxu0  ;;  %5036 = vmatprep.mubr.f32.mxu0 %v16817_v56  ;;  %v4737_v13 = vsub.f32 1.0, %v10800_v20 }
 0x64f   : > { %17045 = vst [vmem:[#allocation178_spill] sm:$0xff] %v14975_v0  ;;  %v4652_v33 = vadd.f32 %v4651_v61, %v17047_v29  ;;  %v10804_v31 = vpop.eup %10803  ;;  %v4736_v32 = vsub.f32 1.0, %v10802_v28  ;;  %v17048_v61 = vld [vmem:[#allocation139_spill] sm:$0xff] }
 0x650   : > { %10815 = vtanh.f32 %v4657_v1  ;;  %v10806_v48 = vpop.eup %10805  ;;  %v4293_v44 = vadd.f32 1.0, %v10804_v31  ;;  %v4769_v15 = vmul.f32 %v4737_v13, %v14562_v36 }
 0x651   : > { %10817 = vtanh.f32 %v4652_v33  ;;  %5037 = vmatmul.mubr.f32.gmra.mrb[172].mxu0 %v14975_v0  ;;  %v10808_v50 = vpop.eup %10807  ;;  %v4768_v40 = vmul.f32 %v4736_v32, %v14566_v27  ;;  %v4291_v1 = vadd.f32 1.0, %v10806_v48 }
 0x652   : > { %10819 = vrcp.f32 %v4289_v5  ;;  %5042 = vmatprep.mubr.f32.mxu0 %v16817_v56 }
 0x653   : > { %v10810_v53 = vpop.eup %10809  ;;  %10821 = vrcp.f32 %v4287_v14  ;;  %v17049_v14 = vld [vmem:[#allocation140_spill] sm:$0xff] }
 0x654   : > { %v10812_v17 = vpop.eup %10811  ;;  %v4801_v37 = vmul.f32 %v10810_v53, %v10800_v20  ;;  %v9199_v42 = vpop.f32.mrb[124].mxu0  ;;  %10823 = vrcp.f32 %v4293_v44  ;;  %v4739_v20 = vsub.f32 1.0, %v10808_v50 }
 0x655   : > { %v10814_v12 = vpop.eup %10813  ;;  %5043 = vmatmul.mubr.f32.gmra.mrb[174].mxu0 %v14972_v19  ;;  %v4800_v54 = vmul.f32 %v10812_v17, %v10802_v28  ;;  %v4667_v33 = vadd.f32 %v9199_v42, %v17048_v61  ;;  %v4661_v5 = vpop.f32.mrb[125].mxu0  ;;  %v17050_v42 = vld [vmem:[#allocation141_spill] sm:$0xff] }
 0x656   : > { %5048 = vmatprep.mubr.f32.mxu0 %v16817_v56  ;;  %v14987_v29 = vadd.f32 %v4801_v37, %v4769_v15  ;;  %v4662_v31 = vadd.f32 %v4661_v5, %v17049_v14  ;;  %v4738_v13 = vsub.f32 1.0, %v10814_v12  ;;  %v4771_v48 = vmul.f32 %v4739_v20, %v14579_v47 }
 0x657   : > { %v14990_v36 = vadd.f32 %v4800_v54, %v4768_v40  ;;  %10825 = vtanh.f32 %v4667_v33 }
 0x658   : > { %10827 = vtanh.f32 %v4662_v31  ;;  %v4770_v17 = vmul.f32 %v4738_v13, %v14583_v38 }
 0x659   : > { %5049 = vmatmul.mubr.f32.gmra.mrb[176].mxu0 %v14990_v36  ;;  %10829 = vrcp.f32 %v4291_v1  ;;  %v17051_v1 = vld [vmem:[#allocation142_spill] sm:$0xff] }
 0x65a   : > { %v10816_v27 = vpop.eup %10815  ;;  %5054 = vmatprep.mubr.f32.mxu0 %v16817_v56 }
 0x65b   : > { %v10818_v28 = vpop.eup %10817  ;;  %v4803_v32 = vmul.f32 %v10816_v27, %v10808_v50 }
 0x65c   : > { %v10820_v53 = vpop.eup %10819  ;;  %v9202_v44 = vpop.f32.mrb[126].mxu0  ;;  %v4802_v15 = vmul.f32 %v10818_v28, %v10814_v12 }
 0x65d   : > { %v10822_v37 = vpop.eup %10821  ;;  %5055 = vmatmul.mubr.f32.gmra.mrb[178].mxu0 %v14987_v29  ;;  %v4677_v40 = vadd.f32 %v9202_v44, %v17050_v42  ;;  %v4671_v54 = vpop.f32.mrb[127].mxu0  ;;  %v14998_v33 = vadd.f32 %v4803_v32, %v4771_v48  ;;  %v4741_v47 = vsub.f32 1.0, %v10820_v53 }
 0x65e   : > { %v4672_v5 = vadd.f32 %v4671_v54, %v17051_v1  ;;  %5060 = vmatprep.mubr.f32.mxu0 %v16817_v56  ;;  %v15002_v31 = vadd.f32 %v4802_v15, %v4770_v17  ;;  %v4740_v50 = vsub.f32 1.0, %v10822_v37  ;;  %v10824_v38 = vpop.eup %10823 }
 0x65f   : > { %10831 = vtanh.f32 %v4677_v40  ;;  %v4773_v13 = vmul.f32 %v4741_v47, %v14591_v11  ;;  %v4743_v15 = vsub.f32 1.0, %v10824_v38 }
 0x660   : > { %10833 = vtanh.f32 %v4672_v5  ;;  %v4772_v48 = vmul.f32 %v4740_v50, %v14595_v57 }
 0x661   : > { %5061 = vmatmul.mubr.f32.gmra.mrb[180].mxu0 %v15002_v31  ;;  %v10826_v12 = vpop.eup %10825  ;;  %v4775_v11 = vmul.f32 %v4743_v15, %v14603_v6 }
 0x662   : > { %5066 = vmatprep.mubr.f32.mxu0 %v16817_v56  ;;  %v10828_v20 = vpop.eup %10827  ;;  %v4805_v27 = vmul.f32 %v10826_v12, %v10820_v53 }
 0x663   : > { %v10830_v28 = vpop.eup %10829  ;;  %v4804_v32 = vmul.f32 %v10828_v20, %v10822_v37 }
 0x664   : > { %v15009_v44 = vadd.f32 %v4805_v27, %v4773_v13  ;;  %v4742_v40 = vsub.f32 1.0, %v10830_v28 }
 0x665   : > { %5067 = vmatmul.mubr.f32.gmra.mrb[182].mxu0 %v14998_v33  ;;  %v15012_v17 = vadd.f32 %v4804_v32, %v4772_v48 }
 0x666   : > { %5072 = vmatprep.mubr.f32.mxu0 %v16817_v56  ;;  %v4774_v53 = vmul.f32 %v4742_v40, %v14607_v7 }
 0x669   : > { %v10832_v54 = vpop.eup %10831  ;;  %5073 = vmatmul.mubr.f32.gmra.mrb[184].mxu0 %v15012_v17 }
 0x66a   : > { %v10834_v5 = vpop.eup %10833  ;;  %5078 = vmatprep.mubr.f32.mxu0 %v16817_v56  ;;  %v4807_v57 = vmul.f32 %v10832_v54, %v10824_v38  ;;  %v17052_v38 = vld [vmem:[#allocation144_spill] sm:$0xff] }
 0x66b   : > { %v4806_v37 = vmul.f32 %v10834_v5, %v10830_v28  ;;  %v17053_v28 = vld [vmem:[#allocation146_spill] sm:$0xff]  ;;  %v17054_v54 = vld [vmem:[#allocation148_spill] sm:$0xff] }
 0x66c   : > { %v15018_v47 = vadd.f32 %v4807_v57, %v4775_v11 }
 0x66d   : > { %5079 = vmatmul.mubr.f32.gmra.mrb[186].mxu0 %v15009_v44  ;;  %v15021_v50 = vadd.f32 %v4806_v37, %v4774_v53 }
 0x66e   : > { %5084 = vmatprep.mubr.f32.mxu0 %v16817_v56 }
 0x671   : > { %5085 = vmatmul.mubr.f32.gmra.mrb[188].mxu0 %v15021_v50 }
 0x672   : > { %5090 = vmatprep.mubr.f32.mxu0 %v16817_v56 }
 0x675   : > { %5091 = vmatmul.mubr.f32.gmra.mrb[190].mxu0 %v15018_v47 }
 0x6c7   : > { %v15027_v12 = vpop.f32.mrb[128].mxu0 }
 0x6c8   : > { %v4908_v6 = vpop.f32.mrb[129].mxu0 }
 0x6c9   : > { %v4909_v7 = vadd.f32 %v4908_v6, %v17052_v38 }
 0x6cb   : > { %v8428_v20 = vmul.f32 -1.442695, %v4909_v7  ;;  %v15030_v13 = vpop.f32.mrb[130].mxu0  ;;  %v17055_v7 = vld [vmem:[#allocation150_spill] sm:$0xff] }
 0x6cc   : > { %v4914_v27 = vpop.f32.mrb[131].mxu0 }
 0x6cd   : > { %10835 = vpow2.f32 %v8428_v20  ;;  %v4915_v48 = vadd.f32 %v4914_v27, %v17053_v28  ;;  %v17056_v28 = vld [vmem:[#allocation152_spill] sm:$0xff] }
 0x6cf   : > { %v8430_v32 = vmul.f32 -1.442695, %v4915_v48 }
 0x6d1   : > { %10837 = vpow2.f32 %v8430_v32  ;;  %v15033_v15 = vpop.f32.mrb[132].mxu0 }
 0x6d2   : > { %v4920_v40 = vpop.f32.mrb[133].mxu0 }
 0x6d3   : > { %v4921_v5 = vadd.f32 %v4920_v40, %v17054_v54 }
 0x6d5   : > { %v8432_v11 = vmul.f32 -1.442695, %v4921_v5  ;;  %v15036_v57 = vpop.f32.mrb[134].mxu0 }
 0x6d6   : > { %v4926_v37 = vpop.f32.mrb[135].mxu0 }
 0x6d7   : > { %v10836_v53 = vpop.eup %10835  ;;  %10839 = vpow2.f32 %v8432_v11  ;;  %v4927_v38 = vadd.f32 %v4926_v37, %v17055_v7 }
 0x6d8   : > { %v5290_v6 = vadd.f32 1.0, %v10836_v53  ;;  %v17057_v53 = vld [vmem:[#allocation36_spill] sm:$0xff] }
 0x6d9   : > { %v8434_v20 = vmul.f32 -1.442695, %v4927_v38 }
 0x6da   : > { %10841 = vrcp.f32 %v5290_v6 }
 0x6db   : > { %v10838_v1 = vpop.eup %10837  ;;  %v15039_v27 = vpop.f32.mrb[136].mxu0  ;;  %10843 = vpow2.f32 %v8434_v20 }
 0x6dc   : > { %v5292_v48 = vadd.f32 1.0, %v10838_v1  ;;  %v4932_v32 = vpop.f32.mrb[137].mxu0  ;;  %v17058_v1 = vld [vmem:[#allocation39_spill] sm:$0xff] }
 0x6dd   : > { %v4933_v42 = vadd.f32 %v4932_v32, %v17056_v28 }
 0x6de   : > { %10845 = vrcp.f32 %v5292_v48 }
 0x6df   : > { %v8436_v40 = vmul.f32 -1.442695, %v4933_v42  ;;  %v15042_v5 = vpop.f32.mrb[138].mxu0 }
 0x6e0   : > { %v4938_v54 = vpop.f32.mrb[139].mxu0 }
 0x6e1   : > { %10847 = vpow2.f32 %v8436_v40  ;;  %v4939_v11 = vadd.f32 %v4938_v54, %v17057_v53  ;;  %v10840_v14 = vpop.eup %10839 }
 0x6e2   : > { %v5294_v37 = vadd.f32 1.0, %v10840_v14  ;;  %v17059_v14 = vld [vmem:[#allocation43_spill] sm:$0xff] }
 0x6e3   : > { %v8438_v6 = vmul.f32 -1.442695, %v4939_v11  ;;  %v15045_v38 = vpop.f32.mrb[140].mxu0 }
 0x6e4   : > { %v10842_v7 = vpop.eup %10841  ;;  %v4944_v61 = vpop.f32.mrb[141].mxu0  ;;  %10849 = vrcp.f32 %v5294_v37 }
 0x6e5   : > { %v4945_v20 = vadd.f32 %v4944_v61, %v17058_v1  ;;  %v5481_v32 = vmul.f32 %v10842_v7, %v14789_v46  ;;  %v10844_v48 = vpop.eup %10843  ;;  %10851 = vpow2.f32 %v8438_v6 }
 0x6e6   : > { %v5296_v42 = vadd.f32 1.0, %v10844_v48  ;;  %v17060_v48 = vld [vmem:[#allocation38_spill] sm:$0xff] }
 0x6e7   : > { %v8440_v28 = vmul.f32 -1.442695, %v4945_v20  ;;  %v15049_v26 = vpop.f32.mrb[142].mxu0  ;;  %9235 = vmatprep.mubr.f32.mxu1 %v5481_v32  ;;  %v17061_v20 = vld [vmem:[#allocation40_spill] sm:$0xff]  ;;  %v17062_v32 = vld [vmem:[#allocation47_spill] sm:$0xff] }
 0x6e8   : > { %v10846_v54 = vpop.eup %10845  ;;  %v4950_v40 = vpop.f32.mrb[143].mxu0  ;;  %10853 = vrcp.f32 %v5296_v42 }
 0x6e9   : > { %v4951_v11 = vadd.f32 %v4950_v40, %v17059_v14  ;;  %v5482_v53 = vmul.f32 %v10846_v54, %v14787_v16  ;;  %10855 = vpow2.f32 %v8440_v28  ;;  %v17063_v54 = vld [vmem:[#allocation42_spill] sm:$0xff] }
 0x6eb   : > { %v10848_v63 = vpop.eup %10847  ;;  %v8442_v37 = vmul.f32 -1.442695, %v4951_v11  ;;  %9236 = vmatmul.mubr.f32.vlgmr.msra.gmra.mrb[224].mxu1 %v5482_v53  ;;  %v15053_v7 = vpop.f32.mrb[144].mxu0  ;;  %v17064_v11 = vld [vmem:[#allocation44_spill] sm:$0xff] }
 0x6ec   : > { %v5298_v61 = vadd.f32 1.0, %v10848_v63  ;;  %9886 = vmatpush1.bf16.msra.mxu1 %v17060_v48  ;;  %v4956_v6 = vpop.f32.mrb[145].mxu0 }
 0x6ed   : > { %9888 = vmatprep.subr.bf16.mxu1 %v17061_v20  ;;  %v4957_v1 = vadd.f32 %v4956_v6, %v17062_v32  ;;  %v17066_v32 = vld [vmem:[#allocation46_spill] sm:$0xff] }
 0x6ee   : > { %10857 = vrcp.f32 %v5298_v61  ;;  %v10850_v42 = vpop.eup %10849 }
 0x6ef   : > { %10859 = vpow2.f32 %v8442_v37  ;;  %v8444_v40 = vmul.f32 -1.442695, %v4957_v1  ;;  %v15058_v14 = vpop.f32.mrb[146].mxu0  ;;  %v5483_v28 = vmul.f32 %v10850_v42, %v14811_v18  ;;  %v10852_v63 = vpop.eup %10851 }
 0x6f0   : > { %9890 = vmatpush1.bf16.msra.mxu1 %v17063_v54  ;;  %v4962_v53 = vpop.f32.mrb[147].mxu0  ;;  %v5300_v48 = vadd.f32 1.0, %v10852_v63  ;;  %v17068_v63 = vld [vmem:[#allocation57_spill] sm:$0xff] }
 0x6f1   : > { %9892 = vmatprep.subr.bf16.mxu1 %v17064_v11  ;;  %10861 = vpow2.f32 %v8444_v40  ;;  %v4963_v20 = vadd.f32 %v4962_v53, %v17065_v24  ;;  %9238 = vmatprep.mubr.f32.mxu1 %v5483_v28  ;;  %v17070_v24 = vld [vmem:[#allocation51_spill] sm:$0xff] }
 0x6f2   : > { %v10854_v61 = vpop.eup %10853  ;;  %10863 = vrcp.f32 %v5300_v48  ;;  %v17069_v48 = vld [vmem:[#allocation49_spill] sm:$0xff] }
 0x6f3   : > { %v8446_v6 = vmul.f32 -1.442695, %v4963_v20  ;;  %v15064_v37 = vpop.f32.mrb[148].mxu0  ;;  %v5484_v1 = vmul.f32 %v10854_v61, %v14808_v51  ;;  %v10856_v42 = vpop.eup %10855 }
 0x6f4   : > { %9894 = vmatpush1.bf16.msra.mxu1 %v17066_v32  ;;  %v4968_v54 = vpop.f32.mrb[149].mxu0  ;;  %v5302_v2 = vadd.f32 1.0, %v10856_v42 }
 0x6f5   : > { %9896 = vmatprep.subr.bf16.mxu1 %v17067_v43  ;;  %10865 = vpow2.f32 %v8446_v6  ;;  %v4969_v40 = vadd.f32 %v4968_v54, %v17068_v63  ;;  %9239 = vmatmul.mubr.f32.gmra.mrb[226].mxu1 %v5484_v1  ;;  %v17071_v43 = vld [vmem:[#allocation156_spill] sm:$0xff]  ;;  %v17072_v54 = vld [vmem:[#allocation53_spill] sm:$0xff]  ;;  %v17073_v63 = vld [vmem:[#allocation54_spill] sm:$0xff] }
 0x6f6   : > { %10867 = vrcp.f32 %v5302_v2 }
 0x6f7   : > { %v8448_v28 = vmul.f32 -1.442695, %v4969_v40  ;;  %v15070_v11 = vpop.f32.mrb[150].mxu0 }
 0x6f8   : > { %v10858_v53 = vpop.eup %10857  ;;  %9898 = vmatpush1.bf16.msra.mxu1 %v17069_v48  ;;  %v4974_v61 = vpop.f32.mrb[151].mxu0 }
 0x6f9   : > { %v10860_v20 = vpop.eup %10859  ;;  %v5485_v32 = vmul.f32 %v10858_v53, %v14834_v62  ;;  %9900 = vmatprep.subr.bf16.mxu1 %v17070_v24  ;;  %v4975_v42 = vadd.f32 %v4974_v61, %v17071_v43  ;;  %10869 = vpow2.f32 %v8448_v28  ;;  %v17074_v53 = vld [vmem:[#allocation158_spill] sm:$0xff] }
 0x6fa   : > { %v5304_v18 = vadd.f32 1.0, %v10860_v20 }
 0x6fb   : > { %9241 = vmatprep.mubr.f32.mxu1 %v5485_v32  ;;  %v10862_v6 = vpop.eup %10861  ;;  %v8450_v1 = vmul.f32 -1.442695, %v4975_v42  ;;  %v15076_v2 = vpop.f32.mrb[152].mxu0 }
 0x6fc   : > { %10871 = vrcp.f32 %v5304_v18  ;;  %9902 = vmatpush1.bf16.msra.mxu1 %v17072_v54  ;;  %v5306_v40 = vadd.f32 1.0, %v10862_v6  ;;  %v4980_v48 = vpop.f32.mrb[153].mxu0  ;;  %v10864_v51 = vpop.eup %10863  ;;  %v17075_v18 = vld [vmem:[#allocation56_spill] sm:$0xff]  ;;  %v17076_v6 = vld [vmem:[#allocation58_spill] sm:$0xff] }
 0x6fd   : > { %9904 = vmatprep.subr.bf16.mxu1 %v17073_v63  ;;  %v4981_v62 = vadd.f32 %v4980_v48, %v17074_v53  ;;  %v5486_v24 = vmul.f32 %v10864_v51, %v14829_v58  ;;  %v17077_v63 = vld [vmem:[#allocation160_spill] sm:$0xff]  ;;  %v17081_v53 = vld [vmem:[#allocation162_spill] sm:$0xff] }
 0x6fe   : > { %10873 = vrcp.f32 %v5306_v40  ;;  %v17078_v48 = vld [vmem:[#allocation60_spill] sm:$0xff] }
 0x6ff   : > { %v10866_v20 = vpop.eup %10865  ;;  %10875 = vpow2.f32 %v8450_v1  ;;  %v8452_v28 = vmul.f32 -1.442695, %v4981_v62  ;;  %v15082_v61 = vpop.f32.mrb[154].mxu0  ;;  %9242 = vmatmul.mubr.f32.gmra.mrb[228].mxu1 %v5486_v24 }
 0x700   : > { %9906 = vmatpush1.bf16.msra.mxu1 %v17075_v18  ;;  %v5308_v32 = vadd.f32 1.0, %v10866_v20  ;;  %v4986_v42 = vpop.f32.mrb[155].mxu0  ;;  %v10868_v54 = vpop.eup %10867  ;;  %v17080_v18 = vld [vmem:[#allocation61_spill] sm:$0xff] }
 0x701   : > { %9908 = vmatprep.subr.bf16.mxu1 %v17076_v6  ;;  %v4987_v43 = vadd.f32 %v4986_v42, %v17077_v63  ;;  %v5487_v40 = vmul.f32 %v10868_v54, %v14848_v52  ;;  %v17082_v42 = vld [vmem:[#allocation62_spill] sm:$0xff]  ;;  %v17084_v52 = vld [vmem:[#allocation165_spill] sm:$0xff] }
 0x702   : > { %10877 = vrcp.f32 %v5308_v32 }
 0x703   : > { %10879 = vpow2.f32 %v8452_v28  ;;  %v8454_v51 = vmul.f32 -1.442695, %v4987_v43  ;;  %v10870_v62 = vpop.eup %10869  ;;  %9244 = vmatprep.mubr.f32.mxu1 %v5487_v40 }
 0x704   : > { %9910 = vmatpush1.bf16.msra.mxu1 %v17078_v48  ;;  %v15089_v1 = vpop.f32.mrb[156].mxu0  ;;  %v5310_v20 = vadd.f32 1.0, %v10870_v62 }
 0x705   : > { %17079 = vst [vmem:[#allocation179_spill] sm:$0xff] %v15089_v1  ;;  %9912 = vmatprep.subr.bf16.mxu1 %v17080_v18  ;;  %10881 = vpow2.f32 %v8454_v51  ;;  %v4992_v6 = vpop.f32.mrb[157].mxu0  ;;  %v17083_v18 = vld [vmem:[#allocation164_spill] sm:$0xff] }
 0x706   : > { %v10872_v24 = vpop.eup %10871  ;;  %v4993_v58 = vadd.f32 %v4992_v6, %v17081_v53  ;;  %10883 = vrcp.f32 %v5310_v20 }
 0x707   : > { %v5488_v32 = vmul.f32 %v10872_v24, %v14845_v39 }
 0x708   : > { %9914 = vmatpush1.bf16.msra.mxu1 %v17082_v42  ;;  %v10874_v43 = vpop.eup %10873  ;;  %v8456_v28 = vmul.f32 -1.442695, %v4993_v58  ;;  %v15095_v54 = vpop.f32.mrb[158].mxu0 }
 0x709   : > { %9245 = vmatmul.mubr.f32.gmra.mrb[230].mxu1 %v5488_v32  ;;  %10003 = vmatprep.subr.bf16.mxu1 %v13397_v34  ;;  %v10876_v40 = vpop.eup %10875  ;;  %v4998_v48 = vpop.f32.mrb[159].mxu0  ;;  %v5489_v62 = vmul.f32 %v10874_v43, %v14870_v41 }
 0x70a   : > { %v5312_v51 = vadd.f32 1.0, %v10876_v40  ;;  %v4999_v63 = vadd.f32 %v4998_v48, %v17083_v18  ;;  %10885 = vpow2.f32 %v8456_v28 }
 0x70b   : > { %9247 = vmatprep.mubr.f32.mxu1 %v5489_v62 }
 0x70c   : > { %v10878_v24 = vpop.eup %10877  ;;  %10887 = vrcp.f32 %v5312_v51  ;;  %v8458_v20 = vmul.f32 -1.442695, %v4999_v63  ;;  %v15100_v6 = vpop.f32.mrb[160].mxu0  ;;  %v17085_v63 = vld [vmem:[#allocation76_spill] sm:$0xff] }
 0x70d   : > { %v10880_v58 = vpop.eup %10879  ;;  %v5004_v42 = vpop.f32.mrb[161].mxu0  ;;  %v5490_v32 = vmul.f32 %v10878_v24, %v14867_v49 }
 0x70e   : > { %v5314_v53 = vadd.f32 1.0, %v10880_v58  ;;  %v5005_v39 = vadd.f32 %v5004_v42, %v17084_v52  ;;  %10889 = vpow2.f32 %v8458_v20 }
 0x70f   : > { %v10882_v1 = vpop.eup %10881  ;;  %9248 = vmatmul.mubr.f32.gmra.mrb[232].mxu1 %v5490_v32 }
 0x710   : > { %10891 = vrcp.f32 %v5314_v53  ;;  %v5316_v43 = vadd.f32 1.0, %v10882_v1  ;;  %v8460_v40 = vmul.f32 -1.442695, %v5005_v39  ;;  %v15104_v28 = vpop.f32.mrb[162].mxu0  ;;  %v10884_v48 = vpop.eup %10883  ;;  %v17086_v39 = vld [vmem:[#allocation80_spill] sm:$0xff] }
 0x711   : > { %v5010_v62 = vpop.f32.mrb[163].mxu0  ;;  %v5491_v18 = vmul.f32 %v10884_v48, %v14883_v45 }
 0x712   : > { %10893 = vrcp.f32 %v5316_v43  ;;  %v5011_v51 = vadd.f32 %v5010_v62, %v17085_v63 }
 0x713   : > { %10895 = vpow2.f32 %v8460_v40  ;;  %9250 = vmatprep.mubr.f32.mxu1 %v5491_v18  ;;  %v17087_v18 = vld [vmem:[#allocation85_spill] sm:$0xff] }
 0x714   : > { %v8462_v24 = vmul.f32 -1.442695, %v5011_v51  ;;  %v15108_v58 = vpop.f32.mrb[164].mxu0  ;;  %v10886_v42 = vpop.eup %10885 }
 0x715   : > { %v5016_v20 = vpop.f32.mrb[165].mxu0  ;;  %v5318_v53 = vadd.f32 1.0, %v10886_v42 }
 0x716   : > { %v10888_v32 = vpop.eup %10887  ;;  %10897 = vpow2.f32 %v8462_v24  ;;  %v5017_v1 = vadd.f32 %v5016_v20, %v17086_v39  ;;  %v17088_v39 = vld [vmem:[#allocation91_spill] sm:$0xff] }
 0x717   : > { %v5492_v52 = vmul.f32 %v10888_v32, %v14878_v21  ;;  %10899 = vrcp.f32 %v5318_v53 }
 0x718   : > { %v8464_v43 = vmul.f32 -1.442695, %v5017_v1  ;;  %v15112_v41 = vpop.f32.mrb[166].mxu0  ;;  %v10890_v62 = vpop.eup %10889 }
 0x719   : > { %9251 = vmatmul.mubr.f32.gmra.mrb[234].mxu1 %v5492_v52  ;;  %v5022_v40 = vpop.f32.mrb[167].mxu0  ;;  %v5320_v51 = vadd.f32 1.0, %v10890_v62 }
 0x71a   : > { %v10892_v48 = vpop.eup %10891  ;;  %10901 = vpow2.f32 %v8464_v43  ;;  %v5023_v63 = vadd.f32 %v5022_v40, %v17087_v18  ;;  %v17089_v18 = vld [vmem:[#allocation63_spill] sm:$0xff] }
 0x71b   : > { %v5493_v45 = vmul.f32 %v10892_v48, %v14901_v4  ;;  %10903 = vrcp.f32 %v5320_v51 }
 0x71c   : > { %v10894_v42 = vpop.eup %10893  ;;  %v8466_v24 = vmul.f32 -1.442695, %v5023_v63  ;;  %v15116_v20 = vpop.f32.mrb[168].mxu0 }
 0x71d   : > { %9253 = vmatprep.mubr.f32.mxu1 %v5493_v45  ;;  %v5494_v32 = vmul.f32 %v10894_v42, %v14897_v23  ;;  %v10896_v53 = vpop.eup %10895  ;;  %v5028_v1 = vpop.f32.mrb[169].mxu0 }
 0x71e   : > { %10905 = vpow2.f32 %v8466_v24  ;;  %v5322_v52 = vadd.f32 1.0, %v10896_v53  ;;  %v5029_v21 = vadd.f32 %v5028_v1, %v17088_v39 }
 0x71f   : > { %9254 = vmatmul.mubr.f32.gmra.mrb[236].mxu1 %v5494_v32 }
 0x720   : > { %v10898_v43 = vpop.eup %10897  ;;  %10907 = vrcp.f32 %v5322_v52  ;;  %v8468_v40 = vmul.f32 -1.442695, %v5029_v21  ;;  %v15120_v48 = vpop.f32.mrb[170].mxu0  ;;  %v17090_v21 = vld [vmem:[#allocation94_spill] sm:$0xff] }
 0x721   : > { %v5324_v62 = vadd.f32 1.0, %v10898_v43  ;;  %v10900_v51 = vpop.eup %10899  ;;  %v5034_v63 = vpop.f32.mrb[171].mxu0 }
 0x722   : > { %v5035_v45 = vadd.f32 %v5034_v63, %v17089_v18  ;;  %v5495_v42 = vmul.f32 %v10900_v51, %v14919_v3  ;;  %v17091_v51 = vld [vmem:[#allocation169_spill] sm:$0xff] }
 0x723   : > { %10909 = vrcp.f32 %v5324_v62 }
 0x724   : > { %v10902_v4 = vpop.eup %10901  ;;  %10911 = vpow2.f32 %v8468_v40  ;;  %v8470_v53 = vmul.f32 -1.442695, %v5035_v45  ;;  %v15124_v23 = vpop.f32.mrb[172].mxu0  ;;  %9256 = vmatprep.mubr.f32.mxu1 %v5495_v42 }
 0x725   : > { %v5326_v24 = vadd.f32 1.0, %v10902_v4  ;;  %v10904_v32 = vpop.eup %10903  ;;  %v5040_v1 = vpop.f32.mrb[173].mxu0 }
 0x726   : > { %v5041_v52 = vadd.f32 %v5040_v1, %v17090_v21  ;;  %v5496_v43 = vmul.f32 %v10904_v32, %v14914_v22 }
 0x727   : > { %10913 = vrcp.f32 %v5326_v24 }
 0x728   : > { %v10906_v39 = vpop.eup %10905  ;;  %10915 = vpow2.f32 %v8470_v53  ;;  %v8472_v63 = vmul.f32 -1.442695, %v5041_v52  ;;  %v15128_v18 = vpop.f32.mrb[174].mxu0  ;;  %9257 = vmatmul.mubr.f32.gmra.mrb[238].mxu1 %v5496_v43  ;;  %v17092_v52 = vld [vmem:[#allocation170_spill] sm:$0xff] }
 0x729   : > { %v5328_v62 = vadd.f32 1.0, %v10906_v39  ;;  %v5046_v4 = vpop.f32.mrb[175].mxu0 }
 0x72a   : > { %v10908_v40 = vpop.eup %10907  ;;  %v5047_v45 = vadd.f32 %v5046_v4, %v17091_v51  ;;  %v17093_v51 = vld [vmem:[#allocation97_spill] sm:$0xff] }
 0x72b   : > { %10917 = vrcp.f32 %v5328_v62  ;;  %v5497_v42 = vmul.f32 %v10908_v40, %v14931_v30 }
 0x72c   : > { %10919 = vpow2.f32 %v8472_v63  ;;  %v8474_v24 = vmul.f32 -1.442695, %v5047_v45  ;;  %v15132_v1 = vpop.f32.mrb[176].mxu0 }
 0x72d   : > { %v10910_v3 = vpop.eup %10909  ;;  %9259 = vmatprep.mubr.f32.mxu1 %v5497_v42  ;;  %v5052_v32 = vpop.f32.mrb[177].mxu0 }
 0x72e   : > { %v5498_v39 = vmul.f32 %v10910_v3, %v14928_v25  ;;  %v10912_v53 = vpop.eup %10911  ;;  %10921 = vpow2.f32 %v8474_v24  ;;  %v5053_v43 = vadd.f32 %v5052_v32, %v17092_v52 }
 0x72f   : > { %v5330_v21 = vadd.f32 1.0, %v10912_v53 }
 0x730   : > { %9260 = vmatmul.mubr.f32.gmra.mrb[240].mxu1 %v5498_v39  ;;  %v8476_v22 = vmul.f32 -1.442695, %v5053_v43  ;;  %v15136_v4 = vpop.f32.mrb[178].mxu0  ;;  %v17094_v43 = vld [vmem:[#allocation99_spill] sm:$0xff] }
 0x731   : > { %v10914_v62 = vpop.eup %10913  ;;  %10923 = vrcp.f32 %v5330_v21  ;;  %v5058_v40 = vpop.f32.mrb[179].mxu0 }
 0x732   : > { %v5499_v63 = vmul.f32 %v10914_v62, %v14952_v59  ;;  %v10916_v45 = vpop.eup %10915  ;;  %v5059_v42 = vadd.f32 %v5058_v40, %v17093_v51  ;;  %10925 = vpow2.f32 %v8476_v22 }
 0x733   : > { %v5332_v30 = vadd.f32 1.0, %v10916_v45  ;;  %v17095_v45 = vld [vmem:[#allocation102_spill] sm:$0xff] }
 0x734   : > { %9262 = vmatprep.mubr.f32.mxu1 %v5499_v63  ;;  %v8478_v24 = vmul.f32 -1.442695, %v5059_v42  ;;  %v15140_v25 = vpop.f32.mrb[180].mxu0 }
 0x735   : > { %v10918_v3 = vpop.eup %10917  ;;  %10927 = vrcp.f32 %v5332_v30  ;;  %v5064_v32 = vpop.f32.mrb[181].mxu0 }
 0x736   : > { %v5500_v39 = vmul.f32 %v10918_v3, %v14947_v55  ;;  %v10920_v53 = vpop.eup %10919  ;;  %v5065_v21 = vadd.f32 %v5064_v32, %v17094_v43  ;;  %10929 = vpow2.f32 %v8478_v24 }
 0x737   : > { %v5334_v52 = vadd.f32 1.0, %v10920_v53  ;;  %v17097_v53 = vld [vmem:[#allocation105_spill] sm:$0xff] }
 0x738   : > { %9263 = vmatmul.mubr.f32.gmra.mrb[242].mxu1 %v5500_v39  ;;  %v10922_v62 = vpop.eup %10921  ;;  %v15144_v59 = vpop.f32.mrb[182].mxu0  ;;  %v8480_v40 = vmul.f32 -1.442695, %v5065_v21 }
 0x739   : > { %10931 = vrcp.f32 %v5334_v52  ;;  %v5336_v22 = vadd.f32 1.0, %v10922_v62  ;;  %v5070_v63 = vpop.f32.mrb[183].mxu0 }
 0x73a   : > { %v5071_v42 = vadd.f32 %v5070_v63, %v17095_v45 }
 0x73b   : > { %v10924_v51 = vpop.eup %10923  ;;  %10933 = vrcp.f32 %v5336_v22 }
 0x73c   : > { %v15147_v30 = vpop.f32.mrb[184].mxu0  ;;  %v5501_v3 = vmul.f32 %v10924_v51, %v14965_v35  ;;  %v10926_v55 = vpop.eup %10925  ;;  %10935 = vpow2.f32 %v8480_v40  ;;  %v8482_v32 = vmul.f32 -1.442695, %v5071_v42  ;;  %v17098_v51 = vld [vmem:[#allocation107_spill] sm:$0xff] }
 0x73d   : > { %17096 = vst [vmem:[#allocation174_spill] sm:$0xff] %v15147_v30  ;;  %v5076_v24 = vpop.f32.mrb[185].mxu0  ;;  %v5338_v39 = vadd.f32 1.0, %v10926_v55 }
 0x73e   : > { %9265 = vmatprep.mubr.f32.mxu1 %v5501_v3  ;;  %v5077_v43 = vadd.f32 %v5076_v24, %v17097_v53 }
 0x73f   : > { %v10928_v52 = vpop.eup %10927  ;;  %10937 = vrcp.f32 %v5338_v39 }
 0x740   : > { %v15151_v21 = vpop.f32.mrb[186].mxu0  ;;  %v5502_v62 = vmul.f32 %v10928_v52, %v14962_v10  ;;  %v10930_v63 = vpop.eup %10929  ;;  %10939 = vpow2.f32 %v8482_v32  ;;  %v8484_v22 = vmul.f32 -1.442695, %v5077_v43  ;;  %v17099_v52 = vld [vmem:[#allocation109_spill] sm:$0xff] }
 0x741   : > { %v5082_v45 = vpop.f32.mrb[187].mxu0  ;;  %v5340_v30 = vadd.f32 1.0, %v10930_v63 }
 0x742   : > { %9266 = vmatmul.mubr.f32.gmra.mrb[244].mxu1 %v5502_v62  ;;  %v5083_v40 = vadd.f32 %v5082_v45, %v17098_v51  ;;  %v17100_v51 = vld [vmem:[#allocation111_spill] sm:$0xff] }
 0x743   : > { %v10932_v42 = vpop.eup %10931  ;;  %10941 = vrcp.f32 %v5340_v30 }
 0x744   : > { %v8486_v55 = vmul.f32 -1.442695, %v5083_v40  ;;  %v15155_v3 = vpop.f32.mrb[188].mxu0  ;;  %v5503_v24 = vmul.f32 %v10932_v42, %v14975_v0  ;;  %10943 = vpow2.f32 %v8484_v22 }
 0x745   : > { %v10934_v39 = vpop.eup %10933  ;;  %v5088_v53 = vpop.f32.mrb[189].mxu0 }
 0x746   : > { %9268 = vmatprep.mubr.f32.mxu1 %v5503_v24  ;;  %v5089_v35 = vadd.f32 %v5088_v53, %v17099_v52  ;;  %v5504_v43 = vmul.f32 %v10934_v39, %v14972_v19  ;;  %v10936_v32 = vpop.eup %10935  ;;  %10945 = vpow2.f32 %v8486_v55 }
 0x747   : > { %v5342_v62 = vadd.f32 1.0, %v10936_v32 }
 0x748   : > { %v15160_v63 = vpop.f32.mrb[190].mxu0  ;;  %9269 = vmatmul.mubr.f32.gmra.mrb[246].mxu1 %v5504_v43  ;;  %v8488_v45 = vmul.f32 -1.442695, %v5089_v35 }
 0x749   : > { %v5094_v30 = vpop.f32.mrb[191].mxu0  ;;  %v10938_v40 = vpop.eup %10937  ;;  %10947 = vrcp.f32 %v5342_v62 }
 0x74a   : > { %v5095_v42 = vadd.f32 %v5094_v30, %v17100_v51  ;;  %v10940_v0 = vpop.eup %10939  ;;  %v5505_v22 = vmul.f32 %v10938_v40, %v14990_v36  ;;  %10949 = vpow2.f32 %v8488_v45 }
 0x74b   : > { %v5344_v24 = vadd.f32 1.0, %v10940_v0 }
 0x74c   : > { %v8490_v53 = vmul.f32 -1.442695, %v5095_v42  ;;  %9271 = vmatprep.mubr.f32.mxu1 %v5505_v22 }
 0x74d   : > { %v10942_v39 = vpop.eup %10941  ;;  %10951 = vrcp.f32 %v5344_v24 }
 0x74e   : > { %v10944_v55 = vpop.eup %10943  ;;  %v5506_v32 = vmul.f32 %v10942_v39, %v14987_v29  ;;  %10953 = vpow2.f32 %v8490_v53 }
 0x74f   : > { %v5346_v52 = vadd.f32 1.0, %v10944_v55 }
 0x750   : > { %v10946_v43 = vpop.eup %10945  ;;  %9272 = vmatmul.mubr.f32.gmra.mrb[248].mxu1 %v5506_v32 }
 0x751   : > { %10955 = vrcp.f32 %v5346_v52  ;;  %v5348_v35 = vadd.f32 1.0, %v10946_v43 }
 0x753   : > { %v10948_v62 = vpop.eup %10947  ;;  %10957 = vrcp.f32 %v5348_v35 }
 0x754   : > { %v5507_v30 = vmul.f32 %v10948_v62, %v15002_v31  ;;  %v10950_v40 = vpop.eup %10949 }
 0x755   : > { %v5350_v45 = vadd.f32 1.0, %v10950_v40 }
 0x756   : > { %9274 = vmatprep.mubr.f32.mxu1 %v5507_v30  ;;  %v17101_v30 = vld [vmem:[#allocation145_spill] sm:$0xff] }
 0x757   : > { %v10952_v0 = vpop.eup %10951  ;;  %10959 = vrcp.f32 %v5350_v45  ;;  %v4913_v40 = vadd.f32 %v15030_v13, %v17101_v30 }
 0x758   : > { %v5508_v42 = vmul.f32 %v10952_v0, %v14998_v33  ;;  %v10954_v22 = vpop.eup %10953  ;;  %v17102_v0 = vld [vmem:[#allocation143_spill] sm:$0xff] }
 0x759   : > { %v5352_v39 = vadd.f32 1.0, %v10954_v22  ;;  %v4907_v45 = vadd.f32 %v15027_v12, %v17102_v0 }
 0x75a   : > { %9275 = vmatmul.mubr.f32.gmra.mrb[250].mxu1 %v5508_v42  ;;  %v8429_v42 = vmul.f32 -1.442695, %v4913_v40 }
 0x75b   : > { %v10956_v24 = vpop.eup %10955  ;;  %10961 = vrcp.f32 %v5352_v39  ;;  %v8427_v22 = vmul.f32 -1.442695, %v4907_v45  ;;  %v17106_v45 = vld [vmem:[#allocation153_spill] sm:$0xff] }
 0x75c   : > { %v5509_v53 = vmul.f32 %v10956_v24, %v15012_v17  ;;  %10963 = vpow2.f32 %v8429_v42  ;;  %v17103_v24 = vld [vmem:[#allocation149_spill] sm:$0xff]  ;;  %v4937_v42 = vadd.f32 %v15042_v5, %v17106_v45 }
 0x75d   : > { %v10958_v55 = vpop.eup %10957  ;;  %10965 = vpow2.f32 %v8427_v22  ;;  %v4925_v39 = vadd.f32 %v15036_v57, %v17103_v24  ;;  %v17107_v24 = vld [vmem:[#allocation37_spill] sm:$0xff] }
 0x75e   : > { %9277 = vmatprep.mubr.f32.mxu1 %v5509_v53  ;;  %v5510_v52 = vmul.f32 %v10958_v55, %v15009_v44  ;;  %v17104_v53 = vld [vmem:[#allocation147_spill] sm:$0xff]  ;;  %v8437_v57 = vmul.f32 -1.442695, %v4937_v42  ;;  %v17110_v5 = vld [vmem:[#allocation113_spill] sm:$0xff]  ;;  %v17111_v42 = vld [vmem:[#allocation50_spill] sm:$0xff] }
 0x75f   : > { %v4919_v55 = vadd.f32 %v15033_v15, %v17104_v53  ;;  %v4943_v15 = vadd.f32 %v15045_v38, %v17107_v24  ;;  %v4961_v38 = vadd.f32 %v15058_v14, %v17111_v42 }
 0x760   : > { %9278 = vmatmul.mubr.f32.gmra.mrb[252].mxu1 %v5510_v52  ;;  %v8433_v52 = vmul.f32 -1.442695, %v4925_v39 }
 0x761   : > { %v10960_v32 = vpop.eup %10959 }
 0x762   : > { %v5511_v43 = vmul.f32 %v10960_v32, %v15021_v50  ;;  %v8431_v32 = vmul.f32 -1.442695, %v4919_v55  ;;  %10967 = vpow2.f32 %v8433_v52  ;;  %v17108_v52 = vld [vmem:[#allocation112_spill] sm:$0xff] }
 0x764   : > { %9280 = vmatprep.mubr.f32.mxu1 %v5511_v43  ;;  %10969 = vpow2.f32 %v8431_v32 }
 0x765   : > { %v10962_v35 = vpop.eup %10961 }
 0x766   : > { %v5512_v62 = vmul.f32 %v10962_v35, %v15018_v47  ;;  %v10964_v43 = vpop.eup %10963 }
 0x767   : > { %v10966_v35 = vpop.eup %10965  ;;  %v5291_v13 = vadd.f32 1.0, %v10964_v43 }
 0x768   : > { %9281 = vmatmul.mubr.f32.gmra.mrb[254].mxu1 %v5512_v62  ;;  %v17105_v62 = vld [vmem:[#allocation151_spill] sm:$0xff]  ;;  %v5289_v40 = vadd.f32 1.0, %v10966_v35  ;;  %v17109_v35 = vld [vmem:[#allocation41_spill] sm:$0xff] }
 0x769   : > { %5962 = vmatprep.mubr.f32.mxu1 %v16817_v56  ;;  %v4931_v12 = vadd.f32 %v15039_v27, %v17105_v62  ;;  %10971 = vrcp.f32 %v5291_v13  ;;  %v8439_v27 = vmul.f32 -1.442695, %v4943_v15  ;;  %v4949_v62 = vadd.f32 %v15049_v26, %v17109_v35 }
 0x76a   : > { %10973 = vrcp.f32 %v5289_v40 }
 0x76b   : > { %v8435_v22 = vmul.f32 -1.442695, %v4931_v12 }
 0x76c   : > { %v10968_v55 = vpop.eup %10967 }
 0x76d   : > { %10975 = vpow2.f32 %v8435_v22  ;;  %v5295_v12 = vadd.f32 1.0, %v10968_v55  ;;  %v8441_v22 = vmul.f32 -1.442695, %v4949_v62 }
 0x76e   : > { %v10970_v53 = vpop.eup %10969  ;;  %10977 = vpow2.f32 %v8437_v57  ;;  %v8445_v57 = vmul.f32 -1.442695, %v4961_v38 }
 0x76f   : > { %v5293_v40 = vadd.f32 1.0, %v10970_v53 }
 0x773   : > { %v10972_v24 = vpop.eup %10971 }
 0x774   : > { %v5771_v15 = vsub.f32 1.0, %v10972_v24 }
 0x776   : > { %v5803_v38 = vmul.f32 %v5771_v15, %v14787_v16 }
 0x7be   : > { %v9237_v39 = vpop.f32.mrb[224].mxu1 }
 0x7bf   : > { %v5585_v32 = vadd.f32 %v9237_v39, %v17108_v52  ;;  %v5579_v43 = vpop.f32.mrb[225].mxu1  ;;  %v10974_v39 = vpop.eup %10973  ;;  %v17112_v52 = vld [vmem:[#allocation45_spill] sm:$0xff] }
 0x7c0   : > { %v5580_v13 = vadd.f32 %v5579_v43, %v17110_v5  ;;  %v4955_v26 = vadd.f32 %v15053_v7, %v17112_v52  ;;  %v10976_v43 = vpop.eup %10975 }
 0x7c1   : > { %10979 = vtanh.f32 %v5585_v32  ;;  %v5770_v32 = vsub.f32 1.0, %v10974_v39  ;;  %v5297_v35 = vadd.f32 1.0, %v10976_v43 }
 0x7c2   : > { %10981 = vtanh.f32 %v5580_v13  ;;  %v10978_v13 = vpop.eup %10977 }
 0x7c3   : > { %10983 = vpow2.f32 %v8439_v27  ;;  %v5802_v7 = vmul.f32 %v5770_v32, %v14789_v46  ;;  %v17115_v46 = vld [vmem:[#allocation55_spill] sm:$0xff]  ;;  %v17117_v32 = vld [vmem:[#allocation73_spill] sm:$0xff] }
 0x7c4   : > { %10985 = vrcp.f32 %v5295_v12  ;;  %v8443_v12 = vmul.f32 -1.442695, %v4955_v26 }
 0x7c5   : > { %10987 = vrcp.f32 %v5293_v40 }
 0x7c6   : > { %10989 = vpow2.f32 %v8441_v22  ;;  %v5299_v22 = vadd.f32 1.0, %v10978_v13 }
 0x7c7   : > { %10991 = vpow2.f32 %v8445_v57 }
 0x7c8   : > { %v9240_v55 = vpop.f32.mrb[226].mxu1 }
 0x7c9   : > { %v5595_v53 = vadd.f32 %v9240_v55, %v14325_v9  ;;  %v5589_v5 = vpop.f32.mrb[227].mxu1  ;;  %v4973_v55 = vadd.f32 %v15070_v11, %v16958_v8 }
 0x7ca   : > { %v5590_v62 = vadd.f32 %v5589_v5, %v16957_v60 }
 0x7cb   : > { %v10980_v14 = vpop.eup %10979  ;;  %10993 = vtanh.f32 %v5595_v53  ;;  %v8449_v15 = vmul.f32 -1.442695, %v4973_v55  ;;  %v17121_v55 = vld [vmem:[#allocation70_spill] sm:$0xff] }
 0x7cc   : > { %v10982_v27 = vpop.eup %10981  ;;  %v5835_v40 = vmul.f32 %v10980_v14, %v10972_v24  ;;  %10995 = vtanh.f32 %v5590_v62 }
 0x7cd   : > { %v5834_v52 = vmul.f32 %v10982_v27, %v10974_v39  ;;  %v10984_v42 = vpop.eup %10983  ;;  %10997 = vpow2.f32 %v8443_v12  ;;  %v4967_v39 = vadd.f32 %v15064_v37, %v17115_v46  ;;  %v17119_v37 = vld [vmem:[#allocation116_spill] sm:$0xff] }
 0x7ce   : > { %v15200_v9 = vadd.f32 %v5835_v40, %v5803_v38  ;;  %v10986_v5 = vpop.eup %10985  ;;  %10999 = vrcp.f32 %v5299_v22  ;;  %v5301_v26 = vadd.f32 1.0, %v10984_v42  ;;  %v17118_v42 = vld [vmem:[#allocation159_spill] sm:$0xff]  ;;  %v17120_v38 = vld [vmem:[#allocation154_spill] sm:$0xff] }
 0x7cf   : > { %v15202_v57 = vadd.f32 %v5834_v52, %v5802_v7  ;;  %v10988_v24 = vpop.eup %10987  ;;  %11001 = vrcp.f32 %v5297_v35  ;;  %v5773_v11 = vsub.f32 1.0, %v10986_v5  ;;  %v17116_v52 = vld [vmem:[#allocation157_spill] sm:$0xff]  ;;  %v4985_v53 = vadd.f32 %v15082_v61, %v17118_v42 }
 0x7d0   : > { %17113 = vst [vmem:[#allocation180_spill] sm:$0xff] %v15200_v9  ;;  %v10990_v16 = vpop.eup %10989  ;;  %v4979_v43 = vadd.f32 %v15076_v2, %v17116_v52  ;;  %v5772_v13 = vsub.f32 1.0, %v10988_v24  ;;  %11003 = vrcp.f32 %v5301_v26  ;;  %v8447_v40 = vmul.f32 -1.442695, %v4967_v39 }
 0x7d1   : > { %17114 = vst [vmem:[#allocation181_spill] sm:$0xff] %v15202_v57  ;;  %5963 = vmatmul.mubr.f32.vlgmr.msra.gmra.mrb[0].mxu1 %v15202_v57  ;;  %v10992_v35 = vpop.eup %10991  ;;  %v5303_v62 = vadd.f32 1.0, %v10990_v16  ;;  %11005 = vpow2.f32 %v8449_v15  ;;  %v5805_v26 = vmul.f32 %v5773_v11, %v17121_v55  ;;  %v17122_v16 = vld [vmem:[#allocation78_spill] sm:$0xff]  ;;  %v17125_v11 = vld [vmem:[#allocation87_spill] sm:$0xff] }
 0x7d2   : > { %5968 = vmatprep.mubr.f32.mxu1 %v16817_v56  ;;  %10011 = vmatpush3.bf16.msra.mxu1 %v13397_v34  ;;  %v9243_v14 = vpop.f32.mrb[228].mxu1  ;;  %v8451_v61 = vmul.f32 -1.442695, %v4979_v43 }
 0x7d3   : > { %10004 = vmatprep.subr.bf16.mxu1 %v17117_v32  ;;  %v5605_v27 = vadd.f32 %v9243_v14, %v17119_v37  ;;  %v5599_v12 = vpop.f32.mrb[229].mxu1  ;;  %v8453_v14 = vmul.f32 -1.442695, %v4985_v53  ;;  %v17123_v37 = vld [vmem:[#allocation69_spill] sm:$0xff] }
 0x7d4   : > { %v5600_v2 = vadd.f32 %v5599_v12, %v17120_v38  ;;  %v5804_v39 = vmul.f32 %v5772_v13, %v17123_v37  ;;  %v5307_v38 = vadd.f32 1.0, %v10992_v35  ;;  %v17126_v53 = vld [vmem:[#allocation117_spill] sm:$0xff] }
 0x7d5   : > { %5969 = vmatmul.mubr.f32.gmra.mrb[2].mxu1 %v15200_v9  ;;  %v10994_v34 = vpop.eup %10993  ;;  %11007 = vtanh.f32 %v5605_v27 }
 0x7d6   : > { %5974 = vmatprep.mubr.f32.mxu1 %v16817_v56  ;;  %10012 = vmatpush3.bf16.msra.mxu1 %v17117_v32  ;;  %v10996_v22 = vpop.eup %10995  ;;  %v5837_v7 = vmul.f32 %v10994_v34, %v10986_v5  ;;  %11009 = vtanh.f32 %v5600_v2  ;;  %v17128_v2 = vld [vmem:[#allocation93_spill] sm:$0xff] }
 0x7d7   : > { %10005 = vmatprep.subr.bf16.mxu1 %v17122_v16  ;;  %v5836_v42 = vmul.f32 %v10996_v22, %v10988_v24  ;;  %11011 = vrcp.f32 %v5303_v62  ;;  %v10998_v12 = vpop.eup %10997 }
 0x7d8   : > { %v15222_v15 = vadd.f32 %v5837_v7, %v5805_v26  ;;  %11013 = vpow2.f32 %v8447_v40  ;;  %v11000_v5 = vpop.eup %10999  ;;  %v5305_v13 = vadd.f32 1.0, %v10998_v12  ;;  %v17129_v7 = vld [vmem:[#allocation163_spill] sm:$0xff]  ;;  %v17130_v26 = vld [vmem:[#allocation161_spill] sm:$0xff] }
 0x7d9   : > { %v15224_v32 = vadd.f32 %v5836_v42, %v5804_v39  ;;  %11015 = vpow2.f32 %v8451_v61  ;;  %v11002_v43 = vpop.eup %11001  ;;  %v5775_v35 = vsub.f32 1.0, %v11000_v5  ;;  %v17127_v42 = vld [vmem:[#allocation118_spill] sm:$0xff]  ;;  %v4997_v55 = vadd.f32 %v15095_v54, %v17129_v7  ;;  %v17132_v12 = vld [vmem:[#allocation175_spill] sm:$0xff]  ;;  %v17135_v7 = vld [vmem:[#allocation120_spill] sm:$0xff] }
 0x7da   : > { %10013 = vmatpush3.bf16.msra.mxu1 %v17122_v16  ;;  %11017 = vpow2.f32 %v8453_v14  ;;  %v11004_v34 = vpop.eup %11003  ;;  %v5774_v40 = vsub.f32 1.0, %v11002_v43  ;;  %v17131_v16 = vld [vmem:[#allocation179_spill] sm:$0xff] }
 0x7db   : > { %17124 = vst [vmem:[#allocation182_spill] sm:$0xff] %v15224_v32  ;;  %10006 = vmatprep.subr.bf16.mxu1 %v17125_v11  ;;  %5975 = vmatmul.mubr.f32.gmra.mrb[4].mxu1 %v15224_v32  ;;  %11019 = vrcp.f32 %v5307_v38  ;;  %v11006_v22 = vpop.eup %11005  ;;  %v4991_v14 = vadd.f32 %v17131_v16, %v17130_v26  ;;  %v17139_v26 = vld [vmem:[#allocation6_spill] sm:$0xff] }
 0x7dc   : > { %v9246_v24 = vpop.f32.mrb[230].mxu1  ;;  %5980 = vmatprep.mubr.f32.mxu1 %v16817_v56  ;;  %v5311_v54 = vadd.f32 1.0, %v11006_v22  ;;  %v5776_v22 = vsub.f32 1.0, %v11004_v34 }
 0x7dd   : > { %v5615_v62 = vadd.f32 %v9246_v24, %v17126_v53  ;;  %v5609_v37 = vpop.f32.mrb[231].mxu1 }
 0x7de   : > { %v5610_v27 = vadd.f32 %v5609_v37, %v17127_v42  ;;  %10014 = vmatpush3.bf16.msra.mxu1 %v17125_v11  ;;  %v5807_v11 = vmul.f32 %v5775_v35, %v17132_v12 }
 0x7df   : > { %11021 = vtanh.f32 %v5615_v62  ;;  %10007 = vmatprep.subr.bf16.mxu1 %v17128_v2  ;;  %5981 = vmatmul.mubr.f32.gmra.mrb[6].mxu1 %v15222_v15  ;;  %v11008_v61 = vpop.eup %11007 }
 0x7e0   : > { %11023 = vtanh.f32 %v5610_v27  ;;  %5986 = vmatprep.mubr.f32.mxu1 %v16817_v56  ;;  %v11010_v38 = vpop.eup %11009  ;;  %v5839_v39 = vmul.f32 %v11008_v61, %v11000_v5  ;;  %v17133_v27 = vld [vmem:[#allocation71_spill] sm:$0xff]  ;;  %v8457_v5 = vmul.f32 -1.442695, %v4997_v55  ;;  %v17137_v61 = vld [vmem:[#allocation121_spill] sm:$0xff] }
 0x7e1   : > { %11025 = vrcp.f32 %v5305_v13  ;;  %v11012_v24 = vpop.eup %11011  ;;  %v5838_v62 = vmul.f32 %v11010_v38, %v11002_v43  ;;  %v5806_v42 = vmul.f32 %v5774_v40, %v17133_v27  ;;  %v17134_v13 = vld [vmem:[#allocation95_spill] sm:$0xff]  ;;  %v8455_v38 = vmul.f32 -1.442695, %v4991_v14  ;;  %v17140_v27 = vld [vmem:[#allocation72_spill] sm:$0xff] }
 0x7e2   : > { %10015 = vmatpush3.bf16.msra.mxu1 %v17128_v2  ;;  %v9249_v37 = vpop.f32.mrb[232].mxu1  ;;  %v11014_v53 = vpop.eup %11013  ;;  %v15245_v8 = vadd.f32 %v5839_v39, %v5807_v11  ;;  %v5777_v43 = vsub.f32 1.0, %v11012_v24  ;;  %v5009_v40 = vadd.f32 %v15104_v28, %v17139_v26  ;;  %v5003_v39 = vadd.f32 %v15100_v6, %v17140_v27  ;;  %v17144_v26 = vld [vmem:[#allocation103_spill] sm:$0xff] }
 0x7e3   : > { %10008 = vmatprep.subr.bf16.mxu1 %v17134_v13  ;;  %v5625_v52 = vadd.f32 %v9249_v37, %v17135_v7  ;;  %v5619_v46 = vpop.f32.mrb[233].mxu1  ;;  %v11016_v16 = vpop.eup %11015  ;;  %v15248_v12 = vadd.f32 %v5838_v62, %v5806_v42  ;;  %v5309_v37 = vadd.f32 1.0, %v11014_v53  ;;  %v17142_v62 = vld [vmem:[#allocation74_spill] sm:$0xff] }
 0x7e4   : > { %17136 = vst [vmem:[#allocation183_spill] sm:$0xff] %v15245_v8  ;;  %v5620_v35 = vadd.f32 %v5619_v46, %v17137_v61  ;;  %v11018_v2 = vpop.eup %11017  ;;  %v17141_v46 = vld [vmem:[#allocation100_spill] sm:$0xff]  ;;  %v5313_v55 = vadd.f32 1.0, %v11016_v16  ;;  %v8461_v11 = vmul.f32 -1.442695, %v5009_v40  ;;  %v17147_v40 = vld [vmem:[#allocation122_spill] sm:$0xff] }
 0x7e5   : > { %17138 = vst [vmem:[#allocation86_spill] sm:$0xff] %v15248_v12  ;;  %11027 = vtanh.f32 %v5625_v52  ;;  %5987 = vmatmul.mubr.f32.gmra.mrb[8].mxu1 %v15248_v12  ;;  %v11020_v42 = vpop.eup %11019  ;;  %v5315_v28 = vadd.f32 1.0, %v11018_v2 }
 0x7e6   : > { %10016 = vmatpush3.bf16.msra.mxu1 %v17134_v13  ;;  %11029 = vtanh.f32 %v5620_v35  ;;  %5992 = vmatprep.mubr.f32.mxu1 %v16817_v56  ;;  %v5809_v13 = vmul.f32 %v5777_v43, %v17142_v62  ;;  %v8459_v35 = vmul.f32 -1.442695, %v5003_v39 }
 0x7e7   : > { %10009 = vmatprep.subr.bf16.mxu1 %v17141_v46  ;;  %11031 = vrcp.f32 %v5311_v54  ;;  %v17143_v54 = vld [vmem:[#allocation75_spill] sm:$0xff] }
 0x7e8   : > { %11033 = vpow2.f32 %v8457_v5  ;;  %v5808_v16 = vmul.f32 %v5776_v22, %v17143_v54  ;;  %v17148_v22 = vld [vmem:[#allocation123_spill] sm:$0xff] }
 0x7e9   : > { %v11022_v14 = vpop.eup %11021  ;;  %11035 = vpow2.f32 %v8455_v38  ;;  %5993 = vmatmul.mubr.f32.gmra.mrb[10].mxu1 %v15245_v8 }
 0x7ea   : > { %v11024_v52 = vpop.eup %11023  ;;  %v5841_v53 = vmul.f32 %v11022_v14, %v11012_v24  ;;  %10017 = vmatpush3.bf16.msra.mxu1 %v17141_v46  ;;  %11037 = vrcp.f32 %v5309_v37  ;;  %5998 = vmatprep.mubr.f32.mxu1 %v16817_v56  ;;  %v5779_v24 = vsub.f32 1.0, %v11020_v42 }
 0x7eb   : > { %v11026_v6 = vpop.eup %11025  ;;  %v5840_v27 = vmul.f32 %v11024_v52, %v11004_v34  ;;  %10010 = vmatprep.subr.bf16.mxu1 %v17144_v26  ;;  %11039 = vrcp.f32 %v5313_v55  ;;  %v17149_v55 = vld [vmem:[#allocation81_spill] sm:$0xff] }
 0x7ec   : > { %v15264_v5 = vadd.f32 %v5841_v53, %v5809_v13  ;;  %11041 = vrcp.f32 %v5315_v28  ;;  %v9252_v2 = vpop.f32.mrb[234].mxu1  ;;  %v5778_v38 = vsub.f32 1.0, %v11026_v6  ;;  %v5021_v14 = vadd.f32 %v15112_v41, %v17149_v55  ;;  %v17150_v28 = vld [vmem:[#allocation59_spill] sm:$0xff]  ;;  %v17151_v13 = vld [vmem:[#allocation82_spill] sm:$0xff] }
 0x7ed   : > { %v15266_v43 = vadd.f32 %v5840_v27, %v5808_v16  ;;  %11043 = vpow2.f32 %v8461_v11  ;;  %v5635_v34 = vadd.f32 %v9252_v2, %v17147_v40  ;;  %v5629_v37 = vpop.f32.mrb[235].mxu1  ;;  %v5015_v52 = vadd.f32 %v15108_v58, %v17150_v28 }
 0x7ee   : > { %17145 = vst [vmem:[#allocation166_spill] sm:$0xff] %v15264_v5  ;;  %10018 = vmatpush3.bf16.msra.mxu1 %v17144_v26  ;;  %11045 = vpow2.f32 %v8459_v35  ;;  %v5630_v39 = vadd.f32 %v5629_v37, %v17148_v22  ;;  %v5811_v26 = vmul.f32 %v5779_v24, %v14867_v49  ;;  %v5810_v35 = vmul.f32 %v5778_v38, %v17151_v13  ;;  %v17153_v37 = vld [vmem:[#allocation124_spill] sm:$0xff] }
 0x7ef   : > { %17146 = vst [vmem:[#allocation167_spill] sm:$0xff] %v15266_v43  ;;  %5999 = vmatmul.mubr.f32.gmra.mrb[12].mxu1 %v15266_v43  ;;  %v11028_v46 = vpop.eup %11027  ;;  %11047 = vtanh.f32 %v5635_v34  ;;  %v8465_v34 = vmul.f32 -1.442695, %v5021_v14 }
 0x7f0   : > { %6004 = vmatprep.mubr.f32.mxu1 %v16817_v56  ;;  %v11030_v27 = vpop.eup %11029  ;;  %v5843_v11 = vmul.f32 %v11028_v46, %v11020_v42  ;;  %11049 = vtanh.f32 %v5630_v39  ;;  %v8463_v42 = vmul.f32 -1.442695, %v5015_v52  ;;  %v17156_v52 = vld [vmem:[#allocation77_spill] sm:$0xff] }
 0x7f1   : > { %v11032_v53 = vpop.eup %11031  ;;  %v5842_v62 = vmul.f32 %v11030_v27, %v11026_v6  ;;  %v17155_v6 = vld [vmem:[#allocation125_spill] sm:$0xff] }
 0x7f2   : > { %v11034_v54 = vpop.eup %11033  ;;  %v9255_v16 = vpop.f32.mrb[236].mxu1  ;;  %v15280_v41 = vadd.f32 %v5843_v11, %v5811_v26  ;;  %v5781_v39 = vsub.f32 1.0, %v11032_v53 }
 0x7f3   : > { %6005 = vmatmul.mubr.f32.gmra.mrb[14].mxu1 %v15264_v5  ;;  %v11036_v2 = vpop.eup %11035  ;;  %v5645_v22 = vadd.f32 %v9255_v16, %v17153_v37  ;;  %v5639_v40 = vpop.f32.mrb[237].mxu1  ;;  %v15284_v58 = vadd.f32 %v5842_v62, %v5810_v35  ;;  %v5319_v46 = vadd.f32 1.0, %v11034_v54 }
 0x7f4   : > { %17152 = vst [vmem:[#allocation184_spill] sm:$0xff] %v15280_v41  ;;  %6010 = vmatprep.mubr.f32.mxu1 %v16817_v56  ;;  %v11038_v49 = vpop.eup %11037  ;;  %v5640_v24 = vadd.f32 %v5639_v40, %v17155_v6  ;;  %v5317_v11 = vadd.f32 1.0, %v11036_v2  ;;  %v5813_v40 = vmul.f32 %v5781_v39, %v17156_v52  ;;  %v17160_v39 = vld [vmem:[#allocation168_spill] sm:$0xff] }
 0x7f5   : > { %17154 = vst [vmem:[#allocation173_spill] sm:$0xff] %v15284_v58  ;;  %v11040_v38 = vpop.eup %11039  ;;  %11051 = vtanh.f32 %v5645_v22  ;;  %v5780_v26 = vsub.f32 1.0, %v11038_v49  ;;  %v17157_v22 = vld [vmem:[#allocation92_spill] sm:$0xff] }
 0x7f6   : > { %v11042_v27 = vpop.eup %11041  ;;  %11053 = vtanh.f32 %v5640_v24  ;;  %v5033_v16 = vadd.f32 %v15120_v48, %v17157_v22  ;;  %v17158_v24 = vld [vmem:[#allocation89_spill] sm:$0xff]  ;;  %v17163_v22 = vld [vmem:[#allocation19_spill] sm:$0xff] }
 0x7f7   : > { %6011 = vmatmul.mubr.f32.gmra.mrb[16].mxu1 %v15284_v58  ;;  %v11044_v14 = vpop.eup %11043  ;;  %11055 = vpow2.f32 %v8465_v34  ;;  %v5027_v34 = vadd.f32 %v15116_v20, %v17158_v24  ;;  %v5783_v28 = vsub.f32 1.0, %v11042_v27 }
 0x7f8   : > { %6016 = vmatprep.mubr.f32.mxu1 %v16817_v56  ;;  %v11046_v62 = vpop.eup %11045  ;;  %11057 = vpow2.f32 %v8463_v42  ;;  %v5323_v54 = vadd.f32 1.0, %v11044_v14  ;;  %v17159_v42 = vld [vmem:[#allocation79_spill] sm:$0xff] }
 0x7f9   : > { %v11048_v13 = vpop.eup %11047  ;;  %11059 = vrcp.f32 %v5319_v46  ;;  %v5812_v37 = vmul.f32 %v5780_v26, %v17159_v42  ;;  %v5782_v46 = vsub.f32 1.0, %v11040_v38  ;;  %v5321_v48 = vadd.f32 1.0, %v11046_v62  ;;  %v17165_v26 = vld [vmem:[#allocation126_spill] sm:$0xff] }
 0x7fa   : > { %v11050_v35 = vpop.eup %11049  ;;  %11061 = vrcp.f32 %v5317_v11  ;;  %v5845_v2 = vmul.f32 %v11048_v13, %v11032_v53  ;;  %v5039_v11 = vadd.f32 %v15124_v23, %v17160_v39  ;;  %v17162_v53 = vld [vmem:[#allocation64_spill] sm:$0xff]  ;;  %v8467_v61 = vmul.f32 -1.442695, %v5027_v34 }
 0x7fb   : > { %6017 = vmatmul.mubr.f32.gmra.mrb[18].mxu1 %v15280_v41  ;;  %v5844_v6 = vmul.f32 %v11050_v35, %v11038_v49  ;;  %v9258_v14 = vpop.f32.mrb[238].mxu1  ;;  %v5045_v13 = vadd.f32 %v15128_v18, %v17162_v53  ;;  %11063 = vrcp.f32 %v5323_v54  ;;  %v8469_v35 = vmul.f32 -1.442695, %v5033_v16  ;;  %v17166_v18 = vld [vmem:[#allocation88_spill] sm:$0xff]  ;;  %v17167_v54 = vld [vmem:[#allocation83_spill] sm:$0xff] }
 0x7fc   : > { %6022 = vmatprep.mubr.f32.mxu1 %v16817_v56  ;;  %v15299_v52 = vadd.f32 %v5845_v2, %v5813_v40  ;;  %v5655_v55 = vadd.f32 %v9258_v14, %v17163_v22  ;;  %v5649_v20 = vpop.f32.mrb[239].mxu1  ;;  %v8471_v40 = vmul.f32 -1.442695, %v5039_v11  ;;  %v5815_v2 = vmul.f32 %v5783_v28, %v17166_v18  ;;  %v17170_v28 = vld [vmem:[#allocation127_spill] sm:$0xff]  ;;  %v17172_v18 = vld [vmem:[#allocation96_spill] sm:$0xff] }
 0x7fd   : > { %v15304_v49 = vadd.f32 %v5844_v6, %v5812_v37  ;;  %v5650_v42 = vadd.f32 %v5649_v20, %v17165_v26  ;;  %v8473_v37 = vmul.f32 -1.442695, %v5045_v13  ;;  %v5814_v16 = vmul.f32 %v5782_v46, %v17167_v54  ;;  %v17171_v46 = vld [vmem:[#allocation128_spill] sm:$0xff] }
 0x7fe   : > { %17161 = vst [vmem:[#allocation185_spill] sm:$0xff] %v15299_v52  ;;  %11065 = vtanh.f32 %v5655_v55 }
 0x7ff   : > { %17164 = vst [vmem:[#allocation171_spill] sm:$0xff] %v15304_v49  ;;  %v11052_v24 = vpop.eup %11051  ;;  %6023 = vmatmul.mubr.f32.gmra.mrb[20].mxu1 %v15304_v49  ;;  %11067 = vtanh.f32 %v5650_v42 }
 0x800   : > { %v11054_v23 = vpop.eup %11053  ;;  %v5847_v62 = vmul.f32 %v11052_v24, %v11042_v27  ;;  %6028 = vmatprep.mubr.f32.mxu1 %v16817_v56  ;;  %11069 = vrcp.f32 %v5321_v48 }
 0x801   : > { %v11056_v14 = vpop.eup %11055  ;;  %v5846_v6 = vmul.f32 %v11054_v23, %v11040_v38  ;;  %11071 = vpow2.f32 %v8469_v35 }
 0x802   : > { %v11058_v20 = vpop.eup %11057  ;;  %v15311_v34 = vadd.f32 %v5847_v62, %v5815_v2  ;;  %11073 = vpow2.f32 %v8467_v61  ;;  %v5327_v42 = vadd.f32 1.0, %v11056_v14  ;;  %v5057_v2 = vadd.f32 %v15136_v4, %v17172_v18 }
 0x803   : > { %v11060_v55 = vpop.eup %11059  ;;  %6029 = vmatmul.mubr.f32.gmra.mrb[22].mxu1 %v15299_v52  ;;  %v9261_v27 = vpop.f32.mrb[240].mxu1  ;;  %v15314_v24 = vadd.f32 %v5846_v6, %v5814_v16  ;;  %11075 = vpow2.f32 %v8471_v40  ;;  %v5325_v38 = vadd.f32 1.0, %v11058_v20  ;;  %v17173_v6 = vld [vmem:[#allocation65_spill] sm:$0xff]  ;;  %v17174_v16 = vld [vmem:[#allocation90_spill] sm:$0xff] }
 0x804   : > { %17168 = vst [vmem:[#allocation172_spill] sm:$0xff] %v15311_v34  ;;  %v11062_v11 = vpop.eup %11061  ;;  %v5665_v48 = vadd.f32 %v9261_v27, %v17170_v28  ;;  %v5659_v13 = vpop.f32.mrb[241].mxu1  ;;  %6034 = vmatprep.mubr.f32.mxu1 %v16817_v56  ;;  %11077 = vpow2.f32 %v8473_v37  ;;  %v5785_v23 = vsub.f32 1.0, %v11060_v55  ;;  %v5051_v37 = vadd.f32 %v15132_v1, %v17173_v6  ;;  %v17176_v28 = vld [vmem:[#allocation129_spill] sm:$0xff] }
 0x805   : > { %17169 = vst [vmem:[#allocation66_spill] sm:$0xff] %v15314_v24  ;;  %v5660_v35 = vadd.f32 %v5659_v13, %v17171_v46  ;;  %v5784_v61 = vsub.f32 1.0, %v11062_v11  ;;  %v11064_v62 = vpop.eup %11063 }
 0x806   : > { %11079 = vtanh.f32 %v5665_v48  ;;  %v5817_v20 = vmul.f32 %v5785_v23, %v17174_v16  ;;  %v5787_v1 = vsub.f32 1.0, %v11064_v62  ;;  %v8475_v6 = vmul.f32 -1.442695, %v5051_v37 }
 0x807   : > { %11081 = vtanh.f32 %v5660_v35  ;;  %6035 = vmatmul.mubr.f32.gmra.mrb[24].mxu1 %v15314_v24 }
 0x808   : > { %11083 = vrcp.f32 %v5327_v42  ;;  %6040 = vmatprep.mubr.f32.mxu1 %v16817_v56  ;;  %v11066_v40 = vpop.eup %11065  ;;  %v17175_v42 = vld [vmem:[#allocation84_spill] sm:$0xff] }
 0x809   : > { %11085 = vrcp.f32 %v5325_v38  ;;  %v11068_v14 = vpop.eup %11067  ;;  %v5849_v54 = vmul.f32 %v11066_v40, %v11060_v55  ;;  %v5816_v35 = vmul.f32 %v5784_v61, %v17175_v42  ;;  %v8477_v55 = vmul.f32 -1.442695, %v5057_v2  ;;  %v17178_v40 = vld [vmem:[#allocation130_spill] sm:$0xff] }
 0x80a   : > { %v11070_v27 = vpop.eup %11069  ;;  %v5848_v48 = vmul.f32 %v11068_v14, %v11062_v11 }
 0x80b   : > { %6041 = vmatmul.mubr.f32.gmra.mrb[26].mxu1 %v15311_v34  ;;  %v9264_v13 = vpop.f32.mrb[242].mxu1  ;;  %v11072_v46 = vpop.eup %11071  ;;  %v15330_v4 = vadd.f32 %v5849_v54, %v5817_v20  ;;  %v5786_v14 = vsub.f32 1.0, %v11070_v27  ;;  %v17180_v54 = vld [vmem:[#allocation101_spill] sm:$0xff] }
 0x80c   : > { %v5675_v38 = vadd.f32 %v9264_v13, %v17176_v28  ;;  %v5669_v39 = vpop.f32.mrb[243].mxu1  ;;  %6046 = vmatprep.mubr.f32.mxu1 %v16817_v56  ;;  %v11074_v18 = vpop.eup %11073  ;;  %v15333_v16 = vadd.f32 %v5848_v48, %v5816_v35  ;;  %v5331_v42 = vadd.f32 1.0, %v11072_v46  ;;  %v5069_v20 = vadd.f32 %v15144_v59, %v17180_v54  ;;  %v17181_v48 = vld [vmem:[#allocation115_spill] sm:$0xff]  ;;  %v17183_v59 = vld [vmem:[#allocation98_spill] sm:$0xff] }
 0x80d   : > { %17177 = vst [vmem:[#allocation68_spill] sm:$0xff] %v15330_v4  ;;  %v5670_v23 = vadd.f32 %v5669_v39, %v17178_v40  ;;  %v11076_v11 = vpop.eup %11075  ;;  %v5329_v28 = vadd.f32 1.0, %v11074_v18  ;;  %v5819_v35 = vmul.f32 %v5787_v1, %v17181_v48  ;;  %v17182_v46 = vld [vmem:[#allocation119_spill] sm:$0xff] }
 0x80e   : > { %17179 = vst [vmem:[#allocation38_spill] sm:$0xff] %v15333_v16  ;;  %11087 = vtanh.f32 %v5675_v38  ;;  %v11078_v61 = vpop.eup %11077  ;;  %v5333_v37 = vadd.f32 1.0, %v11076_v11  ;;  %v17186_v11 = vld [vmem:[#allocation174_spill] sm:$0xff] }
 0x80f   : > { %11089 = vtanh.f32 %v5670_v23  ;;  %6047 = vmatmul.mubr.f32.gmra.mrb[28].mxu1 %v15333_v16  ;;  %v5818_v23 = vmul.f32 %v5786_v14, %v17182_v46  ;;  %v5335_v26 = vadd.f32 1.0, %v11078_v61  ;;  %v17187_v61 = vld [vmem:[#allocation106_spill] sm:$0xff] }
 0x810   : > { %v11080_v13 = vpop.eup %11079  ;;  %6052 = vmatprep.mubr.f32.mxu1 %v16817_v56  ;;  %11091 = vpow2.f32 %v8477_v55  ;;  %v5063_v55 = vadd.f32 %v15140_v25, %v17183_v59  ;;  %v17199_v59 = vld [vmem:[#allocation135_spill] sm:$0xff] }
 0x811   : > { %v11082_v2 = vpop.eup %11081  ;;  %v5851_v39 = vmul.f32 %v11080_v13, %v11064_v62  ;;  %11093 = vpow2.f32 %v8475_v6  ;;  %v8481_v62 = vmul.f32 -1.442695, %v5069_v20 }
 0x812   : > { %v11084_v40 = vpop.eup %11083  ;;  %v5850_v38 = vmul.f32 %v11082_v2, %v11070_v27  ;;  %11095 = vrcp.f32 %v5331_v42  ;;  %v17185_v27 = vld [vmem:[#allocation104_spill] sm:$0xff]  ;;  %v5081_v42 = vadd.f32 %v15151_v21, %v17187_v61  ;;  %v8479_v20 = vmul.f32 -1.442695, %v5063_v55 }
 0x813   : > { %v11086_v53 = vpop.eup %11085  ;;  %6053 = vmatmul.mubr.f32.gmra.mrb[30].mxu1 %v15330_v4  ;;  %v15342_v18 = vadd.f32 %v5851_v39, %v5819_v35  ;;  %11097 = vrcp.f32 %v5329_v28  ;;  %v5789_v6 = vsub.f32 1.0, %v11084_v40  ;;  %v5075_v14 = vadd.f32 %v17186_v11, %v17185_v27  ;;  %v17188_v28 = vld [vmem:[#allocation131_spill] sm:$0xff]  ;;  %v17189_v35 = vld [vmem:[#allocation132_spill] sm:$0xff] }
 0x814   : > { %6058 = vmatprep.mubr.f32.mxu1 %v16817_v56  ;;  %v15347_v1 = vadd.f32 %v5850_v38, %v5818_v23  ;;  %v5788_v13 = vsub.f32 1.0, %v11086_v53  ;;  %11099 = vrcp.f32 %v5333_v37  ;;  %v17190_v11 = vld [vmem:[#allocation176_spill] sm:$0xff]  ;;  %v8485_v27 = vmul.f32 -1.442695, %v5081_v42 }
 0x815   : > { %v9267_v2 = vpop.f32.mrb[244].mxu1  ;;  %11101 = vrcp.f32 %v5335_v26  ;;  %v8483_v23 = vmul.f32 -1.442695, %v5075_v14  ;;  %v5821_v21 = vmul.f32 %v5789_v6, %v17190_v11  ;;  %v17194_v6 = vld [vmem:[#allocation133_spill] sm:$0xff] }
 0x816   : > { %17184 = vst [vmem:[#allocation40_spill] sm:$0xff] %v15347_v1  ;;  %v5685_v39 = vadd.f32 %v9267_v2, %v17188_v28  ;;  %v5679_v48 = vpop.f32.mrb[245].mxu1  ;;  %11103 = vpow2.f32 %v8481_v62  ;;  %v17191_v2 = vld [vmem:[#allocation177_spill] sm:$0xff] }
 0x817   : > { %6059 = vmatmul.mubr.f32.gmra.mrb[32].mxu1 %v15347_v1  ;;  %v5680_v38 = vadd.f32 %v5679_v48, %v17189_v35  ;;  %v5820_v61 = vmul.f32 %v5788_v13, %v17191_v2  ;;  %v17195_v13 = vld [vmem:[#allocation134_spill] sm:$0xff]  ;;  %v17197_v2 = vld [vmem:[#allocation108_spill] sm:$0xff] }
 0x818   : > { %v11088_v25 = vpop.eup %11087  ;;  %6064 = vmatprep.mubr.f32.mxu1 %v16817_v56  ;;  %11105 = vtanh.f32 %v5685_v39 }
 0x819   : > { %v11090_v46 = vpop.eup %11089  ;;  %v5853_v37 = vmul.f32 %v11088_v25, %v11084_v40  ;;  %11107 = vtanh.f32 %v5680_v38 }
 0x81a   : > { %v5852_v26 = vmul.f32 %v11090_v46, %v11086_v53  ;;  %v11092_v28 = vpop.eup %11091  ;;  %11109 = vpow2.f32 %v8479_v20 }
 0x81b   : > { %6065 = vmatmul.mubr.f32.gmra.mrb[34].mxu1 %v15342_v18  ;;  %v15360_v55 = vadd.f32 %v5853_v37, %v5821_v21  ;;  %v11094_v62 = vpop.eup %11093  ;;  %v9270_v48 = vpop.f32.mrb[246].mxu1  ;;  %11111 = vpow2.f32 %v8483_v23  ;;  %v5339_v25 = vadd.f32 1.0, %v11092_v28 }
 0x81c   : > { %6070 = vmatprep.mubr.f32.mxu1 %v16817_v56  ;;  %v15363_v14 = vadd.f32 %v5852_v26, %v5820_v61  ;;  %v11096_v40 = vpop.eup %11095  ;;  %v5695_v42 = vadd.f32 %v9270_v48, %v17194_v6  ;;  %v5689_v53 = vpop.f32.mrb[247].mxu1  ;;  %11113 = vpow2.f32 %v8485_v27  ;;  %v5337_v46 = vadd.f32 1.0, %v11094_v62  ;;  %v17196_v26 = vld [vmem:[#allocation110_spill] sm:$0xff] }
 0x81d   : > { %17192 = vst [vmem:[#allocation42_spill] sm:$0xff] %v15360_v55  ;;  %v11098_v39 = vpop.eup %11097  ;;  %v5690_v38 = vadd.f32 %v5689_v53, %v17195_v13  ;;  %v5791_v37 = vsub.f32 1.0, %v11096_v40  ;;  %v5093_v27 = vadd.f32 %v15160_v63, %v17196_v26  ;;  %v5087_v62 = vadd.f32 %v15155_v3, %v17197_v2  ;;  %v17198_v13 = vld [vmem:[#allocation67_spill] sm:$0xff] }
 0x81e   : > { %17193 = vst [vmem:[#allocation44_spill] sm:$0xff] %v15363_v14  ;;  %11115 = vtanh.f32 %v5695_v42  ;;  %v11100_v20 = vpop.eup %11099  ;;  %v5790_v11 = vsub.f32 1.0, %v11098_v39 }
 0x81f   : > { %6071 = vmatmul.mubr.f32.gmra.mrb[36].mxu1 %v15363_v14  ;;  %11117 = vtanh.f32 %v5690_v38  ;;  %v11102_v61 = vpop.eup %11101  ;;  %v5823_v42 = vmul.f32 %v5791_v37, %v14962_v10  ;;  %v5792_v7 = vsub.f32 1.0, %v11100_v20  ;;  %v8489_v3 = vmul.f32 -1.442695, %v5093_v27 }
 0x820   : > { %6076 = vmatprep.mubr.f32.mxu1 %v16817_v56  ;;  %v11104_v23 = vpop.eup %11103  ;;  %11119 = vrcp.f32 %v5339_v25  ;;  %v5822_v25 = vmul.f32 %v5790_v11, %v17198_v13 }
 0x821   : > { %11121 = vrcp.f32 %v5337_v46  ;;  %v5793_v46 = vsub.f32 1.0, %v11102_v61  ;;  %v5343_v35 = vadd.f32 1.0, %v11104_v23 }
 0x822   : > { %v11106_v21 = vpop.eup %11105 }
 0x823   : > { %6077 = vmatmul.mubr.f32.gmra.mrb[38].mxu1 %v15360_v55  ;;  %v11108_v28 = vpop.eup %11107  ;;  %v5855_v48 = vmul.f32 %v11106_v21, %v11096_v40  ;;  %v9273_v38 = vpop.f32.mrb[248].mxu1  ;;  %v17201_v40 = vld [vmem:[#allocation136_spill] sm:$0xff] }
 0x824   : > { %6082 = vmatprep.mubr.f32.mxu1 %v16817_v56  ;;  %v5854_v53 = vmul.f32 %v11108_v28, %v11098_v39  ;;  %v11110_v6 = vpop.eup %11109  ;;  %v5705_v63 = vadd.f32 %v9273_v38, %v17199_v59  ;;  %v5699_v26 = vpop.f32.mrb[249].mxu1  ;;  %v8487_v39 = vmul.f32 -1.442695, %v5087_v62  ;;  %v5825_v28 = vmul.f32 %v5793_v46, %v14972_v19 }
 0x825   : > { %v15378_v54 = vadd.f32 %v5855_v48, %v5823_v42  ;;  %v11112_v22 = vpop.eup %11111  ;;  %v5700_v21 = vadd.f32 %v5699_v26, %v17201_v40  ;;  %v5341_v13 = vadd.f32 1.0, %v11110_v6  ;;  %v17203_v26 = vld [vmem:[#allocation178_spill] sm:$0xff] }
 0x826   : > { %v15381_v2 = vadd.f32 %v5854_v53, %v5822_v25  ;;  %v11114_v10 = vpop.eup %11113  ;;  %11123 = vtanh.f32 %v5705_v63  ;;  %v5824_v48 = vmul.f32 %v5792_v7, %v17203_v26  ;;  %v5345_v53 = vadd.f32 1.0, %v11112_v22  ;;  %v17206_v22 = vld [vmem:[#allocation138_spill] sm:$0xff] }
 0x827   : > { %17200 = vst [vmem:[#allocation46_spill] sm:$0xff] %v15378_v54  ;;  %11125 = vtanh.f32 %v5700_v21  ;;  %v5347_v38 = vadd.f32 1.0, %v11114_v10 }
 0x828   : > { %17202 = vst [vmem:[#allocation48_spill] sm:$0xff] %v15381_v2  ;;  %v11116_v37 = vpop.eup %11115  ;;  %6083 = vmatmul.mubr.f32.gmra.mrb[40].mxu1 %v15381_v2  ;;  %11127 = vrcp.f32 %v5343_v35 }
 0x829   : > { %v11118_v11 = vpop.eup %11117  ;;  %v5857_v23 = vmul.f32 %v11116_v37, %v11102_v61  ;;  %6088 = vmatprep.mubr.f32.mxu1 %v16817_v56  ;;  %11129 = vpow2.f32 %v8489_v3 }
 0x82a   : > { %v5856_v27 = vmul.f32 %v11118_v11, %v11100_v20  ;;  %v11120_v42 = vpop.eup %11119  ;;  %11131 = vpow2.f32 %v8487_v39  ;;  %v17205_v20 = vld [vmem:[#allocation137_spill] sm:$0xff] }
 0x82b   : > { %v15387_v62 = vadd.f32 %v5857_v23, %v5825_v28  ;;  %v11122_v6 = vpop.eup %11121  ;;  %11133 = vrcp.f32 %v5341_v13  ;;  %v5795_v61 = vsub.f32 1.0, %v11120_v42 }
 0x82c   : > { %6089 = vmatmul.mubr.f32.gmra.mrb[42].mxu1 %v15378_v54  ;;  %v15390_v35 = vadd.f32 %v5856_v27, %v5824_v48  ;;  %v5794_v25 = vsub.f32 1.0, %v11122_v6  ;;  %11135 = vrcp.f32 %v5345_v53  ;;  %v17207_v48 = vld [vmem:[#allocation139_spill] sm:$0xff] }
 0x82d   : > { %6094 = vmatprep.mubr.f32.mxu1 %v16817_v56  ;;  %v9276_v19 = vpop.f32.mrb[250].mxu1  ;;  %11137 = vrcp.f32 %v5347_v38  ;;  %v5827_v39 = vmul.f32 %v5795_v61, %v14987_v29  ;;  %v17208_v29 = vld [vmem:[#allocation140_spill] sm:$0xff] }
 0x82e   : > { %17204 = vst [vmem:[#allocation49_spill] sm:$0xff] %v15390_v35  ;;  %v5715_v7 = vadd.f32 %v9276_v19, %v17205_v20  ;;  %v5709_v46 = vpop.f32.mrb[251].mxu1  ;;  %v5826_v11 = vmul.f32 %v5794_v25, %v14990_v36 }
 0x82f   : > { %v5710_v63 = vadd.f32 %v5709_v46, %v17206_v22  ;;  %v6976_v22 = vld [vmem:[%s16039_s10 + $0x20] sm:$0xff] }
 0x830   : > { %6095 = vmatmul.mubr.f32.gmra.mrb[44].mxu1 %v15390_v35  ;;  %v11124_v3 = vpop.eup %11123  ;;  %11139 = vtanh.f32 %v5715_v7 }
 0x831   : > { %6100 = vmatprep.mubr.f32.mxu1 %v16817_v56  ;;  %v11126_v21 = vpop.eup %11125  ;;  %v5859_v10 = vmul.f32 %v11124_v3, %v11120_v42  ;;  %11141 = vtanh.f32 %v5710_v63 }
 0x832   : > { %v11128_v37 = vpop.eup %11127  ;;  %v5858_v13 = vmul.f32 %v11126_v21, %v11122_v6 }
 0x833   : > { %v11130_v23 = vpop.eup %11129  ;;  %v9279_v28 = vpop.f32.mrb[252].mxu1  ;;  %v15400_v27 = vadd.f32 %v5859_v10, %v5827_v39  ;;  %v5797_v36 = vsub.f32 1.0, %v11128_v37 }
 0x834   : > { %6101 = vmatmul.mubr.f32.gmra.mrb[46].mxu1 %v15387_v62  ;;  %v11132_v26 = vpop.eup %11131  ;;  %v5725_v53 = vadd.f32 %v9279_v28, %v17207_v48  ;;  %v5719_v38 = vpop.f32.mrb[253].mxu1  ;;  %v15404_v42 = vadd.f32 %v5858_v13, %v5826_v11  ;;  %v5351_v6 = vadd.f32 1.0, %v11130_v23 }
 0x835   : > { %6106 = vmatprep.mubr.f32.mxu1 %v16817_v56  ;;  %v11134_v19 = vpop.eup %11133  ;;  %v5720_v61 = vadd.f32 %v5719_v38, %v17208_v29  ;;  %v5349_v25 = vadd.f32 1.0, %v11132_v26  ;;  %v5829_v39 = vmul.f32 %v5797_v36, %v14998_v33  ;;  %v17209_v38 = vld [vmem:[#allocation141_spill] sm:$0xff] }
 0x836   : > { %11143 = vtanh.f32 %v5725_v53  ;;  %v11136_v7 = vpop.eup %11135  ;;  %v5796_v46 = vsub.f32 1.0, %v11134_v19 }
 0x837   : > { %11145 = vtanh.f32 %v5720_v61  ;;  %v11138_v63 = vpop.eup %11137  ;;  %v5798_v53 = vsub.f32 1.0, %v11136_v7 }
 0x838   : > { %6107 = vmatmul.mubr.f32.gmra.mrb[48].mxu1 %v15404_v42  ;;  %11147 = vrcp.f32 %v5351_v6  ;;  %v5828_v11 = vmul.f32 %v5796_v46, %v15002_v31  ;;  %v5799_v23 = vsub.f32 1.0, %v11138_v63 }
 0x839   : > { %6112 = vmatprep.mubr.f32.mxu1 %v16817_v56  ;;  %11149 = vrcp.f32 %v5349_v25  ;;  %v5830_v46 = vmul.f32 %v5798_v53, %v15012_v17 }
 0x83a   : > { %v11140_v3 = vpop.eup %11139  ;;  %v5831_v31 = vmul.f32 %v5799_v23, %v15009_v44 }
 0x83b   : > { %v11142_v21 = vpop.eup %11141  ;;  %v5861_v10 = vmul.f32 %v11140_v3, %v11128_v37  ;;  %v9282_v28 = vpop.f32.mrb[254].mxu1  ;;  %v17210_v37 = vld [vmem:[#allocation142_spill] sm:$0xff] }
 0x83c   : > { %6113 = vmatmul.mubr.f32.gmra.mrb[50].mxu1 %v15400_v27  ;;  %v5860_v13 = vmul.f32 %v11142_v21, %v11134_v19  ;;  %v5735_v61 = vadd.f32 %v9282_v28, %v17209_v38  ;;  %v5729_v6 = vpop.f32.mrb[255].mxu1 }
 0x83d   : > { %6118 = vmatprep.mubr.f32.mxu1 %v16817_v56  ;;  %v15413_v26 = vadd.f32 %v5861_v10, %v5829_v39  ;;  %v5730_v25 = vadd.f32 %v5729_v6, %v17210_v37 }
 0x83e   : > { %v15416_v29 = vadd.f32 %v5860_v13, %v5828_v11  ;;  %11151 = vtanh.f32 %v5735_v61 }
 0x83f   : > { %11153 = vtanh.f32 %v5730_v25 }
 0x840   : > { %v11144_v3 = vpop.eup %11143  ;;  %6119 = vmatmul.mubr.f32.gmra.mrb[52].mxu1 %v15416_v29 }
 0x841   : > { %v11146_v33 = vpop.eup %11145  ;;  %v5863_v19 = vmul.f32 %v11144_v3, %v11138_v63  ;;  %6124 = vmatprep.mubr.f32.mxu1 %v16817_v56 }
 0x842   : > { %v5862_v36 = vmul.f32 %v11146_v33, %v11136_v7  ;;  %v11148_v10 = vpop.eup %11147 }
 0x843   : > { %v15423_v21 = vadd.f32 %v5863_v19, %v5831_v31  ;;  %v11150_v13 = vpop.eup %11149  ;;  %v5801_v11 = vsub.f32 1.0, %v11148_v10  ;;  %v17211_v19 = vld [vmem:[#allocation144_spill] sm:$0xff] }
 0x844   : > { %6125 = vmatmul.mubr.f32.gmra.mrb[54].mxu1 %v15413_v26  ;;  %v15426_v39 = vadd.f32 %v5862_v36, %v5830_v46  ;;  %v5800_v63 = vsub.f32 1.0, %v11150_v13 }
 0x845   : > { %6130 = vmatprep.mubr.f32.mxu1 %v16817_v56  ;;  %v5833_v17 = vmul.f32 %v5801_v11, %v15018_v47  ;;  %v6972_v47 = vld [vmem:[%s16039_s10] sm:$0xff] }
 0x846   : > { %v5832_v53 = vmul.f32 %v5800_v63, %v15021_v50  ;;  %v6973_v50 = vld [vmem:[%s16039_s10 + $0x8] sm:$0xff] }
 0x847   : > { %v9947_v25 = vpack.c.bf16 %v6973_v50, %v6972_v47 }
 0x848   : > { %6131 = vmatmul.mubr.f32.gmra.mrb[56].mxu1 %v15426_v39  ;;  %v11152_v44 = vpop.eup %11151 }
 0x849   : > { %6136 = vmatprep.mubr.f32.mxu1 %v16817_v56  ;;  %v11154_v7 = vpop.eup %11153  ;;  %v5865_v23 = vmul.f32 %v11152_v44, %v11148_v10  ;;  %9948 = vmatprep.subr.bf16.mxu0 %v9947_v25  ;;  %v17212_v10 = vld [vmem:[#allocation146_spill] sm:$0xff] }
 0x84a   : > { %v5864_v28 = vmul.f32 %v11154_v7, %v11150_v13  ;;  %v17213_v7 = vld [vmem:[#allocation148_spill] sm:$0xff] }
 0x84b   : > { %v15435_v61 = vadd.f32 %v5865_v23, %v5833_v17 }
 0x84c   : > { %6137 = vmatmul.mubr.f32.gmra.mrb[58].mxu1 %v15423_v21  ;;  %v15437_v6 = vadd.f32 %v5864_v28, %v5832_v53 }
 0x84d   : > { %6142 = vmatprep.mubr.f32.mxu1 %v16817_v56 }
 0x850   : > { %6143 = vmatmul.mubr.f32.gmra.mrb[60].mxu1 %v15437_v6 }
 0x851   : > { %6148 = vmatprep.mubr.f32.mxu1 %v16817_v56 }
 0x854   : > { %6149 = vmatmul.mubr.f32.gmra.mrb[62].mxu1 %v15435_v61 }
 0x8a4   : > { %v15448_v3 = vpop.f32.mrb[0].mxu1 }
 0x8a5   : > { %v5966_v33 = vpop.f32.mrb[1].mxu1 }
 0x8a6   : > { %v5967_v31 = vadd.f32 %v5966_v33, %v17211_v19  ;;  %v17214_v33 = vld [vmem:[#allocation150_spill] sm:$0xff] }
 0x8a8   : > { %v8492_v36 = vmul.f32 -1.442695, %v5967_v31  ;;  %v15451_v46 = vpop.f32.mrb[2].mxu1 }
 0x8a9   : > { %v5972_v56 = vpop.f32.mrb[3].mxu1 }
 0x8aa   : > { %11155 = vpow2.f32 %v8492_v36  ;;  %v5973_v13 = vadd.f32 %v5972_v56, %v17212_v10 }
 0x8ac   : > { %v8494_v11 = vmul.f32 -1.442695, %v5973_v13 }
 0x8ae   : > { %11157 = vpow2.f32 %v8494_v11  ;;  %v15454_v63 = vpop.f32.mrb[4].mxu1  ;;  %v17215_v11 = vld [vmem:[#allocation152_spill] sm:$0xff] }
 0x8af   : > { %v5978_v44 = vpop.f32.mrb[5].mxu1 }
 0x8b0   : > { %v5979_v23 = vadd.f32 %v5978_v44, %v17213_v7 }
 0x8b2   : > { %v8496_v17 = vmul.f32 -1.442695, %v5979_v23  ;;  %v15457_v28 = vpop.f32.mrb[6].mxu1 }
 0x8b3   : > { %v5984_v47 = vpop.f32.mrb[7].mxu1 }
 0x8b4   : > { %v11156_v53 = vpop.eup %11155  ;;  %11159 = vpow2.f32 %v8496_v17  ;;  %v5985_v19 = vadd.f32 %v5984_v47, %v17214_v33  ;;  %v17216_v17 = vld [vmem:[#allocation36_spill] sm:$0xff] }
 0x8b5   : > { %v6348_v50 = vadd.f32 1.0, %v11156_v53 }
 0x8b6   : > { %v8498_v31 = vmul.f32 -1.442695, %v5985_v19 }
 0x8b7   : > { %11161 = vrcp.f32 %v6348_v50 }
 0x8b8   : > { %v11158_v36 = vpop.eup %11157  ;;  %11163 = vpow2.f32 %v8498_v31  ;;  %v15460_v10 = vpop.f32.mrb[8].mxu1 }
 0x8b9   : > { %v6350_v56 = vadd.f32 1.0, %v11158_v36  ;;  %v5990_v13 = vpop.f32.mrb[9].mxu1 }
 0x8ba   : > { %v5991_v44 = vadd.f32 %v5990_v13, %v17215_v11  ;;  %v6974_v13 = vld [vmem:[%s16039_s10 + $0x10] sm:$0xff] }
 0x8bb   : > { %11165 = vrcp.f32 %v6350_v56 }
 0x8bc   : > { %v8500_v7 = vmul.f32 -1.442695, %v5991_v44  ;;  %v15463_v23 = vpop.f32.mrb[10].mxu1 }
 0x8bd   : > { %v5996_v38 = vpop.f32.mrb[11].mxu1 }
 0x8be   : > { %v11160_v37 = vpop.eup %11159  ;;  %11167 = vpow2.f32 %v8500_v7  ;;  %v5997_v47 = vadd.f32 %v5996_v38, %v17216_v17  ;;  %v17217_v38 = vld [vmem:[#allocation39_spill] sm:$0xff] }
 0x8bf   : > { %v6352_v53 = vadd.f32 1.0, %v11160_v37  ;;  %v6975_v37 = vld [vmem:[%s16039_s10 + $0x18] sm:$0xff] }
 0x8c0   : > { %v8502_v33 = vmul.f32 -1.442695, %v5997_v47 }
 0x8c1   : > { %v11162_v50 = vpop.eup %11161  ;;  %11169 = vrcp.f32 %v6352_v53 }
 0x8c2   : > { %v15466_v19 = vpop.f32.mrb[12].mxu1  ;;  %v6539_v31 = vmul.f32 %v11162_v50, %v15202_v57  ;;  %v11164_v36 = vpop.eup %11163  ;;  %11171 = vpow2.f32 %v8502_v33  ;;  %v9951_v50 = vpack.c.bf16 %v6975_v37, %v6974_v13  ;;  %v6977_v33 = vld [vmem:[%s16039_s10 + $0x28] sm:$0xff]  ;;  %v17220_v57 = vld [vmem:[#allocation52_spill] sm:$0xff] }
 0x8c3   : > { %v6002_v56 = vpop.f32.mrb[13].mxu1  ;;  %v6354_v11 = vadd.f32 1.0, %v11164_v36  ;;  %v17218_v36 = vld [vmem:[#allocation43_spill] sm:$0xff]  ;;  %v9955_v13 = vpack.c.bf16 %v6977_v33, %v6976_v22 }
 0x8c4   : > { %v6003_v44 = vadd.f32 %v6002_v56, %v17217_v38  ;;  %9315 = vmatprep.mubr.f32.mxu0 %v6539_v31 }
 0x8c5   : > { %v11166_v7 = vpop.eup %11165  ;;  %11173 = vrcp.f32 %v6354_v11 }
 0x8c6   : > { %v8504_v53 = vmul.f32 -1.442695, %v6003_v44  ;;  %v15476_v17 = vpop.f32.mrb[14].mxu1  ;;  %v6540_v47 = vmul.f32 %v11166_v7, %v15200_v9  ;;  %v6978_v7 = vld [vmem:[%s16039_s10 + $0x30] sm:$0xff] }
 0x8c7   : > { %v6008_v48 = vpop.f32.mrb[15].mxu1 }
 0x8c8   : > { %11175 = vpow2.f32 %v8504_v53  ;;  %v6009_v31 = vadd.f32 %v6008_v48, %v17218_v36  ;;  %9316 = vmatmul.mubr.f32.vlgmr.msra.gmra.mrb[192].mxu0 %v6540_v47  ;;  %v11168_v56 = vpop.eup %11167  ;;  %v6979_v53 = vld [vmem:[%s16039_s10 + $0x38] sm:$0xff]  ;;  %v17219_v48 = vld [vmem:[#allocation47_spill] sm:$0xff] }
 0x8c9   : > { %9950 = vmatpush3.bf16.msra.mxu0 %v9947_v25  ;;  %v6356_v37 = vadd.f32 1.0, %v11168_v56 }
 0x8ca   : > { %v8506_v11 = vmul.f32 -1.442695, %v6009_v31  ;;  %v15486_v38 = vpop.f32.mrb[16].mxu1  ;;  %9952 = vmatprep.subr.bf16.mxu0 %v9951_v50  ;;  %v9959_v31 = vpack.c.bf16 %v6979_v53, %v6978_v7  ;;  %v17221_v7 = vld [vmem:[#allocation57_spill] sm:$0xff] }
 0x8cb   : > { %v6014_v44 = vpop.f32.mrb[17].mxu1  ;;  %v11170_v20 = vpop.eup %11169  ;;  %11177 = vrcp.f32 %v6356_v37 }
 0x8cc   : > { %v6015_v47 = vadd.f32 %v6014_v44, %v17219_v48  ;;  %v6541_v25 = vmul.f32 %v11170_v20, %v15224_v32  ;;  %v11172_v36 = vpop.eup %11171  ;;  %11179 = vpow2.f32 %v8506_v11 }
 0x8cd   : > { %9954 = vmatpush3.bf16.msra.mxu0 %v9951_v50  ;;  %v6358_v56 = vadd.f32 1.0, %v11172_v36  ;;  %v6957_v36 = vld [vmem:[%s16038_s9 + $0x8] sm:$0xff] }
 0x8ce   : > { %v8508_v22 = vmul.f32 -1.442695, %v6015_v47  ;;  %v15496_v33 = vpop.f32.mrb[18].mxu1  ;;  %9956 = vmatprep.subr.bf16.mxu0 %v9955_v13  ;;  %9318 = vmatprep.mubr.f32.mxu0 %v6541_v25 }
 0x8cf   : > { %v6020_v40 = vpop.f32.mrb[19].mxu1  ;;  %v11174_v59 = vpop.eup %11173  ;;  %11181 = vrcp.f32 %v6358_v56  ;;  %v17222_v56 = vld [vmem:[#allocation156_spill] sm:$0xff] }
 0x8d0   : > { %v6021_v9 = vadd.f32 %v6020_v40, %v17220_v57  ;;  %v6542_v44 = vmul.f32 %v11174_v59, %v15222_v15  ;;  %11183 = vpow2.f32 %v8508_v22 }
 0x8d1   : > { %9958 = vmatpush3.bf16.msra.mxu0 %v9955_v13 }
 0x8d2   : > { %v11176_v37 = vpop.eup %11175  ;;  %v8510_v20 = vmul.f32 -1.442695, %v6021_v9  ;;  %9960 = vmatprep.subr.bf16.mxu0 %v9959_v31  ;;  %v15500_v11 = vpop.f32.mrb[20].mxu1  ;;  %9319 = vmatmul.mubr.f32.gmra.mrb[194].mxu0 %v6542_v44  ;;  %v6956_v9 = vld [vmem:[%s16038_s9] sm:$0xff] }
 0x8d3   : > { %v6360_v50 = vadd.f32 1.0, %v11176_v37  ;;  %v6026_v48 = vpop.f32.mrb[21].mxu1  ;;  %v15513_v44 = vpack.c.bf16 %v6957_v36, %v6956_v9 }
 0x8d4   : > { %v6027_v53 = vadd.f32 %v6026_v48, %v17221_v7 }
 0x8d5   : > { %11185 = vrcp.f32 %v6360_v50  ;;  %9962 = vmatpush3.bf16.msra.mxu0 %v9959_v31  ;;  %v11178_v47 = vpop.eup %11177 }
 0x8d6   : > { %11187 = vpow2.f32 %v8510_v20  ;;  %v8512_v57 = vmul.f32 -1.442695, %v6027_v53  ;;  %v15503_v40 = vpop.f32.mrb[22].mxu1  ;;  %v11180_v59 = vpop.eup %11179  ;;  %v6543_v25 = vmul.f32 %v11178_v47, %v15248_v12  ;;  %9964 = vmatprep.subr.bf16.mxu0 %v15513_v44  ;;  %v17223_v12 = vld [vmem:[#allocation158_spill] sm:$0xff] }
 0x8d7   : > { %v6032_v13 = vpop.f32.mrb[23].mxu1  ;;  %v6362_v22 = vadd.f32 1.0, %v11180_v59 }
 0x8d8   : > { %v6033_v31 = vadd.f32 %v6032_v13, %v17222_v56  ;;  %11189 = vpow2.f32 %v8512_v57  ;;  %9321 = vmatprep.mubr.f32.mxu0 %v6543_v25 }
 0x8d9   : > { %v11182_v37 = vpop.eup %11181  ;;  %11191 = vrcp.f32 %v6362_v22 }
 0x8da   : > { %v8514_v20 = vmul.f32 -1.442695, %v6033_v31  ;;  %v15515_v50 = vpop.f32.mrb[24].mxu1  ;;  %v11184_v48 = vpop.eup %11183  ;;  %v6544_v53 = vmul.f32 %v11182_v37, %v15245_v8  ;;  %v17224_v31 = vld [vmem:[#allocation160_spill] sm:$0xff] }
 0x8db   : > { %v6038_v7 = vpop.f32.mrb[25].mxu1  ;;  %v6364_v47 = vadd.f32 1.0, %v11184_v48 }
 0x8dc   : > { %v6039_v59 = vadd.f32 %v6038_v7, %v17223_v12  ;;  %11193 = vpow2.f32 %v8514_v20  ;;  %9322 = vmatmul.mubr.f32.gmra.mrb[196].mxu0 %v6544_v53 }
 0x8dd   : > { %11195 = vrcp.f32 %v6364_v47  ;;  %v17225_v47 = vld [vmem:[#allocation162_spill] sm:$0xff] }
 0x8de   : > { %v8516_v57 = vmul.f32 -1.442695, %v6039_v59  ;;  %v15520_v25 = vpop.f32.mrb[26].mxu1 }
 0x8df   : > { %v11186_v13 = vpop.eup %11185  ;;  %v6044_v36 = vpop.f32.mrb[27].mxu1 }
 0x8e0   : > { %v11188_v9 = vpop.eup %11187  ;;  %v6545_v22 = vmul.f32 %v11186_v13, %v15266_v43  ;;  %v6045_v32 = vadd.f32 %v6044_v36, %v17224_v31  ;;  %11197 = vpow2.f32 %v8516_v57 }
 0x8e1   : > { %v6366_v56 = vadd.f32 1.0, %v11188_v9 }
 0x8e2   : > { %9324 = vmatprep.mubr.f32.mxu0 %v6545_v22  ;;  %v8518_v37 = vmul.f32 -1.442695, %v6045_v32  ;;  %v15524_v48 = vpop.f32.mrb[28].mxu1  ;;  %v11190_v12 = vpop.eup %11189 }
 0x8e3   : > { %11199 = vrcp.f32 %v6366_v56  ;;  %v6050_v20 = vpop.f32.mrb[29].mxu1  ;;  %v11192_v7 = vpop.eup %11191  ;;  %v6368_v53 = vadd.f32 1.0, %v11190_v12  ;;  %v17226_v56 = vld [vmem:[#allocation164_spill] sm:$0xff] }
 0x8e4   : > { %11201 = vpow2.f32 %v8518_v37  ;;  %v6051_v59 = vadd.f32 %v6050_v20, %v17225_v47  ;;  %v6546_v8 = vmul.f32 %v11192_v7, %v15264_v5 }
 0x8e5   : > { %11203 = vrcp.f32 %v6368_v53 }
 0x8e6   : > { %v8520_v13 = vmul.f32 -1.442695, %v6051_v59  ;;  %v15528_v9 = vpop.f32.mrb[30].mxu1  ;;  %v11194_v36 = vpop.eup %11193  ;;  %9325 = vmatmul.mubr.f32.gmra.mrb[198].mxu0 %v6546_v8  ;;  %v17227_v59 = vld [vmem:[#allocation165_spill] sm:$0xff] }
 0x8e7   : > { %v6056_v57 = vpop.f32.mrb[31].mxu1  ;;  %v11196_v22 = vpop.eup %11195  ;;  %v6370_v32 = vadd.f32 1.0, %v11194_v36 }
 0x8e8   : > { %11205 = vpow2.f32 %v8520_v13  ;;  %v6057_v31 = vadd.f32 %v6056_v57, %v17226_v56  ;;  %v6547_v43 = vmul.f32 %v11196_v22, %v15284_v58 }
 0x8e9   : > { %11207 = vrcp.f32 %v6370_v32 }
 0x8ea   : > { %v8522_v37 = vmul.f32 -1.442695, %v6057_v31  ;;  %v15532_v12 = vpop.f32.mrb[32].mxu1  ;;  %v11198_v20 = vpop.eup %11197  ;;  %9327 = vmatprep.mubr.f32.mxu0 %v6547_v43  ;;  %v17228_v31 = vld [vmem:[#allocation76_spill] sm:$0xff] }
 0x8eb   : > { %v6062_v7 = vpop.f32.mrb[33].mxu1  ;;  %v6372_v47 = vadd.f32 1.0, %v11198_v20 }
 0x8ec   : > { %11209 = vpow2.f32 %v8522_v37  ;;  %v6063_v8 = vadd.f32 %v6062_v7, %v17227_v59 }
 0x8ed   : > { %v11200_v53 = vpop.eup %11199  ;;  %11211 = vrcp.f32 %v6372_v47 }
 0x8ee   : > { %v6548_v5 = vmul.f32 %v11200_v53, %v15280_v41  ;;  %v11202_v36 = vpop.eup %11201  ;;  %v8524_v13 = vmul.f32 -1.442695, %v6063_v8  ;;  %v15536_v57 = vpop.f32.mrb[34].mxu1  ;;  %v17229_v8 = vld [vmem:[#allocation80_spill] sm:$0xff] }
 0x8ef   : > { %v6374_v22 = vadd.f32 1.0, %v11202_v36  ;;  %v6068_v32 = vpop.f32.mrb[35].mxu1  ;;  %v11204_v56 = vpop.eup %11203 }
 0x8f0   : > { %9328 = vmatmul.mubr.f32.gmra.mrb[200].mxu0 %v6548_v5  ;;  %v6069_v58 = vadd.f32 %v6068_v32, %v17228_v31  ;;  %v6549_v43 = vmul.f32 %v11204_v56, %v15304_v49  ;;  %v17230_v31 = vld [vmem:[#allocation85_spill] sm:$0xff] }
 0x8f1   : > { %11213 = vrcp.f32 %v6374_v22 }
 0x8f2   : > { %v11206_v20 = vpop.eup %11205  ;;  %11215 = vpow2.f32 %v8524_v13  ;;  %v8526_v37 = vmul.f32 -1.442695, %v6069_v58  ;;  %v15540_v7 = vpop.f32.mrb[36].mxu1  ;;  %9330 = vmatprep.mubr.f32.mxu0 %v6549_v43 }
 0x8f3   : > { %v6376_v53 = vadd.f32 1.0, %v11206_v20  ;;  %v6074_v47 = vpop.f32.mrb[37].mxu1  ;;  %v11208_v59 = vpop.eup %11207 }
 0x8f4   : > { %v6075_v41 = vadd.f32 %v6074_v47, %v17229_v8  ;;  %v6550_v5 = vmul.f32 %v11208_v59, %v15299_v52 }
 0x8f5   : > { %11217 = vrcp.f32 %v6376_v53 }
 0x8f6   : > { %v11210_v36 = vpop.eup %11209  ;;  %11219 = vpow2.f32 %v8526_v37  ;;  %v8528_v32 = vmul.f32 -1.442695, %v6075_v41  ;;  %v15544_v22 = vpop.f32.mrb[38].mxu1  ;;  %9331 = vmatmul.mubr.f32.gmra.mrb[202].mxu0 %v6550_v5  ;;  %v17231_v5 = vld [vmem:[#allocation91_spill] sm:$0xff] }
 0x8f7   : > { %v6378_v56 = vadd.f32 1.0, %v11210_v36  ;;  %v6080_v13 = vpop.f32.mrb[39].mxu1  ;;  %v11212_v58 = vpop.eup %11211 }
 0x8f8   : > { %v6081_v49 = vadd.f32 %v6080_v13, %v17230_v31  ;;  %v6551_v43 = vmul.f32 %v11212_v58, %v15314_v24 }
 0x8f9   : > { %11221 = vrcp.f32 %v6378_v56 }
 0x8fa   : > { %11223 = vpow2.f32 %v8528_v32  ;;  %v8530_v20 = vmul.f32 -1.442695, %v6081_v49  ;;  %9333 = vmatprep.mubr.f32.mxu0 %v6551_v43  ;;  %v17232_v43 = vld [vmem:[#allocation63_spill] sm:$0xff] }
 0x8fb   : > { %v11214_v47 = vpop.eup %11213  ;;  %v15548_v59 = vpop.f32.mrb[40].mxu1 }
 0x8fc   : > { %v11216_v53 = vpop.eup %11215  ;;  %v6552_v41 = vmul.f32 %v11214_v47, %v15311_v34  ;;  %11225 = vpow2.f32 %v8530_v20  ;;  %v6086_v8 = vpop.f32.mrb[41].mxu1 }
 0x8fd   : > { %v6380_v37 = vadd.f32 1.0, %v11216_v53  ;;  %v6087_v36 = vadd.f32 %v6086_v8, %v17231_v5 }
 0x8fe   : > { %9334 = vmatmul.mubr.f32.gmra.mrb[204].mxu0 %v6552_v41 }
 0x8ff   : > { %v11218_v52 = vpop.eup %11217  ;;  %11227 = vrcp.f32 %v6380_v37  ;;  %v8532_v13 = vmul.f32 -1.442695, %v6087_v36  ;;  %v15552_v58 = vpop.f32.mrb[42].mxu1  ;;  %v17233_v36 = vld [vmem:[#allocation94_spill] sm:$0xff] }
 0x900   : > { %v11220_v56 = vpop.eup %11219  ;;  %v6553_v49 = vmul.f32 %v11218_v52, %v15333_v16  ;;  %v6092_v31 = vpop.f32.mrb[43].mxu1 }
 0x901   : > { %v6382_v32 = vadd.f32 1.0, %v11220_v56  ;;  %11229 = vpow2.f32 %v8532_v13  ;;  %v6093_v24 = vadd.f32 %v6092_v31, %v17232_v43 }
 0x902   : > { %9336 = vmatprep.mubr.f32.mxu0 %v6553_v49 }
 0x903   : > { %v11222_v47 = vpop.eup %11221  ;;  %11231 = vrcp.f32 %v6382_v32  ;;  %v8534_v53 = vmul.f32 -1.442695, %v6093_v24  ;;  %v15556_v8 = vpop.f32.mrb[44].mxu1  ;;  %v17234_v24 = vld [vmem:[#allocation169_spill] sm:$0xff] }
 0x904   : > { %v11224_v20 = vpop.eup %11223  ;;  %v6554_v41 = vmul.f32 %v11222_v47, %v15330_v4  ;;  %v6098_v5 = vpop.f32.mrb[45].mxu1 }
 0x905   : > { %v6384_v37 = vadd.f32 1.0, %v11224_v20  ;;  %11233 = vpow2.f32 %v8534_v53  ;;  %v6099_v34 = vadd.f32 %v6098_v5, %v17233_v36  ;;  %v17235_v36 = vld [vmem:[#allocation170_spill] sm:$0xff] }
 0x906   : > { %9337 = vmatmul.mubr.f32.gmra.mrb[206].mxu0 %v6554_v41  ;;  %v11226_v52 = vpop.eup %11225 }
 0x907   : > { %11235 = vrcp.f32 %v6384_v37  ;;  %v6386_v56 = vadd.f32 1.0, %v11226_v52  ;;  %v8536_v13 = vmul.f32 -1.442695, %v6099_v34  ;;  %v15560_v31 = vpop.f32.mrb[46].mxu1 }
 0x908   : > { %v6104_v32 = vpop.f32.mrb[47].mxu1 }
 0x909   : > { %v11228_v49 = vpop.eup %11227  ;;  %11237 = vrcp.f32 %v6386_v56  ;;  %v6105_v43 = vadd.f32 %v6104_v32, %v17234_v24 }
 0x90a   : > { %v6555_v16 = vmul.f32 %v11228_v49, %v15347_v1  ;;  %11239 = vpow2.f32 %v8536_v13 }
 0x90b   : > { %v11230_v47 = vpop.eup %11229  ;;  %v8538_v20 = vmul.f32 -1.442695, %v6105_v43  ;;  %v15564_v53 = vpop.f32.mrb[48].mxu1  ;;  %v17236_v43 = vld [vmem:[#allocation97_spill] sm:$0xff] }
 0x90c   : > { %9339 = vmatprep.mubr.f32.mxu0 %v6555_v16  ;;  %v6388_v5 = vadd.f32 1.0, %v11230_v47  ;;  %v6110_v37 = vpop.f32.mrb[49].mxu1 }
 0x90d   : > { %v11232_v41 = vpop.eup %11231  ;;  %v6111_v34 = vadd.f32 %v6110_v37, %v17235_v36 }
 0x90e   : > { %v6556_v52 = vmul.f32 %v11232_v41, %v15342_v18  ;;  %11241 = vrcp.f32 %v6388_v5 }
 0x90f   : > { %v11234_v4 = vpop.eup %11233  ;;  %11243 = vpow2.f32 %v8538_v20  ;;  %v8540_v56 = vmul.f32 -1.442695, %v6111_v34  ;;  %v15568_v32 = vpop.f32.mrb[50].mxu1 }
 0x910   : > { %9340 = vmatmul.mubr.f32.gmra.mrb[208].mxu0 %v6556_v52  ;;  %v6390_v49 = vadd.f32 1.0, %v11234_v4  ;;  %v6116_v24 = vpop.f32.mrb[51].mxu1  ;;  %v17237_v52 = vld [vmem:[#allocation99_spill] sm:$0xff] }
 0x911   : > { %v11236_v13 = vpop.eup %11235  ;;  %v6117_v1 = vadd.f32 %v6116_v24, %v17236_v43 }
 0x912   : > { %v6557_v16 = vmul.f32 %v11236_v13, %v15363_v14  ;;  %11245 = vrcp.f32 %v6390_v49  ;;  %v6958_v13 = vld [vmem:[%s16038_s9 + $0x10] sm:$0xff]  ;;  %v17240_v14 = vld [vmem:[#allocation21_spill] sm:$0xff] }
 0x913   : > { %v11238_v47 = vpop.eup %11237  ;;  %11247 = vpow2.f32 %v8540_v56  ;;  %v8542_v37 = vmul.f32 -1.442695, %v6117_v1  ;;  %v15572_v5 = vpop.f32.mrb[52].mxu1  ;;  %v6959_v1 = vld [vmem:[%s16038_s9 + $0x18] sm:$0xff]  ;;  %v17238_v56 = vld [vmem:[#allocation20_spill] sm:$0xff] }
 0x914   : > { %9342 = vmatprep.mubr.f32.mxu0 %v6557_v16  ;;  %v11240_v41 = vpop.eup %11239  ;;  %v6558_v20 = vmul.f32 %v11238_v47, %v15360_v55  ;;  %v6122_v34 = vpop.f32.mrb[53].mxu1  ;;  %v17242_v55 = vld [vmem:[#allocation105_spill] sm:$0xff] }
 0x915   : > { %v6392_v36 = vadd.f32 1.0, %v11240_v41  ;;  %11249 = vpow2.f32 %v8542_v37  ;;  %v6123_v4 = vadd.f32 %v6122_v34, %v17237_v52  ;;  %v9967_v41 = vpack.c.bf16 %v6959_v1, %v6958_v13  ;;  %v17239_v34 = vld [vmem:[#allocation102_spill] sm:$0xff] }
 0x916   : > { %9343 = vmatmul.mubr.f32.gmra.mrb[210].mxu0 %v6558_v20 }
 0x917   : > { %11251 = vrcp.f32 %v6392_v36  ;;  %9379 = vmatprep.mubr.msk.f32.mxu0 %vm2097_vm6, %v17238_v56  ;;  %v8544_v24 = vmul.f32 -1.442695, %v6123_v4  ;;  %v15584_v43 = vpop.f32.mrb[54].mxu1  ;;  %v6960_v36 = vld [vmem:[%s16038_s9 + $0x20] sm:$0xff]  ;;  %v6961_v4 = vld [vmem:[%s16038_s9 + $0x28] sm:$0xff]  ;;  %v17241_v56 = vld [vmem:[#allocation24_spill] sm:$0xff] }
 0x918   : > { %v11242_v49 = vpop.eup %11241  ;;  %v6128_v47 = vpop.f32.mrb[55].mxu1 }
 0x919   : > { %v11244_v16 = vpop.eup %11243  ;;  %v6559_v37 = vmul.f32 %v11242_v49, %v15381_v2  ;;  %v6129_v52 = vadd.f32 %v6128_v47, %v17239_v34  ;;  %11253 = vpow2.f32 %v8544_v24  ;;  %v9971_v34 = vpack.c.bf16 %v6961_v4, %v6960_v36  ;;  %v17245_v4 = vld [vmem:[#allocation107_spill] sm:$0xff] }
 0x91a   : > { %v6394_v20 = vadd.f32 1.0, %v11244_v16  ;;  %9380 = vmatmul.mubr.msk.f32.vlgmr.msra.gmra.mrb[212].mxu0 %vm2097_vm6, %v17240_v14 }
 0x91b   : > { %9345 = vmatprep.mubr.f32.mxu1 %v6559_v37  ;;  %9382 = vmatprep.mubr.msk.f32.mxu0 %vm2097_vm6, %v17241_v56  ;;  %v8546_v1 = vmul.f32 -1.442695, %v6129_v52  ;;  %v15598_v49 = vpop.f32.mrb[56].mxu1  ;;  %v17243_v37 = vld [vmem:[#allocation25_spill] sm:$0xff] }
 0x91c   : > { %v11246_v13 = vpop.eup %11245  ;;  %11255 = vrcp.f32 %v6394_v20  ;;  %9966 = vmatpush3.bf16.msra.mxu0 %v15513_v44  ;;  %v6134_v47 = vpop.f32.mrb[57].mxu1  ;;  %v17244_v20 = vld [vmem:[#allocation26_spill] sm:$0xff] }
 0x91d   : > { %v11248_v14 = vpop.eup %11247  ;;  %v6560_v16 = vmul.f32 %v11246_v13, %v15378_v54  ;;  %9968 = vmatprep.subr.bf16.mxu0 %v9967_v41  ;;  %v6135_v24 = vadd.f32 %v6134_v47, %v17242_v55  ;;  %11257 = vpow2.f32 %v8546_v1  ;;  %v17246_v47 = vld [vmem:[#allocation27_spill] sm:$0xff]  ;;  %v6962_v1 = vld [vmem:[%s16038_s9 + $0x30] sm:$0xff] }
 0x91e   : > { %v6396_v2 = vadd.f32 1.0, %v11248_v14  ;;  %9383 = vmatmul.mubr.msk.f32.gmra.mrb[214].mxu0 %vm2097_vm6, %v17243_v37 }
 0x91f   : > { %9346 = vmatmul.mubr.f32.vlgmr.msra.gmra.mrb[64].mxu1 %v6560_v16  ;;  %9385 = vmatprep.mubr.msk.f32.mxu0 %vm2097_vm6, %v17244_v20  ;;  %v11250_v52 = vpop.eup %11249  ;;  %v8548_v44 = vmul.f32 -1.442695, %v6135_v24  ;;  %v15607_v56 = vpop.f32.mrb[58].mxu1 }
 0x920   : > { %11259 = vrcp.f32 %v6396_v2  ;;  %9970 = vmatpush3.bf16.msra.mxu0 %v9967_v41  ;;  %v6398_v54 = vadd.f32 1.0, %v11250_v52  ;;  %v6140_v36 = vpop.f32.mrb[59].mxu1  ;;  %v6963_v2 = vld [vmem:[%s16038_s9 + $0x38] sm:$0xff]  ;;  %v17247_v41 = vld [vmem:[#allocation28_spill] sm:$0xff] }
 0x921   : > { %v11252_v13 = vpop.eup %11251  ;;  %9972 = vmatprep.subr.bf16.mxu0 %v9971_v34  ;;  %v6141_v55 = vadd.f32 %v6140_v36, %v17245_v4  ;;  %v9975_v16 = vpack.c.bf16 %v6963_v2, %v6962_v1  ;;  %v17248_v4 = vld [vmem:[#allocation109_spill] sm:$0xff]  ;;  %v6966_v1 = vld [vmem:[%s16038_s9 + $0x50] sm:$0xff] }
 0x922   : > { %v6561_v14 = vmul.f32 %v11252_v13, %v15390_v35  ;;  %9386 = vmatmul.mubr.msk.f32.gmra.mrb[216].mxu0 %vm2097_vm6, %v17246_v47  ;;  %11261 = vrcp.f32 %v6398_v54  ;;  %v17249_v35 = vld [vmem:[#allocation29_spill] sm:$0xff]  ;;  %v6964_v54 = vld [vmem:[%s16038_s9 + $0x40] sm:$0xff] }
 0x923   : > { %9388 = vmatprep.mubr.msk.f32.mxu0 %vm2097_vm6, %v17247_v41  ;;  %11263 = vpow2.f32 %v8548_v44  ;;  %v8550_v24 = vmul.f32 -1.442695, %v6141_v55  ;;  %v15621_v37 = vpop.f32.mrb[60].mxu1  ;;  %v11254_v20 = vpop.eup %11253  ;;  %v6965_v44 = vld [vmem:[%s16038_s9 + $0x48] sm:$0xff]  ;;  %v17250_v55 = vld [vmem:[#allocation30_spill] sm:$0xff] }
 0x924   : > { %9348 = vmatprep.mubr.f32.mxu1 %v6561_v14  ;;  %9974 = vmatpush3.bf16.msra.mxu0 %v9971_v34  ;;  %v6146_v52 = vpop.f32.mrb[61].mxu1  ;;  %v6400_v36 = vadd.f32 1.0, %v11254_v20  ;;  %v9979_v14 = vpack.c.bf16 %v6965_v44, %v6964_v54  ;;  %v17251_v44 = vld [vmem:[#allocation31_spill] sm:$0xff] }
 0x925   : > { %9976 = vmatprep.subr.bf16.mxu0 %v9975_v16  ;;  %11265 = vpow2.f32 %v8550_v24  ;;  %v6147_v47 = vadd.f32 %v6146_v52, %v17248_v4 }
 0x926   : > { %v11256_v13 = vpop.eup %11255  ;;  %9389 = vmatmul.mubr.msk.f32.gmra.mrb[218].mxu0 %vm2097_vm6, %v17249_v35  ;;  %v6967_v35 = vld [vmem:[%s16038_s9 + $0x58] sm:$0xff]  ;;  %11267 = vrcp.f32 %v6400_v36  ;;  %v6968_v36 = vld [vmem:[%s16038_s9 + $0x60] sm:$0xff] }
 0x927   : > { %v6562_v34 = vmul.f32 %v11256_v13, %v15387_v62  ;;  %9391 = vmatprep.mubr.msk.f32.mxu0 %vm2097_vm6, %v17250_v55  ;;  %v8552_v2 = vmul.f32 -1.442695, %v6147_v47  ;;  %v15641_v41 = vpop.f32.mrb[62].mxu1  ;;  %v11258_v24 = vpop.eup %11257  ;;  %v9983_v52 = vpack.c.bf16 %v6967_v35, %v6966_v1 }
 0x928   : > { %9978 = vmatpush3.bf16.msra.mxu0 %v9975_v16  ;;  %v6152_v20 = vpop.f32.mrb[63].mxu1  ;;  %v6402_v4 = vadd.f32 1.0, %v11258_v24  ;;  %v6969_v16 = vld [vmem:[%s16038_s9 + $0x68] sm:$0xff]  ;;  %v17253_v24 = vld [vmem:[#allocation33_spill] sm:$0xff] }
 0x929   : > { %9349 = vmatmul.mubr.f32.gmra.mrb[66].mxu1 %v6562_v34  ;;  %9980 = vmatprep.subr.bf16.mxu0 %v9979_v14  ;;  %11269 = vpow2.f32 %v8552_v2  ;;  %v6153_v54 = vadd.f32 %v6152_v20, %v17100_v51  ;;  %v17252_v34 = vld [vmem:[#allocation32_spill] sm:$0xff]  ;;  %v9987_v1 = vpack.c.bf16 %v6969_v16, %v6968_v36  ;;  %v6971_v16 = vld [vmem:[%s16038_s9 + $0x78] sm:$0xff] }
 0x92a   : > { %v11260_v13 = vpop.eup %11259  ;;  %9392 = vmatmul.mubr.msk.f32.gmra.mrb[220].mxu0 %vm2097_vm6, %v17251_v44  ;;  %11271 = vrcp.f32 %v6402_v4  ;;  %v17254_v44 = vld [vmem:[#allocation34_spill] sm:$0xff]  ;;  %v6970_v36 = vld [vmem:[%s16038_s9 + $0x70] sm:$0xff] }
 0x92b   : > { %v6563_v47 = vmul.f32 %v11260_v13, %v15404_v42  ;;  %9394 = vmatprep.mubr.msk.f32.mxu0 %vm2097_vm6, %v17252_v34  ;;  %v8554_v55 = vmul.f32 -1.442695, %v6153_v54  ;;  %v17255_v54 = vld [vmem:[#allocation3_spill] sm:$0xff]  ;;  %v17256_v34 = vld [vmem:[#allocation2_spill] sm:$0xff] }
 0x92c   : > { %9982 = vmatpush3.bf16.msra.mxu0 %v9979_v14  ;;  %v11262_v51 = vpop.eup %11261 }
 0x92d   : > { %9351 = vmatprep.mubr.f32.mxu1 %v6563_v47  ;;  %9984 = vmatprep.subr.bf16.mxu0 %v9983_v52  ;;  %v11264_v35 = vpop.eup %11263  ;;  %11273 = vpow2.f32 %v8554_v55  ;;  %v6564_v2 = vmul.f32 %v11262_v51, %v15400_v27 }
 0x92e   : > { %9395 = vmatmul.mubr.msk.f32.gmra.mrb[222].mxu0 %vm2097_vm6, %v17253_v24  ;;  %v6404_v20 = vadd.f32 1.0, %v11264_v35 }
 0x92f   : > { %9397 = vmatprep.mubr.msk.f32.mxu0 %vm2097_vm6, %v17254_v44  ;;  %v11266_v13 = vpop.eup %11265  ;;  %9352 = vmatmul.mubr.f32.gmra.mrb[68].mxu1 %v6564_v2  ;;  %v17257_v2 = vld [vmem:[#allocation5_spill] sm:$0xff] }
 0x930   : > { %9986 = vmatpush3.bf16.msra.mxu0 %v9983_v52  ;;  %11275 = vrcp.f32 %v6404_v20  ;;  %v6406_v14 = vadd.f32 1.0, %v11266_v13  ;;  %v11268_v4 = vpop.eup %11267  ;;  %v9991_v52 = vpack.c.bf16 %v6971_v16, %v6970_v36  ;;  %v17258_v20 = vld [vmem:[#allocation4_spill] sm:$0xff] }
 0x931   : > { %9988 = vmatprep.subr.bf16.mxu0 %v9987_v1  ;;  %v6565_v47 = vmul.f32 %v11268_v4, %v15416_v29  ;;  %v17260_v4 = vld [vmem:[#allocation9_spill] sm:$0xff] }
 0x932   : > { %9398 = vmatmul.mubr.msk.f32.gmra.mrb[224].mxu0 %vm2097_vm6, %v17255_v54  ;;  %11277 = vrcp.f32 %v6406_v14  ;;  %v17259_v14 = vld [vmem:[#allocation7_spill] sm:$0xff] }
 0x933   : > { %9400 = vmatprep.mubr.msk.f32.mxu0 %vm2097_vm6, %v17256_v34  ;;  %v11270_v55 = vpop.eup %11269  ;;  %9354 = vmatprep.mubr.f32.mxu1 %v6565_v47  ;;  %v17261_v47 = vld [vmem:[#allocation8_spill] sm:$0xff]  ;;  %v17262_v34 = vld [vmem:[#allocation23_spill] sm:$0xff] }
 0x934   : > { %9990 = vmatpush3.bf16.msra.mxu0 %v9987_v1  ;;  %v6408_v51 = vadd.f32 1.0, %v11270_v55  ;;  %v11272_v35 = vpop.eup %11271 }
 0x935   : > { %9992 = vmatprep.subr.bf16.mxu0 %v9991_v52  ;;  %v6566_v24 = vmul.f32 %v11272_v35, %v15413_v26  ;;  %v17264_v35 = vld [vmem:[#allocation11_spill] sm:$0xff] }
 0x936   : > { %9401 = vmatmul.mubr.msk.f32.gmra.mrb[226].mxu0 %vm2097_vm6, %v17257_v2  ;;  %11279 = vrcp.f32 %v6408_v51  ;;  %v17263_v51 = vld [vmem:[#allocation22_spill] sm:$0xff] }
 0x937   : > { %9403 = vmatprep.mubr.msk.f32.mxu0 %vm2097_vm6, %v17258_v20  ;;  %v11274_v44 = vpop.eup %11273  ;;  %9355 = vmatmul.mubr.f32.gmra.mrb[70].mxu1 %v6566_v24  ;;  %v17265_v20 = vld [vmem:[#allocation10_spill] sm:$0xff] }
 0x938   : > { %9994 = vmatpush3.bf16.msra.mxu0 %v9991_v52  ;;  %v6410_v13 = vadd.f32 1.0, %v11274_v44  ;;  %v17266_v44 = vld [vmem:[#allocation13_spill] sm:$0xff] }
 0x93a   : > { %9404 = vmatmul.mubr.msk.f32.gmra.mrb[228].mxu0 %vm2097_vm6, %v17259_v14  ;;  %v11276_v1 = vpop.eup %11275  ;;  %11281 = vrcp.f32 %v6410_v13  ;;  %v17267_v13 = vld [vmem:[#allocation12_spill] sm:$0xff]  ;;  %v17268_v14 = vld [vmem:[#allocation15_spill] sm:$0xff] }
 0x93b   : > { %9406 = vmatprep.mubr.msk.f32.mxu0 %vm2097_vm6, %v17260_v4  ;;  %v6567_v54 = vmul.f32 %v11276_v1, %v15426_v39  ;;  %v17269_v1 = vld [vmem:[#allocation14_spill] sm:$0xff]  ;;  %v17270_v4 = vld [vmem:[#allocation17_spill] sm:$0xff] }
 0x93c   : > { %v11278_v36 = vpop.eup %11277 }
 0x93d   : > { %9357 = vmatprep.mubr.f32.mxu1 %v6567_v54  ;;  %v6568_v16 = vmul.f32 %v11278_v36, %v15423_v21  ;;  %v17271_v54 = vld [vmem:[#allocation16_spill] sm:$0xff]  ;;  %v17272_v36 = vld [vmem:[#allocation18_spill] sm:$0xff] }
 0x93e   : > { %9407 = vmatmul.mubr.msk.f32.gmra.mrb[230].mxu0 %vm2097_vm6, %v17261_v47  ;;  %v5971_v47 = vadd.f32 %v15451_v46, %v17101_v30  ;;  %v17276_v46 = vld [vmem:[#allocation151_spill] sm:$0xff] }
 0x93f   : > { %9409 = vmatprep.mubr.msk.f32.mxu0 %vm2097_vm6, %v17262_v34  ;;  %9358 = vmatmul.mubr.f32.gmra.mrb[72].mxu1 %v6568_v16  ;;  %v17273_v16 = vld [vmem:[#allocation35_spill] sm:$0xff]  ;;  %v5965_v34 = vadd.f32 %v15448_v3, %v17102_v0  ;;  %v5989_v0 = vadd.f32 %v15460_v10, %v17276_v46  ;;  %v17279_v10 = vld [vmem:[#allocation113_spill] sm:$0xff] }
 0x940   : > { %v11280_v52 = vpop.eup %11279 }
 0x941   : > { %v6569_v55 = vmul.f32 %v11280_v52, %v15437_v6  ;;  %v8493_v52 = vmul.f32 -1.442695, %v5971_v47 }
 0x942   : > { %9410 = vmatmul.mubr.msk.f32.gmra.mrb[232].mxu0 %vm2097_vm6, %v17263_v51  ;;  %v17274_v51 = vld [vmem:[#allocation149_spill] sm:$0xff] }
 0x943   : > { %9412 = vmatprep.mubr.msk.f32.mxu0 %vm2097_vm6, %v17264_v35  ;;  %9360 = vmatprep.mubr.f32.mxu1 %v6569_v55  ;;  %v8491_v55 = vmul.f32 -1.442695, %v5965_v34  ;;  %11283 = vpow2.f32 %v8493_v52  ;;  %v5983_v35 = vadd.f32 %v15457_v28, %v17274_v51  ;;  %v17278_v52 = vld [vmem:[#allocation41_spill] sm:$0xff] }
 0x944   : > { %v11282_v2 = vpop.eup %11281 }
 0x945   : > { %v6570_v24 = vmul.f32 %v11282_v2, %v15435_v61  ;;  %11285 = vpow2.f32 %v8491_v55  ;;  %v17275_v2 = vld [vmem:[#allocation147_spill] sm:$0xff]  ;;  %v6007_v55 = vadd.f32 %v15476_v17, %v17278_v52 }
 0x946   : > { %9413 = vmatmul.mubr.msk.f32.gmra.mrb[234].mxu0 %vm2097_vm6, %v17265_v20  ;;  %v8497_v20 = vmul.f32 -1.442695, %v5983_v35 }
 0x947   : > { %9415 = vmatprep.mubr.msk.f32.mxu0 %vm2097_vm6, %v17266_v44  ;;  %9361 = vmatmul.mubr.f32.gmra.mrb[74].mxu1 %v6570_v24  ;;  %v5977_v24 = vadd.f32 %v15454_v63, %v17275_v2 }
 0x948   : > { %11287 = vpow2.f32 %v8497_v20 }
 0x949   : > { %v8495_v44 = vmul.f32 -1.442695, %v5977_v24  ;;  %v8505_v24 = vmul.f32 -1.442695, %v6007_v55  ;;  %v17284_v55 = vld [vmem:[#allocation180_spill] sm:$0xff] }
 0x94a   : > { %9416 = vmatmul.mubr.msk.f32.gmra.mrb[236].mxu0 %vm2097_vm6, %v17267_v13 }
 0x94b   : > { %9418 = vmatprep.mubr.msk.f32.mxu0 %vm2097_vm6, %v17268_v14  ;;  %11289 = vpow2.f32 %v8495_v44 }
 0x94d   : > { %v11284_v13 = vpop.eup %11283 }
 0x94e   : > { %9419 = vmatmul.mubr.msk.f32.gmra.mrb[238].mxu0 %vm2097_vm6, %v17269_v1  ;;  %v6349_v30 = vadd.f32 1.0, %v11284_v13  ;;  %v5995_v1 = vadd.f32 %v15463_v23, %v17106_v45  ;;  %v17280_v23 = vld [vmem:[#allocation37_spill] sm:$0xff] }
 0x94f   : > { %9421 = vmatprep.mubr.msk.f32.mxu0 %vm2097_vm6, %v17270_v4  ;;  %v11286_v14 = vpop.eup %11285  ;;  %v8499_v4 = vmul.f32 -1.442695, %v5989_v0  ;;  %v6001_v2 = vadd.f32 %v15466_v19, %v17280_v23  ;;  %v17283_v19 = vld [vmem:[#allocation45_spill] sm:$0xff] }
 0x950   : > { %v6347_v3 = vadd.f32 1.0, %v11286_v14  ;;  %11291 = vrcp.f32 %v6349_v30  ;;  %v8501_v28 = vmul.f32 -1.442695, %v5995_v1 }
 0x951   : > { %v8503_v13 = vmul.f32 -1.442695, %v6001_v2 }
 0x952   : > { %9422 = vmatmul.mubr.msk.f32.gmra.mrb[240].mxu0 %vm2097_vm6, %v17271_v54  ;;  %11293 = vrcp.f32 %v6347_v3  ;;  %v11288_v54 = vpop.eup %11287  ;;  %v17281_v3 = vld [vmem:[#allocation50_spill] sm:$0xff] }
 0x953   : > { %9424 = vmatprep.mubr.msk.f32.mxu0 %vm2097_vm6, %v17272_v36  ;;  %11295 = vpow2.f32 %v8499_v4  ;;  %v17277_v36 = vld [vmem:[#allocation112_spill] sm:$0xff]  ;;  %v6353_v35 = vadd.f32 1.0, %v11288_v54  ;;  %v6019_v1 = vadd.f32 %v15496_v33, %v17281_v3  ;;  %v17282_v4 = vld [vmem:[#allocation114_spill] sm:$0xff] }
 0x954   : > { %11297 = vpow2.f32 %v8501_v28 }
 0x955   : > { %v11290_v34 = vpop.eup %11289  ;;  %v8509_v23 = vmul.f32 -1.442695, %v6019_v1 }
 0x956   : > { %9425 = vmatmul.mubr.msk.f32.gmra.mrb[242].mxu0 %vm2097_vm6, %v17273_v16  ;;  %v6351_v45 = vadd.f32 1.0, %v11290_v34  ;;  %vm7633_vm6 = vcmask 261120  }
 0x95a   : > { %v11292_v20 = vpop.eup %11291 }
 0x95b   : > { %v6829_v14 = vsub.f32 1.0, %v11292_v20 }
 0x95c   : > { %v11294_v44 = vpop.eup %11293 }
 0x95d   : > { %v11296_v30 = vpop.eup %11295  ;;  %v6828_v17 = vsub.f32 1.0, %v11294_v44 }
 0x95e   : > { %v11298_v0 = vpop.eup %11297  ;;  %v6355_v34 = vadd.f32 1.0, %v11296_v30 }
 0x99b   : > { %v9317_v63 = vpop.f32.mrb[192].mxu0 }
 0x99c   : > { %v6643_v16 = vadd.f32 %v9317_v63, %v17277_v36  ;;  %v6637_v47 = vpop.f32.mrb[193].mxu0  ;;  %v6013_v36 = vadd.f32 %v15486_v38, %v17283_v19 }
 0x99d   : > { %v6638_v51 = vadd.f32 %v6637_v47, %v17279_v10  ;;  %v6861_v10 = vmul.f32 %v6829_v14, %v17284_v55 }
 0x99e   : > { %11299 = vtanh.f32 %v6643_v16 }
 0x99f   : > { %11301 = vtanh.f32 %v6638_v51  ;;  %v6357_v51 = vadd.f32 1.0, %v11298_v0  ;;  %v17287_v0 = vld [vmem:[#allocation55_spill] sm:$0xff] }
 0x9a0   : > { %11303 = vrcp.f32 %v6353_v35  ;;  %v17285_v35 = vld [vmem:[#allocation181_spill] sm:$0xff] }
 0x9a1   : > { %11305 = vrcp.f32 %v6351_v45  ;;  %v6860_v33 = vmul.f32 %v6828_v17, %v17285_v35 }
 0x9a2   : > { %11307 = vpow2.f32 %v8505_v24 }
 0x9a3   : > { %11309 = vpow2.f32 %v8503_v13  ;;  %v8507_v13 = vmul.f32 -1.442695, %v6013_v36 }
 0x9a5   : > { %v9320_v46 = vpop.f32.mrb[194].mxu0 }
 0x9a6   : > { %v6653_v28 = vadd.f32 %v9320_v46, %v17282_v4  ;;  %v6647_v54 = vpop.f32.mrb[195].mxu0 }
 0x9a7   : > { %v6648_v16 = vadd.f32 %v6647_v54, %v16957_v60 }
 0x9a8   : > { %v11300_v63 = vpop.eup %11299  ;;  %11311 = vtanh.f32 %v6653_v28  ;;  %v17288_v28 = vld [vmem:[#allocation157_spill] sm:$0xff] }
 0x9a9   : > { %v11302_v47 = vpop.eup %11301  ;;  %v6893_v52 = vmul.f32 %v11300_v63, %v11292_v20  ;;  %11313 = vtanh.f32 %v6648_v16  ;;  %v17286_v20 = vld [vmem:[#allocation155_spill] sm:$0xff]  ;;  %v6037_v54 = vadd.f32 %v15515_v50, %v17288_v28  ;;  %v17289_v63 = vld [vmem:[#allocation116_spill] sm:$0xff] }
 0x9aa   : > { %v6892_v45 = vmul.f32 %v11302_v47, %v11294_v44  ;;  %v11304_v24 = vpop.eup %11303  ;;  %11315 = vrcp.f32 %v6355_v34  ;;  %v6031_v30 = vadd.f32 %v15503_v40, %v17286_v20  ;;  %v6025_v44 = vadd.f32 %v15500_v11, %v17287_v0  ;;  %v17290_v34 = vld [vmem:[#allocation154_spill] sm:$0xff] }
 0x9ab   : > { %v6925_v2 = vadd.f32 %v6893_v52, %v6861_v10  ;;  %v11306_v38 = vpop.eup %11305  ;;  %11317 = vrcp.f32 %v6357_v51  ;;  %v6831_v14 = vsub.f32 1.0, %v11304_v24  ;;  %v17291_v51 = vld [vmem:[#allocation159_spill] sm:$0xff] }
 0x9ac   : > { %v6924_v46 = vadd.f32 %v6892_v45, %v6860_v33  ;;  %v11308_v60 = vpop.eup %11307  ;;  %11319 = vpow2.f32 %v8509_v23  ;;  %v6830_v3 = vsub.f32 1.0, %v11306_v38  ;;  %v8513_v47 = vmul.f32 -1.442695, %v6031_v30  ;;  %v17292_v45 = vld [vmem:[#allocation182_spill] sm:$0xff] }
 0x9ad   : > { %11321 = vpow2.f32 %v8507_v13  ;;  %v11310_v1 = vpop.eup %11309  ;;  %v6361_v4 = vadd.f32 1.0, %v11308_v60  ;;  %v6863_v52 = vmul.f32 %v6831_v14, %v15222_v15  ;;  %v8511_v10 = vmul.f32 -1.442695, %v6025_v44 }
 0x9ae   : > { %9459 = vmatprep.mubr.f32.mxu0 %v6924_v46  ;;  %v6043_v11 = vadd.f32 %v15520_v25, %v17291_v51  ;;  %v6359_v33 = vadd.f32 1.0, %v11310_v1  ;;  %v6862_v50 = vmul.f32 %v6830_v3, %v17292_v45 }
 0x9af   : > { %9460 = vmatmul.mubr.f32.vlgmr.msra.gmra.mrb[212].mxu0 %v6925_v2  ;;  %v9323_v17 = vpop.f32.mrb[196].mxu0  ;;  %v8515_v2 = vmul.f32 -1.442695, %v6037_v54  ;;  %v17295_v54 = vld [vmem:[#allocation163_spill] sm:$0xff] }
 0x9b0   : > { %v6663_v19 = vadd.f32 %v9323_v17, %v17289_v63  ;;  %v6657_v36 = vpop.f32.mrb[197].mxu0  ;;  %v8517_v15 = vmul.f32 -1.442695, %v6043_v11  ;;  %v17294_v17 = vld [vmem:[#allocation117_spill] sm:$0xff]  ;;  %v6055_v63 = vadd.f32 %v15528_v9, %v17295_v54 }
 0x9b1   : > { %v6658_v40 = vadd.f32 %v6657_v36, %v17290_v34 }
 0x9b2   : > { %v11312_v16 = vpop.eup %11311  ;;  %11323 = vtanh.f32 %v6663_v19  ;;  %v17296_v19 = vld [vmem:[#allocation118_spill] sm:$0xff] }
 0x9b3   : > { %v11314_v55 = vpop.eup %11313  ;;  %v6895_v35 = vmul.f32 %v11312_v16, %v11304_v24  ;;  %11325 = vtanh.f32 %v6658_v40  ;;  %v17293_v24 = vld [vmem:[#allocation161_spill] sm:$0xff] }
 0x9b4   : > { %v6894_v23 = vmul.f32 %v11314_v55, %v11306_v38  ;;  %11327 = vrcp.f32 %v6361_v4  ;;  %v11316_v46 = vpop.eup %11315  ;;  %v6049_v14 = vadd.f32 %v15524_v48, %v17293_v24  ;;  %v17297_v48 = vld [vmem:[#allocation183_spill] sm:$0xff] }
 0x9b5   : > { %v6927_v13 = vadd.f32 %v6895_v35, %v6863_v52  ;;  %11329 = vpow2.f32 %v8513_v47  ;;  %v11318_v20 = vpop.eup %11317  ;;  %v6832_v4 = vsub.f32 1.0, %v11316_v46 }
 0x9b6   : > { %v6926_v60 = vadd.f32 %v6894_v23, %v6862_v50  ;;  %11331 = vpow2.f32 %v8511_v10  ;;  %v11320_v30 = vpop.eup %11319  ;;  %v6833_v38 = vsub.f32 1.0, %v11318_v20  ;;  %v8519_v47 = vmul.f32 -1.442695, %v6049_v14  ;;  %v17298_v10 = vld [vmem:[#allocation86_spill] sm:$0xff]  ;;  %v17300_v14 = vld [vmem:[#allocation121_spill] sm:$0xff] }
 0x9b7   : > { %11333 = vrcp.f32 %v6359_v33  ;;  %v11322_v25 = vpop.eup %11321  ;;  %v6365_v44 = vadd.f32 1.0, %v11320_v30  ;;  %v6864_v51 = vmul.f32 %v6832_v4, %v17298_v10  ;;  %v8521_v33 = vmul.f32 -1.442695, %v6055_v63  ;;  %v17302_v4 = vld [vmem:[#allocation166_spill] sm:$0xff] }
 0x9b8   : > { %9462 = vmatprep.mubr.f32.mxu0 %v6926_v60  ;;  %11335 = vpow2.f32 %v8515_v2  ;;  %v6363_v28 = vadd.f32 1.0, %v11322_v25  ;;  %v6865_v40 = vmul.f32 %v6833_v38, %v17297_v48 }
 0x9b9   : > { %9463 = vmatmul.mubr.f32.gmra.mrb[214].mxu0 %v6927_v13  ;;  %v9326_v0 = vpop.f32.mrb[198].mxu0  ;;  %11337 = vpow2.f32 %v8517_v15  ;;  %v17299_v15 = vld [vmem:[#allocation120_spill] sm:$0xff] }
 0x9ba   : > { %v6673_v3 = vadd.f32 %v9326_v0, %v17294_v17  ;;  %v6667_v1 = vpop.f32.mrb[199].mxu0 }
 0x9bb   : > { %v6668_v36 = vadd.f32 %v6667_v1, %v17296_v19  ;;  %v17303_v19 = vld [vmem:[#allocation72_spill] sm:$0xff] }
 0x9bc   : > { %v11324_v16 = vpop.eup %11323  ;;  %11339 = vtanh.f32 %v6673_v3  ;;  %v17301_v3 = vld [vmem:[#allocation6_spill] sm:$0xff] }
 0x9bd   : > { %v11326_v34 = vpop.eup %11325  ;;  %11341 = vtanh.f32 %v6668_v36  ;;  %v6897_v52 = vmul.f32 %v11324_v16, %v11318_v20  ;;  %v6067_v1 = vadd.f32 %v15536_v57, %v17301_v3  ;;  %v6061_v36 = vadd.f32 %v15532_v12, %v17303_v19  ;;  %v17305_v57 = vld [vmem:[#allocation81_spill] sm:$0xff] }
 0x9be   : > { %v11328_v55 = vpop.eup %11327  ;;  %11343 = vrcp.f32 %v6365_v44  ;;  %v6896_v11 = vmul.f32 %v11326_v34, %v11316_v46  ;;  %v17304_v34 = vld [vmem:[#allocation167_spill] sm:$0xff]  ;;  %v17310_v3 = vld [vmem:[#allocation173_spill] sm:$0xff] }
 0x9bf   : > { %v11330_v35 = vpop.eup %11329  ;;  %11345 = vrcp.f32 %v6363_v28  ;;  %v6929_v45 = vadd.f32 %v6897_v52, %v6865_v40  ;;  %v6835_v20 = vsub.f32 1.0, %v11328_v55  ;;  %v8523_v12 = vmul.f32 -1.442695, %v6061_v36 }
 0x9c0   : > { %v11332_v9 = vpop.eup %11331  ;;  %11347 = vpow2.f32 %v8519_v47  ;;  %v6928_v50 = vadd.f32 %v6896_v11, %v6864_v51  ;;  %v6369_v60 = vadd.f32 1.0, %v11330_v35  ;;  %v8525_v35 = vmul.f32 -1.442695, %v6067_v1 }
 0x9c1   : > { %v11334_v23 = vpop.eup %11333  ;;  %v6367_v24 = vadd.f32 1.0, %v11332_v9  ;;  %11349 = vpow2.f32 %v8521_v33  ;;  %v6867_v28 = vmul.f32 %v6835_v20, %v17302_v4  ;;  %v6079_v33 = vadd.f32 %v15544_v22, %v17305_v57  ;;  %v17308_v20 = vld [vmem:[#allocation59_spill] sm:$0xff] }
 0x9c2   : > { %v11336_v13 = vpop.eup %11335  ;;  %9465 = vmatprep.mubr.f32.mxu0 %v6928_v50  ;;  %v6834_v38 = vsub.f32 1.0, %v11334_v23  ;;  %v6073_v22 = vadd.f32 %v15540_v7, %v17308_v20  ;;  %v17312_v7 = vld [vmem:[#allocation125_spill] sm:$0xff]  ;;  %v17317_v20 = vld [vmem:[#allocation19_spill] sm:$0xff] }
 0x9c3   : > { %v9329_v2 = vpop.f32.mrb[200].mxu0  ;;  %9466 = vmatmul.mubr.f32.gmra.mrb[216].mxu0 %v6929_v45  ;;  %v11338_v0 = vpop.eup %11337  ;;  %v6371_v44 = vadd.f32 1.0, %v11336_v13  ;;  %v17306_v45 = vld [vmem:[#allocation122_spill] sm:$0xff] }
 0x9c4   : > { %v6683_v30 = vadd.f32 %v9329_v2, %v17299_v15  ;;  %v6677_v25 = vpop.f32.mrb[201].mxu0  ;;  %v6373_v63 = vadd.f32 1.0, %v11338_v0  ;;  %v6866_v48 = vmul.f32 %v6834_v38, %v17304_v34  ;;  %v8527_v34 = vmul.f32 -1.442695, %v6073_v22 }
 0x9c5   : > { %v6678_v46 = vadd.f32 %v6677_v25, %v17300_v14 }
 0x9c6   : > { %11351 = vtanh.f32 %v6683_v30  ;;  %v11340_v17 = vpop.eup %11339 }
 0x9c7   : > { %11353 = vtanh.f32 %v6678_v46  ;;  %v11342_v54 = vpop.eup %11341  ;;  %v6899_v16 = vmul.f32 %v11340_v17, %v11328_v55  ;;  %v17307_v55 = vld [vmem:[#allocation123_spill] sm:$0xff]  ;;  %v17309_v46 = vld [vmem:[#allocation184_spill] sm:$0xff] }
 0x9c8   : > { %11355 = vrcp.f32 %v6369_v60  ;;  %v11344_v47 = vpop.eup %11343  ;;  %v6898_v40 = vmul.f32 %v11342_v54, %v11334_v23 }
 0x9c9   : > { %11357 = vrcp.f32 %v6367_v24  ;;  %v11346_v52 = vpop.eup %11345  ;;  %v9332_v10 = vpop.f32.mrb[202].mxu0  ;;  %v6931_v51 = vadd.f32 %v6899_v16, %v6867_v28  ;;  %v6837_v60 = vsub.f32 1.0, %v11344_v47  ;;  %v8529_v24 = vmul.f32 -1.442695, %v6079_v33  ;;  %v17314_v33 = vld [vmem:[#allocation92_spill] sm:$0xff] }
 0x9ca   : > { %11359 = vrcp.f32 %v6371_v44  ;;  %v11348_v11 = vpop.eup %11347  ;;  %v6693_v9 = vadd.f32 %v9332_v10, %v17306_v45  ;;  %v6687_v50 = vpop.f32.mrb[203].mxu0  ;;  %v6930_v2 = vadd.f32 %v6898_v40, %v6866_v48  ;;  %v6836_v23 = vsub.f32 1.0, %v11346_v52 }
 0x9cb   : > { %11361 = vrcp.f32 %v6373_v63  ;;  %v6688_v13 = vadd.f32 %v6687_v50, %v17307_v55  ;;  %v11350_v15 = vpop.eup %11349  ;;  %v6375_v30 = vadd.f32 1.0, %v11348_v11  ;;  %v6869_v0 = vmul.f32 %v6837_v60, %v17309_v46  ;;  %v17311_v63 = vld [vmem:[#allocation124_spill] sm:$0xff]  ;;  %v17315_v50 = vld [vmem:[#allocation185_spill] sm:$0xff]  ;;  %v17316_v60 = vld [vmem:[#allocation171_spill] sm:$0xff] }
 0x9cc   : > { %11363 = vtanh.f32 %v6693_v9  ;;  %9468 = vmatprep.mubr.f32.mxu0 %v6930_v2  ;;  %v6868_v1 = vmul.f32 %v6836_v23, %v17310_v3  ;;  %v6377_v54 = vadd.f32 1.0, %v11350_v15  ;;  %v6091_v45 = vadd.f32 %v15552_v58, %v17314_v33  ;;  %v17318_v46 = vld [vmem:[#allocation126_spill] sm:$0xff] }
 0x9cd   : > { %11365 = vtanh.f32 %v6688_v13  ;;  %9469 = vmatmul.mubr.f32.gmra.mrb[218].mxu0 %v6931_v51 }
 0x9ce   : > { %11367 = vpow2.f32 %v8525_v35 }
 0x9cf   : > { %11369 = vpow2.f32 %v8523_v12 }
 0x9d0   : > { %v11352_v25 = vpop.eup %11351  ;;  %11371 = vrcp.f32 %v6375_v30 }
 0x9d1   : > { %v11354_v14 = vpop.eup %11353  ;;  %v6901_v38 = vmul.f32 %v11352_v25, %v11344_v47  ;;  %v9335_v17 = vpop.f32.mrb[204].mxu0  ;;  %11373 = vpow2.f32 %v8529_v24 }
 0x9d2   : > { %v11356_v44 = vpop.eup %11355  ;;  %v6900_v4 = vmul.f32 %v11354_v14, %v11346_v52  ;;  %v6703_v19 = vadd.f32 %v9335_v17, %v17311_v63  ;;  %v6697_v36 = vpop.f32.mrb[205].mxu0  ;;  %v17313_v52 = vld [vmem:[#allocation89_spill] sm:$0xff]  ;;  %v8533_v14 = vmul.f32 -1.442695, %v6091_v45 }
 0x9d3   : > { %v11358_v28 = vpop.eup %11357  ;;  %v6933_v16 = vadd.f32 %v6901_v38, %v6869_v0  ;;  %v6698_v48 = vadd.f32 %v6697_v36, %v17312_v7  ;;  %v6839_v47 = vsub.f32 1.0, %v11356_v44  ;;  %v6085_v35 = vadd.f32 %v15548_v59, %v17313_v52  ;;  %v17320_v36 = vld [vmem:[#allocation172_spill] sm:$0xff] }
 0x9d4   : > { %v6932_v40 = vadd.f32 %v6900_v4, %v6868_v1  ;;  %v11360_v10 = vpop.eup %11359  ;;  %11375 = vtanh.f32 %v6703_v19  ;;  %v6838_v51 = vsub.f32 1.0, %v11358_v28 }
 0x9d5   : > { %11377 = vtanh.f32 %v6698_v48  ;;  %v11362_v11 = vpop.eup %11361  ;;  %v6871_v2 = vmul.f32 %v6839_v47, %v17315_v50  ;;  %v8531_v25 = vmul.f32 -1.442695, %v6085_v35 }
 0x9d6   : > { %9471 = vmatprep.mubr.f32.mxu0 %v6932_v40  ;;  %11379 = vrcp.f32 %v6377_v54  ;;  %v11364_v57 = vpop.eup %11363  ;;  %v6870_v23 = vmul.f32 %v6838_v51, %v17316_v60  ;;  %v6841_v58 = vsub.f32 1.0, %v11362_v11  ;;  %v17319_v54 = vld [vmem:[#allocation64_spill] sm:$0xff]  ;;  %v17321_v40 = vld [vmem:[#allocation66_spill] sm:$0xff] }
 0x9d7   : > { %9472 = vmatmul.mubr.f32.gmra.mrb[220].mxu0 %v6933_v16  ;;  %11381 = vpow2.f32 %v8527_v34  ;;  %v11366_v9 = vpop.eup %11365  ;;  %v6903_v12 = vmul.f32 %v11364_v57, %v11356_v44  ;;  %v6840_v44 = vsub.f32 1.0, %v11360_v10  ;;  %v17322_v57 = vld [vmem:[#allocation168_spill] sm:$0xff] }
 0x9d8   : > { %v11368_v55 = vpop.eup %11367  ;;  %v6902_v15 = vmul.f32 %v11366_v9, %v11358_v28  ;;  %v6103_v28 = vadd.f32 %v15560_v31, %v17319_v54  ;;  %v6873_v16 = vmul.f32 %v6841_v58, %v17320_v36  ;;  %v6097_v33 = vadd.f32 %v15556_v8, %v17322_v57  ;;  %v17328_v58 = vld [vmem:[#allocation65_spill] sm:$0xff] }
 0x9d9   : > { %v9338_v13 = vpop.f32.mrb[206].mxu0  ;;  %v11370_v30 = vpop.eup %11369  ;;  %v6935_v24 = vadd.f32 %v6903_v12, %v6871_v2  ;;  %v6381_v3 = vadd.f32 1.0, %v11368_v55  ;;  %v6872_v47 = vmul.f32 %v6840_v44, %v17321_v40 }
 0x9da   : > { %v6713_v22 = vadd.f32 %v9338_v13, %v17317_v20  ;;  %v6707_v59 = vpop.f32.mrb[207].mxu0  ;;  %v6934_v38 = vadd.f32 %v6902_v15, %v6870_v23  ;;  %v11372_v17 = vpop.eup %11371  ;;  %v6379_v4 = vadd.f32 1.0, %v11370_v30  ;;  %v8537_v35 = vmul.f32 -1.442695, %v6103_v28  ;;  %v17324_v13 = vld [vmem:[#allocation127_spill] sm:$0xff]  ;;  %v17326_v20 = vld [vmem:[#allocation68_spill] sm:$0xff] }
 0x9db   : > { %v6708_v0 = vadd.f32 %v6707_v59, %v17318_v46  ;;  %v11374_v1 = vpop.eup %11373  ;;  %v6842_v50 = vsub.f32 1.0, %v11372_v17 }
 0x9dc   : > { %11383 = vtanh.f32 %v6713_v22  ;;  %9474 = vmatprep.mubr.f32.mxu0 %v6934_v38  ;;  %v6385_v48 = vadd.f32 1.0, %v11374_v1 }
 0x9dd   : > { %11385 = vtanh.f32 %v6708_v0  ;;  %9475 = vmatmul.mubr.f32.gmra.mrb[222].mxu0 %v6935_v24 }
 0x9de   : > { %v11376_v63 = vpop.eup %11375  ;;  %11387 = vpow2.f32 %v8531_v25  ;;  %v8535_v25 = vmul.f32 -1.442695, %v6097_v33 }
 0x9df   : > { %v11378_v19 = vpop.eup %11377  ;;  %11389 = vpow2.f32 %v8533_v14  ;;  %v6905_v34 = vmul.f32 %v11376_v63, %v11362_v11  ;;  %v17323_v11 = vld [vmem:[#allocation96_spill] sm:$0xff] }
 0x9e0   : > { %v11380_v7 = vpop.eup %11379  ;;  %11391 = vrcp.f32 %v6381_v3  ;;  %v6904_v51 = vmul.f32 %v11378_v19, %v11360_v10  ;;  %v6115_v55 = vadd.f32 %v15568_v32, %v17323_v11  ;;  %v17325_v10 = vld [vmem:[#allocation128_spill] sm:$0xff]  ;;  %v17327_v32 = vld [vmem:[#allocation38_spill] sm:$0xff]  ;;  %v6109_v3 = vadd.f32 %v15564_v53, %v17328_v58  ;;  %v17329_v19 = vld [vmem:[#allocation129_spill] sm:$0xff] }
 0x9e1   : > { %v11382_v52 = vpop.eup %11381  ;;  %11393 = vrcp.f32 %v6379_v4  ;;  %v6937_v31 = vadd.f32 %v6905_v34, %v6873_v16  ;;  %v6843_v2 = vsub.f32 1.0, %v11380_v7  ;;  %v6874_v46 = vmul.f32 %v6842_v50, %v17327_v32  ;;  %v17332_v50 = vld [vmem:[#allocation98_spill] sm:$0xff] }
 0x9e2   : > { %v6936_v45 = vadd.f32 %v6904_v51, %v6872_v47  ;;  %v6383_v12 = vadd.f32 1.0, %v11382_v52  ;;  %11395 = vrcp.f32 %v6385_v48  ;;  %v8541_v14 = vmul.f32 -1.442695, %v6115_v55  ;;  %v17336_v32 = vld [vmem:[#allocation106_spill] sm:$0xff] }
 0x9e3   : > { %v9341_v9 = vpop.f32.mrb[208].mxu0  ;;  %11397 = vpow2.f32 %v8537_v35  ;;  %v6875_v22 = vmul.f32 %v6843_v2, %v17326_v20  ;;  %v6121_v2 = vadd.f32 %v15572_v5, %v17332_v50  ;;  %v6139_v5 = vadd.f32 %v15607_v56, %v17336_v32  ;;  %v17347_v32 = vld [vmem:[#allocation136_spill] sm:$0xff] }
 0x9e4   : > { %v6723_v60 = vadd.f32 %v9341_v9, %v17324_v13  ;;  %v6717_v23 = vpop.f32.mrb[209].mxu0  ;;  %9477 = vmatprep.mubr.f32.mxu0 %v6936_v45 }
 0x9e5   : > { %v6718_v15 = vadd.f32 %v6717_v23, %v17325_v10  ;;  %9478 = vmatmul.mubr.f32.gmra.mrb[224].mxu0 %v6937_v31  ;;  %v17331_v31 = vld [vmem:[#allocation101_spill] sm:$0xff] }
 0x9e6   : > { %v11384_v30 = vpop.eup %11383  ;;  %11399 = vtanh.f32 %v6723_v60  ;;  %v6127_v57 = vadd.f32 %v15584_v43, %v17331_v31 }
 0x9e7   : > { %v11386_v8 = vpop.eup %11385  ;;  %11401 = vtanh.f32 %v6718_v15  ;;  %v6907_v59 = vmul.f32 %v11384_v30, %v11380_v7  ;;  %v17330_v7 = vld [vmem:[#allocation130_spill] sm:$0xff]  ;;  %v17334_v15 = vld [vmem:[#allocation131_spill] sm:$0xff] }
 0x9e8   : > { %v11388_v24 = vpop.eup %11387  ;;  %11403 = vrcp.f32 %v6383_v12  ;;  %v6906_v0 = vmul.f32 %v11386_v8, %v11372_v17  ;;  %v8539_v17 = vmul.f32 -1.442695, %v6109_v3  ;;  %v17333_v12 = vld [vmem:[#allocation40_spill] sm:$0xff]  ;;  %v8545_v43 = vmul.f32 -1.442695, %v6127_v57 }
 0x9e9   : > { %v11390_v38 = vpop.eup %11389  ;;  %v6939_v44 = vadd.f32 %v6907_v59, %v6875_v22  ;;  %11405 = vpow2.f32 %v8535_v25  ;;  %v9344_v4 = vpop.f32.mrb[210].mxu0  ;;  %v6387_v63 = vadd.f32 1.0, %v11388_v24  ;;  %v17335_v22 = vld [vmem:[#allocation132_spill] sm:$0xff] }
 0x9ea   : > { %v11392_v1 = vpop.eup %11391  ;;  %v6938_v54 = vadd.f32 %v6906_v0, %v6874_v46  ;;  %v6733_v36 = vadd.f32 %v9344_v4, %v17329_v19  ;;  %v6727_v16 = vpop.f32.mrb[211].mxu0  ;;  %v6389_v34 = vadd.f32 1.0, %v11390_v38  ;;  %11407 = vpow2.f32 %v8541_v14  ;;  %v17337_v38 = vld [vmem:[#allocation104_spill] sm:$0xff] }
 0x9eb   : > { %v11394_v28 = vpop.eup %11393  ;;  %v6728_v48 = vadd.f32 %v6727_v16, %v17330_v7  ;;  %v6845_v40 = vsub.f32 1.0, %v11392_v1  ;;  %v8543_v14 = vmul.f32 -1.442695, %v6121_v2  ;;  %v6133_v58 = vadd.f32 %v15598_v49, %v17337_v38  ;;  %v17343_v2 = vld [vmem:[#allocation108_spill] sm:$0xff] }
 0x9ec   : > { %9480 = vmatprep.mubr.f32.mxu0 %v6938_v54  ;;  %11409 = vtanh.f32 %v6733_v36  ;;  %v11396_v53 = vpop.eup %11395  ;;  %v6844_v47 = vsub.f32 1.0, %v11394_v28  ;;  %v8549_v16 = vmul.f32 -1.442695, %v6139_v5 }
 0x9ed   : > { %9481 = vmatmul.mubr.f32.gmra.mrb[226].mxu0 %v6939_v44  ;;  %11411 = vtanh.f32 %v6728_v48  ;;  %v11398_v51 = vpop.eup %11397  ;;  %v6877_v33 = vmul.f32 %v6845_v40, %v15342_v18  ;;  %v6847_v20 = vsub.f32 1.0, %v11396_v53  ;;  %v17338_v44 = vld [vmem:[#allocation42_spill] sm:$0xff]  ;;  %v8547_v49 = vmul.f32 -1.442695, %v6133_v58 }
 0x9ee   : > { %11413 = vrcp.f32 %v6387_v63  ;;  %v6876_v11 = vmul.f32 %v6844_v47, %v17333_v12  ;;  %v6393_v10 = vadd.f32 1.0, %v11398_v51  ;;  %v17339_v63 = vld [vmem:[#allocation44_spill] sm:$0xff]  ;;  %v17340_v51 = vld [vmem:[#allocation110_spill] sm:$0xff]  ;;  %v6145_v12 = vadd.f32 %v15621_v37, %v17343_v2 }
 0x9ef   : > { %11415 = vrcp.f32 %v6389_v34 }
 0x9f0   : > { %v11400_v52 = vpop.eup %11399  ;;  %11417 = vpow2.f32 %v8539_v17 }
 0x9f1   : > { %v11402_v35 = vpop.eup %11401  ;;  %v6909_v45 = vmul.f32 %v11400_v52, %v11392_v1  ;;  %v6879_v1 = vmul.f32 %v6847_v20, %v17338_v44  ;;  %v6151_v52 = vadd.f32 %v15641_v41, %v17340_v51  ;;  %v17350_v51 = vld [vmem:[#allocation138_spill] sm:$0xff] }
 0x9f2   : > { %v11404_v9 = vpop.eup %11403  ;;  %v6908_v55 = vmul.f32 %v11402_v35, %v11394_v28  ;;  %v9347_v13 = vpop.f32.mrb[64].mxu1  ;;  %v17341_v35 = vld [vmem:[#allocation133_spill] sm:$0xff] }
 0x9f3   : > { %v6941_v60 = vadd.f32 %v6909_v45, %v6877_v33  ;;  %v11406_v23 = vpop.eup %11405  ;;  %v6743_v30 = vadd.f32 %v9347_v13, %v17334_v15  ;;  %v6737_v25 = vpop.f32.mrb[65].mxu1  ;;  %v6846_v59 = vsub.f32 1.0, %v11404_v9  ;;  %v17342_v33 = vld [vmem:[#allocation134_spill] sm:$0xff]  ;;  %v8553_v41 = vmul.f32 -1.442695, %v6151_v52 }
 0x9f4   : > { %v6940_v8 = vadd.f32 %v6908_v55, %v6876_v11  ;;  %v6738_v18 = vadd.f32 %v6737_v25, %v17335_v22  ;;  %v11408_v24 = vpop.eup %11407  ;;  %v6391_v0 = vadd.f32 1.0, %v11406_v23  ;;  %v17344_v11 = vld [vmem:[#allocation46_spill] sm:$0xff]  ;;  %v17345_v23 = vld [vmem:[#allocation48_spill] sm:$0xff] }
 0x9f5   : > { %11419 = vtanh.f32 %v6743_v30  ;;  %v6397_v28 = vadd.f32 1.0, %v11408_v24  ;;  %v6878_v19 = vmul.f32 %v6846_v59, %v17339_v63  ;;  %v17346_v59 = vld [vmem:[#allocation135_spill] sm:$0xff] }
 0x9f6   : > { %9483 = vmatprep.mubr.f32.mxu0 %v6940_v8  ;;  %v11410_v46 = vpop.eup %11409  ;;  %11421 = vtanh.f32 %v6738_v18  ;;  %v8551_v18 = vmul.f32 -1.442695, %v6145_v12 }
 0x9f7   : > { %9484 = vmatmul.mubr.f32.gmra.mrb[228].mxu0 %v6941_v60  ;;  %v11412_v3 = vpop.eup %11411  ;;  %11423 = vrcp.f32 %v6393_v10  ;;  %v6911_v4 = vmul.f32 %v11410_v46, %v11396_v53 }
 0x9f8   : > { %v11414_v54 = vpop.eup %11413  ;;  %11425 = vpow2.f32 %v8545_v43  ;;  %v6910_v56 = vmul.f32 %v11412_v3, %v11404_v9 }
 0x9f9   : > { %v11416_v36 = vpop.eup %11415  ;;  %11427 = vpow2.f32 %v8543_v14  ;;  %v6943_v34 = vadd.f32 %v6911_v4, %v6879_v1  ;;  %v6848_v40 = vsub.f32 1.0, %v11414_v54 }
 0x9fa   : > { %v11418_v7 = vpop.eup %11417  ;;  %11429 = vrcp.f32 %v6391_v0  ;;  %v6942_v48 = vadd.f32 %v6910_v56, %v6878_v19  ;;  %v6849_v47 = vsub.f32 1.0, %v11416_v36  ;;  %v17348_v56 = vld [vmem:[#allocation49_spill] sm:$0xff] }
 0x9fb   : > { %11431 = vrcp.f32 %v6397_v28  ;;  %v6395_v53 = vadd.f32 1.0, %v11418_v7  ;;  %v6880_v10 = vmul.f32 %v6848_v40, %v17345_v23 }
 0x9fc   : > { %v9350_v17 = vpop.f32.mrb[66].mxu1  ;;  %9486 = vmatprep.mubr.f32.mxu0 %v6942_v48  ;;  %11433 = vpow2.f32 %v8549_v16  ;;  %v6881_v55 = vmul.f32 %v6849_v47, %v17344_v11  ;;  %v17349_v48 = vld [vmem:[#allocation137_spill] sm:$0xff] }
 0x9fd   : > { %v6753_v31 = vadd.f32 %v9350_v17, %v17341_v35  ;;  %v6747_v57 = vpop.f32.mrb[67].mxu1  ;;  %9487 = vmatmul.mubr.f32.gmra.mrb[230].mxu0 %v6943_v34  ;;  %11435 = vpow2.f32 %v8547_v49 }
 0x9fe   : > { %v6748_v45 = vadd.f32 %v6747_v57, %v17342_v33 }
 0x9ff   : > { %v11420_v9 = vpop.eup %11419  ;;  %11437 = vtanh.f32 %v6753_v31 }
 0xa00   : > { %v11422_v50 = vpop.eup %11421  ;;  %11439 = vtanh.f32 %v6748_v45  ;;  %v6913_v13 = vmul.f32 %v11420_v9, %v11416_v36 }
 0xa01   : > { %v11424_v60 = vpop.eup %11423  ;;  %11441 = vrcp.f32 %v6395_v53  ;;  %v6912_v15 = vmul.f32 %v11422_v50, %v11414_v54 }
 0xa02   : > { %v11426_v30 = vpop.eup %11425  ;;  %v6945_v25 = vadd.f32 %v6913_v13, %v6881_v55  ;;  %v9353_v20 = vpop.f32.mrb[68].mxu1  ;;  %11443 = vpow2.f32 %v8553_v41  ;;  %v6851_v38 = vsub.f32 1.0, %v11424_v60  ;;  %v17351_v41 = vld [vmem:[#allocation139_spill] sm:$0xff] }
 0xa03   : > { %v11428_v8 = vpop.eup %11427  ;;  %v6944_v43 = vadd.f32 %v6912_v15, %v6880_v10  ;;  %v6763_v24 = vadd.f32 %v9353_v20, %v17346_v59  ;;  %v6757_v37 = vpop.f32.mrb[69].mxu1  ;;  %v6401_v14 = vadd.f32 1.0, %v11426_v30 }
 0xa04   : > { %v11430_v22 = vpop.eup %11429  ;;  %v6758_v5 = vadd.f32 %v6757_v37, %v17347_v32  ;;  %v6399_v0 = vadd.f32 1.0, %v11428_v8  ;;  %v6883_v28 = vmul.f32 %v6851_v38, %v15387_v62  ;;  %v7631_v38 = vld [vmem:[%s16041_s12 + $0x10] sm:$0xff] }
 0xa05   : > { %9489 = vmatprep.mubr.f32.mxu0 %v6944_v43  ;;  %v11432_v46 = vpop.eup %11431  ;;  %11445 = vtanh.f32 %v6763_v24  ;;  %v6850_v3 = vsub.f32 1.0, %v11430_v22  ;;  %v7630_v43 = vld [vmem:[%s16041_s12 + $0x8] sm:$0xff] }
 0xa06   : > { %9490 = vmatmul.mubr.f32.gmra.mrb[232].mxu0 %v6945_v25  ;;  %v11434_v58 = vpop.eup %11433  ;;  %11447 = vtanh.f32 %v6758_v5  ;;  %v6853_v53 = vsub.f32 1.0, %v11432_v46  ;;  %v17352_v25 = vld [vmem:[#allocation140_spill] sm:$0xff] }
 0xa07   : > { %v11436_v44 = vpop.eup %11435  ;;  %11449 = vpow2.f32 %v8551_v18  ;;  %v6405_v54 = vadd.f32 1.0, %v11434_v58  ;;  %v6882_v36 = vmul.f32 %v6850_v3, %v17348_v56  ;;  %v7632_v58 = vld [vmem:[%s16041_s12 + $0x18] sm:$0xff] }
 0xa08   : > { %11451 = vrcp.f32 %v6401_v14  ;;  %v6403_v49 = vadd.f32 1.0, %v11436_v44  ;;  %v6885_v33 = vmul.f32 %v6853_v53, %v15400_v27  ;;  %v17353_v3 = vld [vmem:[#allocation141_spill] sm:$0xff] }
 0xa09   : > { %v11438_v1 = vpop.eup %11437  ;;  %11453 = vrcp.f32 %v6399_v0 }
 0xa0a   : > { %v11440_v4 = vpop.eup %11439  ;;  %v6915_v63 = vmul.f32 %v11438_v1, %v11424_v60  ;;  %v9356_v34 = vpop.f32.mrb[70].mxu1  ;;  %11455 = vrcp.f32 %v6405_v54  ;;  %v17354_v54 = vld [vmem:[#allocation142_spill] sm:$0xff] }
 0xa0b   : > { %v11442_v19 = vpop.eup %11441  ;;  %v6914_v16 = vmul.f32 %v11440_v4, %v11430_v22  ;;  %v6773_v17 = vadd.f32 %v9356_v34, %v17349_v48  ;;  %v6767_v40 = vpop.f32.mrb[71].mxu1  ;;  %v9999_v4 = vpack.c.bf16 %v7632_v58, %v7631_v38 }
 0xa0c   : > { %v6947_v7 = vadd.f32 %v6915_v63, %v6883_v28  ;;  %v6768_v52 = vadd.f32 %v6767_v40, %v17350_v51  ;;  %v6852_v35 = vsub.f32 1.0, %v11442_v19  ;;  %v11444_v31 = vpop.eup %11443 }
 0xa0d   : > { %v6946_v47 = vadd.f32 %v6914_v16, %v6882_v36  ;;  %11457 = vtanh.f32 %v6773_v17  ;;  %v6409_v60 = vadd.f32 1.0, %v11444_v31 }
 0xa0e   : > { %11459 = vtanh.f32 %v6768_v52  ;;  %v6884_v50 = vmul.f32 %v6852_v35, %v15404_v42  ;;  %v7629_v42 = vld [vmem:[%s16041_s12] sm:$0xff] }
 0xa0f   : > { %9492 = vmatprep.mubr.f32.mxu0 %v6946_v47  ;;  %v11446_v62 = vpop.eup %11445  ;;  %11461 = vrcp.f32 %v6403_v49  ;;  %v9995_v18 = vpack.c.bf16 %v7630_v43, %v7629_v42 }
 0xa10   : > { %9493 = vmatmul.mubr.f32.gmra.mrb[234].mxu0 %v6947_v7  ;;  %v11448_v57 = vpop.eup %11447  ;;  %v6917_v45 = vmul.f32 %v11446_v62, %v11432_v46 }
 0xa11   : > { %v11450_v9 = vpop.eup %11449  ;;  %v6916_v2 = vmul.f32 %v11448_v57, %v11442_v19  ;;  %9996 = vmatprep.subr.bf16.mxu1 %v9995_v18 }
 0xa12   : > { %v11452_v12 = vpop.eup %11451  ;;  %v9359_v11 = vpop.f32.mrb[72].mxu1  ;;  %v6949_v55 = vadd.f32 %v6917_v45, %v6885_v33  ;;  %v6407_v30 = vadd.f32 1.0, %v11450_v9  ;;  %9998 = vmatpush3.bf16.msra.mxu1 %v9995_v18 }
 0xa13   : > { %v11454_v13 = vpop.eup %11453  ;;  %v6783_v23 = vadd.f32 %v9359_v11, %v17351_v41  ;;  %v6777_v10 = vpop.f32.mrb[73].mxu1  ;;  %v6948_v15 = vadd.f32 %v6916_v2, %v6884_v50  ;;  %v6855_v27 = vsub.f32 1.0, %v11452_v12  ;;  %10000 = vmatprep.subr.bf16.mxu1 %v9999_v4 }
 0xa14   : > { %v6778_v8 = vadd.f32 %v6777_v10, %v17352_v25  ;;  %v6854_v20 = vsub.f32 1.0, %v11454_v13  ;;  %v11456_v22 = vpop.eup %11455 }
 0xa15   : > { %11463 = vtanh.f32 %v6783_v23  ;;  %9495 = vmatprep.mubr.f32.mxu0 %v6948_v15  ;;  %v6887_v37 = vmul.f32 %v6855_v27, %v15413_v26  ;;  %v6857_v19 = vsub.f32 1.0, %v11456_v22 }
 0xa16   : > { %11465 = vtanh.f32 %v6778_v8  ;;  %9496 = vmatmul.mubr.f32.gmra.mrb[236].mxu0 %v6949_v55  ;;  %v6886_v46 = vmul.f32 %v6854_v20, %v15416_v29  ;;  %10002 = vmatpush3.bf16.msra.mxu1 %v9999_v4 }
 0xa17   : > { %11467 = vrcp.f32 %v6409_v60  ;;  %v11458_v59 = vpop.eup %11457  ;;  %v6889_v16 = vmul.f32 %v6857_v19, %v15423_v21 }
 0xa18   : > { %11469 = vrcp.f32 %v6407_v30  ;;  %v11460_v24 = vpop.eup %11459  ;;  %v6919_v14 = vmul.f32 %v11458_v59, %v11452_v12 }
 0xa19   : > { %v11462_v32 = vpop.eup %11461  ;;  %v6918_v0 = vmul.f32 %v11460_v24, %v11454_v13 }
 0xa1a   : > { %v9362_v5 = vpop.f32.mrb[74].mxu1  ;;  %v6951_v26 = vadd.f32 %v6919_v14, %v6887_v37  ;;  %v6856_v29 = vsub.f32 1.0, %v11462_v32 }
 0xa1b   : > { %v6793_v44 = vadd.f32 %v9362_v5, %v17353_v3  ;;  %v6787_v1 = vpop.f32.mrb[75].mxu1  ;;  %v6950_v63 = vadd.f32 %v6918_v0, %v6886_v46 }
 0xa1c   : > { %v6788_v28 = vadd.f32 %v6787_v1, %v17354_v54  ;;  %v6888_v49 = vmul.f32 %v6856_v29, %v15426_v39  ;;  %v15853_v39 = vld [vmem:[%s16040_s11] ss:$0 sm:$0xff] }
 0xa1d   : > { %11471 = vtanh.f32 %v6793_v44  ;;  %9498 = vmatprep.mubr.f32.mxu0 %v6950_v63 }
 0xa1e   : > { %11473 = vtanh.f32 %v6788_v28  ;;  %9499 = vmatmul.mubr.f32.gmra.mrb[238].mxu0 %v6951_v26 }
 0xa1f   : > { %v11464_v56 = vpop.eup %11463 }
 0xa20   : > { %v11466_v36 = vpop.eup %11465  ;;  %v6921_v34 = vmul.f32 %v11464_v56, %v11456_v22 }
 0xa21   : > { %v11468_v7 = vpop.eup %11467  ;;  %v6920_v48 = vmul.f32 %v11466_v36, %v11462_v32 }
 0xa22   : > { %v11470_v17 = vpop.eup %11469  ;;  %v6953_v40 = vadd.f32 %v6921_v34, %v6889_v16  ;;  %v6859_v53 = vsub.f32 1.0, %v11468_v7 }
 0xa23   : > { %v6952_v47 = vadd.f32 %v6920_v48, %v6888_v49  ;;  %v6858_v51 = vsub.f32 1.0, %v11470_v17 }
 0xa24   : > { %v6891_v31 = vmul.f32 %v6859_v53, %v15435_v61 }
 0xa25   : > { %9501 = vmatprep.mubr.f32.mxu0 %v6952_v47  ;;  %v6890_v57 = vmul.f32 %v6858_v51, %v15437_v6 }
 0xa26   : > { %9502 = vmatmul.mubr.f32.gmra.mrb[240].mxu0 %v6953_v40 }
 0xa27   : > { %v11472_v52 = vpop.eup %11471 }
 0xa28   : > { %v11474_v35 = vpop.eup %11473  ;;  %v6923_v62 = vmul.f32 %v11472_v52, %v11468_v7 }
 0xa29   : > { %v6922_v21 = vmul.f32 %v11474_v35, %v11470_v17 }
 0xa2a   : > { %v6955_v33 = vadd.f32 %v6923_v62, %v6891_v31 }
 0xa2b   : > { %v6954_v45 = vadd.f32 %v6922_v21, %v6890_v57 }
 0xa2d   : > { %9504 = vmatprep.mubr.f32.mxu0 %v6954_v45 }
 0xa2e   : > { %9505 = vmatmul.mubr.f32.gmra.mrb[242].mxu0 %v6955_v33 }
 0xa82   : > { %v9461_v9 = vpop.f32.mrb[212].mxu0 }
 0xa83   : > { %v7438_v50 = vadd.f32 %v9461_v9, %v15853_v39  ;;  %v7271_v2 = vpop.f32.mrb[213].mxu0 }
 0xa84   : > { %v7437_v12 = vadd.f32 %v15853_v39, %v7271_v2 }
 0xa85   : > { %v7502_v61 = vmul.f32 0.70710677, %v7438_v50  ;;  %v7470_v27 = vmul.f32 0.5, %v7438_v50 }
 0xa86   : > { %v7501_v11 = vmul.f32 0.70710677, %v7437_v12  ;;  %v7469_v25 = vmul.f32 0.5, %v7437_v12 }
 0xa87   : > { %11475 = verf.f32 %v7502_v61 }
 0xa88   : > { %11477 = verf.f32 %v7501_v11 }
 0xa8c   : > { %v9464_v6 = vpop.f32.mrb[214].mxu0 }
 0xa8d   : > { %v7440_v55 = vadd.f32 %v9464_v6, %v15853_v39  ;;  %v7281_v13 = vpop.f32.mrb[215].mxu0 }
 0xa8e   : > { %v7439_v60 = vadd.f32 %v15853_v39, %v7281_v13 }
 0xa8f   : > { %v7504_v41 = vmul.f32 0.70710677, %v7440_v55  ;;  %v7472_v38 = vmul.f32 0.5, %v7440_v55 }
 0xa90   : > { %v7503_v10 = vmul.f32 0.70710677, %v7439_v60  ;;  %v7471_v46 = vmul.f32 0.5, %v7439_v60 }
 0xa91   : > { %v11476_v23 = vpop.eup %11475  ;;  %11479 = verf.f32 %v7504_v41 }
 0xa92   : > { %v11478_v15 = vpop.eup %11477  ;;  %v7566_v30 = vadd.f32 1.0, %v11476_v23  ;;  %11481 = verf.f32 %v7503_v10 }
 0xa93   : > { %v7565_v8 = vadd.f32 1.0, %v11478_v15 }
 0xa94   : > { %v7598_v42 = vmul.f32 %v7566_v30, %v7470_v27 }
 0xa95   : > { %v7597_v20 = vmul.f32 %v7565_v8, %v7469_v25 }
 0xa96   : > { %v9467_v43 = vpop.f32.mrb[216].mxu0 }
 0xa97   : > { %9515 = vmatprep.mubr.msk.f32.mxu1 %vm7633_vm6, %v7597_v20  ;;  %v7442_v22 = vadd.f32 %v9467_v43, %v15853_v39  ;;  %v7291_v18 = vpop.f32.mrb[217].mxu0 }
 0xa98   : > { %9516 = vmatmul.mubr.msk.f32.vlgmr.msra.gmra.mrb[76].mxu1 %vm7633_vm6, %v7598_v42  ;;  %v7441_v59 = vadd.f32 %v15853_v39, %v7291_v18 }
 0xa99   : > { %v7506_v24 = vmul.f32 0.70710677, %v7442_v22  ;;  %v7474_v16 = vmul.f32 0.5, %v7442_v22 }
 0xa9a   : > { %v7505_v14 = vmul.f32 0.70710677, %v7441_v59  ;;  %v7473_v56 = vmul.f32 0.5, %v7441_v59 }
 0xa9b   : > { %v11480_v37 = vpop.eup %11479  ;;  %11483 = verf.f32 %v7506_v24 }
 0xa9c   : > { %v11482_v32 = vpop.eup %11481  ;;  %v7568_v5 = vadd.f32 1.0, %v11480_v37  ;;  %11485 = verf.f32 %v7505_v14 }
 0xa9d   : > { %v7567_v0 = vadd.f32 1.0, %v11482_v32 }
 0xa9e   : > { %v7600_v3 = vmul.f32 %v7568_v5, %v7472_v38 }
 0xa9f   : > { %v7599_v58 = vmul.f32 %v7567_v0, %v7471_v46 }
 0xaa0   : > { %v9470_v44 = vpop.f32.mrb[218].mxu0 }
 0xaa1   : > { %9518 = vmatprep.mubr.msk.f32.mxu1 %vm7633_vm6, %v7599_v58  ;;  %v7444_v1 = vadd.f32 %v9470_v44, %v15853_v39  ;;  %v7301_v26 = vpop.f32.mrb[219].mxu0 }
 0xaa2   : > { %9519 = vmatmul.mubr.msk.f32.gmra.mrb[78].mxu1 %vm7633_vm6, %v7600_v3  ;;  %v7443_v4 = vadd.f32 %v15853_v39, %v7301_v26 }
 0xaa3   : > { %v7508_v54 = vmul.f32 0.70710677, %v7444_v1  ;;  %v7476_v45 = vmul.f32 0.5, %v7444_v1 }
 0xaa4   : > { %v7507_v28 = vmul.f32 0.70710677, %v7443_v4  ;;  %v7475_v62 = vmul.f32 0.5, %v7443_v4 }
 0xaa5   : > { %v11484_v63 = vpop.eup %11483  ;;  %11487 = verf.f32 %v7508_v54 }
 0xaa6   : > { %v11486_v19 = vpop.eup %11485  ;;  %v7570_v29 = vadd.f32 1.0, %v11484_v63  ;;  %11489 = verf.f32 %v7507_v28 }
 0xaa7   : > { %v7569_v36 = vadd.f32 1.0, %v11486_v19 }
 0xaa8   : > { %v7602_v17 = vmul.f32 %v7570_v29, %v7474_v16 }
 0xaa9   : > { %v7601_v7 = vmul.f32 %v7569_v36, %v7473_v56 }
 0xaaa   : > { %v9473_v34 = vpop.f32.mrb[220].mxu0 }
 0xaab   : > { %v7446_v49 = vadd.f32 %v9473_v34, %v15853_v39  ;;  %v7311_v48 = vpop.f32.mrb[221].mxu0  ;;  %9521 = vmatprep.mubr.msk.f32.mxu1 %vm7633_vm6, %v7601_v7 }
 0xaac   : > { %v7445_v40 = vadd.f32 %v15853_v39, %v7311_v48  ;;  %9522 = vmatmul.mubr.msk.f32.gmra.mrb[80].mxu1 %vm7633_vm6, %v7602_v17 }
 0xaad   : > { %v7510_v47 = vmul.f32 0.70710677, %v7446_v49  ;;  %v7478_v30 = vmul.f32 0.5, %v7446_v49 }
 0xaae   : > { %v7509_v53 = vmul.f32 0.70710677, %v7445_v40  ;;  %v7477_v23 = vmul.f32 0.5, %v7445_v40 }
 0xaaf   : > { %11491 = verf.f32 %v7510_v47  ;;  %v11488_v51 = vpop.eup %11487 }
 0xab0   : > { %11493 = verf.f32 %v7509_v53  ;;  %v11490_v52 = vpop.eup %11489  ;;  %v7572_v35 = vadd.f32 1.0, %v11488_v51  ;;  %v9476_v31 = vpop.f32.mrb[222].mxu0 }
 0xab1   : > { %v7571_v57 = vadd.f32 1.0, %v11490_v52  ;;  %v7448_v21 = vadd.f32 %v9476_v31, %v15853_v39  ;;  %v7321_v33 = vpop.f32.mrb[223].mxu0 }
 0xab2   : > { %v7447_v9 = vadd.f32 %v15853_v39, %v7321_v33  ;;  %v7604_v12 = vmul.f32 %v7572_v35, %v7476_v45 }
 0xab3   : > { %v7603_v50 = vmul.f32 %v7571_v57, %v7475_v62  ;;  %v7512_v2 = vmul.f32 0.70710677, %v7448_v21  ;;  %v7480_v5 = vmul.f32 0.5, %v7448_v21 }
 0xab4   : > { %v7511_v61 = vmul.f32 0.70710677, %v7447_v9  ;;  %v7479_v37 = vmul.f32 0.5, %v7447_v9 }
 0xab5   : > { %11495 = verf.f32 %v7512_v2  ;;  %9524 = vmatprep.mubr.msk.f32.mxu1 %vm7633_vm6, %v7603_v50 }
 0xab6   : > { %11497 = verf.f32 %v7511_v61  ;;  %9525 = vmatmul.mubr.msk.f32.gmra.mrb[82].mxu1 %vm7633_vm6, %v7604_v12 }
 0xab8   : > { %v9479_v6 = vpop.f32.mrb[224].mxu0 }
 0xab9   : > { %v11492_v11 = vpop.eup %11491  ;;  %v7450_v60 = vadd.f32 %v9479_v6, %v15853_v39  ;;  %v7331_v41 = vpop.f32.mrb[225].mxu0 }
 0xaba   : > { %v11494_v55 = vpop.eup %11493  ;;  %v7574_v13 = vadd.f32 1.0, %v11492_v11  ;;  %v7449_v15 = vadd.f32 %v15853_v39, %v7331_v41 }
 0xabb   : > { %v7573_v10 = vadd.f32 1.0, %v11494_v55  ;;  %v7514_v25 = vmul.f32 0.70710677, %v7450_v60  ;;  %v7482_v54 = vmul.f32 0.5, %v7450_v60 }
 0xabc   : > { %v7513_v27 = vmul.f32 0.70710677, %v7449_v15  ;;  %v7606_v20 = vmul.f32 %v7574_v13, %v7478_v30  ;;  %v7481_v26 = vmul.f32 0.5, %v7449_v15 }
 0xabd   : > { %v7605_v8 = vmul.f32 %v7573_v10, %v7477_v23  ;;  %11499 = verf.f32 %v7514_v25 }
 0xabe   : > { %11501 = verf.f32 %v7513_v27 }
 0xabf   : > { %9527 = vmatprep.mubr.msk.f32.mxu1 %vm7633_vm6, %v7605_v8  ;;  %v11496_v42 = vpop.eup %11495 }
 0xac0   : > { %9528 = vmatmul.mubr.msk.f32.gmra.mrb[84].mxu1 %vm7633_vm6, %v7606_v20  ;;  %v9482_v43 = vpop.f32.mrb[226].mxu0  ;;  %v11498_v22 = vpop.eup %11497  ;;  %v7576_v18 = vadd.f32 1.0, %v11496_v42 }
 0xac1   : > { %v7452_v59 = vadd.f32 %v9482_v43, %v15853_v39  ;;  %v7341_v24 = vpop.f32.mrb[227].mxu0  ;;  %v7575_v14 = vadd.f32 1.0, %v11498_v22 }
 0xac2   : > { %v7451_v32 = vadd.f32 %v15853_v39, %v7341_v24  ;;  %v7608_v58 = vmul.f32 %v7576_v18, %v7480_v5 }
 0xac3   : > { %v7516_v46 = vmul.f32 0.70710677, %v7452_v59  ;;  %v7607_v0 = vmul.f32 %v7575_v14, %v7479_v37  ;;  %v7484_v53 = vmul.f32 0.5, %v7452_v59 }
 0xac4   : > { %v7515_v38 = vmul.f32 0.70710677, %v7451_v32  ;;  %v7483_v17 = vmul.f32 0.5, %v7451_v32 }
 0xac5   : > { %11503 = verf.f32 %v7516_v46  ;;  %9530 = vmatprep.mubr.msk.f32.mxu1 %vm7633_vm6, %v7607_v0 }
 0xac6   : > { %11505 = verf.f32 %v7515_v38  ;;  %9531 = vmatmul.mubr.msk.f32.gmra.mrb[86].mxu1 %vm7633_vm6, %v7608_v58 }
 0xac7   : > { %v11500_v3 = vpop.eup %11499 }
 0xac8   : > { %v11502_v44 = vpop.eup %11501  ;;  %v7578_v1 = vadd.f32 1.0, %v11500_v3 }
 0xac9   : > { %v7577_v4 = vadd.f32 1.0, %v11502_v44 }
 0xaca   : > { %v9485_v28 = vpop.f32.mrb[228].mxu0  ;;  %v7610_v56 = vmul.f32 %v7578_v1, %v7482_v54 }
 0xacb   : > { %v7609_v63 = vmul.f32 %v7577_v4, %v7481_v26  ;;  %v7454_v19 = vadd.f32 %v9485_v28, %v15853_v39  ;;  %v7351_v29 = vpop.f32.mrb[229].mxu0 }
 0xacc   : > { %v7453_v36 = vadd.f32 %v15853_v39, %v7351_v29 }
 0xacd   : > { %v7518_v16 = vmul.f32 0.70710677, %v7454_v19  ;;  %9533 = vmatprep.mubr.msk.f32.mxu1 %vm7633_vm6, %v7609_v63  ;;  %v7486_v6 = vmul.f32 0.5, %v7454_v19 }
 0xace   : > { %v7517_v34 = vmul.f32 0.70710677, %v7453_v36  ;;  %9534 = vmatmul.mubr.msk.f32.gmra.mrb[88].mxu1 %vm7633_vm6, %v7610_v56  ;;  %v7485_v2 = vmul.f32 0.5, %v7453_v36 }
 0xacf   : > { %v11504_v7 = vpop.eup %11503  ;;  %11507 = verf.f32 %v7518_v16 }
 0xad0   : > { %v11506_v49 = vpop.eup %11505  ;;  %v7580_v48 = vadd.f32 1.0, %v11504_v7  ;;  %11509 = verf.f32 %v7517_v34  ;;  %v9488_v47 = vpop.f32.mrb[230].mxu0 }
 0xad1   : > { %v7579_v40 = vadd.f32 1.0, %v11506_v49  ;;  %v7456_v51 = vadd.f32 %v9488_v47, %v15853_v39  ;;  %v7361_v52 = vpop.f32.mrb[231].mxu0 }
 0xad2   : > { %v7455_v31 = vadd.f32 %v15853_v39, %v7361_v52  ;;  %v7612_v62 = vmul.f32 %v7580_v48, %v7484_v53 }
 0xad3   : > { %v7611_v35 = vmul.f32 %v7579_v40, %v7483_v17  ;;  %v7520_v57 = vmul.f32 0.70710677, %v7456_v51  ;;  %v7488_v27 = vmul.f32 0.5, %v7456_v51 }
 0xad4   : > { %v7519_v21 = vmul.f32 0.70710677, %v7455_v31  ;;  %v7487_v25 = vmul.f32 0.5, %v7455_v31 }
 0xad5   : > { %9536 = vmatprep.mubr.msk.f32.mxu1 %vm7633_vm6, %v7611_v35  ;;  %11511 = verf.f32 %v7520_v57 }
 0xad6   : > { %9537 = vmatmul.mubr.msk.f32.gmra.mrb[90].mxu1 %vm7633_vm6, %v7612_v62  ;;  %11513 = verf.f32 %v7519_v21 }
 0xad9   : > { %v11508_v33 = vpop.eup %11507  ;;  %v9491_v50 = vpop.f32.mrb[232].mxu0 }
 0xada   : > { %v11510_v45 = vpop.eup %11509  ;;  %v7582_v9 = vadd.f32 1.0, %v11508_v33  ;;  %v7458_v61 = vadd.f32 %v9491_v50, %v15853_v39  ;;  %v7371_v11 = vpop.f32.mrb[233].mxu0 }
 0xadb   : > { %v7581_v12 = vadd.f32 1.0, %v11510_v45  ;;  %v7457_v55 = vadd.f32 %v15853_v39, %v7371_v11 }
 0xadc   : > { %v7522_v60 = vmul.f32 0.70710677, %v7458_v61  ;;  %v7614_v41 = vmul.f32 %v7582_v9, %v7486_v6  ;;  %v7490_v58 = vmul.f32 0.5, %v7458_v61 }
 0xadd   : > { %v7613_v13 = vmul.f32 %v7581_v12, %v7485_v2  ;;  %v7521_v23 = vmul.f32 0.70710677, %v7457_v55  ;;  %v7489_v46 = vmul.f32 0.5, %v7457_v55 }
 0xade   : > { %11515 = verf.f32 %v7522_v60 }
 0xadf   : > { %9539 = vmatprep.mubr.msk.f32.mxu1 %vm7633_vm6, %v7613_v13  ;;  %v11512_v10 = vpop.eup %11511  ;;  %11517 = verf.f32 %v7521_v23 }
 0xae0   : > { %9540 = vmatmul.mubr.msk.f32.gmra.mrb[92].mxu1 %vm7633_vm6, %v7614_v41  ;;  %v11514_v15 = vpop.eup %11513  ;;  %v7584_v30 = vadd.f32 1.0, %v11512_v10 }
 0xae1   : > { %v7583_v8 = vadd.f32 1.0, %v11514_v15 }
 0xae2   : > { %v7616_v43 = vmul.f32 %v7584_v30, %v7488_v27 }
 0xae3   : > { %v7615_v20 = vmul.f32 %v7583_v8, %v7487_v25  ;;  %v9494_v42 = vpop.f32.mrb[234].mxu0 }
 0xae4   : > { %v7460_v22 = vadd.f32 %v9494_v42, %v15853_v39  ;;  %v7381_v18 = vpop.f32.mrb[235].mxu0 }
 0xae5   : > { %v7459_v59 = vadd.f32 %v15853_v39, %v7381_v18  ;;  %9542 = vmatprep.mubr.msk.f32.mxu1 %vm7633_vm6, %v7615_v20 }
 0xae6   : > { %v7524_v24 = vmul.f32 0.70710677, %v7460_v22  ;;  %9543 = vmatmul.mubr.msk.f32.gmra.mrb[94].mxu1 %vm7633_vm6, %v7616_v43  ;;  %v7492_v49 = vmul.f32 0.5, %v7460_v22 }
 0xae7   : > { %v7523_v37 = vmul.f32 0.70710677, %v7459_v59  ;;  %v7491_v36 = vmul.f32 0.5, %v7459_v59 }
 0xae8   : > { %v11516_v14 = vpop.eup %11515  ;;  %11519 = verf.f32 %v7524_v24 }
 0xae9   : > { %v11518_v32 = vpop.eup %11517  ;;  %v7586_v5 = vadd.f32 1.0, %v11516_v14  ;;  %11521 = verf.f32 %v7523_v37  ;;  %v9497_v38 = vpop.f32.mrb[236].mxu0 }
 0xaea   : > { %v7585_v0 = vadd.f32 1.0, %v11518_v32  ;;  %v7462_v3 = vadd.f32 %v9497_v38, %v15853_v39  ;;  %v7391_v44 = vpop.f32.mrb[237].mxu0 }
 0xaeb   : > { %v7461_v26 = vadd.f32 %v15853_v39, %v7391_v44  ;;  %v7618_v4 = vmul.f32 %v7586_v5, %v7490_v58  ;;  %v15922_v44 = vld [vmem:[%s16042_s13] ss:$0 sm:$0xff] }
 0xaec   : > { %v7617_v1 = vmul.f32 %v7585_v0, %v7489_v46  ;;  %v7526_v54 = vmul.f32 0.70710677, %v7462_v3  ;;  %v7494_v45 = vmul.f32 0.5, %v7462_v3 }
 0xaed   : > { %v7525_v28 = vmul.f32 0.70710677, %v7461_v26  ;;  %v7493_v62 = vmul.f32 0.5, %v7461_v26 }
 0xaee   : > { %9545 = vmatprep.mubr.msk.f32.mxu1 %vm7633_vm6, %v7617_v1  ;;  %11523 = verf.f32 %v7526_v54 }
 0xaef   : > { %9546 = vmatmul.mubr.msk.f32.gmra.mrb[96].mxu1 %vm7633_vm6, %v7618_v4  ;;  %11525 = verf.f32 %v7525_v28 }
 0xaf1   : > { %v9500_v56 = vpop.f32.mrb[238].mxu0 }
 0xaf2   : > { %v11520_v63 = vpop.eup %11519  ;;  %v7464_v34 = vadd.f32 %v9500_v56, %v15853_v39  ;;  %v7401_v7 = vpop.f32.mrb[239].mxu0 }
 0xaf3   : > { %v11522_v19 = vpop.eup %11521  ;;  %v7588_v29 = vadd.f32 1.0, %v11520_v63  ;;  %v7463_v48 = vadd.f32 %v15853_v39, %v7401_v7 }
 0xaf4   : > { %v7587_v16 = vadd.f32 1.0, %v11522_v19  ;;  %v7528_v40 = vmul.f32 0.70710677, %v7464_v34  ;;  %v7496_v30 = vmul.f32 0.5, %v7464_v34 }
 0xaf5   : > { %v7620_v47 = vmul.f32 %v7588_v29, %v7492_v49  ;;  %v7527_v53 = vmul.f32 0.70710677, %v7463_v48  ;;  %v7495_v23 = vmul.f32 0.5, %v7463_v48 }
 0xaf6   : > { %v7619_v17 = vmul.f32 %v7587_v16, %v7491_v36  ;;  %11527 = verf.f32 %v7528_v40 }
 0xaf7   : > { %11529 = verf.f32 %v7527_v53 }
 0xaf8   : > { %9548 = vmatprep.mubr.msk.f32.mxu1 %vm7633_vm6, %v7619_v17  ;;  %v11524_v51 = vpop.eup %11523 }
 0xaf9   : > { %9549 = vmatmul.mubr.msk.f32.gmra.mrb[98].mxu1 %vm7633_vm6, %v7620_v47  ;;  %v11526_v52 = vpop.eup %11525  ;;  %v7590_v35 = vadd.f32 1.0, %v11524_v51  ;;  %v9503_v31 = vpop.f32.mrb[240].mxu0 }
 0xafa   : > { %v7589_v57 = vadd.f32 1.0, %v11526_v52  ;;  %v7466_v21 = vadd.f32 %v9503_v31, %v15853_v39  ;;  %v7411_v33 = vpop.f32.mrb[241].mxu0 }
 0xafb   : > { %v7465_v9 = vadd.f32 %v15853_v39, %v7411_v33  ;;  %v7622_v12 = vmul.f32 %v7590_v35, %v7494_v45 }
 0xafc   : > { %v7621_v50 = vmul.f32 %v7589_v57, %v7493_v62  ;;  %v7530_v2 = vmul.f32 0.70710677, %v7466_v21  ;;  %v7498_v24 = vmul.f32 0.5, %v7466_v21 }
 0xafd   : > { %v7529_v61 = vmul.f32 0.70710677, %v7465_v9  ;;  %v7497_v18 = vmul.f32 0.5, %v7465_v9 }
 0xafe   : > { %11531 = verf.f32 %v7530_v2  ;;  %9551 = vmatprep.mubr.msk.f32.mxu1 %vm7633_vm6, %v7621_v50 }
 0xaff   : > { %11533 = verf.f32 %v7529_v61  ;;  %9552 = vmatmul.mubr.msk.f32.gmra.mrb[100].mxu1 %vm7633_vm6, %v7622_v12 }
 0xb00   : > { %v11528_v11 = vpop.eup %11527 }
 0xb01   : > { %v9506_v6 = vpop.f32.mrb[242].mxu0  ;;  %v11530_v55 = vpop.eup %11529  ;;  %v7592_v13 = vadd.f32 1.0, %v11528_v11 }
 0xb02   : > { %v7468_v60 = vadd.f32 %v9506_v6, %v15853_v39  ;;  %v7421_v41 = vpop.f32.mrb[243].mxu0  ;;  %v7591_v10 = vadd.f32 1.0, %v11530_v55 }
 0xb03   : > { %v7467_v15 = vadd.f32 %v15853_v39, %v7421_v41  ;;  %v7624_v20 = vmul.f32 %v7592_v13, %v7496_v30 }
 0xb04   : > { %v7532_v25 = vmul.f32 0.70710677, %v7468_v60  ;;  %v7623_v8 = vmul.f32 %v7591_v10, %v7495_v23  ;;  %v7500_v38 = vmul.f32 0.5, %v7468_v60 }
 0xb05   : > { %v7531_v27 = vmul.f32 0.70710677, %v7467_v15  ;;  %v7499_v46 = vmul.f32 0.5, %v7467_v15 }
 0xb06   : > { %11535 = verf.f32 %v7532_v25  ;;  %9554 = vmatprep.mubr.msk.f32.mxu1 %vm7633_vm6, %v7623_v8 }
 0xb07   : > { %11537 = verf.f32 %v7531_v27  ;;  %9555 = vmatmul.mubr.msk.f32.gmra.mrb[102].mxu1 %vm7633_vm6, %v7624_v20 }
 0xb08   : > { %v11532_v42 = vpop.eup %11531 }
 0xb09   : > { %v11534_v43 = vpop.eup %11533  ;;  %v7594_v22 = vadd.f32 1.0, %v11532_v42 }
 0xb0a   : > { %v7593_v59 = vadd.f32 1.0, %v11534_v43 }
 0xb0b   : > { %v7626_v39 = vmul.f32 %v7594_v22, %v7498_v24 }
 0xb0c   : > { %v7625_v37 = vmul.f32 %v7593_v59, %v7497_v18 }
 0xb0e   : > { %9557 = vmatprep.mubr.msk.f32.mxu1 %vm7633_vm6, %v7625_v37 }
 0xb0f   : > { %9558 = vmatmul.mubr.msk.f32.gmra.mrb[104].mxu1 %vm7633_vm6, %v7626_v39 }
 0xb10   : > { %v11536_v14 = vpop.eup %11535 }
 0xb11   : > { %v11538_v32 = vpop.eup %11537  ;;  %v7596_v5 = vadd.f32 1.0, %v11536_v14 }
 0xb12   : > { %v7595_v0 = vadd.f32 1.0, %v11538_v32 }
 0xb13   : > { %v7628_v3 = vmul.f32 %v7596_v5, %v7500_v38 }
 0xb14   : > { %v7627_v58 = vmul.f32 %v7595_v0, %v7499_v46 }
 0xb16   : > { %9560 = vmatprep.mubr.msk.f32.mxu1 %vm7633_vm6, %v7627_v58 }
 0xb17   : > { %9561 = vmatmul.mubr.msk.f32.gmra.mrb[106].mxu1 %vm7633_vm6, %v7628_v3 }
 0xb6b   : > { %v9517_v1 = vpop.f32.mrb[76].mxu1 }
 0xb6c   : > { %v7963_v26 = vadd.f32 %v9517_v1, %v15922_v44  ;;  %v7796_v4 = vpop.f32.mrb[77].mxu1 }
 0xb6d   : > { %v7962_v54 = vadd.f32 %v15922_v44, %v7796_v4 }
 0xb6e   : > { %7996 = vst.msk [vmem:[%s15928_s24 + $0x8] sm:$0xff] %vm7994_vm11, %v7963_v26 }
 0xb6f   : > { %7995 = vst.msk [vmem:[%s15928_s24] sm:$0xff] %vm7994_vm11, %v7962_v54 }
 0xb75   : > { %v9520_v28 = vpop.f32.mrb[78].mxu1 }
 0xb76   : > { %v7965_v63 = vadd.f32 %v9520_v28, %v15922_v44  ;;  %v7806_v19 = vpop.f32.mrb[79].mxu1 }
 0xb77   : > { %v7964_v29 = vadd.f32 %v15922_v44, %v7806_v19 }
 0xb78   : > { %7998 = vst.msk [vmem:[%s15928_s24 + $0x18] sm:$0xff] %vm7994_vm11, %v7965_v63 }
 0xb79   : > { %7997 = vst.msk [vmem:[%s15928_s24 + $0x10] sm:$0xff] %vm7994_vm11, %v7964_v29 }
 0xb7f   : > { %v9523_v56 = vpop.f32.mrb[80].mxu1 }
 0xb80   : > { %v7967_v36 = vadd.f32 %v9523_v56, %v15922_v44  ;;  %v7816_v16 = vpop.f32.mrb[81].mxu1 }
 0xb81   : > { %v7966_v34 = vadd.f32 %v15922_v44, %v7816_v16 }
 0xb82   : > { %8000 = vst.msk [vmem:[%s15928_s24 + $0x28] sm:$0xff] %vm7994_vm11, %v7967_v36 }
 0xb83   : > { %7999 = vst.msk [vmem:[%s15928_s24 + $0x20] sm:$0xff] %vm7994_vm11, %v7966_v34 }
 0xb89   : > { %v9526_v7 = vpop.f32.mrb[82].mxu1 }
 0xb8a   : > { %v7969_v49 = vadd.f32 %v9526_v7, %v15922_v44  ;;  %v7826_v48 = vpop.f32.mrb[83].mxu1 }
 0xb8b   : > { %v7968_v17 = vadd.f32 %v15922_v44, %v7826_v48 }
 0xb8c   : > { %8002 = vst.msk [vmem:[%s15928_s24 + $0x38] sm:$0xff] %vm7994_vm11, %v7969_v49 }
 0xb8d   : > { %8001 = vst.msk [vmem:[%s15928_s24 + $0x30] sm:$0xff] %vm7994_vm11, %v7968_v17 }
 0xb93   : > { %v9529_v40 = vpop.f32.mrb[84].mxu1 }
 0xb94   : > { %v7971_v47 = vadd.f32 %v9529_v40, %v15922_v44  ;;  %v7836_v53 = vpop.f32.mrb[85].mxu1 }
 0xb95   : > { %v7970_v51 = vadd.f32 %v15922_v44, %v7836_v53 }
 0xb96   : > { %8004 = vst.msk [vmem:[%s15928_s24 + $0x48] sm:$0xff] %vm7994_vm11, %v7971_v47 }
 0xb97   : > { %8003 = vst.msk [vmem:[%s15928_s24 + $0x40] sm:$0xff] %vm7994_vm11, %v7970_v51 }
 0xb99   : > { %v9532_v52 = vpop.f32.mrb[86].mxu1 }
 0xb9a   : > { %v7973_v35 = vadd.f32 %v9532_v52, %v15922_v44  ;;  %v7846_v31 = vpop.f32.mrb[87].mxu1 }
 0xb9b   : > { %v7972_v62 = vadd.f32 %v15922_v44, %v7846_v31 }
 0xb9c   : > { %8006 = vst.msk [vmem:[%s15928_s24 + $0x58] sm:$0xff] %vm7994_vm11, %v7973_v35 }
 0xb9d   : > { %8005 = vst.msk [vmem:[%s15928_s24 + $0x50] sm:$0xff] %vm7994_vm11, %v7972_v62 }
 0xba1   : > { %v9535_v57 = vpop.f32.mrb[88].mxu1 }
 0xba2   : > { %v7975_v21 = vadd.f32 %v9535_v57, %v15922_v44  ;;  %v7856_v33 = vpop.f32.mrb[89].mxu1 }
 0xba3   : > { %v7974_v45 = vadd.f32 %v15922_v44, %v7856_v33 }
 0xba4   : > { %8008 = vst.msk [vmem:[%s15928_s24 + $0x68] sm:$0xff] %vm7994_vm11, %v7975_v21 }
 0xba5   : > { %8007 = vst.msk [vmem:[%s15928_s24 + $0x60] sm:$0xff] %vm7994_vm11, %v7974_v45 }
 0xba9   : > { %v9538_v9 = vpop.f32.mrb[90].mxu1 }
 0xbaa   : > { %v7977_v50 = vadd.f32 %v9538_v9, %v15922_v44  ;;  %v7866_v2 = vpop.f32.mrb[91].mxu1 }
 0xbab   : > { %v7976_v12 = vadd.f32 %v15922_v44, %v7866_v2 }
 0xbac   : > { %8010 = vst.msk [vmem:[%s15928_s24 + $0x78] sm:$0xff] %vm7994_vm11, %v7977_v50 }
 0xbad   : > { %8009 = vst.msk [vmem:[%s15928_s24 + $0x70] sm:$0xff] %vm7994_vm11, %v7976_v12 }
 0xbb3   : > { %v9541_v61 = vpop.f32.mrb[92].mxu1 }
 0xbb4   : > { %v7979_v11 = vadd.f32 %v9541_v61, %v15922_v44  ;;  %v7876_v6 = vpop.f32.mrb[93].mxu1 }
 0xbb5   : > { %v7978_v55 = vadd.f32 %v15922_v44, %v7876_v6 }
 0xbb6   : > { %8012 = vst.msk [vmem:[%s15928_s24 + $0x88] sm:$0xff] %vm7994_vm11, %v7979_v11 }
 0xbb7   : > { %8011 = vst.msk [vmem:[%s15928_s24 + $0x80] sm:$0xff] %vm7994_vm11, %v7978_v55 }
 0xbb9   : > { %v9544_v13 = vpop.f32.mrb[94].mxu1 }
 0xbba   : > { %v7981_v60 = vadd.f32 %v9544_v13, %v15922_v44  ;;  %v7886_v41 = vpop.f32.mrb[95].mxu1 }
 0xbbb   : > { %v7980_v23 = vadd.f32 %v15922_v44, %v7886_v41 }
 0xbbc   : > { %8014 = vst.msk [vmem:[%s15928_s24 + $0x98] sm:$0xff] %vm7994_vm11, %v7981_v60 }
 0xbbd   : > { %8013 = vst.msk [vmem:[%s15928_s24 + $0x90] sm:$0xff] %vm7994_vm11, %v7980_v23 }
 0xbc2   : > { %v9547_v10 = vpop.f32.mrb[96].mxu1 }
 0xbc3   : > { %v7983_v15 = vadd.f32 %v9547_v10, %v15922_v44  ;;  %v7896_v30 = vpop.f32.mrb[97].mxu1 }
 0xbc4   : > { %v7982_v25 = vadd.f32 %v15922_v44, %v7896_v30 }
 0xbc5   : > { %8016 = vst.msk [vmem:[%s15928_s24 + $0xa8] sm:$0xff] %vm7994_vm11, %v7983_v15 }
 0xbc6   : > { %8015 = vst.msk [vmem:[%s15928_s24 + $0xa0] sm:$0xff] %vm7994_vm11, %v7982_v25 }
 0xbcc   : > { %v9550_v8 = vpop.f32.mrb[98].mxu1 }
 0xbcd   : > { %v7985_v27 = vadd.f32 %v9550_v8, %v15922_v44  ;;  %v7906_v20 = vpop.f32.mrb[99].mxu1 }
 0xbce   : > { %v7984_v42 = vadd.f32 %v15922_v44, %v7906_v20 }
 0xbcf   : > { %8018 = vst.msk [vmem:[%s15928_s24 + $0xb8] sm:$0xff] %vm7994_vm11, %v7985_v27 }
 0xbd0   : > { %8017 = vst.msk [vmem:[%s15928_s24 + $0xb0] sm:$0xff] %vm7994_vm11, %v7984_v42 }
 0xbd2   : > { %v9553_v43 = vpop.f32.mrb[100].mxu1 }
 0xbd3   : > { %v7987_v22 = vadd.f32 %v9553_v43, %v15922_v44  ;;  %v7916_v18 = vpop.f32.mrb[101].mxu1 }
 0xbd4   : > { %v7986_v59 = vadd.f32 %v15922_v44, %v7916_v18 }
 0xbd5   : > { %8020 = vst.msk [vmem:[%s15928_s24 + $0xc8] sm:$0xff] %vm7994_vm11, %v7987_v22 }
 0xbd6   : > { %8019 = vst.msk [vmem:[%s15928_s24 + $0xc0] sm:$0xff] %vm7994_vm11, %v7986_v59 }
 0xbda   : > { %v9556_v24 = vpop.f32.mrb[102].mxu1 }
 0xbdb   : > { %v7989_v37 = vadd.f32 %v9556_v24, %v15922_v44  ;;  %v7926_v39 = vpop.f32.mrb[103].mxu1 }
 0xbdc   : > { %v7988_v14 = vadd.f32 %v15922_v44, %v7926_v39 }
 0xbdd   : > { %8022 = vst.msk [vmem:[%s15928_s24 + $0xd8] sm:$0xff] %vm7994_vm11, %v7989_v37 }
 0xbde   : > { %8021 = vst.msk [vmem:[%s15928_s24 + $0xd0] sm:$0xff] %vm7994_vm11, %v7988_v14 }
 0xbe2   : > { %v9559_v32 = vpop.f32.mrb[104].mxu1 }
 0xbe3   : > { %v7991_v5 = vadd.f32 %v9559_v32, %v15922_v44  ;;  %v7936_v46 = vpop.f32.mrb[105].mxu1 }
 0xbe4   : > { %v7990_v0 = vadd.f32 %v15922_v44, %v7936_v46 }
 0xbe5   : > { %8024 = vst.msk [vmem:[%s15928_s24 + $0xe8] sm:$0xff] %vm7994_vm11, %v7991_v5 }
 0xbe6   : > { %8023 = vst.msk [vmem:[%s15928_s24 + $0xe0] sm:$0xff] %vm7994_vm11, %v7990_v0 }
 0xbea   : > { %v9562_v38 = vpop.f32.mrb[106].mxu1 }
 0xbeb   : > { %v7993_v58 = vadd.f32 %v9562_v38, %v15922_v44  ;;  %v7946_v3 = vpop.f32.mrb[107].mxu1 }
 0xbec   : > { %v7992_v1 = vadd.f32 %v15922_v44, %v7946_v3 }
 0xbed   : > { %8026 = vst.msk [vmem:[%s15928_s24 + $0xf8] sm:$0xff] %vm7994_vm11, %v7993_v58 }
 0xbee   : > { %8025 = vst.msk [vmem:[%s15928_s24 + $0xf0] sm:$0xff] %vm7994_vm11, %v7992_v1 }
 0xbef PF: > { %s24_s29 = sadd.s32 1, %s11546_s29  }
 0xbf0   : > { %p21_p4 = scmp.ge.s32.totalorder %s24_s29, 4  }
 0xbf2   :  { %23 = sbr.rel (!%p21_p4) target bundleno = 1 (0x1), region = 109 }

</bundles_post_ra>
